<compile_context>
chip_gen: v7x
topology: tpu7x:2x2x1
jax: 0.10.0
libtpu: 0.0.40
codegen_flags: <defaults>
</compile_context>

<pallas_src>
import math

import numpy as np
import jax
import jax.numpy as jnp
from jax.experimental import pallas as pl
from jax.experimental.pallas import tpu as pltpu

# ----------------------------- config (downscaled Swin) ----------------------
PATCH = 4            # patch_size (as swin-base-patch4)
WINDOW = 4           # window_size (12 in the real model -> 4 here)
EMBED_DIM = 32       # 128 in swin-base -> 32 here
DEPTHS = (2, 2)      # (2, 2, 18, 2) -> (2, 2)
NUM_HEADS = (2, 4)   # (4, 8, 16, 32) -> (2, 4)
MLP_RATIO = 4
NUM_LABELS = 2
LN_EPS = 1e-5
IMG = 32             # 384 -> 32 (stage-0 tokens 8x8, stage-1 4x4)


# ----------------------------- static geometry --------------------------------
def _stage_geometry():
    """Static per-stage geometry shared by init / pack: resolution, window,
    per-block shift (HF set_shift_and_window_size rule), dim, heads."""
    geo = []
    res = (IMG // PATCH, IMG // PATCH)
    dim = EMBED_DIM
    for s, (depth, nh) in enumerate(zip(DEPTHS, NUM_HEADS)):
        ws = WINDOW if min(res) > WINDOW else min(res)
        shifts = [ws // 2 if (bi % 2 == 1 and min(res) > WINDOW) else 0
                  for bi in range(depth)]
        geo.append(dict(res=res, ws=ws, shifts=shifts, dim=dim, nh=nh,
                        merge=s < len(DEPTHS) - 1))
        if s < len(DEPTHS) - 1:
            res = (res[0] // 2, res[1] // 2)
            dim *= 2
    return geo, dim


# ----------------------------- in-kernel math helpers --------------------------
def _normalize(x, eps=LN_EPS):
    """LayerNorm without affine (gamma/beta are folded into the next matmul)."""
    mean = jnp.mean(x, axis=-1, keepdims=True)
    var = jnp.mean(jnp.square(x - mean), axis=-1, keepdims=True)
    return (x - mean) * jax.lax.rsqrt(var + eps)


def _gelu_erf(x):
    """HF Swin exact-erf GELU; erf via Abramowitz&Stegun 7.1.26 (|err|<1.5e-7).
    The polynomial's divide runs on the otherwise idle EUP reciprocal."""
    a = jnp.abs(x) * 0.7071067811865476
    t = pl.reciprocal(1.0 + 0.3275911 * a, approx=True)
    poly = t * (0.254829592 + t * (-0.284496736 + t * (1.421413741
               + t * (-1.453152027 + t * 1.061405429))))
    erf_a = 1.0 - poly * jnp.exp(-(a * a))
    erf = jnp.where(x < 0.0, -erf_a, erf_a)
    return 0.5 * x * (1.0 + erf)


def _mm(x, w_ref):
    """bf16 MXU matmul with f32 accumulation (weights pre-cast to bf16)."""
    return jnp.dot(x.astype(jnp.bfloat16), w_ref[...],
                   preferred_element_type=jnp.float32)


def _swin_block(x, nh, qkv_w, qkv_b, bias, proj_w, proj_b,
                fc1_w, fc1_b, fc2_w, fc2_b):
    """One Swin block on the (T, C) tokens of a single image.  The window
    structure, cyclic shift, -100 shift mask and relative-position bias are
    all encoded in the dense additive (nh, T, T) `bias`, so attention is a
    plain lane-dense masked softmax over all T tokens of the image."""
    T, C = x.shape
    hd = C // nh
    qkv = _mm(_normalize(x), qkv_w) + qkv_b[...]          # LN1 folded into qkv_w
    heads = []
    for h in range(nh):
        q = qkv[:, h * hd:(h + 1) * hd]                   # query scale pre-folded
        k = qkv[:, C + h * hd:C + (h + 1) * hd]
        v = qkv[:, 2 * C + h * hd:2 * C + (h + 1) * hd]
        s = jnp.einsum('nd,md->nm', q.astype(jnp.bfloat16), k.astype(jnp.bfloat16),
                       preferred_element_type=jnp.float32)
        s = s + bias[h]
        s = s - jnp.max(s, axis=-1, keepdims=True)
        p = jnp.exp(s)
        p = p * pl.reciprocal(jnp.sum(p, axis=-1, keepdims=True), approx=True)
        heads.append(jnp.dot(p.astype(jnp.bfloat16), v.astype(jnp.bfloat16),
                             preferred_element_type=jnp.float32))
    attn = heads[0] if nh == 1 else jnp.concatenate(heads, axis=-1)
    y = x + _mm(attn, proj_w) + proj_b[...]               # one (C, C) proj matmul
    h2 = _gelu_erf(_mm(_normalize(y), fc1_w) + fc1_b[...])  # LN2 folded into fc1
    return y + _mm(h2, fc2_w) + fc2_b[...]


def _patch_merge(x, sel, red_w, red_b):
    """SwinPatchMerging on one image: the four strided gathers are 0/1
    row-selection matmuls; the LN(4C) affine is folded into the reduction."""
    pieces = [jnp.dot(sel[k], x, preferred_element_type=jnp.float32)
              for k in range(4)]
    cat = jnp.concatenate(pieces, axis=-1)                # (T/4, 4C) lane-dense
    return _mm(_normalize(cat), red_w) + red_b[...]


def _swin_forward_kernel(*refs):
    """Entire SwinForImageClassification forward for ONE image per grid step."""
    it = iter(refs[:-1])
    out_ref = refs[-1]
    nxt = lambda: next(it)

    # patch embedding (Conv2d-as-matmul) + patch LayerNorm
    patches, pe_w, pe_b, pn_g, pn_b = nxt(), nxt(), nxt(), nxt(), nxt()
    x = _mm(patches[...], pe_w) + pe_b[...]
    x = _normalize(x) * pn_g[...] + pn_b[...]

    for s, depth in enumerate(DEPTHS):
        nh = NUM_HEADS[s]
        for _ in range(depth):
            x = _swin_block(x, nh, *[nxt() for _ in range(9)])
        if s < len(DEPTHS) - 1:
            sel, red_w, red_b = nxt(), nxt(), nxt()
            x = _patch_merge(x, sel, red_w, red_b)

    # final LayerNorm (affine folded into the classifier) + avg-pool + head
    head_w, head_b = nxt(), nxt()
    pooled = jnp.mean(_normalize(x), axis=0, keepdims=True)   # (1, C_final)
    out_ref[...] = (_mm(pooled, head_w) + head_b[...]).astype(out_ref.dtype)


# ----------------------------- host-side precompute ----------------------------
def _dense_attn_bias(H, W, ws, shift, rel_table):
    """(nh, H*W, H*W) f32 additive attention bias over one image's tokens in
    (H, W) row-major order.  Encodes exactly the HF per-window attention:
      * -1e9 between tokens in different (cyclic-shift) windows,
      * the learned relative-position bias within a window,
      * the -100 shifted-window region mask (shift > 0)."""
    T = H * W
    nh = rel_table.shape[1]
    ii, jj = np.meshgrid(np.arange(H), np.arange(W), indexing='ij')
    ri, rj = (ii - shift) % H, (jj - shift) % W            # coords after torch.roll
    win = ((ri // ws) * (W // ws) + (rj // ws)).reshape(-1)
    pr, pc = (ri % ws).reshape(-1), (rj % ws).reshape(-1)
    rel_idx = ((pr[:, None] - pr[None, :] + ws - 1) * (2 * ws - 1)
               + (pc[:, None] - pc[None, :] + ws - 1))
    bias = rel_table[rel_idx.reshape(-1)].reshape(T, T, nh)
    bias = np.ascontiguousarray(bias.transpose(2, 0, 1)).astype(np.float32)
    if shift > 0:
        region = np.zeros((H, W), np.int32)
        cnt = 0
        for hs in (slice(0, -ws), slice(-ws, -shift), slice(-shift, None)):
            for wsl in (slice(0, -ws), slice(-ws, -shift), slice(-shift, None)):
                region[hs, wsl] = cnt
                cnt += 1
        reg = region[ri, rj].reshape(-1)
        bias += np.where(reg[:, None] == reg[None, :], 0.0, -100.0
                         ).astype(np.float32)[None]
    bias = np.where((win[:, None] == win[None, :])[None], bias, np.float32(-1e9))
    return bias.astype(np.float32)


def _merge_select(H, W):
    """(4, H*W/4, H*W) 0/1 matrices realising x[:,0::2,0::2], [1::2,0::2],
    [0::2,1::2], [1::2,1::2] as row-selection matmuls."""
    t_out = (H // 2) * (W // 2)
    sel = np.zeros((4, t_out, H * W), np.float32)
    for i2 in range(H // 2):
        for j2 in range(W // 2):
            o = i2 * (W // 2) + j2
            sel[0, o, (2 * i2) * W + 2 * j2] = 1.0
            sel[1, o, (2 * i2 + 1) * W + 2 * j2] = 1.0
            sel[2, o, (2 * i2) * W + 2 * j2 + 1] = 1.0
            sel[3, o, (2 * i2 + 1) * W + 2 * j2 + 1] = 1.0
    return sel


def pack_params(params):
    """Fold LN affines / query scale into bf16 matmul weights, precompute the
    dense attention biases and the merge-selection matrices, and flatten
    everything into the operand tuple consumed (same order) by the kernel."""
    b16 = lambda w: w.astype(jnp.bfloat16)
    row = lambda v: v.reshape(1, -1)

    out = [b16(params['patch_embed']['w']), row(params['patch_embed']['b']),
           row(params['patch_norm']['g']), row(params['patch_norm']['b'])]

    geo, _ = _stage_geometry()
    for g, stage in zip(geo, params['stages']):
        (H, W), ws, dim, nh = g['res'], g['ws'], g['dim'], g['nh']
        for shift, blk in zip(g['shifts'], stage['blocks']):
            hd = dim // nh
            # fused QKV with LN1 affine and the 1/sqrt(hd) query scale folded in
            wqkv = jnp.concatenate([blk['q']['w'], blk['k']['w'], blk['v']['w']],
                                   axis=1)
            bqkv = jnp.concatenate([blk['q']['b'], blk['k']['b'], blk['v']['b']])
            g1, b1 = blk['ln1']['g'], blk['ln1']['b']
            sv = jnp.concatenate([jnp.full((dim,), 1.0 / math.sqrt(hd), jnp.float32),
                                  jnp.ones((2 * dim,), jnp.float32)])
            bqkv_f = (bqkv + b1 @ wqkv) * sv
            wqkv_f = wqkv * g1[:, None] * sv[None, :]
            # LN2 affine folded into fc1
            g2, b2 = blk['ln2']['g'], blk['ln2']['b']
            w1_f = blk['fc1']['w'] * g2[:, None]
            b1_f = blk['fc1']['b'] + b2 @ blk['fc1']['w']
            bias = _dense_attn_bias(H, W, ws, shift, np.asarray(blk['rel_table']))
            out += [b16(wqkv_f), row(bqkv_f), jnp.asarray(bias),
                    b16(blk['proj']['w']), row(blk['proj']['b']),
                    b16(w1_f), row(b1_f),
                    b16(blk['fc2']['w']), row(blk['fc2']['b'])]
        if g['merge']:
            mrg = stage['merge']
            gm, bm = mrg['norm']['g'], mrg['norm']['b']
            out += [jnp.asarray(_merge_select(H, W)),
                    b16(mrg['red_w'] * gm[:, None]), row(bm @ mrg['red_w'])]

    gf, bfin = params['final_norm']['g'], params['final_norm']['b']
    out += [b16(params['head']['w'] * gf[:, None]),
            row(params['head']['b'] + bfin @ params['head']['w'])]
    return tuple(out)


# ----------------------------- forward wrapper ---------------------------------
def swin_forward(packed, x):
    """x: (B, 3, IMG, IMG) NCHW float32; packed: tuple from pack_params()."""
    B, Cin, H, W = x.shape
    Hp, Wp = H // PATCH, W // PATCH
    timg = Hp * Wp
    kin = Cin * PATCH * PATCH
    # Conv2d(3, C, kernel=4, stride=4) == unfold + matmul.  The unfold is the
    # single XLA op left outside the fused kernel (transpose of the tiny input).
    patches = (x.reshape(B, Cin, Hp, PATCH, Wp, PATCH)
                .transpose(0, 2, 4, 1, 3, 5)
                .reshape(B, timg, kin))

    def full_spec(a):
        return pl.BlockSpec(a.shape, lambda i, _n=a.ndim: (0,) * _n)

    in_specs = [pl.BlockSpec((None, timg, kin), lambda i: (i, 0, 0))]
    in_specs += [full_spec(a) for a in packed]

    out = pl.pallas_call(
        _swin_forward_kernel,
        out_shape=jax.ShapeDtypeStruct((B, 1, NUM_LABELS), jnp.float32),
        grid=(B,),
        in_specs=in_specs,
        out_specs=pl.BlockSpec((None, 1, NUM_LABELS), lambda i: (i, 0, 0)),
        compiler_params=pltpu.CompilerParams(
            dimension_semantics=("parallel",)),  # images -> TensorCores on v7x
    )(patches, *packed)
    return out.reshape(B, NUM_LABELS)


# ----------------------------- deterministic init ------------------------------
class _KeyGen:
    def __init__(self, key):
        self.key = key

    def __call__(self):
        self.key, sub = jax.random.split(self.key)
        return sub


def init_params(key):
    # TODO(synk): the real module loads pretrained
    # 'microsoft/swin-base-patch4-window12-384-in22k' weights; synthetic
    # deterministic random tensors (downscaled shapes) are used here instead.
    kg = _KeyGen(key)

    def dense(k_in, k_out):
        return {'w': jax.random.normal(kg(), (k_in, k_out), jnp.float32) * 0.02,
                'b': jnp.zeros((k_out,), jnp.float32)}

    def ln(c):
        return {'g': jnp.ones((c,), jnp.float32), 'b': jnp.zeros((c,), jnp.float32)}

    geo, final_dim = _stage_geometry()
    params = {'patch_embed': dense(3 * PATCH * PATCH, EMBED_DIM),
              'patch_norm': ln(EMBED_DIM),
              'stages': []}
    for g in geo:
        dim, nh, ws = g['dim'], g['nh'], g['ws']
        blocks = []
        for _ in g['shifts']:
            blocks.append({
                'ln1': ln(dim),
                'q': dense(dim, dim), 'k': dense(dim, dim), 'v': dense(dim, dim),
                # table sized by the stage's ACTUAL window so table and
                # relative-position index always agree (fixes the latent
                # ws != WINDOW indexing bug flagged in review).
                'rel_table': jax.random.normal(
                    kg(), ((2 * ws - 1) ** 2, nh), jnp.float32) * 0.02,
                'proj': dense(dim, dim),
                'ln2': ln(dim),
                'fc1': dense(dim, MLP_RATIO * dim),
                'fc2': dense(MLP_RATIO * dim, dim),
            })
        stage = {'blocks': blocks}
        if g['merge']:
            stage['merge'] = {'norm': ln(4 * dim),
                              'red_w': jax.random.normal(
                                  kg(), (4 * dim, 2 * dim), jnp.float32) * 0.02}
        params['stages'].append(stage)
    params['final_norm'] = ln(final_dim)
    params['head'] = dense(final_dim, NUM_LABELS)
    return params


# ----------------------------- main --------------------------------------------
if __name__ == "__main__":
    key = jax.random.PRNGKey(0)
    pkey, xkey = jax.random.split(key)
    params = init_params(pkey)
    packed = pack_params(params)
    x = jax.random.normal(xkey, (2, 3, IMG, IMG), jnp.float32)  # NCHW like PyTorch

    logits = jax.jit(swin_forward)(packed, x)
    logits = jax.block_until_ready(logits)
    assert logits.shape == (2, NUM_LABELS)
    assert bool(jnp.all(jnp.isfinite(logits)))
    print("KERNEL_OK")
</pallas_src>

<mosaic_0001>
module attributes {stable_mosaic.version = 11 : i64} {
  func.func @_swin_forward_kernel(%arg0: i32, %arg1: memref<1x64x48xf32, #tpu.memory_space<vmem>>, %arg2: memref<48x32xbf16, #tpu.memory_space<vmem>>, %arg3: memref<1x32xf32, #tpu.memory_space<vmem>>, %arg4: memref<1x32xf32, #tpu.memory_space<vmem>>, %arg5: memref<1x32xf32, #tpu.memory_space<vmem>>, %arg6: memref<32x96xbf16, #tpu.memory_space<vmem>>, %arg7: memref<1x96xf32, #tpu.memory_space<vmem>>, %arg8: memref<2x64x64xf32, #tpu.memory_space<vmem>>, %arg9: memref<32x32xbf16, #tpu.memory_space<vmem>>, %arg10: memref<1x32xf32, #tpu.memory_space<vmem>>, %arg11: memref<32x128xbf16, #tpu.memory_space<vmem>>, %arg12: memref<1x128xf32, #tpu.memory_space<vmem>>, %arg13: memref<128x32xbf16, #tpu.memory_space<vmem>>, %arg14: memref<1x32xf32, #tpu.memory_space<vmem>>, %arg15: memref<32x96xbf16, #tpu.memory_space<vmem>>, %arg16: memref<1x96xf32, #tpu.memory_space<vmem>>, %arg17: memref<2x64x64xf32, #tpu.memory_space<vmem>>, %arg18: memref<32x32xbf16, #tpu.memory_space<vmem>>, %arg19: memref<1x32xf32, #tpu.memory_space<vmem>>, %arg20: memref<32x128xbf16, #tpu.memory_space<vmem>>, %arg21: memref<1x128xf32, #tpu.memory_space<vmem>>, %arg22: memref<128x32xbf16, #tpu.memory_space<vmem>>, %arg23: memref<1x32xf32, #tpu.memory_space<vmem>>, %arg24: memref<4x16x64xf32, #tpu.memory_space<vmem>>, %arg25: memref<128x64xbf16, #tpu.memory_space<vmem>>, %arg26: memref<1x64xf32, #tpu.memory_space<vmem>>, %arg27: memref<64x192xbf16, #tpu.memory_space<vmem>>, %arg28: memref<1x192xf32, #tpu.memory_space<vmem>>, %arg29: memref<4x16x16xf32, #tpu.memory_space<vmem>>, %arg30: memref<64x64xbf16, #tpu.memory_space<vmem>>, %arg31: memref<1x64xf32, #tpu.memory_space<vmem>>, %arg32: memref<64x256xbf16, #tpu.memory_space<vmem>>, %arg33: memref<1x256xf32, #tpu.memory_space<vmem>>, %arg34: memref<256x64xbf16, #tpu.memory_space<vmem>>, %arg35: memref<1x64xf32, #tpu.memory_space<vmem>>, %arg36: memref<64x192xbf16, #tpu.memory_space<vmem>>, %arg37: memref<1x192xf32, #tpu.memory_space<vmem>>, %arg38: memref<4x16x16xf32, #tpu.memory_space<vmem>>, %arg39: memref<64x64xbf16, #tpu.memory_space<vmem>>, %arg40: memref<1x64xf32, #tpu.memory_space<vmem>>, %arg41: memref<64x256xbf16, #tpu.memory_space<vmem>>, %arg42: memref<1x256xf32, #tpu.memory_space<vmem>>, %arg43: memref<256x64xbf16, #tpu.memory_space<vmem>>, %arg44: memref<1x64xf32, #tpu.memory_space<vmem>>, %arg45: memref<64x2xbf16, #tpu.memory_space<vmem>>, %arg46: memref<1x2xf32, #tpu.memory_space<vmem>>, %arg47: memref<1x1x2xf32, #tpu.memory_space<vmem>>) attributes {dimension_semantics = [#tpu.dimension_semantics<parallel>], iteration_bounds = array<i64: 2>, scalar_prefetch = 0 : i64, scratch_operands = 0 : i64, tpu.core_type = #tpu.core_type<tc>, window_params = [{transform_indices = @transform_0, window_bounds = array<i64: 1, 64, 48>}, {pipeline_mode = #tpu.pipeline_mode<synchronous>, transform_indices = @transform_1, window_bounds = array<i64: 48, 32>}, {pipeline_mode = #tpu.pipeline_mode<synchronous>, transform_indices = @transform_2, window_bounds = array<i64: 1, 32>}, {pipeline_mode = #tpu.pipeline_mode<synchronous>, transform_indices = @transform_3, window_bounds = array<i64: 1, 32>}, {pipeline_mode = #tpu.pipeline_mode<synchronous>, transform_indices = @transform_4, window_bounds = array<i64: 1, 32>}, {pipeline_mode = #tpu.pipeline_mode<synchronous>, transform_indices = @transform_5, window_bounds = array<i64: 32, 96>}, {pipeline_mode = #tpu.pipeline_mode<synchronous>, transform_indices = @transform_6, window_bounds = array<i64: 1, 96>}, {pipeline_mode = #tpu.pipeline_mode<synchronous>, transform_indices = @transform_7, window_bounds = array<i64: 2, 64, 64>}, {pipeline_mode = #tpu.pipeline_mode<synchronous>, transform_indices = @transform_8, window_bounds = array<i64: 32, 32>}, {pipeline_mode = #tpu.pipeline_mode<synchronous>, transform_indices = @transform_9, window_bounds = array<i64: 1, 32>}, {pipeline_mode = #tpu.pipeline_mode<synchronous>, transform_indices = @transform_10, window_bounds = array<i64: 32, 128>}, {pipeline_mode = #tpu.pipeline_mode<synchronous>, transform_indices = @transform_11, window_bounds = array<i64: 1, 128>}, {pipeline_mode = #tpu.pipeline_mode<synchronous>, transform_indices = @transform_12, window_bounds = array<i64: 128, 32>}, {pipeline_mode = #tpu.pipeline_mode<synchronous>, transform_indices = @transform_13, window_bounds = array<i64: 1, 32>}, {pipeline_mode = #tpu.pipeline_mode<synchronous>, transform_indices = @transform_14, window_bounds = array<i64: 32, 96>}, {pipeline_mode = #tpu.pipeline_mode<synchronous>, transform_indices = @transform_15, window_bounds = array<i64: 1, 96>}, {pipeline_mode = #tpu.pipeline_mode<synchronous>, transform_indices = @transform_16, window_bounds = array<i64: 2, 64, 64>}, {pipeline_mode = #tpu.pipeline_mode<synchronous>, transform_indices = @transform_17, window_bounds = array<i64: 32, 32>}, {pipeline_mode = #tpu.pipeline_mode<synchronous>, transform_indices = @transform_18, window_bounds = array<i64: 1, 32>}, {pipeline_mode = #tpu.pipeline_mode<synchronous>, transform_indices = @transform_19, window_bounds = array<i64: 32, 128>}, {pipeline_mode = #tpu.pipeline_mode<synchronous>, transform_indices = @transform_20, window_bounds = array<i64: 1, 128>}, {pipeline_mode = #tpu.pipeline_mode<synchronous>, transform_indices = @transform_21, window_bounds = array<i64: 128, 32>}, {pipeline_mode = #tpu.pipeline_mode<synchronous>, transform_indices = @transform_22, window_bounds = array<i64: 1, 32>}, {pipeline_mode = #tpu.pipeline_mode<synchronous>, transform_indices = @transform_23, window_bounds = array<i64: 4, 16, 64>}, {pipeline_mode = #tpu.pipeline_mode<synchronous>, transform_indices = @transform_24, window_bounds = array<i64: 128, 64>}, {pipeline_mode = #tpu.pipeline_mode<synchronous>, transform_indices = @transform_25, window_bounds = array<i64: 1, 64>}, {pipeline_mode = #tpu.pipeline_mode<synchronous>, transform_indices = @transform_26, window_bounds = array<i64: 64, 192>}, {pipeline_mode = #tpu.pipeline_mode<synchronous>, transform_indices = @transform_27, window_bounds = array<i64: 1, 192>}, {pipeline_mode = #tpu.pipeline_mode<synchronous>, transform_indices = @transform_28, window_bounds = array<i64: 4, 16, 16>}, {pipeline_mode = #tpu.pipeline_mode<synchronous>, transform_indices = @transform_29, window_bounds = array<i64: 64, 64>}, {pipeline_mode = #tpu.pipeline_mode<synchronous>, transform_indices = @transform_30, window_bounds = array<i64: 1, 64>}, {pipeline_mode = #tpu.pipeline_mode<synchronous>, transform_indices = @transform_31, window_bounds = array<i64: 64, 256>}, {pipeline_mode = #tpu.pipeline_mode<synchronous>, transform_indices = @transform_32, window_bounds = array<i64: 1, 256>}, {pipeline_mode = #tpu.pipeline_mode<synchronous>, transform_indices = @transform_33, window_bounds = array<i64: 256, 64>}, {pipeline_mode = #tpu.pipeline_mode<synchronous>, transform_indices = @transform_34, window_bounds = array<i64: 1, 64>}, {pipeline_mode = #tpu.pipeline_mode<synchronous>, transform_indices = @transform_35, window_bounds = array<i64: 64, 192>}, {pipeline_mode = #tpu.pipeline_mode<synchronous>, transform_indices = @transform_36, window_bounds = array<i64: 1, 192>}, {pipeline_mode = #tpu.pipeline_mode<synchronous>, transform_indices = @transform_37, window_bounds = array<i64: 4, 16, 16>}, {pipeline_mode = #tpu.pipeline_mode<synchronous>, transform_indices = @transform_38, window_bounds = array<i64: 64, 64>}, {pipeline_mode = #tpu.pipeline_mode<synchronous>, transform_indices = @transform_39, window_bounds = array<i64: 1, 64>}, {pipeline_mode = #tpu.pipeline_mode<synchronous>, transform_indices = @transform_40, window_bounds = array<i64: 64, 256>}, {pipeline_mode = #tpu.pipeline_mode<synchronous>, transform_indices = @transform_41, window_bounds = array<i64: 1, 256>}, {pipeline_mode = #tpu.pipeline_mode<synchronous>, transform_indices = @transform_42, window_bounds = array<i64: 256, 64>}, {pipeline_mode = #tpu.pipeline_mode<synchronous>, transform_indices = @transform_43, window_bounds = array<i64: 1, 64>}, {pipeline_mode = #tpu.pipeline_mode<synchronous>, transform_indices = @transform_44, window_bounds = array<i64: 64, 2>}, {pipeline_mode = #tpu.pipeline_mode<synchronous>, transform_indices = @transform_45, window_bounds = array<i64: 1, 2>}, {transform_indices = @transform_46, window_bounds = array<i64: 1, 1, 2>}]} {
    %c0 = arith.constant 0 : index
    %c0_0 = arith.constant 0 : index
    %c0_1 = arith.constant 0 : index
    %0 = vector.load %arg1[%c0, %c0_0, %c0_1] : memref<1x64x48xf32, #tpu.memory_space<vmem>>, vector<1x64x48xf32>
    %1 = vector.shape_cast %0 : vector<1x64x48xf32> to vector<64x48xf32>
    %2 = arith.truncf %1 : vector<64x48xf32> to vector<64x48xbf16>
    %c0_2 = arith.constant 0 : index
    %c0_3 = arith.constant 0 : index
    %3 = vector.load %arg2[%c0_2, %c0_3] : memref<48x32xbf16, #tpu.memory_space<vmem>>, vector<48x32xbf16>
    %cst = arith.constant dense<0.000000e+00> : vector<64x32xf32>
    %4 = tpu.matmul %2, %3, %cst {dimension_numbers = #tpu.dot_dimension_numbers<[1], [0], [0], [1], [0, 0, 1, 1], [], []>} : vector<64x48xbf16>, vector<48x32xbf16>, vector<64x32xf32> -> vector<64x32xf32>
    %c0_4 = arith.constant 0 : index
    %c0_5 = arith.constant 0 : index
    %5 = vector.load %arg3[%c0_4, %c0_5] : memref<1x32xf32, #tpu.memory_space<vmem>>, vector<1x32xf32>
    %6 = vector.broadcast %5 : vector<1x32xf32> to vector<64x32xf32>
    %7 = arith.addf %4, %6 : vector<64x32xf32>
    %cst_6 = arith.constant dense<0.000000e+00> : vector<64xf32>
    %8 = vector.multi_reduction <add>, %7, %cst_6 [1] : vector<64x32xf32> to vector<64xf32>
    %9 = vector.shape_cast %8 : vector<64xf32> to vector<64x1xf32>
    %cst_7 = arith.constant 3.200000e+01 : f32
    %10 = vector.broadcast %cst_7 : f32 to vector<64x1xf32>
    %11 = arith.divf %9, %10 : vector<64x1xf32>
    %12 = vector.broadcast %11 : vector<64x1xf32> to vector<64x32xf32>
    %13 = arith.subf %7, %12 : vector<64x32xf32>
    %14 = arith.mulf %13, %13 : vector<64x32xf32>
    %cst_8 = arith.constant dense<0.000000e+00> : vector<64xf32>
    %15 = vector.multi_reduction <add>, %14, %cst_8 [1] : vector<64x32xf32> to vector<64xf32>
    %16 = vector.shape_cast %15 : vector<64xf32> to vector<64x1xf32>
    %cst_9 = arith.constant 3.200000e+01 : f32
    %17 = vector.broadcast %cst_9 : f32 to vector<64x1xf32>
    %18 = arith.divf %16, %17 : vector<64x1xf32>
    %19 = vector.broadcast %11 : vector<64x1xf32> to vector<64x32xf32>
    %20 = arith.subf %7, %19 : vector<64x32xf32>
    %cst_10 = arith.constant 9.99999974E-6 : f32
    %21 = vector.broadcast %cst_10 : f32 to vector<64x1xf32>
    %22 = arith.addf %18, %21 : vector<64x1xf32>
    %23 = math.rsqrt %22 : vector<64x1xf32>
    %24 = vector.broadcast %23 : vector<64x1xf32> to vector<64x32xf32>
    %25 = arith.mulf %20, %24 : vector<64x32xf32>
    %c0_11 = arith.constant 0 : index
    %c0_12 = arith.constant 0 : index
    %26 = vector.load %arg4[%c0_11, %c0_12] : memref<1x32xf32, #tpu.memory_space<vmem>>, vector<1x32xf32>
    %27 = vector.broadcast %26 : vector<1x32xf32> to vector<64x32xf32>
    %28 = arith.mulf %25, %27 : vector<64x32xf32>
    %c0_13 = arith.constant 0 : index
    %c0_14 = arith.constant 0 : index
    %29 = vector.load %arg5[%c0_13, %c0_14] : memref<1x32xf32, #tpu.memory_space<vmem>>, vector<1x32xf32>
    %30 = vector.broadcast %29 : vector<1x32xf32> to vector<64x32xf32>
    %31 = arith.addf %28, %30 : vector<64x32xf32>
    %cst_15 = arith.constant dense<0.000000e+00> : vector<64xf32>
    %32 = vector.multi_reduction <add>, %31, %cst_15 [1] : vector<64x32xf32> to vector<64xf32>
    %33 = vector.shape_cast %32 : vector<64xf32> to vector<64x1xf32>
    %cst_16 = arith.constant 3.200000e+01 : f32
    %34 = vector.broadcast %cst_16 : f32 to vector<64x1xf32>
    %35 = arith.divf %33, %34 : vector<64x1xf32>
    %36 = vector.broadcast %35 : vector<64x1xf32> to vector<64x32xf32>
    %37 = arith.subf %31, %36 : vector<64x32xf32>
    %38 = arith.mulf %37, %37 : vector<64x32xf32>
    %cst_17 = arith.constant dense<0.000000e+00> : vector<64xf32>
    %39 = vector.multi_reduction <add>, %38, %cst_17 [1] : vector<64x32xf32> to vector<64xf32>
    %40 = vector.shape_cast %39 : vector<64xf32> to vector<64x1xf32>
    %cst_18 = arith.constant 3.200000e+01 : f32
    %41 = vector.broadcast %cst_18 : f32 to vector<64x1xf32>
    %42 = arith.divf %40, %41 : vector<64x1xf32>
    %43 = vector.broadcast %35 : vector<64x1xf32> to vector<64x32xf32>
    %44 = arith.subf %31, %43 : vector<64x32xf32>
    %cst_19 = arith.constant 9.99999974E-6 : f32
    %45 = vector.broadcast %cst_19 : f32 to vector<64x1xf32>
    %46 = arith.addf %42, %45 : vector<64x1xf32>
    %47 = math.rsqrt %46 : vector<64x1xf32>
    %48 = vector.broadcast %47 : vector<64x1xf32> to vector<64x32xf32>
    %49 = arith.mulf %44, %48 : vector<64x32xf32>
    %50 = arith.truncf %49 : vector<64x32xf32> to vector<64x32xbf16>
    %c0_20 = arith.constant 0 : index
    %c0_21 = arith.constant 0 : index
    %51 = vector.load %arg6[%c0_20, %c0_21] : memref<32x96xbf16, #tpu.memory_space<vmem>>, vector<32x96xbf16>
    %cst_22 = arith.constant dense<0.000000e+00> : vector<64x96xf32>
    %52 = tpu.matmul %50, %51, %cst_22 {dimension_numbers = #tpu.dot_dimension_numbers<[1], [0], [0], [1], [0, 0, 1, 1], [], []>} : vector<64x32xbf16>, vector<32x96xbf16>, vector<64x96xf32> -> vector<64x96xf32>
    %c0_23 = arith.constant 0 : index
    %c0_24 = arith.constant 0 : index
    %53 = vector.load %arg7[%c0_23, %c0_24] : memref<1x96xf32, #tpu.memory_space<vmem>>, vector<1x96xf32>
    %54 = vector.broadcast %53 : vector<1x96xf32> to vector<64x96xf32>
    %55 = arith.addf %52, %54 : vector<64x96xf32>
    %56 = vector.extract_strided_slice %55 {offsets = [0, 0], sizes = [64, 16], strides = [1, 1]} : vector<64x96xf32> to vector<64x16xf32>
    %57 = vector.extract_strided_slice %55 {offsets = [0, 32], sizes = [64, 16], strides = [1, 1]} : vector<64x96xf32> to vector<64x16xf32>
    %58 = vector.extract_strided_slice %55 {offsets = [0, 64], sizes = [64, 16], strides = [1, 1]} : vector<64x96xf32> to vector<64x16xf32>
    %59 = arith.truncf %56 : vector<64x16xf32> to vector<64x16xbf16>
    %60 = arith.truncf %57 : vector<64x16xf32> to vector<64x16xbf16>
    "tpu.trace_start"() <{level = 10 : i32, message = "nd,md->nm"}> : () -> ()
    %cst_25 = arith.constant dense<0.000000e+00> : vector<64x64xf32>
    %61 = tpu.matmul %59, %60, %cst_25 {dimension_numbers = #tpu.dot_dimension_numbers<[1], [1], [0], [0], [0, 0, 1, 0], [], []>} : vector<64x16xbf16>, vector<64x16xbf16>, vector<64x64xf32> -> vector<64x64xf32>
    "tpu.trace_stop"() : () -> ()
    %c0_26 = arith.constant 0 : index
    %c0_27 = arith.constant 0 : index
    %c0_28 = arith.constant 0 : index
    %62 = vector.load %arg8[%c0_26, %c0_27, %c0_28] : memref<2x64x64xf32, #tpu.memory_space<vmem>>, vector<1x64x64xf32>
    %63 = vector.shape_cast %62 : vector<1x64x64xf32> to vector<64x64xf32>
    %64 = arith.addf %61, %63 : vector<64x64xf32>
    %cst_29 = arith.constant dense<0xFF800000> : vector<64xf32>
    %65 = vector.multi_reduction <maximumf>, %64, %cst_29 [1] : vector<64x64xf32> to vector<64xf32>
    %66 = vector.shape_cast %65 : vector<64xf32> to vector<64x1xf32>
    %67 = vector.broadcast %66 : vector<64x1xf32> to vector<64x64xf32>
    %68 = arith.subf %64, %67 : vector<64x64xf32>
    %69 = math.exp %68 : vector<64x64xf32>
    %cst_30 = arith.constant dense<0.000000e+00> : vector<64xf32>
    %70 = vector.multi_reduction <add>, %69, %cst_30 [1] : vector<64x64xf32> to vector<64xf32>
    %71 = vector.shape_cast %70 : vector<64xf32> to vector<64x1xf32>
    %72 = tpu.reciprocal %71 {approx = true} : vector<64x1xf32> -> vector<64x1xf32>
    %73 = vector.broadcast %72 : vector<64x1xf32> to vector<64x64xf32>
    %74 = arith.mulf %69, %73 : vector<64x64xf32>
    %75 = arith.truncf %74 : vector<64x64xf32> to vector<64x64xbf16>
    %76 = arith.truncf %58 : vector<64x16xf32> to vector<64x16xbf16>
    %cst_31 = arith.constant dense<0.000000e+00> : vector<64x16xf32>
    %77 = tpu.matmul %75, %76, %cst_31 {dimension_numbers = #tpu.dot_dimension_numbers<[1], [0], [0], [1], [0, 0, 1, 1], [], []>} : vector<64x64xbf16>, vector<64x16xbf16>, vector<64x16xf32> -> vector<64x16xf32>
    %78 = vector.extract_strided_slice %55 {offsets = [0, 16], sizes = [64, 16], strides = [1, 1]} : vector<64x96xf32> to vector<64x16xf32>
    %79 = vector.extract_strided_slice %55 {offsets = [0, 48], sizes = [64, 16], strides = [1, 1]} : vector<64x96xf32> to vector<64x16xf32>
    %80 = vector.extract_strided_slice %55 {offsets = [0, 80], sizes = [64, 16], strides = [1, 1]} : vector<64x96xf32> to vector<64x16xf32>
    %81 = arith.truncf %78 : vector<64x16xf32> to vector<64x16xbf16>
    %82 = arith.truncf %79 : vector<64x16xf32> to vector<64x16xbf16>
    "tpu.trace_start"() <{level = 10 : i32, message = "nd,md->nm"}> : () -> ()
    %cst_32 = arith.constant dense<0.000000e+00> : vector<64x64xf32>
    %83 = tpu.matmul %81, %82, %cst_32 {dimension_numbers = #tpu.dot_dimension_numbers<[1], [1], [0], [0], [0, 0, 1, 0], [], []>} : vector<64x16xbf16>, vector<64x16xbf16>, vector<64x64xf32> -> vector<64x64xf32>
    "tpu.trace_stop"() : () -> ()
    %c1 = arith.constant 1 : index
    %c0_33 = arith.constant 0 : index
    %c0_34 = arith.constant 0 : index
    %84 = vector.load %arg8[%c1, %c0_33, %c0_34] : memref<2x64x64xf32, #tpu.memory_space<vmem>>, vector<1x64x64xf32>
    %85 = vector.shape_cast %84 : vector<1x64x64xf32> to vector<64x64xf32>
    %86 = arith.addf %83, %85 : vector<64x64xf32>
    %cst_35 = arith.constant dense<0xFF800000> : vector<64xf32>
    %87 = vector.multi_reduction <maximumf>, %86, %cst_35 [1] : vector<64x64xf32> to vector<64xf32>
    %88 = vector.shape_cast %87 : vector<64xf32> to vector<64x1xf32>
    %89 = vector.broadcast %88 : vector<64x1xf32> to vector<64x64xf32>
    %90 = arith.subf %86, %89 : vector<64x64xf32>
    %91 = math.exp %90 : vector<64x64xf32>
    %cst_36 = arith.constant dense<0.000000e+00> : vector<64xf32>
    %92 = vector.multi_reduction <add>, %91, %cst_36 [1] : vector<64x64xf32> to vector<64xf32>
    %93 = vector.shape_cast %92 : vector<64xf32> to vector<64x1xf32>
    %94 = tpu.reciprocal %93 {approx = true} : vector<64x1xf32> -> vector<64x1xf32>
    %95 = vector.broadcast %94 : vector<64x1xf32> to vector<64x64xf32>
    %96 = arith.mulf %91, %95 : vector<64x64xf32>
    %97 = arith.truncf %96 : vector<64x64xf32> to vector<64x64xbf16>
    %98 = arith.truncf %80 : vector<64x16xf32> to vector<64x16xbf16>
    %cst_37 = arith.constant dense<0.000000e+00> : vector<64x16xf32>
    %99 = tpu.matmul %97, %98, %cst_37 {dimension_numbers = #tpu.dot_dimension_numbers<[1], [0], [0], [1], [0, 0, 1, 1], [], []>} : vector<64x64xbf16>, vector<64x16xbf16>, vector<64x16xf32> -> vector<64x16xf32>
    %100 = tpu.concatenate %77, %99 in 1 : vector<64x16xf32>, vector<64x16xf32> -> vector<64x32xf32>
    %101 = arith.truncf %100 : vector<64x32xf32> to vector<64x32xbf16>
    %c0_38 = arith.constant 0 : index
    %c0_39 = arith.constant 0 : index
    %102 = vector.load %arg9[%c0_38, %c0_39] : memref<32x32xbf16, #tpu.memory_space<vmem>>, vector<32x32xbf16>
    %cst_40 = arith.constant dense<0.000000e+00> : vector<64x32xf32>
    %103 = tpu.matmul %101, %102, %cst_40 {dimension_numbers = #tpu.dot_dimension_numbers<[1], [0], [0], [1], [0, 0, 1, 1], [], []>} : vector<64x32xbf16>, vector<32x32xbf16>, vector<64x32xf32> -> vector<64x32xf32>
    %104 = arith.addf %31, %103 : vector<64x32xf32>
    %c0_41 = arith.constant 0 : index
    %c0_42 = arith.constant 0 : index
    %105 = vector.load %arg10[%c0_41, %c0_42] : memref<1x32xf32, #tpu.memory_space<vmem>>, vector<1x32xf32>
    %106 = vector.broadcast %105 : vector<1x32xf32> to vector<64x32xf32>
    %107 = arith.addf %104, %106 : vector<64x32xf32>
    %cst_43 = arith.constant dense<0.000000e+00> : vector<64xf32>
    %108 = vector.multi_reduction <add>, %107, %cst_43 [1] : vector<64x32xf32> to vector<64xf32>
    %109 = vector.shape_cast %108 : vector<64xf32> to vector<64x1xf32>
    %cst_44 = arith.constant 3.200000e+01 : f32
    %110 = vector.broadcast %cst_44 : f32 to vector<64x1xf32>
    %111 = arith.divf %109, %110 : vector<64x1xf32>
    %112 = vector.broadcast %111 : vector<64x1xf32> to vector<64x32xf32>
    %113 = arith.subf %107, %112 : vector<64x32xf32>
    %114 = arith.mulf %113, %113 : vector<64x32xf32>
    %cst_45 = arith.constant dense<0.000000e+00> : vector<64xf32>
    %115 = vector.multi_reduction <add>, %114, %cst_45 [1] : vector<64x32xf32> to vector<64xf32>
    %116 = vector.shape_cast %115 : vector<64xf32> to vector<64x1xf32>
    %cst_46 = arith.constant 3.200000e+01 : f32
    %117 = vector.broadcast %cst_46 : f32 to vector<64x1xf32>
    %118 = arith.divf %116, %117 : vector<64x1xf32>
    %119 = vector.broadcast %111 : vector<64x1xf32> to vector<64x32xf32>
    %120 = arith.subf %107, %119 : vector<64x32xf32>
    %cst_47 = arith.constant 9.99999974E-6 : f32
    %121 = vector.broadcast %cst_47 : f32 to vector<64x1xf32>
    %122 = arith.addf %118, %121 : vector<64x1xf32>
    %123 = math.rsqrt %122 : vector<64x1xf32>
    %124 = vector.broadcast %123 : vector<64x1xf32> to vector<64x32xf32>
    %125 = arith.mulf %120, %124 : vector<64x32xf32>
    %126 = arith.truncf %125 : vector<64x32xf32> to vector<64x32xbf16>
    %c0_48 = arith.constant 0 : index
    %c0_49 = arith.constant 0 : index
    %127 = vector.load %arg11[%c0_48, %c0_49] : memref<32x128xbf16, #tpu.memory_space<vmem>>, vector<32x128xbf16>
    %cst_50 = arith.constant dense<0.000000e+00> : vector<64x128xf32>
    %128 = tpu.matmul %126, %127, %cst_50 {dimension_numbers = #tpu.dot_dimension_numbers<[1], [0], [0], [1], [0, 0, 1, 1], [], []>} : vector<64x32xbf16>, vector<32x128xbf16>, vector<64x128xf32> -> vector<64x128xf32>
    %c0_51 = arith.constant 0 : index
    %c0_52 = arith.constant 0 : index
    %129 = vector.load %arg12[%c0_51, %c0_52] : memref<1x128xf32, #tpu.memory_space<vmem>>, vector<1x128xf32>
    %130 = vector.broadcast %129 : vector<1x128xf32> to vector<64x128xf32>
    %131 = arith.addf %128, %130 : vector<64x128xf32>
    %132 = math.absf %131 : vector<64x128xf32>
    %cst_53 = arith.constant 0.707106769 : f32
    %133 = vector.broadcast %cst_53 : f32 to vector<64x128xf32>
    %134 = arith.mulf %132, %133 : vector<64x128xf32>
    %cst_54 = arith.constant 0.327591091 : f32
    %135 = vector.broadcast %cst_54 : f32 to vector<64x128xf32>
    %136 = arith.mulf %135, %134 : vector<64x128xf32>
    %cst_55 = arith.constant 1.000000e+00 : f32
    %137 = vector.broadcast %cst_55 : f32 to vector<64x128xf32>
    %138 = arith.addf %137, %136 : vector<64x128xf32>
    %139 = tpu.reciprocal %138 {approx = true} : vector<64x128xf32> -> vector<64x128xf32>
    %cst_56 = arith.constant 1.06140542 : f32
    %140 = vector.broadcast %cst_56 : f32 to vector<64x128xf32>
    %141 = arith.mulf %139, %140 : vector<64x128xf32>
    %cst_57 = arith.constant -1.45315206 : f32
    %142 = vector.broadcast %cst_57 : f32 to vector<64x128xf32>
    %143 = arith.addf %142, %141 : vector<64x128xf32>
    %144 = arith.mulf %139, %143 : vector<64x128xf32>
    %cst_58 = arith.constant 1.42141378 : f32
    %145 = vector.broadcast %cst_58 : f32 to vector<64x128xf32>
    %146 = arith.addf %145, %144 : vector<64x128xf32>
    %147 = arith.mulf %139, %146 : vector<64x128xf32>
    %cst_59 = arith.constant -0.284496725 : f32
    %148 = vector.broadcast %cst_59 : f32 to vector<64x128xf32>
    %149 = arith.addf %148, %147 : vector<64x128xf32>
    %150 = arith.mulf %139, %149 : vector<64x128xf32>
    %cst_60 = arith.constant 0.254829586 : f32
    %151 = vector.broadcast %cst_60 : f32 to vector<64x128xf32>
    %152 = arith.addf %151, %150 : vector<64x128xf32>
    %153 = arith.mulf %139, %152 : vector<64x128xf32>
    %154 = arith.mulf %134, %134 : vector<64x128xf32>
    %cst_61 = arith.constant 0.000000e+00 : f32
    %155 = vector.broadcast %cst_61 : f32 to vector<64x128xf32>
    %156 = arith.subf %155, %154 : vector<64x128xf32>
    %157 = math.exp %156 : vector<64x128xf32>
    %158 = arith.mulf %153, %157 : vector<64x128xf32>
    %cst_62 = arith.constant 1.000000e+00 : f32
    %159 = vector.broadcast %cst_62 : f32 to vector<64x128xf32>
    %160 = arith.subf %159, %158 : vector<64x128xf32>
    %cst_63 = arith.constant 0.000000e+00 : f32
    %161 = vector.broadcast %cst_63 : f32 to vector<64x128xf32>
    %162 = arith.cmpf olt, %131, %161 : vector<64x128xf32>
    %cst_64 = arith.constant 0.000000e+00 : f32
    %163 = vector.broadcast %cst_64 : f32 to vector<64x128xf32>
    %164 = arith.subf %163, %160 : vector<64x128xf32>
    %165 = arith.select %162, %164, %160 : vector<64x128xi1>, vector<64x128xf32>
    %cst_65 = arith.constant 5.000000e-01 : f32
    %166 = vector.broadcast %cst_65 : f32 to vector<64x128xf32>
    %167 = arith.mulf %166, %131 : vector<64x128xf32>
    %cst_66 = arith.constant 1.000000e+00 : f32
    %168 = vector.broadcast %cst_66 : f32 to vector<64x128xf32>
    %169 = arith.addf %168, %165 : vector<64x128xf32>
    %170 = arith.mulf %167, %169 : vector<64x128xf32>
    %171 = arith.truncf %170 : vector<64x128xf32> to vector<64x128xbf16>
    %c0_67 = arith.constant 0 : index
    %c0_68 = arith.constant 0 : index
    %172 = vector.load %arg13[%c0_67, %c0_68] : memref<128x32xbf16, #tpu.memory_space<vmem>>, vector<128x32xbf16>
    %cst_69 = arith.constant dense<0.000000e+00> : vector<64x32xf32>
    %173 = tpu.matmul %171, %172, %cst_69 {dimension_numbers = #tpu.dot_dimension_numbers<[1], [0], [0], [1], [0, 0, 1, 1], [], []>} : vector<64x128xbf16>, vector<128x32xbf16>, vector<64x32xf32> -> vector<64x32xf32>
    %174 = arith.addf %107, %173 : vector<64x32xf32>
    %c0_70 = arith.constant 0 : index
    %c0_71 = arith.constant 0 : index
    %175 = vector.load %arg14[%c0_70, %c0_71] : memref<1x32xf32, #tpu.memory_space<vmem>>, vector<1x32xf32>
    %176 = vector.broadcast %175 : vector<1x32xf32> to vector<64x32xf32>
    %177 = arith.addf %174, %176 : vector<64x32xf32>
    %cst_72 = arith.constant dense<0.000000e+00> : vector<64xf32>
    %178 = vector.multi_reduction <add>, %177, %cst_72 [1] : vector<64x32xf32> to vector<64xf32>
    %179 = vector.shape_cast %178 : vector<64xf32> to vector<64x1xf32>
    %cst_73 = arith.constant 3.200000e+01 : f32
    %180 = vector.broadcast %cst_73 : f32 to vector<64x1xf32>
    %181 = arith.divf %179, %180 : vector<64x1xf32>
    %182 = vector.broadcast %181 : vector<64x1xf32> to vector<64x32xf32>
    %183 = arith.subf %177, %182 : vector<64x32xf32>
    %184 = arith.mulf %183, %183 : vector<64x32xf32>
    %cst_74 = arith.constant dense<0.000000e+00> : vector<64xf32>
    %185 = vector.multi_reduction <add>, %184, %cst_74 [1] : vector<64x32xf32> to vector<64xf32>
    %186 = vector.shape_cast %185 : vector<64xf32> to vector<64x1xf32>
    %cst_75 = arith.constant 3.200000e+01 : f32
    %187 = vector.broadcast %cst_75 : f32 to vector<64x1xf32>
    %188 = arith.divf %186, %187 : vector<64x1xf32>
    %189 = vector.broadcast %181 : vector<64x1xf32> to vector<64x32xf32>
    %190 = arith.subf %177, %189 : vector<64x32xf32>
    %cst_76 = arith.constant 9.99999974E-6 : f32
    %191 = vector.broadcast %cst_76 : f32 to vector<64x1xf32>
    %192 = arith.addf %188, %191 : vector<64x1xf32>
    %193 = math.rsqrt %192 : vector<64x1xf32>
    %194 = vector.broadcast %193 : vector<64x1xf32> to vector<64x32xf32>
    %195 = arith.mulf %190, %194 : vector<64x32xf32>
    %196 = arith.truncf %195 : vector<64x32xf32> to vector<64x32xbf16>
    %c0_77 = arith.constant 0 : index
    %c0_78 = arith.constant 0 : index
    %197 = vector.load %arg15[%c0_77, %c0_78] : memref<32x96xbf16, #tpu.memory_space<vmem>>, vector<32x96xbf16>
    %cst_79 = arith.constant dense<0.000000e+00> : vector<64x96xf32>
    %198 = tpu.matmul %196, %197, %cst_79 {dimension_numbers = #tpu.dot_dimension_numbers<[1], [0], [0], [1], [0, 0, 1, 1], [], []>} : vector<64x32xbf16>, vector<32x96xbf16>, vector<64x96xf32> -> vector<64x96xf32>
    %c0_80 = arith.constant 0 : index
    %c0_81 = arith.constant 0 : index
    %199 = vector.load %arg16[%c0_80, %c0_81] : memref<1x96xf32, #tpu.memory_space<vmem>>, vector<1x96xf32>
    %200 = vector.broadcast %199 : vector<1x96xf32> to vector<64x96xf32>
    %201 = arith.addf %198, %200 : vector<64x96xf32>
    %202 = vector.extract_strided_slice %201 {offsets = [0, 0], sizes = [64, 16], strides = [1, 1]} : vector<64x96xf32> to vector<64x16xf32>
    %203 = vector.extract_strided_slice %201 {offsets = [0, 32], sizes = [64, 16], strides = [1, 1]} : vector<64x96xf32> to vector<64x16xf32>
    %204 = vector.extract_strided_slice %201 {offsets = [0, 64], sizes = [64, 16], strides = [1, 1]} : vector<64x96xf32> to vector<64x16xf32>
    %205 = arith.truncf %202 : vector<64x16xf32> to vector<64x16xbf16>
    %206 = arith.truncf %203 : vector<64x16xf32> to vector<64x16xbf16>
    "tpu.trace_start"() <{level = 10 : i32, message = "nd,md->nm"}> : () -> ()
    %cst_82 = arith.constant dense<0.000000e+00> : vector<64x64xf32>
    %207 = tpu.matmul %205, %206, %cst_82 {dimension_numbers = #tpu.dot_dimension_numbers<[1], [1], [0], [0], [0, 0, 1, 0], [], []>} : vector<64x16xbf16>, vector<64x16xbf16>, vector<64x64xf32> -> vector<64x64xf32>
    "tpu.trace_stop"() : () -> ()
    %c0_83 = arith.constant 0 : index
    %c0_84 = arith.constant 0 : index
    %c0_85 = arith.constant 0 : index
    %208 = vector.load %arg17[%c0_83, %c0_84, %c0_85] : memref<2x64x64xf32, #tpu.memory_space<vmem>>, vector<1x64x64xf32>
    %209 = vector.shape_cast %208 : vector<1x64x64xf32> to vector<64x64xf32>
    %210 = arith.addf %207, %209 : vector<64x64xf32>
    %cst_86 = arith.constant dense<0xFF800000> : vector<64xf32>
    %211 = vector.multi_reduction <maximumf>, %210, %cst_86 [1] : vector<64x64xf32> to vector<64xf32>
    %212 = vector.shape_cast %211 : vector<64xf32> to vector<64x1xf32>
    %213 = vector.broadcast %212 : vector<64x1xf32> to vector<64x64xf32>
    %214 = arith.subf %210, %213 : vector<64x64xf32>
    %215 = math.exp %214 : vector<64x64xf32>
    %cst_87 = arith.constant dense<0.000000e+00> : vector<64xf32>
    %216 = vector.multi_reduction <add>, %215, %cst_87 [1] : vector<64x64xf32> to vector<64xf32>
    %217 = vector.shape_cast %216 : vector<64xf32> to vector<64x1xf32>
    %218 = tpu.reciprocal %217 {approx = true} : vector<64x1xf32> -> vector<64x1xf32>
    %219 = vector.broadcast %218 : vector<64x1xf32> to vector<64x64xf32>
    %220 = arith.mulf %215, %219 : vector<64x64xf32>
    %221 = arith.truncf %220 : vector<64x64xf32> to vector<64x64xbf16>
    %222 = arith.truncf %204 : vector<64x16xf32> to vector<64x16xbf16>
    %cst_88 = arith.constant dense<0.000000e+00> : vector<64x16xf32>
    %223 = tpu.matmul %221, %222, %cst_88 {dimension_numbers = #tpu.dot_dimension_numbers<[1], [0], [0], [1], [0, 0, 1, 1], [], []>} : vector<64x64xbf16>, vector<64x16xbf16>, vector<64x16xf32> -> vector<64x16xf32>
    %224 = vector.extract_strided_slice %201 {offsets = [0, 16], sizes = [64, 16], strides = [1, 1]} : vector<64x96xf32> to vector<64x16xf32>
    %225 = vector.extract_strided_slice %201 {offsets = [0, 48], sizes = [64, 16], strides = [1, 1]} : vector<64x96xf32> to vector<64x16xf32>
    %226 = vector.extract_strided_slice %201 {offsets = [0, 80], sizes = [64, 16], strides = [1, 1]} : vector<64x96xf32> to vector<64x16xf32>
    %227 = arith.truncf %224 : vector<64x16xf32> to vector<64x16xbf16>
    %228 = arith.truncf %225 : vector<64x16xf32> to vector<64x16xbf16>
    "tpu.trace_start"() <{level = 10 : i32, message = "nd,md->nm"}> : () -> ()
    %cst_89 = arith.constant dense<0.000000e+00> : vector<64x64xf32>
    %229 = tpu.matmul %227, %228, %cst_89 {dimension_numbers = #tpu.dot_dimension_numbers<[1], [1], [0], [0], [0, 0, 1, 0], [], []>} : vector<64x16xbf16>, vector<64x16xbf16>, vector<64x64xf32> -> vector<64x64xf32>
    "tpu.trace_stop"() : () -> ()
    %c1_90 = arith.constant 1 : index
    %c0_91 = arith.constant 0 : index
    %c0_92 = arith.constant 0 : index
    %230 = vector.load %arg17[%c1_90, %c0_91, %c0_92] : memref<2x64x64xf32, #tpu.memory_space<vmem>>, vector<1x64x64xf32>
    %231 = vector.shape_cast %230 : vector<1x64x64xf32> to vector<64x64xf32>
    %232 = arith.addf %229, %231 : vector<64x64xf32>
    %cst_93 = arith.constant dense<0xFF800000> : vector<64xf32>
    %233 = vector.multi_reduction <maximumf>, %232, %cst_93 [1] : vector<64x64xf32> to vector<64xf32>
    %234 = vector.shape_cast %233 : vector<64xf32> to vector<64x1xf32>
    %235 = vector.broadcast %234 : vector<64x1xf32> to vector<64x64xf32>
    %236 = arith.subf %232, %235 : vector<64x64xf32>
    %237 = math.exp %236 : vector<64x64xf32>
    %cst_94 = arith.constant dense<0.000000e+00> : vector<64xf32>
    %238 = vector.multi_reduction <add>, %237, %cst_94 [1] : vector<64x64xf32> to vector<64xf32>
    %239 = vector.shape_cast %238 : vector<64xf32> to vector<64x1xf32>
    %240 = tpu.reciprocal %239 {approx = true} : vector<64x1xf32> -> vector<64x1xf32>
    %241 = vector.broadcast %240 : vector<64x1xf32> to vector<64x64xf32>
    %242 = arith.mulf %237, %241 : vector<64x64xf32>
    %243 = arith.truncf %242 : vector<64x64xf32> to vector<64x64xbf16>
    %244 = arith.truncf %226 : vector<64x16xf32> to vector<64x16xbf16>
    %cst_95 = arith.constant dense<0.000000e+00> : vector<64x16xf32>
    %245 = tpu.matmul %243, %244, %cst_95 {dimension_numbers = #tpu.dot_dimension_numbers<[1], [0], [0], [1], [0, 0, 1, 1], [], []>} : vector<64x64xbf16>, vector<64x16xbf16>, vector<64x16xf32> -> vector<64x16xf32>
    %246 = tpu.concatenate %223, %245 in 1 : vector<64x16xf32>, vector<64x16xf32> -> vector<64x32xf32>
    %247 = arith.truncf %246 : vector<64x32xf32> to vector<64x32xbf16>
    %c0_96 = arith.constant 0 : index
    %c0_97 = arith.constant 0 : index
    %248 = vector.load %arg18[%c0_96, %c0_97] : memref<32x32xbf16, #tpu.memory_space<vmem>>, vector<32x32xbf16>
    %cst_98 = arith.constant dense<0.000000e+00> : vector<64x32xf32>
    %249 = tpu.matmul %247, %248, %cst_98 {dimension_numbers = #tpu.dot_dimension_numbers<[1], [0], [0], [1], [0, 0, 1, 1], [], []>} : vector<64x32xbf16>, vector<32x32xbf16>, vector<64x32xf32> -> vector<64x32xf32>
    %250 = arith.addf %177, %249 : vector<64x32xf32>
    %c0_99 = arith.constant 0 : index
    %c0_100 = arith.constant 0 : index
    %251 = vector.load %arg19[%c0_99, %c0_100] : memref<1x32xf32, #tpu.memory_space<vmem>>, vector<1x32xf32>
    %252 = vector.broadcast %251 : vector<1x32xf32> to vector<64x32xf32>
    %253 = arith.addf %250, %252 : vector<64x32xf32>
    %cst_101 = arith.constant dense<0.000000e+00> : vector<64xf32>
    %254 = vector.multi_reduction <add>, %253, %cst_101 [1] : vector<64x32xf32> to vector<64xf32>
    %255 = vector.shape_cast %254 : vector<64xf32> to vector<64x1xf32>
    %cst_102 = arith.constant 3.200000e+01 : f32
    %256 = vector.broadcast %cst_102 : f32 to vector<64x1xf32>
    %257 = arith.divf %255, %256 : vector<64x1xf32>
    %258 = vector.broadcast %257 : vector<64x1xf32> to vector<64x32xf32>
    %259 = arith.subf %253, %258 : vector<64x32xf32>
    %260 = arith.mulf %259, %259 : vector<64x32xf32>
    %cst_103 = arith.constant dense<0.000000e+00> : vector<64xf32>
    %261 = vector.multi_reduction <add>, %260, %cst_103 [1] : vector<64x32xf32> to vector<64xf32>
    %262 = vector.shape_cast %261 : vector<64xf32> to vector<64x1xf32>
    %cst_104 = arith.constant 3.200000e+01 : f32
    %263 = vector.broadcast %cst_104 : f32 to vector<64x1xf32>
    %264 = arith.divf %262, %263 : vector<64x1xf32>
    %265 = vector.broadcast %257 : vector<64x1xf32> to vector<64x32xf32>
    %266 = arith.subf %253, %265 : vector<64x32xf32>
    %cst_105 = arith.constant 9.99999974E-6 : f32
    %267 = vector.broadcast %cst_105 : f32 to vector<64x1xf32>
    %268 = arith.addf %264, %267 : vector<64x1xf32>
    %269 = math.rsqrt %268 : vector<64x1xf32>
    %270 = vector.broadcast %269 : vector<64x1xf32> to vector<64x32xf32>
    %271 = arith.mulf %266, %270 : vector<64x32xf32>
    %272 = arith.truncf %271 : vector<64x32xf32> to vector<64x32xbf16>
    %c0_106 = arith.constant 0 : index
    %c0_107 = arith.constant 0 : index
    %273 = vector.load %arg20[%c0_106, %c0_107] : memref<32x128xbf16, #tpu.memory_space<vmem>>, vector<32x128xbf16>
    %cst_108 = arith.constant dense<0.000000e+00> : vector<64x128xf32>
    %274 = tpu.matmul %272, %273, %cst_108 {dimension_numbers = #tpu.dot_dimension_numbers<[1], [0], [0], [1], [0, 0, 1, 1], [], []>} : vector<64x32xbf16>, vector<32x128xbf16>, vector<64x128xf32> -> vector<64x128xf32>
    %c0_109 = arith.constant 0 : index
    %c0_110 = arith.constant 0 : index
    %275 = vector.load %arg21[%c0_109, %c0_110] : memref<1x128xf32, #tpu.memory_space<vmem>>, vector<1x128xf32>
    %276 = vector.broadcast %275 : vector<1x128xf32> to vector<64x128xf32>
    %277 = arith.addf %274, %276 : vector<64x128xf32>
    %278 = math.absf %277 : vector<64x128xf32>
    %cst_111 = arith.constant 0.707106769 : f32
    %279 = vector.broadcast %cst_111 : f32 to vector<64x128xf32>
    %280 = arith.mulf %278, %279 : vector<64x128xf32>
    %cst_112 = arith.constant 0.327591091 : f32
    %281 = vector.broadcast %cst_112 : f32 to vector<64x128xf32>
    %282 = arith.mulf %281, %280 : vector<64x128xf32>
    %cst_113 = arith.constant 1.000000e+00 : f32
    %283 = vector.broadcast %cst_113 : f32 to vector<64x128xf32>
    %284 = arith.addf %283, %282 : vector<64x128xf32>
    %285 = tpu.reciprocal %284 {approx = true} : vector<64x128xf32> -> vector<64x128xf32>
    %cst_114 = arith.constant 1.06140542 : f32
    %286 = vector.broadcast %cst_114 : f32 to vector<64x128xf32>
    %287 = arith.mulf %285, %286 : vector<64x128xf32>
    %cst_115 = arith.constant -1.45315206 : f32
    %288 = vector.broadcast %cst_115 : f32 to vector<64x128xf32>
    %289 = arith.addf %288, %287 : vector<64x128xf32>
    %290 = arith.mulf %285, %289 : vector<64x128xf32>
    %cst_116 = arith.constant 1.42141378 : f32
    %291 = vector.broadcast %cst_116 : f32 to vector<64x128xf32>
    %292 = arith.addf %291, %290 : vector<64x128xf32>
    %293 = arith.mulf %285, %292 : vector<64x128xf32>
    %cst_117 = arith.constant -0.284496725 : f32
    %294 = vector.broadcast %cst_117 : f32 to vector<64x128xf32>
    %295 = arith.addf %294, %293 : vector<64x128xf32>
    %296 = arith.mulf %285, %295 : vector<64x128xf32>
    %cst_118 = arith.constant 0.254829586 : f32
    %297 = vector.broadcast %cst_118 : f32 to vector<64x128xf32>
    %298 = arith.addf %297, %296 : vector<64x128xf32>
    %299 = arith.mulf %285, %298 : vector<64x128xf32>
    %300 = arith.mulf %280, %280 : vector<64x128xf32>
    %cst_119 = arith.constant 0.000000e+00 : f32
    %301 = vector.broadcast %cst_119 : f32 to vector<64x128xf32>
    %302 = arith.subf %301, %300 : vector<64x128xf32>
    %303 = math.exp %302 : vector<64x128xf32>
    %304 = arith.mulf %299, %303 : vector<64x128xf32>
    %cst_120 = arith.constant 1.000000e+00 : f32
    %305 = vector.broadcast %cst_120 : f32 to vector<64x128xf32>
    %306 = arith.subf %305, %304 : vector<64x128xf32>
    %cst_121 = arith.constant 0.000000e+00 : f32
    %307 = vector.broadcast %cst_121 : f32 to vector<64x128xf32>
    %308 = arith.cmpf olt, %277, %307 : vector<64x128xf32>
    %cst_122 = arith.constant 0.000000e+00 : f32
    %309 = vector.broadcast %cst_122 : f32 to vector<64x128xf32>
    %310 = arith.subf %309, %306 : vector<64x128xf32>
    %311 = arith.select %308, %310, %306 : vector<64x128xi1>, vector<64x128xf32>
    %cst_123 = arith.constant 5.000000e-01 : f32
    %312 = vector.broadcast %cst_123 : f32 to vector<64x128xf32>
    %313 = arith.mulf %312, %277 : vector<64x128xf32>
    %cst_124 = arith.constant 1.000000e+00 : f32
    %314 = vector.broadcast %cst_124 : f32 to vector<64x128xf32>
    %315 = arith.addf %314, %311 : vector<64x128xf32>
    %316 = arith.mulf %313, %315 : vector<64x128xf32>
    %317 = arith.truncf %316 : vector<64x128xf32> to vector<64x128xbf16>
    %c0_125 = arith.constant 0 : index
    %c0_126 = arith.constant 0 : index
    %318 = vector.load %arg22[%c0_125, %c0_126] : memref<128x32xbf16, #tpu.memory_space<vmem>>, vector<128x32xbf16>
    %cst_127 = arith.constant dense<0.000000e+00> : vector<64x32xf32>
    %319 = tpu.matmul %317, %318, %cst_127 {dimension_numbers = #tpu.dot_dimension_numbers<[1], [0], [0], [1], [0, 0, 1, 1], [], []>} : vector<64x128xbf16>, vector<128x32xbf16>, vector<64x32xf32> -> vector<64x32xf32>
    %320 = arith.addf %253, %319 : vector<64x32xf32>
    %c0_128 = arith.constant 0 : index
    %c0_129 = arith.constant 0 : index
    %321 = vector.load %arg23[%c0_128, %c0_129] : memref<1x32xf32, #tpu.memory_space<vmem>>, vector<1x32xf32>
    %322 = vector.broadcast %321 : vector<1x32xf32> to vector<64x32xf32>
    %323 = arith.addf %320, %322 : vector<64x32xf32>
    %c0_130 = arith.constant 0 : index
    %c0_131 = arith.constant 0 : index
    %c0_132 = arith.constant 0 : index
    %324 = vector.load %arg24[%c0_130, %c0_131, %c0_132] : memref<4x16x64xf32, #tpu.memory_space<vmem>>, vector<1x16x64xf32>
    %325 = vector.shape_cast %324 : vector<1x16x64xf32> to vector<16x64xf32>
    %cst_133 = arith.constant dense<0.000000e+00> : vector<16x32xf32>
    %326 = tpu.matmul %325, %323, %cst_133 {dimension_numbers = #tpu.dot_dimension_numbers<[1], [0], [0], [1], [0, 0, 1, 1], [], []>} : vector<16x64xf32>, vector<64x32xf32>, vector<16x32xf32> -> vector<16x32xf32>
    %c1_134 = arith.constant 1 : index
    %c0_135 = arith.constant 0 : index
    %c0_136 = arith.constant 0 : index
    %327 = vector.load %arg24[%c1_134, %c0_135, %c0_136] : memref<4x16x64xf32, #tpu.memory_space<vmem>>, vector<1x16x64xf32>
    %328 = vector.shape_cast %327 : vector<1x16x64xf32> to vector<16x64xf32>
    %cst_137 = arith.constant dense<0.000000e+00> : vector<16x32xf32>
    %329 = tpu.matmul %328, %323, %cst_137 {dimension_numbers = #tpu.dot_dimension_numbers<[1], [0], [0], [1], [0, 0, 1, 1], [], []>} : vector<16x64xf32>, vector<64x32xf32>, vector<16x32xf32> -> vector<16x32xf32>
    %c2 = arith.constant 2 : index
    %c0_138 = arith.constant 0 : index
    %c0_139 = arith.constant 0 : index
    %330 = vector.load %arg24[%c2, %c0_138, %c0_139] : memref<4x16x64xf32, #tpu.memory_space<vmem>>, vector<1x16x64xf32>
    %331 = vector.shape_cast %330 : vector<1x16x64xf32> to vector<16x64xf32>
    %cst_140 = arith.constant dense<0.000000e+00> : vector<16x32xf32>
    %332 = tpu.matmul %331, %323, %cst_140 {dimension_numbers = #tpu.dot_dimension_numbers<[1], [0], [0], [1], [0, 0, 1, 1], [], []>} : vector<16x64xf32>, vector<64x32xf32>, vector<16x32xf32> -> vector<16x32xf32>
    %c3 = arith.constant 3 : index
    %c0_141 = arith.constant 0 : index
    %c0_142 = arith.constant 0 : index
    %333 = vector.load %arg24[%c3, %c0_141, %c0_142] : memref<4x16x64xf32, #tpu.memory_space<vmem>>, vector<1x16x64xf32>
    %334 = vector.shape_cast %333 : vector<1x16x64xf32> to vector<16x64xf32>
    %cst_143 = arith.constant dense<0.000000e+00> : vector<16x32xf32>
    %335 = tpu.matmul %334, %323, %cst_143 {dimension_numbers = #tpu.dot_dimension_numbers<[1], [0], [0], [1], [0, 0, 1, 1], [], []>} : vector<16x64xf32>, vector<64x32xf32>, vector<16x32xf32> -> vector<16x32xf32>
    %336 = tpu.concatenate %326, %329, %332, %335 in 1 : vector<16x32xf32>, vector<16x32xf32>, vector<16x32xf32>, vector<16x32xf32> -> vector<16x128xf32>
    %cst_144 = arith.constant dense<0.000000e+00> : vector<16xf32>
    %337 = vector.multi_reduction <add>, %336, %cst_144 [1] : vector<16x128xf32> to vector<16xf32>
    %338 = vector.shape_cast %337 : vector<16xf32> to vector<16x1xf32>
    %cst_145 = arith.constant 1.280000e+02 : f32
    %339 = vector.broadcast %cst_145 : f32 to vector<16x1xf32>
    %340 = arith.divf %338, %339 : vector<16x1xf32>
    %341 = vector.broadcast %340 : vector<16x1xf32> to vector<16x128xf32>
    %342 = arith.subf %336, %341 : vector<16x128xf32>
    %343 = arith.mulf %342, %342 : vector<16x128xf32>
    %cst_146 = arith.constant dense<0.000000e+00> : vector<16xf32>
    %344 = vector.multi_reduction <add>, %343, %cst_146 [1] : vector<16x128xf32> to vector<16xf32>
    %345 = vector.shape_cast %344 : vector<16xf32> to vector<16x1xf32>
    %cst_147 = arith.constant 1.280000e+02 : f32
    %346 = vector.broadcast %cst_147 : f32 to vector<16x1xf32>
    %347 = arith.divf %345, %346 : vector<16x1xf32>
    %348 = vector.broadcast %340 : vector<16x1xf32> to vector<16x128xf32>
    %349 = arith.subf %336, %348 : vector<16x128xf32>
    %cst_148 = arith.constant 9.99999974E-6 : f32
    %350 = vector.broadcast %cst_148 : f32 to vector<16x1xf32>
    %351 = arith.addf %347, %350 : vector<16x1xf32>
    %352 = math.rsqrt %351 : vector<16x1xf32>
    %353 = vector.broadcast %352 : vector<16x1xf32> to vector<16x128xf32>
    %354 = arith.mulf %349, %353 : vector<16x128xf32>
    %355 = arith.truncf %354 : vector<16x128xf32> to vector<16x128xbf16>
    %c0_149 = arith.constant 0 : index
    %c0_150 = arith.constant 0 : index
    %356 = vector.load %arg25[%c0_149, %c0_150] : memref<128x64xbf16, #tpu.memory_space<vmem>>, vector<128x64xbf16>
    %cst_151 = arith.constant dense<0.000000e+00> : vector<16x64xf32>
    %357 = tpu.matmul %355, %356, %cst_151 {dimension_numbers = #tpu.dot_dimension_numbers<[1], [0], [0], [1], [0, 0, 1, 1], [], []>} : vector<16x128xbf16>, vector<128x64xbf16>, vector<16x64xf32> -> vector<16x64xf32>
    %c0_152 = arith.constant 0 : index
    %c0_153 = arith.constant 0 : index
    %358 = vector.load %arg26[%c0_152, %c0_153] : memref<1x64xf32, #tpu.memory_space<vmem>>, vector<1x64xf32>
    %359 = vector.broadcast %358 : vector<1x64xf32> to vector<16x64xf32>
    %360 = arith.addf %357, %359 : vector<16x64xf32>
    %cst_154 = arith.constant dense<0.000000e+00> : vector<16xf32>
    %361 = vector.multi_reduction <add>, %360, %cst_154 [1] : vector<16x64xf32> to vector<16xf32>
    %362 = vector.shape_cast %361 : vector<16xf32> to vector<16x1xf32>
    %cst_155 = arith.constant 6.400000e+01 : f32
    %363 = vector.broadcast %cst_155 : f32 to vector<16x1xf32>
    %364 = arith.divf %362, %363 : vector<16x1xf32>
    %365 = vector.broadcast %364 : vector<16x1xf32> to vector<16x64xf32>
    %366 = arith.subf %360, %365 : vector<16x64xf32>
    %367 = arith.mulf %366, %366 : vector<16x64xf32>
    %cst_156 = arith.constant dense<0.000000e+00> : vector<16xf32>
    %368 = vector.multi_reduction <add>, %367, %cst_156 [1] : vector<16x64xf32> to vector<16xf32>
    %369 = vector.shape_cast %368 : vector<16xf32> to vector<16x1xf32>
    %cst_157 = arith.constant 6.400000e+01 : f32
    %370 = vector.broadcast %cst_157 : f32 to vector<16x1xf32>
    %371 = arith.divf %369, %370 : vector<16x1xf32>
    %372 = vector.broadcast %364 : vector<16x1xf32> to vector<16x64xf32>
    %373 = arith.subf %360, %372 : vector<16x64xf32>
    %cst_158 = arith.constant 9.99999974E-6 : f32
    %374 = vector.broadcast %cst_158 : f32 to vector<16x1xf32>
    %375 = arith.addf %371, %374 : vector<16x1xf32>
    %376 = math.rsqrt %375 : vector<16x1xf32>
    %377 = vector.broadcast %376 : vector<16x1xf32> to vector<16x64xf32>
    %378 = arith.mulf %373, %377 : vector<16x64xf32>
    %379 = arith.truncf %378 : vector<16x64xf32> to vector<16x64xbf16>
    %c0_159 = arith.constant 0 : index
    %c0_160 = arith.constant 0 : index
    %380 = vector.load %arg27[%c0_159, %c0_160] : memref<64x192xbf16, #tpu.memory_space<vmem>>, vector<64x192xbf16>
    %cst_161 = arith.constant dense<0.000000e+00> : vector<16x192xf32>
    %381 = tpu.matmul %379, %380, %cst_161 {dimension_numbers = #tpu.dot_dimension_numbers<[1], [0], [0], [1], [0, 0, 1, 1], [], []>} : vector<16x64xbf16>, vector<64x192xbf16>, vector<16x192xf32> -> vector<16x192xf32>
    %c0_162 = arith.constant 0 : index
    %c0_163 = arith.constant 0 : index
    %382 = vector.load %arg28[%c0_162, %c0_163] : memref<1x192xf32, #tpu.memory_space<vmem>>, vector<1x192xf32>
    %383 = vector.broadcast %382 : vector<1x192xf32> to vector<16x192xf32>
    %384 = arith.addf %381, %383 : vector<16x192xf32>
    %385 = vector.extract_strided_slice %384 {offsets = [0, 0], sizes = [16, 16], strides = [1, 1]} : vector<16x192xf32> to vector<16x16xf32>
    %386 = vector.extract_strided_slice %384 {offsets = [0, 64], sizes = [16, 16], strides = [1, 1]} : vector<16x192xf32> to vector<16x16xf32>
    %387 = vector.extract_strided_slice %384 {offsets = [0, 128], sizes = [16, 16], strides = [1, 1]} : vector<16x192xf32> to vector<16x16xf32>
    %388 = arith.truncf %385 : vector<16x16xf32> to vector<16x16xbf16>
    %389 = arith.truncf %386 : vector<16x16xf32> to vector<16x16xbf16>
    "tpu.trace_start"() <{level = 10 : i32, message = "nd,md->nm"}> : () -> ()
    %cst_164 = arith.constant dense<0.000000e+00> : vector<16x16xf32>
    %390 = tpu.matmul %388, %389, %cst_164 {dimension_numbers = #tpu.dot_dimension_numbers<[1], [1], [0], [0], [0, 0, 1, 0], [], []>} : vector<16x16xbf16>, vector<16x16xbf16>, vector<16x16xf32> -> vector<16x16xf32>
    "tpu.trace_stop"() : () -> ()
    %c0_165 = arith.constant 0 : index
    %c0_166 = arith.constant 0 : index
    %c0_167 = arith.constant 0 : index
    %391 = vector.load %arg29[%c0_165, %c0_166, %c0_167] : memref<4x16x16xf32, #tpu.memory_space<vmem>>, vector<1x16x16xf32>
    %392 = vector.shape_cast %391 : vector<1x16x16xf32> to vector<16x16xf32>
    %393 = arith.addf %390, %392 : vector<16x16xf32>
    %cst_168 = arith.constant dense<0xFF800000> : vector<16xf32>
    %394 = vector.multi_reduction <maximumf>, %393, %cst_168 [1] : vector<16x16xf32> to vector<16xf32>
    %395 = vector.shape_cast %394 : vector<16xf32> to vector<16x1xf32>
    %396 = vector.broadcast %395 : vector<16x1xf32> to vector<16x16xf32>
    %397 = arith.subf %393, %396 : vector<16x16xf32>
    %398 = math.exp %397 : vector<16x16xf32>
    %cst_169 = arith.constant dense<0.000000e+00> : vector<16xf32>
    %399 = vector.multi_reduction <add>, %398, %cst_169 [1] : vector<16x16xf32> to vector<16xf32>
    %400 = vector.shape_cast %399 : vector<16xf32> to vector<16x1xf32>
    %401 = tpu.reciprocal %400 {approx = true} : vector<16x1xf32> -> vector<16x1xf32>
    %402 = vector.broadcast %401 : vector<16x1xf32> to vector<16x16xf32>
    %403 = arith.mulf %398, %402 : vector<16x16xf32>
    %404 = arith.truncf %403 : vector<16x16xf32> to vector<16x16xbf16>
    %405 = arith.truncf %387 : vector<16x16xf32> to vector<16x16xbf16>
    %cst_170 = arith.constant dense<0.000000e+00> : vector<16x16xf32>
    %406 = tpu.matmul %404, %405, %cst_170 {dimension_numbers = #tpu.dot_dimension_numbers<[1], [0], [0], [1], [0, 0, 1, 1], [], []>} : vector<16x16xbf16>, vector<16x16xbf16>, vector<16x16xf32> -> vector<16x16xf32>
    %407 = vector.extract_strided_slice %384 {offsets = [0, 16], sizes = [16, 16], strides = [1, 1]} : vector<16x192xf32> to vector<16x16xf32>
    %408 = vector.extract_strided_slice %384 {offsets = [0, 80], sizes = [16, 16], strides = [1, 1]} : vector<16x192xf32> to vector<16x16xf32>
    %409 = vector.extract_strided_slice %384 {offsets = [0, 144], sizes = [16, 16], strides = [1, 1]} : vector<16x192xf32> to vector<16x16xf32>
    %410 = arith.truncf %407 : vector<16x16xf32> to vector<16x16xbf16>
    %411 = arith.truncf %408 : vector<16x16xf32> to vector<16x16xbf16>
    "tpu.trace_start"() <{level = 10 : i32, message = "nd,md->nm"}> : () -> ()
    %cst_171 = arith.constant dense<0.000000e+00> : vector<16x16xf32>
    %412 = tpu.matmul %410, %411, %cst_171 {dimension_numbers = #tpu.dot_dimension_numbers<[1], [1], [0], [0], [0, 0, 1, 0], [], []>} : vector<16x16xbf16>, vector<16x16xbf16>, vector<16x16xf32> -> vector<16x16xf32>
    "tpu.trace_stop"() : () -> ()
    %c1_172 = arith.constant 1 : index
    %c0_173 = arith.constant 0 : index
    %c0_174 = arith.constant 0 : index
    %413 = vector.load %arg29[%c1_172, %c0_173, %c0_174] : memref<4x16x16xf32, #tpu.memory_space<vmem>>, vector<1x16x16xf32>
    %414 = vector.shape_cast %413 : vector<1x16x16xf32> to vector<16x16xf32>
    %415 = arith.addf %412, %414 : vector<16x16xf32>
    %cst_175 = arith.constant dense<0xFF800000> : vector<16xf32>
    %416 = vector.multi_reduction <maximumf>, %415, %cst_175 [1] : vector<16x16xf32> to vector<16xf32>
    %417 = vector.shape_cast %416 : vector<16xf32> to vector<16x1xf32>
    %418 = vector.broadcast %417 : vector<16x1xf32> to vector<16x16xf32>
    %419 = arith.subf %415, %418 : vector<16x16xf32>
    %420 = math.exp %419 : vector<16x16xf32>
    %cst_176 = arith.constant dense<0.000000e+00> : vector<16xf32>
    %421 = vector.multi_reduction <add>, %420, %cst_176 [1] : vector<16x16xf32> to vector<16xf32>
    %422 = vector.shape_cast %421 : vector<16xf32> to vector<16x1xf32>
    %423 = tpu.reciprocal %422 {approx = true} : vector<16x1xf32> -> vector<16x1xf32>
    %424 = vector.broadcast %423 : vector<16x1xf32> to vector<16x16xf32>
    %425 = arith.mulf %420, %424 : vector<16x16xf32>
    %426 = arith.truncf %425 : vector<16x16xf32> to vector<16x16xbf16>
    %427 = arith.truncf %409 : vector<16x16xf32> to vector<16x16xbf16>
    %cst_177 = arith.constant dense<0.000000e+00> : vector<16x16xf32>
    %428 = tpu.matmul %426, %427, %cst_177 {dimension_numbers = #tpu.dot_dimension_numbers<[1], [0], [0], [1], [0, 0, 1, 1], [], []>} : vector<16x16xbf16>, vector<16x16xbf16>, vector<16x16xf32> -> vector<16x16xf32>
    %429 = vector.extract_strided_slice %384 {offsets = [0, 32], sizes = [16, 16], strides = [1, 1]} : vector<16x192xf32> to vector<16x16xf32>
    %430 = vector.extract_strided_slice %384 {offsets = [0, 96], sizes = [16, 16], strides = [1, 1]} : vector<16x192xf32> to vector<16x16xf32>
    %431 = vector.extract_strided_slice %384 {offsets = [0, 160], sizes = [16, 16], strides = [1, 1]} : vector<16x192xf32> to vector<16x16xf32>
    %432 = arith.truncf %429 : vector<16x16xf32> to vector<16x16xbf16>
    %433 = arith.truncf %430 : vector<16x16xf32> to vector<16x16xbf16>
    "tpu.trace_start"() <{level = 10 : i32, message = "nd,md->nm"}> : () -> ()
    %cst_178 = arith.constant dense<0.000000e+00> : vector<16x16xf32>
    %434 = tpu.matmul %432, %433, %cst_178 {dimension_numbers = #tpu.dot_dimension_numbers<[1], [1], [0], [0], [0, 0, 1, 0], [], []>} : vector<16x16xbf16>, vector<16x16xbf16>, vector<16x16xf32> -> vector<16x16xf32>
    "tpu.trace_stop"() : () -> ()
    %c2_179 = arith.constant 2 : index
    %c0_180 = arith.constant 0 : index
    %c0_181 = arith.constant 0 : index
    %435 = vector.load %arg29[%c2_179, %c0_180, %c0_181] : memref<4x16x16xf32, #tpu.memory_space<vmem>>, vector<1x16x16xf32>
    %436 = vector.shape_cast %435 : vector<1x16x16xf32> to vector<16x16xf32>
    %437 = arith.addf %434, %436 : vector<16x16xf32>
    %cst_182 = arith.constant dense<0xFF800000> : vector<16xf32>
    %438 = vector.multi_reduction <maximumf>, %437, %cst_182 [1] : vector<16x16xf32> to vector<16xf32>
    %439 = vector.shape_cast %438 : vector<16xf32> to vector<16x1xf32>
    %440 = vector.broadcast %439 : vector<16x1xf32> to vector<16x16xf32>
    %441 = arith.subf %437, %440 : vector<16x16xf32>
    %442 = math.exp %441 : vector<16x16xf32>
    %cst_183 = arith.constant dense<0.000000e+00> : vector<16xf32>
    %443 = vector.multi_reduction <add>, %442, %cst_183 [1] : vector<16x16xf32> to vector<16xf32>
    %444 = vector.shape_cast %443 : vector<16xf32> to vector<16x1xf32>
    %445 = tpu.reciprocal %444 {approx = true} : vector<16x1xf32> -> vector<16x1xf32>
    %446 = vector.broadcast %445 : vector<16x1xf32> to vector<16x16xf32>
    %447 = arith.mulf %442, %446 : vector<16x16xf32>
    %448 = arith.truncf %447 : vector<16x16xf32> to vector<16x16xbf16>
    %449 = arith.truncf %431 : vector<16x16xf32> to vector<16x16xbf16>
    %cst_184 = arith.constant dense<0.000000e+00> : vector<16x16xf32>
    %450 = tpu.matmul %448, %449, %cst_184 {dimension_numbers = #tpu.dot_dimension_numbers<[1], [0], [0], [1], [0, 0, 1, 1], [], []>} : vector<16x16xbf16>, vector<16x16xbf16>, vector<16x16xf32> -> vector<16x16xf32>
    %451 = vector.extract_strided_slice %384 {offsets = [0, 48], sizes = [16, 16], strides = [1, 1]} : vector<16x192xf32> to vector<16x16xf32>
    %452 = vector.extract_strided_slice %384 {offsets = [0, 112], sizes = [16, 16], strides = [1, 1]} : vector<16x192xf32> to vector<16x16xf32>
    %453 = vector.extract_strided_slice %384 {offsets = [0, 176], sizes = [16, 16], strides = [1, 1]} : vector<16x192xf32> to vector<16x16xf32>
    %454 = arith.truncf %451 : vector<16x16xf32> to vector<16x16xbf16>
    %455 = arith.truncf %452 : vector<16x16xf32> to vector<16x16xbf16>
    "tpu.trace_start"() <{level = 10 : i32, message = "nd,md->nm"}> : () -> ()
    %cst_185 = arith.constant dense<0.000000e+00> : vector<16x16xf32>
    %456 = tpu.matmul %454, %455, %cst_185 {dimension_numbers = #tpu.dot_dimension_numbers<[1], [1], [0], [0], [0, 0, 1, 0], [], []>} : vector<16x16xbf16>, vector<16x16xbf16>, vector<16x16xf32> -> vector<16x16xf32>
    "tpu.trace_stop"() : () -> ()
    %c3_186 = arith.constant 3 : index
    %c0_187 = arith.constant 0 : index
    %c0_188 = arith.constant 0 : index
    %457 = vector.load %arg29[%c3_186, %c0_187, %c0_188] : memref<4x16x16xf32, #tpu.memory_space<vmem>>, vector<1x16x16xf32>
    %458 = vector.shape_cast %457 : vector<1x16x16xf32> to vector<16x16xf32>
    %459 = arith.addf %456, %458 : vector<16x16xf32>
    %cst_189 = arith.constant dense<0xFF800000> : vector<16xf32>
    %460 = vector.multi_reduction <maximumf>, %459, %cst_189 [1] : vector<16x16xf32> to vector<16xf32>
    %461 = vector.shape_cast %460 : vector<16xf32> to vector<16x1xf32>
    %462 = vector.broadcast %461 : vector<16x1xf32> to vector<16x16xf32>
    %463 = arith.subf %459, %462 : vector<16x16xf32>
    %464 = math.exp %463 : vector<16x16xf32>
    %cst_190 = arith.constant dense<0.000000e+00> : vector<16xf32>
    %465 = vector.multi_reduction <add>, %464, %cst_190 [1] : vector<16x16xf32> to vector<16xf32>
    %466 = vector.shape_cast %465 : vector<16xf32> to vector<16x1xf32>
    %467 = tpu.reciprocal %466 {approx = true} : vector<16x1xf32> -> vector<16x1xf32>
    %468 = vector.broadcast %467 : vector<16x1xf32> to vector<16x16xf32>
    %469 = arith.mulf %464, %468 : vector<16x16xf32>
    %470 = arith.truncf %469 : vector<16x16xf32> to vector<16x16xbf16>
    %471 = arith.truncf %453 : vector<16x16xf32> to vector<16x16xbf16>
    %cst_191 = arith.constant dense<0.000000e+00> : vector<16x16xf32>
    %472 = tpu.matmul %470, %471, %cst_191 {dimension_numbers = #tpu.dot_dimension_numbers<[1], [0], [0], [1], [0, 0, 1, 1], [], []>} : vector<16x16xbf16>, vector<16x16xbf16>, vector<16x16xf32> -> vector<16x16xf32>
    %473 = tpu.concatenate %406, %428, %450, %472 in 1 : vector<16x16xf32>, vector<16x16xf32>, vector<16x16xf32>, vector<16x16xf32> -> vector<16x64xf32>
    %474 = arith.truncf %473 : vector<16x64xf32> to vector<16x64xbf16>
    %c0_192 = arith.constant 0 : index
    %c0_193 = arith.constant 0 : index
    %475 = vector.load %arg30[%c0_192, %c0_193] : memref<64x64xbf16, #tpu.memory_space<vmem>>, vector<64x64xbf16>
    %cst_194 = arith.constant dense<0.000000e+00> : vector<16x64xf32>
    %476 = tpu.matmul %474, %475, %cst_194 {dimension_numbers = #tpu.dot_dimension_numbers<[1], [0], [0], [1], [0, 0, 1, 1], [], []>} : vector<16x64xbf16>, vector<64x64xbf16>, vector<16x64xf32> -> vector<16x64xf32>
    %477 = arith.addf %360, %476 : vector<16x64xf32>
    %c0_195 = arith.constant 0 : index
    %c0_196 = arith.constant 0 : index
    %478 = vector.load %arg31[%c0_195, %c0_196] : memref<1x64xf32, #tpu.memory_space<vmem>>, vector<1x64xf32>
    %479 = vector.broadcast %478 : vector<1x64xf32> to vector<16x64xf32>
    %480 = arith.addf %477, %479 : vector<16x64xf32>
    %cst_197 = arith.constant dense<0.000000e+00> : vector<16xf32>
    %481 = vector.multi_reduction <add>, %480, %cst_197 [1] : vector<16x64xf32> to vector<16xf32>
    %482 = vector.shape_cast %481 : vector<16xf32> to vector<16x1xf32>
    %cst_198 = arith.constant 6.400000e+01 : f32
    %483 = vector.broadcast %cst_198 : f32 to vector<16x1xf32>
    %484 = arith.divf %482, %483 : vector<16x1xf32>
    %485 = vector.broadcast %484 : vector<16x1xf32> to vector<16x64xf32>
    %486 = arith.subf %480, %485 : vector<16x64xf32>
    %487 = arith.mulf %486, %486 : vector<16x64xf32>
    %cst_199 = arith.constant dense<0.000000e+00> : vector<16xf32>
    %488 = vector.multi_reduction <add>, %487, %cst_199 [1] : vector<16x64xf32> to vector<16xf32>
    %489 = vector.shape_cast %488 : vector<16xf32> to vector<16x1xf32>
    %cst_200 = arith.constant 6.400000e+01 : f32
    %490 = vector.broadcast %cst_200 : f32 to vector<16x1xf32>
    %491 = arith.divf %489, %490 : vector<16x1xf32>
    %492 = vector.broadcast %484 : vector<16x1xf32> to vector<16x64xf32>
    %493 = arith.subf %480, %492 : vector<16x64xf32>
    %cst_201 = arith.constant 9.99999974E-6 : f32
    %494 = vector.broadcast %cst_201 : f32 to vector<16x1xf32>
    %495 = arith.addf %491, %494 : vector<16x1xf32>
    %496 = math.rsqrt %495 : vector<16x1xf32>
    %497 = vector.broadcast %496 : vector<16x1xf32> to vector<16x64xf32>
    %498 = arith.mulf %493, %497 : vector<16x64xf32>
    %499 = arith.truncf %498 : vector<16x64xf32> to vector<16x64xbf16>
    %c0_202 = arith.constant 0 : index
    %c0_203 = arith.constant 0 : index
    %500 = vector.load %arg32[%c0_202, %c0_203] : memref<64x256xbf16, #tpu.memory_space<vmem>>, vector<64x256xbf16>
    %cst_204 = arith.constant dense<0.000000e+00> : vector<16x256xf32>
    %501 = tpu.matmul %499, %500, %cst_204 {dimension_numbers = #tpu.dot_dimension_numbers<[1], [0], [0], [1], [0, 0, 1, 1], [], []>} : vector<16x64xbf16>, vector<64x256xbf16>, vector<16x256xf32> -> vector<16x256xf32>
    %c0_205 = arith.constant 0 : index
    %c0_206 = arith.constant 0 : index
    %502 = vector.load %arg33[%c0_205, %c0_206] : memref<1x256xf32, #tpu.memory_space<vmem>>, vector<1x256xf32>
    %503 = vector.broadcast %502 : vector<1x256xf32> to vector<16x256xf32>
    %504 = arith.addf %501, %503 : vector<16x256xf32>
    %505 = math.absf %504 : vector<16x256xf32>
    %cst_207 = arith.constant 0.707106769 : f32
    %506 = vector.broadcast %cst_207 : f32 to vector<16x256xf32>
    %507 = arith.mulf %505, %506 : vector<16x256xf32>
    %cst_208 = arith.constant 0.327591091 : f32
    %508 = vector.broadcast %cst_208 : f32 to vector<16x256xf32>
    %509 = arith.mulf %508, %507 : vector<16x256xf32>
    %cst_209 = arith.constant 1.000000e+00 : f32
    %510 = vector.broadcast %cst_209 : f32 to vector<16x256xf32>
    %511 = arith.addf %510, %509 : vector<16x256xf32>
    %512 = tpu.reciprocal %511 {approx = true} : vector<16x256xf32> -> vector<16x256xf32>
    %cst_210 = arith.constant 1.06140542 : f32
    %513 = vector.broadcast %cst_210 : f32 to vector<16x256xf32>
    %514 = arith.mulf %512, %513 : vector<16x256xf32>
    %cst_211 = arith.constant -1.45315206 : f32
    %515 = vector.broadcast %cst_211 : f32 to vector<16x256xf32>
    %516 = arith.addf %515, %514 : vector<16x256xf32>
    %517 = arith.mulf %512, %516 : vector<16x256xf32>
    %cst_212 = arith.constant 1.42141378 : f32
    %518 = vector.broadcast %cst_212 : f32 to vector<16x256xf32>
    %519 = arith.addf %518, %517 : vector<16x256xf32>
    %520 = arith.mulf %512, %519 : vector<16x256xf32>
    %cst_213 = arith.constant -0.284496725 : f32
    %521 = vector.broadcast %cst_213 : f32 to vector<16x256xf32>
    %522 = arith.addf %521, %520 : vector<16x256xf32>
    %523 = arith.mulf %512, %522 : vector<16x256xf32>
    %cst_214 = arith.constant 0.254829586 : f32
    %524 = vector.broadcast %cst_214 : f32 to vector<16x256xf32>
    %525 = arith.addf %524, %523 : vector<16x256xf32>
    %526 = arith.mulf %512, %525 : vector<16x256xf32>
    %527 = arith.mulf %507, %507 : vector<16x256xf32>
    %cst_215 = arith.constant 0.000000e+00 : f32
    %528 = vector.broadcast %cst_215 : f32 to vector<16x256xf32>
    %529 = arith.subf %528, %527 : vector<16x256xf32>
    %530 = math.exp %529 : vector<16x256xf32>
    %531 = arith.mulf %526, %530 : vector<16x256xf32>
    %cst_216 = arith.constant 1.000000e+00 : f32
    %532 = vector.broadcast %cst_216 : f32 to vector<16x256xf32>
    %533 = arith.subf %532, %531 : vector<16x256xf32>
    %cst_217 = arith.constant 0.000000e+00 : f32
    %534 = vector.broadcast %cst_217 : f32 to vector<16x256xf32>
    %535 = arith.cmpf olt, %504, %534 : vector<16x256xf32>
    %cst_218 = arith.constant 0.000000e+00 : f32
    %536 = vector.broadcast %cst_218 : f32 to vector<16x256xf32>
    %537 = arith.subf %536, %533 : vector<16x256xf32>
    %538 = arith.select %535, %537, %533 : vector<16x256xi1>, vector<16x256xf32>
    %cst_219 = arith.constant 5.000000e-01 : f32
    %539 = vector.broadcast %cst_219 : f32 to vector<16x256xf32>
    %540 = arith.mulf %539, %504 : vector<16x256xf32>
    %cst_220 = arith.constant 1.000000e+00 : f32
    %541 = vector.broadcast %cst_220 : f32 to vector<16x256xf32>
    %542 = arith.addf %541, %538 : vector<16x256xf32>
    %543 = arith.mulf %540, %542 : vector<16x256xf32>
    %544 = arith.truncf %543 : vector<16x256xf32> to vector<16x256xbf16>
    %c0_221 = arith.constant 0 : index
    %c0_222 = arith.constant 0 : index
    %545 = vector.load %arg34[%c0_221, %c0_222] : memref<256x64xbf16, #tpu.memory_space<vmem>>, vector<256x64xbf16>
    %cst_223 = arith.constant dense<0.000000e+00> : vector<16x64xf32>
    %546 = tpu.matmul %544, %545, %cst_223 {dimension_numbers = #tpu.dot_dimension_numbers<[1], [0], [0], [1], [0, 0, 1, 1], [], []>} : vector<16x256xbf16>, vector<256x64xbf16>, vector<16x64xf32> -> vector<16x64xf32>
    %547 = arith.addf %480, %546 : vector<16x64xf32>
    %c0_224 = arith.constant 0 : index
    %c0_225 = arith.constant 0 : index
    %548 = vector.load %arg35[%c0_224, %c0_225] : memref<1x64xf32, #tpu.memory_space<vmem>>, vector<1x64xf32>
    %549 = vector.broadcast %548 : vector<1x64xf32> to vector<16x64xf32>
    %550 = arith.addf %547, %549 : vector<16x64xf32>
    %cst_226 = arith.constant dense<0.000000e+00> : vector<16xf32>
    %551 = vector.multi_reduction <add>, %550, %cst_226 [1] : vector<16x64xf32> to vector<16xf32>
    %552 = vector.shape_cast %551 : vector<16xf32> to vector<16x1xf32>
    %cst_227 = arith.constant 6.400000e+01 : f32
    %553 = vector.broadcast %cst_227 : f32 to vector<16x1xf32>
    %554 = arith.divf %552, %553 : vector<16x1xf32>
    %555 = vector.broadcast %554 : vector<16x1xf32> to vector<16x64xf32>
    %556 = arith.subf %550, %555 : vector<16x64xf32>
    %557 = arith.mulf %556, %556 : vector<16x64xf32>
    %cst_228 = arith.constant dense<0.000000e+00> : vector<16xf32>
    %558 = vector.multi_reduction <add>, %557, %cst_228 [1] : vector<16x64xf32> to vector<16xf32>
    %559 = vector.shape_cast %558 : vector<16xf32> to vector<16x1xf32>
    %cst_229 = arith.constant 6.400000e+01 : f32
    %560 = vector.broadcast %cst_229 : f32 to vector<16x1xf32>
    %561 = arith.divf %559, %560 : vector<16x1xf32>
    %562 = vector.broadcast %554 : vector<16x1xf32> to vector<16x64xf32>
    %563 = arith.subf %550, %562 : vector<16x64xf32>
    %cst_230 = arith.constant 9.99999974E-6 : f32
    %564 = vector.broadcast %cst_230 : f32 to vector<16x1xf32>
    %565 = arith.addf %561, %564 : vector<16x1xf32>
    %566 = math.rsqrt %565 : vector<16x1xf32>
    %567 = vector.broadcast %566 : vector<16x1xf32> to vector<16x64xf32>
    %568 = arith.mulf %563, %567 : vector<16x64xf32>
    %569 = arith.truncf %568 : vector<16x64xf32> to vector<16x64xbf16>
    %c0_231 = arith.constant 0 : index
    %c0_232 = arith.constant 0 : index
    %570 = vector.load %arg36[%c0_231, %c0_232] : memref<64x192xbf16, #tpu.memory_space<vmem>>, vector<64x192xbf16>
    %cst_233 = arith.constant dense<0.000000e+00> : vector<16x192xf32>
    %571 = tpu.matmul %569, %570, %cst_233 {dimension_numbers = #tpu.dot_dimension_numbers<[1], [0], [0], [1], [0, 0, 1, 1], [], []>} : vector<16x64xbf16>, vector<64x192xbf16>, vector<16x192xf32> -> vector<16x192xf32>
    %c0_234 = arith.constant 0 : index
    %c0_235 = arith.constant 0 : index
    %572 = vector.load %arg37[%c0_234, %c0_235] : memref<1x192xf32, #tpu.memory_space<vmem>>, vector<1x192xf32>
    %573 = vector.broadcast %572 : vector<1x192xf32> to vector<16x192xf32>
    %574 = arith.addf %571, %573 : vector<16x192xf32>
    %575 = vector.extract_strided_slice %574 {offsets = [0, 0], sizes = [16, 16], strides = [1, 1]} : vector<16x192xf32> to vector<16x16xf32>
    %576 = vector.extract_strided_slice %574 {offsets = [0, 64], sizes = [16, 16], strides = [1, 1]} : vector<16x192xf32> to vector<16x16xf32>
    %577 = vector.extract_strided_slice %574 {offsets = [0, 128], sizes = [16, 16], strides = [1, 1]} : vector<16x192xf32> to vector<16x16xf32>
    %578 = arith.truncf %575 : vector<16x16xf32> to vector<16x16xbf16>
    %579 = arith.truncf %576 : vector<16x16xf32> to vector<16x16xbf16>
    "tpu.trace_start"() <{level = 10 : i32, message = "nd,md->nm"}> : () -> ()
    %cst_236 = arith.constant dense<0.000000e+00> : vector<16x16xf32>
    %580 = tpu.matmul %578, %579, %cst_236 {dimension_numbers = #tpu.dot_dimension_numbers<[1], [1], [0], [0], [0, 0, 1, 0], [], []>} : vector<16x16xbf16>, vector<16x16xbf16>, vector<16x16xf32> -> vector<16x16xf32>
    "tpu.trace_stop"() : () -> ()
    %c0_237 = arith.constant 0 : index
    %c0_238 = arith.constant 0 : index
    %c0_239 = arith.constant 0 : index
    %581 = vector.load %arg38[%c0_237, %c0_238, %c0_239] : memref<4x16x16xf32, #tpu.memory_space<vmem>>, vector<1x16x16xf32>
    %582 = vector.shape_cast %581 : vector<1x16x16xf32> to vector<16x16xf32>
    %583 = arith.addf %580, %582 : vector<16x16xf32>
    %cst_240 = arith.constant dense<0xFF800000> : vector<16xf32>
    %584 = vector.multi_reduction <maximumf>, %583, %cst_240 [1] : vector<16x16xf32> to vector<16xf32>
    %585 = vector.shape_cast %584 : vector<16xf32> to vector<16x1xf32>
    %586 = vector.broadcast %585 : vector<16x1xf32> to vector<16x16xf32>
    %587 = arith.subf %583, %586 : vector<16x16xf32>
    %588 = math.exp %587 : vector<16x16xf32>
    %cst_241 = arith.constant dense<0.000000e+00> : vector<16xf32>
    %589 = vector.multi_reduction <add>, %588, %cst_241 [1] : vector<16x16xf32> to vector<16xf32>
    %590 = vector.shape_cast %589 : vector<16xf32> to vector<16x1xf32>
    %591 = tpu.reciprocal %590 {approx = true} : vector<16x1xf32> -> vector<16x1xf32>
    %592 = vector.broadcast %591 : vector<16x1xf32> to vector<16x16xf32>
    %593 = arith.mulf %588, %592 : vector<16x16xf32>
    %594 = arith.truncf %593 : vector<16x16xf32> to vector<16x16xbf16>
    %595 = arith.truncf %577 : vector<16x16xf32> to vector<16x16xbf16>
    %cst_242 = arith.constant dense<0.000000e+00> : vector<16x16xf32>
    %596 = tpu.matmul %594, %595, %cst_242 {dimension_numbers = #tpu.dot_dimension_numbers<[1], [0], [0], [1], [0, 0, 1, 1], [], []>} : vector<16x16xbf16>, vector<16x16xbf16>, vector<16x16xf32> -> vector<16x16xf32>
    %597 = vector.extract_strided_slice %574 {offsets = [0, 16], sizes = [16, 16], strides = [1, 1]} : vector<16x192xf32> to vector<16x16xf32>
    %598 = vector.extract_strided_slice %574 {offsets = [0, 80], sizes = [16, 16], strides = [1, 1]} : vector<16x192xf32> to vector<16x16xf32>
    %599 = vector.extract_strided_slice %574 {offsets = [0, 144], sizes = [16, 16], strides = [1, 1]} : vector<16x192xf32> to vector<16x16xf32>
    %600 = arith.truncf %597 : vector<16x16xf32> to vector<16x16xbf16>
    %601 = arith.truncf %598 : vector<16x16xf32> to vector<16x16xbf16>
    "tpu.trace_start"() <{level = 10 : i32, message = "nd,md->nm"}> : () -> ()
    %cst_243 = arith.constant dense<0.000000e+00> : vector<16x16xf32>
    %602 = tpu.matmul %600, %601, %cst_243 {dimension_numbers = #tpu.dot_dimension_numbers<[1], [1], [0], [0], [0, 0, 1, 0], [], []>} : vector<16x16xbf16>, vector<16x16xbf16>, vector<16x16xf32> -> vector<16x16xf32>
    "tpu.trace_stop"() : () -> ()
    %c1_244 = arith.constant 1 : index
    %c0_245 = arith.constant 0 : index
    %c0_246 = arith.constant 0 : index
    %603 = vector.load %arg38[%c1_244, %c0_245, %c0_246] : memref<4x16x16xf32, #tpu.memory_space<vmem>>, vector<1x16x16xf32>
    %604 = vector.shape_cast %603 : vector<1x16x16xf32> to vector<16x16xf32>
    %605 = arith.addf %602, %604 : vector<16x16xf32>
    %cst_247 = arith.constant dense<0xFF800000> : vector<16xf32>
    %606 = vector.multi_reduction <maximumf>, %605, %cst_247 [1] : vector<16x16xf32> to vector<16xf32>
    %607 = vector.shape_cast %606 : vector<16xf32> to vector<16x1xf32>
    %608 = vector.broadcast %607 : vector<16x1xf32> to vector<16x16xf32>
    %609 = arith.subf %605, %608 : vector<16x16xf32>
    %610 = math.exp %609 : vector<16x16xf32>
    %cst_248 = arith.constant dense<0.000000e+00> : vector<16xf32>
    %611 = vector.multi_reduction <add>, %610, %cst_248 [1] : vector<16x16xf32> to vector<16xf32>
    %612 = vector.shape_cast %611 : vector<16xf32> to vector<16x1xf32>
    %613 = tpu.reciprocal %612 {approx = true} : vector<16x1xf32> -> vector<16x1xf32>
    %614 = vector.broadcast %613 : vector<16x1xf32> to vector<16x16xf32>
    %615 = arith.mulf %610, %614 : vector<16x16xf32>
    %616 = arith.truncf %615 : vector<16x16xf32> to vector<16x16xbf16>
    %617 = arith.truncf %599 : vector<16x16xf32> to vector<16x16xbf16>
    %cst_249 = arith.constant dense<0.000000e+00> : vector<16x16xf32>
    %618 = tpu.matmul %616, %617, %cst_249 {dimension_numbers = #tpu.dot_dimension_numbers<[1], [0], [0], [1], [0, 0, 1, 1], [], []>} : vector<16x16xbf16>, vector<16x16xbf16>, vector<16x16xf32> -> vector<16x16xf32>
    %619 = vector.extract_strided_slice %574 {offsets = [0, 32], sizes = [16, 16], strides = [1, 1]} : vector<16x192xf32> to vector<16x16xf32>
    %620 = vector.extract_strided_slice %574 {offsets = [0, 96], sizes = [16, 16], strides = [1, 1]} : vector<16x192xf32> to vector<16x16xf32>
    %621 = vector.extract_strided_slice %574 {offsets = [0, 160], sizes = [16, 16], strides = [1, 1]} : vector<16x192xf32> to vector<16x16xf32>
    %622 = arith.truncf %619 : vector<16x16xf32> to vector<16x16xbf16>
    %623 = arith.truncf %620 : vector<16x16xf32> to vector<16x16xbf16>
    "tpu.trace_start"() <{level = 10 : i32, message = "nd,md->nm"}> : () -> ()
    %cst_250 = arith.constant dense<0.000000e+00> : vector<16x16xf32>
    %624 = tpu.matmul %622, %623, %cst_250 {dimension_numbers = #tpu.dot_dimension_numbers<[1], [1], [0], [0], [0, 0, 1, 0], [], []>} : vector<16x16xbf16>, vector<16x16xbf16>, vector<16x16xf32> -> vector<16x16xf32>
    "tpu.trace_stop"() : () -> ()
    %c2_251 = arith.constant 2 : index
    %c0_252 = arith.constant 0 : index
    %c0_253 = arith.constant 0 : index
    %625 = vector.load %arg38[%c2_251, %c0_252, %c0_253] : memref<4x16x16xf32, #tpu.memory_space<vmem>>, vector<1x16x16xf32>
    %626 = vector.shape_cast %625 : vector<1x16x16xf32> to vector<16x16xf32>
    %627 = arith.addf %624, %626 : vector<16x16xf32>
    %cst_254 = arith.constant dense<0xFF800000> : vector<16xf32>
    %628 = vector.multi_reduction <maximumf>, %627, %cst_254 [1] : vector<16x16xf32> to vector<16xf32>
    %629 = vector.shape_cast %628 : vector<16xf32> to vector<16x1xf32>
    %630 = vector.broadcast %629 : vector<16x1xf32> to vector<16x16xf32>
    %631 = arith.subf %627, %630 : vector<16x16xf32>
    %632 = math.exp %631 : vector<16x16xf32>
    %cst_255 = arith.constant dense<0.000000e+00> : vector<16xf32>
    %633 = vector.multi_reduction <add>, %632, %cst_255 [1] : vector<16x16xf32> to vector<16xf32>
    %634 = vector.shape_cast %633 : vector<16xf32> to vector<16x1xf32>
    %635 = tpu.reciprocal %634 {approx = true} : vector<16x1xf32> -> vector<16x1xf32>
    %636 = vector.broadcast %635 : vector<16x1xf32> to vector<16x16xf32>
    %637 = arith.mulf %632, %636 : vector<16x16xf32>
    %638 = arith.truncf %637 : vector<16x16xf32> to vector<16x16xbf16>
    %639 = arith.truncf %621 : vector<16x16xf32> to vector<16x16xbf16>
    %cst_256 = arith.constant dense<0.000000e+00> : vector<16x16xf32>
    %640 = tpu.matmul %638, %639, %cst_256 {dimension_numbers = #tpu.dot_dimension_numbers<[1], [0], [0], [1], [0, 0, 1, 1], [], []>} : vector<16x16xbf16>, vector<16x16xbf16>, vector<16x16xf32> -> vector<16x16xf32>
    %641 = vector.extract_strided_slice %574 {offsets = [0, 48], sizes = [16, 16], strides = [1, 1]} : vector<16x192xf32> to vector<16x16xf32>
    %642 = vector.extract_strided_slice %574 {offsets = [0, 112], sizes = [16, 16], strides = [1, 1]} : vector<16x192xf32> to vector<16x16xf32>
    %643 = vector.extract_strided_slice %574 {offsets = [0, 176], sizes = [16, 16], strides = [1, 1]} : vector<16x192xf32> to vector<16x16xf32>
    %644 = arith.truncf %641 : vector<16x16xf32> to vector<16x16xbf16>
    %645 = arith.truncf %642 : vector<16x16xf32> to vector<16x16xbf16>
    "tpu.trace_start"() <{level = 10 : i32, message = "nd,md->nm"}> : () -> ()
    %cst_257 = arith.constant dense<0.000000e+00> : vector<16x16xf32>
    %646 = tpu.matmul %644, %645, %cst_257 {dimension_numbers = #tpu.dot_dimension_numbers<[1], [1], [0], [0], [0, 0, 1, 0], [], []>} : vector<16x16xbf16>, vector<16x16xbf16>, vector<16x16xf32> -> vector<16x16xf32>
    "tpu.trace_stop"() : () -> ()
    %c3_258 = arith.constant 3 : index
    %c0_259 = arith.constant 0 : index
    %c0_260 = arith.constant 0 : index
    %647 = vector.load %arg38[%c3_258, %c0_259, %c0_260] : memref<4x16x16xf32, #tpu.memory_space<vmem>>, vector<1x16x16xf32>
    %648 = vector.shape_cast %647 : vector<1x16x16xf32> to vector<16x16xf32>
    %649 = arith.addf %646, %648 : vector<16x16xf32>
    %cst_261 = arith.constant dense<0xFF800000> : vector<16xf32>
    %650 = vector.multi_reduction <maximumf>, %649, %cst_261 [1] : vector<16x16xf32> to vector<16xf32>
    %651 = vector.shape_cast %650 : vector<16xf32> to vector<16x1xf32>
    %652 = vector.broadcast %651 : vector<16x1xf32> to vector<16x16xf32>
    %653 = arith.subf %649, %652 : vector<16x16xf32>
    %654 = math.exp %653 : vector<16x16xf32>
    %cst_262 = arith.constant dense<0.000000e+00> : vector<16xf32>
    %655 = vector.multi_reduction <add>, %654, %cst_262 [1] : vector<16x16xf32> to vector<16xf32>
    %656 = vector.shape_cast %655 : vector<16xf32> to vector<16x1xf32>
    %657 = tpu.reciprocal %656 {approx = true} : vector<16x1xf32> -> vector<16x1xf32>
    %658 = vector.broadcast %657 : vector<16x1xf32> to vector<16x16xf32>
    %659 = arith.mulf %654, %658 : vector<16x16xf32>
    %660 = arith.truncf %659 : vector<16x16xf32> to vector<16x16xbf16>
    %661 = arith.truncf %643 : vector<16x16xf32> to vector<16x16xbf16>
    %cst_263 = arith.constant dense<0.000000e+00> : vector<16x16xf32>
    %662 = tpu.matmul %660, %661, %cst_263 {dimension_numbers = #tpu.dot_dimension_numbers<[1], [0], [0], [1], [0, 0, 1, 1], [], []>} : vector<16x16xbf16>, vector<16x16xbf16>, vector<16x16xf32> -> vector<16x16xf32>
    %663 = tpu.concatenate %596, %618, %640, %662 in 1 : vector<16x16xf32>, vector<16x16xf32>, vector<16x16xf32>, vector<16x16xf32> -> vector<16x64xf32>
    %664 = arith.truncf %663 : vector<16x64xf32> to vector<16x64xbf16>
    %c0_264 = arith.constant 0 : index
    %c0_265 = arith.constant 0 : index
    %665 = vector.load %arg39[%c0_264, %c0_265] : memref<64x64xbf16, #tpu.memory_space<vmem>>, vector<64x64xbf16>
    %cst_266 = arith.constant dense<0.000000e+00> : vector<16x64xf32>
    %666 = tpu.matmul %664, %665, %cst_266 {dimension_numbers = #tpu.dot_dimension_numbers<[1], [0], [0], [1], [0, 0, 1, 1], [], []>} : vector<16x64xbf16>, vector<64x64xbf16>, vector<16x64xf32> -> vector<16x64xf32>
    %667 = arith.addf %550, %666 : vector<16x64xf32>
    %c0_267 = arith.constant 0 : index
    %c0_268 = arith.constant 0 : index
    %668 = vector.load %arg40[%c0_267, %c0_268] : memref<1x64xf32, #tpu.memory_space<vmem>>, vector<1x64xf32>
    %669 = vector.broadcast %668 : vector<1x64xf32> to vector<16x64xf32>
    %670 = arith.addf %667, %669 : vector<16x64xf32>
    %cst_269 = arith.constant dense<0.000000e+00> : vector<16xf32>
    %671 = vector.multi_reduction <add>, %670, %cst_269 [1] : vector<16x64xf32> to vector<16xf32>
    %672 = vector.shape_cast %671 : vector<16xf32> to vector<16x1xf32>
    %cst_270 = arith.constant 6.400000e+01 : f32
    %673 = vector.broadcast %cst_270 : f32 to vector<16x1xf32>
    %674 = arith.divf %672, %673 : vector<16x1xf32>
    %675 = vector.broadcast %674 : vector<16x1xf32> to vector<16x64xf32>
    %676 = arith.subf %670, %675 : vector<16x64xf32>
    %677 = arith.mulf %676, %676 : vector<16x64xf32>
    %cst_271 = arith.constant dense<0.000000e+00> : vector<16xf32>
    %678 = vector.multi_reduction <add>, %677, %cst_271 [1] : vector<16x64xf32> to vector<16xf32>
    %679 = vector.shape_cast %678 : vector<16xf32> to vector<16x1xf32>
    %cst_272 = arith.constant 6.400000e+01 : f32
    %680 = vector.broadcast %cst_272 : f32 to vector<16x1xf32>
    %681 = arith.divf %679, %680 : vector<16x1xf32>
    %682 = vector.broadcast %674 : vector<16x1xf32> to vector<16x64xf32>
    %683 = arith.subf %670, %682 : vector<16x64xf32>
    %cst_273 = arith.constant 9.99999974E-6 : f32
    %684 = vector.broadcast %cst_273 : f32 to vector<16x1xf32>
    %685 = arith.addf %681, %684 : vector<16x1xf32>
    %686 = math.rsqrt %685 : vector<16x1xf32>
    %687 = vector.broadcast %686 : vector<16x1xf32> to vector<16x64xf32>
    %688 = arith.mulf %683, %687 : vector<16x64xf32>
    %689 = arith.truncf %688 : vector<16x64xf32> to vector<16x64xbf16>
    %c0_274 = arith.constant 0 : index
    %c0_275 = arith.constant 0 : index
    %690 = vector.load %arg41[%c0_274, %c0_275] : memref<64x256xbf16, #tpu.memory_space<vmem>>, vector<64x256xbf16>
    %cst_276 = arith.constant dense<0.000000e+00> : vector<16x256xf32>
    %691 = tpu.matmul %689, %690, %cst_276 {dimension_numbers = #tpu.dot_dimension_numbers<[1], [0], [0], [1], [0, 0, 1, 1], [], []>} : vector<16x64xbf16>, vector<64x256xbf16>, vector<16x256xf32> -> vector<16x256xf32>
    %c0_277 = arith.constant 0 : index
    %c0_278 = arith.constant 0 : index
    %692 = vector.load %arg42[%c0_277, %c0_278] : memref<1x256xf32, #tpu.memory_space<vmem>>, vector<1x256xf32>
    %693 = vector.broadcast %692 : vector<1x256xf32> to vector<16x256xf32>
    %694 = arith.addf %691, %693 : vector<16x256xf32>
    %695 = math.absf %694 : vector<16x256xf32>
    %cst_279 = arith.constant 0.707106769 : f32
    %696 = vector.broadcast %cst_279 : f32 to vector<16x256xf32>
    %697 = arith.mulf %695, %696 : vector<16x256xf32>
    %cst_280 = arith.constant 0.327591091 : f32
    %698 = vector.broadcast %cst_280 : f32 to vector<16x256xf32>
    %699 = arith.mulf %698, %697 : vector<16x256xf32>
    %cst_281 = arith.constant 1.000000e+00 : f32
    %700 = vector.broadcast %cst_281 : f32 to vector<16x256xf32>
    %701 = arith.addf %700, %699 : vector<16x256xf32>
    %702 = tpu.reciprocal %701 {approx = true} : vector<16x256xf32> -> vector<16x256xf32>
    %cst_282 = arith.constant 1.06140542 : f32
    %703 = vector.broadcast %cst_282 : f32 to vector<16x256xf32>
    %704 = arith.mulf %702, %703 : vector<16x256xf32>
    %cst_283 = arith.constant -1.45315206 : f32
    %705 = vector.broadcast %cst_283 : f32 to vector<16x256xf32>
    %706 = arith.addf %705, %704 : vector<16x256xf32>
    %707 = arith.mulf %702, %706 : vector<16x256xf32>
    %cst_284 = arith.constant 1.42141378 : f32
    %708 = vector.broadcast %cst_284 : f32 to vector<16x256xf32>
    %709 = arith.addf %708, %707 : vector<16x256xf32>
    %710 = arith.mulf %702, %709 : vector<16x256xf32>
    %cst_285 = arith.constant -0.284496725 : f32
    %711 = vector.broadcast %cst_285 : f32 to vector<16x256xf32>
    %712 = arith.addf %711, %710 : vector<16x256xf32>
    %713 = arith.mulf %702, %712 : vector<16x256xf32>
    %cst_286 = arith.constant 0.254829586 : f32
    %714 = vector.broadcast %cst_286 : f32 to vector<16x256xf32>
    %715 = arith.addf %714, %713 : vector<16x256xf32>
    %716 = arith.mulf %702, %715 : vector<16x256xf32>
    %717 = arith.mulf %697, %697 : vector<16x256xf32>
    %cst_287 = arith.constant 0.000000e+00 : f32
    %718 = vector.broadcast %cst_287 : f32 to vector<16x256xf32>
    %719 = arith.subf %718, %717 : vector<16x256xf32>
    %720 = math.exp %719 : vector<16x256xf32>
    %721 = arith.mulf %716, %720 : vector<16x256xf32>
    %cst_288 = arith.constant 1.000000e+00 : f32
    %722 = vector.broadcast %cst_288 : f32 to vector<16x256xf32>
    %723 = arith.subf %722, %721 : vector<16x256xf32>
    %cst_289 = arith.constant 0.000000e+00 : f32
    %724 = vector.broadcast %cst_289 : f32 to vector<16x256xf32>
    %725 = arith.cmpf olt, %694, %724 : vector<16x256xf32>
    %cst_290 = arith.constant 0.000000e+00 : f32
    %726 = vector.broadcast %cst_290 : f32 to vector<16x256xf32>
    %727 = arith.subf %726, %723 : vector<16x256xf32>
    %728 = arith.select %725, %727, %723 : vector<16x256xi1>, vector<16x256xf32>
    %cst_291 = arith.constant 5.000000e-01 : f32
    %729 = vector.broadcast %cst_291 : f32 to vector<16x256xf32>
    %730 = arith.mulf %729, %694 : vector<16x256xf32>
    %cst_292 = arith.constant 1.000000e+00 : f32
    %731 = vector.broadcast %cst_292 : f32 to vector<16x256xf32>
    %732 = arith.addf %731, %728 : vector<16x256xf32>
    %733 = arith.mulf %730, %732 : vector<16x256xf32>
    %734 = arith.truncf %733 : vector<16x256xf32> to vector<16x256xbf16>
    %c0_293 = arith.constant 0 : index
    %c0_294 = arith.constant 0 : index
    %735 = vector.load %arg43[%c0_293, %c0_294] : memref<256x64xbf16, #tpu.memory_space<vmem>>, vector<256x64xbf16>
    %cst_295 = arith.constant dense<0.000000e+00> : vector<16x64xf32>
    %736 = tpu.matmul %734, %735, %cst_295 {dimension_numbers = #tpu.dot_dimension_numbers<[1], [0], [0], [1], [0, 0, 1, 1], [], []>} : vector<16x256xbf16>, vector<256x64xbf16>, vector<16x64xf32> -> vector<16x64xf32>
    %737 = arith.addf %670, %736 : vector<16x64xf32>
    %c0_296 = arith.constant 0 : index
    %c0_297 = arith.constant 0 : index
    %738 = vector.load %arg44[%c0_296, %c0_297] : memref<1x64xf32, #tpu.memory_space<vmem>>, vector<1x64xf32>
    %739 = vector.broadcast %738 : vector<1x64xf32> to vector<16x64xf32>
    %740 = arith.addf %737, %739 : vector<16x64xf32>
    %cst_298 = arith.constant dense<0.000000e+00> : vector<16xf32>
    %741 = vector.multi_reduction <add>, %740, %cst_298 [1] : vector<16x64xf32> to vector<16xf32>
    %742 = vector.shape_cast %741 : vector<16xf32> to vector<16x1xf32>
    %cst_299 = arith.constant 6.400000e+01 : f32
    %743 = vector.broadcast %cst_299 : f32 to vector<16x1xf32>
    %744 = arith.divf %742, %743 : vector<16x1xf32>
    %745 = vector.broadcast %744 : vector<16x1xf32> to vector<16x64xf32>
    %746 = arith.subf %740, %745 : vector<16x64xf32>
    %747 = arith.mulf %746, %746 : vector<16x64xf32>
    %cst_300 = arith.constant dense<0.000000e+00> : vector<16xf32>
    %748 = vector.multi_reduction <add>, %747, %cst_300 [1] : vector<16x64xf32> to vector<16xf32>
    %749 = vector.shape_cast %748 : vector<16xf32> to vector<16x1xf32>
    %cst_301 = arith.constant 6.400000e+01 : f32
    %750 = vector.broadcast %cst_301 : f32 to vector<16x1xf32>
    %751 = arith.divf %749, %750 : vector<16x1xf32>
    %752 = vector.broadcast %744 : vector<16x1xf32> to vector<16x64xf32>
    %753 = arith.subf %740, %752 : vector<16x64xf32>
    %cst_302 = arith.constant 9.99999974E-6 : f32
    %754 = vector.broadcast %cst_302 : f32 to vector<16x1xf32>
    %755 = arith.addf %751, %754 : vector<16x1xf32>
    %756 = math.rsqrt %755 : vector<16x1xf32>
    %757 = vector.broadcast %756 : vector<16x1xf32> to vector<16x64xf32>
    %758 = arith.mulf %753, %757 : vector<16x64xf32>
    %cst_303 = arith.constant dense<0.000000e+00> : vector<64xf32>
    %759 = vector.multi_reduction <add>, %758, %cst_303 [0] : vector<16x64xf32> to vector<64xf32>
    %760 = vector.shape_cast %759 : vector<64xf32> to vector<1x64xf32>
    %cst_304 = arith.constant 1.600000e+01 : f32
    %761 = vector.broadcast %cst_304 : f32 to vector<1x64xf32>
    %762 = arith.divf %760, %761 : vector<1x64xf32>
    %763 = arith.truncf %762 : vector<1x64xf32> to vector<1x64xbf16>
    %c0_305 = arith.constant 0 : index
    %c0_306 = arith.constant 0 : index
    %764 = vector.load %arg45[%c0_305, %c0_306] : memref<64x2xbf16, #tpu.memory_space<vmem>>, vector<64x2xbf16>
    %cst_307 = arith.constant dense<0.000000e+00> : vector<1x2xf32>
    %765 = tpu.matmul %763, %764, %cst_307 {dimension_numbers = #tpu.dot_dimension_numbers<[1], [0], [0], [1], [0, 0, 1, 1], [], []>} : vector<1x64xbf16>, vector<64x2xbf16>, vector<1x2xf32> -> vector<1x2xf32>
    %c0_308 = arith.constant 0 : index
    %c0_309 = arith.constant 0 : index
    %766 = vector.load %arg46[%c0_308, %c0_309] : memref<1x2xf32, #tpu.memory_space<vmem>>, vector<1x2xf32>
    %767 = arith.addf %765, %766 : vector<1x2xf32>
    %c0_310 = arith.constant 0 : index
    %c0_311 = arith.constant 0 : index
    %c0_312 = arith.constant 0 : index
    %768 = vector.load %arg47[%c0_310, %c0_311, %c0_312] : memref<1x1x2xf32, #tpu.memory_space<vmem>>, vector<1x1x2xf32>
    %769 = vector.shape_cast %768 : vector<1x1x2xf32> to vector<1x2xf32>
    %770 = vector.shape_cast %767 : vector<1x2xf32> to vector<1x1x2xf32>
    tpu.vector_store %arg47[%c0_310, %c0_311, %c0_312], %770 {strides = array<i32>} : memref<1x1x2xf32, #tpu.memory_space<vmem>>, vector<1x1x2xf32>,
    return
  }
  func.func @transform_0(%arg0: i32) -> (i32, i32, i32) {
    %c0_i32 = arith.constant 0 : i32
    %c0_i32_0 = arith.constant 0 : i32
    %c0_i32_1 = arith.constant 0 : i32
    return %arg0, %c0_i32, %c0_i32_0 : i32, i32, i32
  }
  func.func @transform_1(%arg0: i32) -> (i32, i32) {
    %c0_i32 = arith.constant 0 : i32
    %c0_i32_0 = arith.constant 0 : i32
    %c0_i32_1 = arith.constant 0 : i32
    return %c0_i32, %c0_i32_0 : i32, i32
  }
  func.func @transform_2(%arg0: i32) -> (i32, i32) {
    %c0_i32 = arith.constant 0 : i32
    %c0_i32_0 = arith.constant 0 : i32
    %c0_i32_1 = arith.constant 0 : i32
    return %c0_i32, %c0_i32_0 : i32, i32
  }
  func.func @transform_3(%arg0: i32) -> (i32, i32) {
    %c0_i32 = arith.constant 0 : i32
    %c0_i32_0 = arith.constant 0 : i32
    %c0_i32_1 = arith.constant 0 : i32
    return %c0_i32, %c0_i32_0 : i32, i32
  }
  func.func @transform_4(%arg0: i32) -> (i32, i32) {
    %c0_i32 = arith.constant 0 : i32
    %c0_i32_0 = arith.constant 0 : i32
    %c0_i32_1 = arith.constant 0 : i32
    return %c0_i32, %c0_i32_0 : i32, i32
  }
  func.func @transform_5(%arg0: i32) -> (i32, i32) {
    %c0_i32 = arith.constant 0 : i32
    %c0_i32_0 = arith.constant 0 : i32
    %c0_i32_1 = arith.constant 0 : i32
    return %c0_i32, %c0_i32_0 : i32, i32
  }
  func.func @transform_6(%arg0: i32) -> (i32, i32) {
    %c0_i32 = arith.constant 0 : i32
    %c0_i32_0 = arith.constant 0 : i32
    %c0_i32_1 = arith.constant 0 : i32
    return %c0_i32, %c0_i32_0 : i32, i32
  }
  func.func @transform_7(%arg0: i32) -> (i32, i32, i32) {
    %c0_i32 = arith.constant 0 : i32
    %c0_i32_0 = arith.constant 0 : i32
    %c0_i32_1 = arith.constant 0 : i32
    %c0_i32_2 = arith.constant 0 : i32
    return %c0_i32, %c0_i32_0, %c0_i32_1 : i32, i32, i32
  }
  func.func @transform_8(%arg0: i32) -> (i32, i32) {
    %c0_i32 = arith.constant 0 : i32
    %c0_i32_0 = arith.constant 0 : i32
    %c0_i32_1 = arith.constant 0 : i32
    return %c0_i32, %c0_i32_0 : i32, i32
  }
  func.func @transform_9(%arg0: i32) -> (i32, i32) {
    %c0_i32 = arith.constant 0 : i32
    %c0_i32_0 = arith.constant 0 : i32
    %c0_i32_1 = arith.constant 0 : i32
    return %c0_i32, %c0_i32_0 : i32, i32
  }
  func.func @transform_10(%arg0: i32) -> (i32, i32) {
    %c0_i32 = arith.constant 0 : i32
    %c0_i32_0 = arith.constant 0 : i32
    %c0_i32_1 = arith.constant 0 : i32
    return %c0_i32, %c0_i32_0 : i32, i32
  }
  func.func @transform_11(%arg0: i32) -> (i32, i32) {
    %c0_i32 = arith.constant 0 : i32
    %c0_i32_0 = arith.constant 0 : i32
    %c0_i32_1 = arith.constant 0 : i32
    return %c0_i32, %c0_i32_0 : i32, i32
  }
  func.func @transform_12(%arg0: i32) -> (i32, i32) {
    %c0_i32 = arith.constant 0 : i32
    %c0_i32_0 = arith.constant 0 : i32
    %c0_i32_1 = arith.constant 0 : i32
    return %c0_i32, %c0_i32_0 : i32, i32
  }
  func.func @transform_13(%arg0: i32) -> (i32, i32) {
    %c0_i32 = arith.constant 0 : i32
    %c0_i32_0 = arith.constant 0 : i32
    %c0_i32_1 = arith.constant 0 : i32
    return %c0_i32, %c0_i32_0 : i32, i32
  }
  func.func @transform_14(%arg0: i32) -> (i32, i32) {
    %c0_i32 = arith.constant 0 : i32
    %c0_i32_0 = arith.constant 0 : i32
    %c0_i32_1 = arith.constant 0 : i32
    return %c0_i32, %c0_i32_0 : i32, i32
  }
  func.func @transform_15(%arg0: i32) -> (i32, i32) {
    %c0_i32 = arith.constant 0 : i32
    %c0_i32_0 = arith.constant 0 : i32
    %c0_i32_1 = arith.constant 0 : i32
    return %c0_i32, %c0_i32_0 : i32, i32
  }
  func.func @transform_16(%arg0: i32) -> (i32, i32, i32) {
    %c0_i32 = arith.constant 0 : i32
    %c0_i32_0 = arith.constant 0 : i32
    %c0_i32_1 = arith.constant 0 : i32
    %c0_i32_2 = arith.constant 0 : i32
    return %c0_i32, %c0_i32_0, %c0_i32_1 : i32, i32, i32
  }
  func.func @transform_17(%arg0: i32) -> (i32, i32) {
    %c0_i32 = arith.constant 0 : i32
    %c0_i32_0 = arith.constant 0 : i32
    %c0_i32_1 = arith.constant 0 : i32
    return %c0_i32, %c0_i32_0 : i32, i32
  }
  func.func @transform_18(%arg0: i32) -> (i32, i32) {
    %c0_i32 = arith.constant 0 : i32
    %c0_i32_0 = arith.constant 0 : i32
    %c0_i32_1 = arith.constant 0 : i32
    return %c0_i32, %c0_i32_0 : i32, i32
  }
  func.func @transform_19(%arg0: i32) -> (i32, i32) {
    %c0_i32 = arith.constant 0 : i32
    %c0_i32_0 = arith.constant 0 : i32
    %c0_i32_1 = arith.constant 0 : i32
    return %c0_i32, %c0_i32_0 : i32, i32
  }
  func.func @transform_20(%arg0: i32) -> (i32, i32) {
    %c0_i32 = arith.constant 0 : i32
    %c0_i32_0 = arith.constant 0 : i32
    %c0_i32_1 = arith.constant 0 : i32
    return %c0_i32, %c0_i32_0 : i32, i32
  }
  func.func @transform_21(%arg0: i32) -> (i32, i32) {
    %c0_i32 = arith.constant 0 : i32
    %c0_i32_0 = arith.constant 0 : i32
    %c0_i32_1 = arith.constant 0 : i32
    return %c0_i32, %c0_i32_0 : i32, i32
  }
  func.func @transform_22(%arg0: i32) -> (i32, i32) {
    %c0_i32 = arith.constant 0 : i32
    %c0_i32_0 = arith.constant 0 : i32
    %c0_i32_1 = arith.constant 0 : i32
    return %c0_i32, %c0_i32_0 : i32, i32
  }
  func.func @transform_23(%arg0: i32) -> (i32, i32, i32) {
    %c0_i32 = arith.constant 0 : i32
    %c0_i32_0 = arith.constant 0 : i32
    %c0_i32_1 = arith.constant 0 : i32
    %c0_i32_2 = arith.constant 0 : i32
    return %c0_i32, %c0_i32_0, %c0_i32_1 : i32, i32, i32
  }
  func.func @transform_24(%arg0: i32) -> (i32, i32) {
    %c0_i32 = arith.constant 0 : i32
    %c0_i32_0 = arith.constant 0 : i32
    %c0_i32_1 = arith.constant 0 : i32
    return %c0_i32, %c0_i32_0 : i32, i32
  }
  func.func @transform_25(%arg0: i32) -> (i32, i32) {
    %c0_i32 = arith.constant 0 : i32
    %c0_i32_0 = arith.constant 0 : i32
    %c0_i32_1 = arith.constant 0 : i32
    return %c0_i32, %c0_i32_0 : i32, i32
  }
  func.func @transform_26(%arg0: i32) -> (i32, i32) {
    %c0_i32 = arith.constant 0 : i32
    %c0_i32_0 = arith.constant 0 : i32
    %c0_i32_1 = arith.constant 0 : i32
    return %c0_i32, %c0_i32_0 : i32, i32
  }
  func.func @transform_27(%arg0: i32) -> (i32, i32) {
    %c0_i32 = arith.constant 0 : i32
    %c0_i32_0 = arith.constant 0 : i32
    %c0_i32_1 = arith.constant 0 : i32
    return %c0_i32, %c0_i32_0 : i32, i32
  }
  func.func @transform_28(%arg0: i32) -> (i32, i32, i32) {
    %c0_i32 = arith.constant 0 : i32
    %c0_i32_0 = arith.constant 0 : i32
    %c0_i32_1 = arith.constant 0 : i32
    %c0_i32_2 = arith.constant 0 : i32
    return %c0_i32, %c0_i32_0, %c0_i32_1 : i32, i32, i32
  }
  func.func @transform_29(%arg0: i32) -> (i32, i32) {
    %c0_i32 = arith.constant 0 : i32
    %c0_i32_0 = arith.constant 0 : i32
    %c0_i32_1 = arith.constant 0 : i32
    return %c0_i32, %c0_i32_0 : i32, i32
  }
  func.func @transform_30(%arg0: i32) -> (i32, i32) {
    %c0_i32 = arith.constant 0 : i32
    %c0_i32_0 = arith.constant 0 : i32
    %c0_i32_1 = arith.constant 0 : i32
    return %c0_i32, %c0_i32_0 : i32, i32
  }
  func.func @transform_31(%arg0: i32) -> (i32, i32) {
    %c0_i32 = arith.constant 0 : i32
    %c0_i32_0 = arith.constant 0 : i32
    %c0_i32_1 = arith.constant 0 : i32
    return %c0_i32, %c0_i32_0 : i32, i32
  }
  func.func @transform_32(%arg0: i32) -> (i32, i32) {
    %c0_i32 = arith.constant 0 : i32
    %c0_i32_0 = arith.constant 0 : i32
    %c0_i32_1 = arith.constant 0 : i32
    return %c0_i32, %c0_i32_0 : i32, i32
  }
  func.func @transform_33(%arg0: i32) -> (i32, i32) {
    %c0_i32 = arith.constant 0 : i32
    %c0_i32_0 = arith.constant 0 : i32
    %c0_i32_1 = arith.constant 0 : i32
    return %c0_i32, %c0_i32_0 : i32, i32
  }
  func.func @transform_34(%arg0: i32) -> (i32, i32) {
    %c0_i32 = arith.constant 0 : i32
    %c0_i32_0 = arith.constant 0 : i32
    %c0_i32_1 = arith.constant 0 : i32
    return %c0_i32, %c0_i32_0 : i32, i32
  }
  func.func @transform_35(%arg0: i32) -> (i32, i32) {
    %c0_i32 = arith.constant 0 : i32
    %c0_i32_0 = arith.constant 0 : i32
    %c0_i32_1 = arith.constant 0 : i32
    return %c0_i32, %c0_i32_0 : i32, i32
  }
  func.func @transform_36(%arg0: i32) -> (i32, i32) {
    %c0_i32 = arith.constant 0 : i32
    %c0_i32_0 = arith.constant 0 : i32
    %c0_i32_1 = arith.constant 0 : i32
    return %c0_i32, %c0_i32_0 : i32, i32
  }
  func.func @transform_37(%arg0: i32) -> (i32, i32, i32) {
    %c0_i32 = arith.constant 0 : i32
    %c0_i32_0 = arith.constant 0 : i32
    %c0_i32_1 = arith.constant 0 : i32
    %c0_i32_2 = arith.constant 0 : i32
    return %c0_i32, %c0_i32_0, %c0_i32_1 : i32, i32, i32
  }
  func.func @transform_38(%arg0: i32) -> (i32, i32) {
    %c0_i32 = arith.constant 0 : i32
    %c0_i32_0 = arith.constant 0 : i32
    %c0_i32_1 = arith.constant 0 : i32
    return %c0_i32, %c0_i32_0 : i32, i32
  }
  func.func @transform_39(%arg0: i32) -> (i32, i32) {
    %c0_i32 = arith.constant 0 : i32
    %c0_i32_0 = arith.constant 0 : i32
    %c0_i32_1 = arith.constant 0 : i32
    return %c0_i32, %c0_i32_0 : i32, i32
  }
  func.func @transform_40(%arg0: i32) -> (i32, i32) {
    %c0_i32 = arith.constant 0 : i32
    %c0_i32_0 = arith.constant 0 : i32
    %c0_i32_1 = arith.constant 0 : i32
    return %c0_i32, %c0_i32_0 : i32, i32
  }
  func.func @transform_41(%arg0: i32) -> (i32, i32) {
    %c0_i32 = arith.constant 0 : i32
    %c0_i32_0 = arith.constant 0 : i32
    %c0_i32_1 = arith.constant 0 : i32
    return %c0_i32, %c0_i32_0 : i32, i32
  }
  func.func @transform_42(%arg0: i32) -> (i32, i32) {
    %c0_i32 = arith.constant 0 : i32
    %c0_i32_0 = arith.constant 0 : i32
    %c0_i32_1 = arith.constant 0 : i32
    return %c0_i32, %c0_i32_0 : i32, i32
  }
  func.func @transform_43(%arg0: i32) -> (i32, i32) {
    %c0_i32 = arith.constant 0 : i32
    %c0_i32_0 = arith.constant 0 : i32
    %c0_i32_1 = arith.constant 0 : i32
    return %c0_i32, %c0_i32_0 : i32, i32
  }
  func.func @transform_44(%arg0: i32) -> (i32, i32) {
    %c0_i32 = arith.constant 0 : i32
    %c0_i32_0 = arith.constant 0 : i32
    %c0_i32_1 = arith.constant 0 : i32
    return %c0_i32, %c0_i32_0 : i32, i32
  }
  func.func @transform_45(%arg0: i32) -> (i32, i32) {
    %c0_i32 = arith.constant 0 : i32
    %c0_i32_0 = arith.constant 0 : i32
    %c0_i32_1 = arith.constant 0 : i32
    return %c0_i32, %c0_i32_0 : i32, i32
  }
  func.func @transform_46(%arg0: i32) -> (i32, i32, i32) {
    %c0_i32 = arith.constant 0 : i32
    %c0_i32_0 = arith.constant 0 : i32
    %c0_i32_1 = arith.constant 0 : i32
    return %arg0, %c0_i32, %c0_i32_0 : i32, i32, i32
  }
}

</mosaic_0001>

<bundles_post_ra>
// kernel: swin_forward.1
= control target key start
LH: loop header
LB: loop body
LE: loop exit
PB: predicated region body
PF: predicated region fallthrough
CT: control target
= control target key end

     0   :  { %s9948_s6 = smov 1   ;;  %s9949_s10 = smov 2   ;;  %s12043_s0 = inlined_call_operand.smem [shape: u32[47], index: -1, kind: input, shape index: {}] }
   0x1   :  { %s10018_s5 = sld [smem:[%s12043_s0]]   ;;  %s9950_s14 = smov 3  }
   0x2   :  { %s10023_s9 = sld [smem:[%s12043_s0 + %s9948_s6]]   ;;  %s9951_s18 = smov 4  }
   0x3   :  { %s10028_s13 = sld [smem:[%s12043_s0 + %s9949_s10]]   ;;  %s9952_s22 = smov 5  }
   0x4   :  { %s10033_s17 = sld [smem:[%s12043_s0 + %s9950_s14]]   ;;  %s9953_s26 = smov 6  }
   0x5   :  { %s10038_s21 = sld [smem:[%s12043_s0 + %s9951_s18]]   ;;  %s9954_s30 = smov 7  }
   0x6   :  { %s10043_s25 = sld [smem:[%s12043_s0 + %s9952_s22]]   ;;  %s9955_s4 = smov 8  }
   0x7   :  { %12100 = sst [smem:[#allocation16_spill]] %s10018_s5  ;;  %s9956_s10 = smov 9  }
   0x8   :  { %s10048_s29 = sld [smem:[%s12043_s0 + %s9953_s26]]   ;;  %s9957_s15 = smov 10  }
   0x9   :  { %s10053_s3 = sld [smem:[%s12043_s0 + %s9954_s30]]   ;;  %s9958_s20 = smov 11  }
   0xa   :  { %s10058_s8 = sld [smem:[%s12043_s0 + %s9955_s4]]   ;;  %s9959_s26 = smov 12  }
   0xb   :  { %s10063_s14 = sld [smem:[%s12043_s0 + %s9956_s10]]   ;;  %s9960_s1 = smov 13  }
   0xc   :  { %s10068_s19 = sld [smem:[%s12043_s0 + %s9957_s15]]   ;;  %s9961_s7 = smov 14  }
   0xd   :  { %s10073_s24 = sld [smem:[%s12043_s0 + %s9958_s20]]   ;;  %s9962_s15 = smov 15  }
   0xe   :  { %s10078_s30 = sld [smem:[%s12043_s0 + %s9959_s26]]   ;;  %s9963_s22 = smov 16  }
   0xf   :  { %12101 = sst [smem:[#allocation17_spill]] %s10053_s3  ;;  %s9964_s28 = smov 17  }
  0x10   :  { %12102 = sst [smem:[#allocation18_spill]] %s10058_s8 }
  0x11   :  { %s10083_s6 = sld [smem:[%s12043_s0 + %s9960_s1]]  }
  0x12   :  { %s10088_s12 = sld [smem:[%s12043_s0 + %s9961_s7]]   ;;  %s9965_s7 = smov 18  }
  0x13   :  { %12103 = sst [smem:[#allocation19_spill]] %s10073_s24 }
  0x14   :  { %12104 = sst [smem:[#allocation20_spill]] %s10078_s30 }
  0x15   :  { %s10093_s20 = sld [smem:[%s12043_s0 + %s9962_s15]]   ;;  %s9966_s15 = smov 19  }
  0x16   :  { %s10098_s27 = sld [smem:[%s12043_s0 + %s9963_s22]]   ;;  %s9967_s22 = smov 20  }
  0x17   :  { %12105 = sst [smem:[#allocation21_spill]] %s10083_s6 }
  0x18   :  { %12106 = sst [smem:[#allocation22_spill]] %s10088_s12 }
  0x19   :  { %s10103_s4 = sld [smem:[%s12043_s0 + %s9964_s28]]   ;;  %s9968_s28 = smov 21  }
  0x1a   :  { %s10108_s12 = sld [smem:[%s12043_s0 + %s9965_s7]]   ;;  %s9969_s7 = smov 22  }
  0x1b   :  { %12107 = sst [smem:[#allocation23_spill]] %s10093_s20 }
  0x1c   :  { %12108 = sst [smem:[#allocation24_spill]] %s10098_s27 }
  0x1d   :  { %s10113_s20 = sld [smem:[%s12043_s0 + %s9966_s15]]   ;;  %s9970_s15 = smov 23  }
  0x1e   :  { %s10118_s27 = sld [smem:[%s12043_s0 + %s9967_s22]]   ;;  %s9971_s22 = smov 24  }
  0x1f   :  { %12109 = sst [smem:[#allocation25_spill]] %s10103_s4 }
  0x20   :  { %12110 = sst [smem:[#allocation26_spill]] %s10108_s12 }
  0x21   :  { %s10123_s4 = sld [smem:[%s12043_s0 + %s9968_s28]]   ;;  %s9972_s28 = smov 25  }
  0x22   :  { %s10128_s12 = sld [smem:[%s12043_s0 + %s9969_s7]]   ;;  %s9973_s7 = smov 26  }
  0x23   :  { %12111 = sst [smem:[#allocation27_spill]] %s10113_s20 }
  0x24   :  { %12112 = sst [smem:[#allocation28_spill]] %s10118_s27 }
  0x25   :  { %s10133_s20 = sld [smem:[%s12043_s0 + %s9970_s15]]   ;;  %s9974_s15 = smov 27  }
  0x26   :  { %s10138_s27 = sld [smem:[%s12043_s0 + %s9971_s22]]   ;;  %s9975_s22 = smov 28  }
  0x27   :  { %12113 = sst [smem:[#allocation29_spill]] %s10123_s4 }
  0x28   :  { %12114 = sst [smem:[#allocation30_spill]] %s10128_s12 }
  0x29   :  { %s10143_s4 = sld [smem:[%s12043_s0 + %s9972_s28]]   ;;  %s9976_s28 = smov 29  }
  0x2a   :  { %s10148_s12 = sld [smem:[%s12043_s0 + %s9973_s7]]   ;;  %s9977_s7 = smov 30  }
  0x2b   :  { %12115 = sst [smem:[#allocation31_spill]] %s10133_s20 }
  0x2c   :  { %12116 = sst [smem:[#allocation32_spill]] %s10138_s27 }
  0x2d   :  { %s10153_s20 = sld [smem:[%s12043_s0 + %s9974_s15]]   ;;  %s9978_s15 = smov 31  }
  0x2e   :  { %s10158_s27 = sld [smem:[%s12043_s0 + %s9975_s22]]   ;;  %s9979_s22 = smov 32  }
  0x2f   :  { %12117 = sst [smem:[#allocation33_spill]] %s10143_s4 }
  0x30   :  { %12118 = sst [smem:[#allocation34_spill]] %s10148_s12 }
  0x31   :  { %s10163_s4 = sld [smem:[%s12043_s0 + %s9976_s28]]   ;;  %s9980_s28 = smov 33  }
  0x32   :  { %s10168_s12 = sld [smem:[%s12043_s0 + %s9977_s7]]   ;;  %s9981_s7 = smov 34  }
  0x33   :  { %12119 = sst [smem:[#allocation35_spill]] %s10153_s20 }
  0x34   :  { %12120 = sst [smem:[#allocation36_spill]] %s10158_s27 }
  0x35   :  { %s10173_s20 = sld [smem:[%s12043_s0 + %s9978_s15]]   ;;  %s9982_s15 = smov 35  }
  0x36   :  { %s10178_s27 = sld [smem:[%s12043_s0 + %s9979_s22]]   ;;  %s9983_s22 = smov 36  }
  0x37   :  { %12121 = sst [smem:[#allocation37_spill]] %s10163_s4 }
  0x38   :  { %s10183_s4 = sld [smem:[%s12043_s0 + %s9980_s28]]   ;;  %s9984_s28 = smov 37  }
  0x39   :  { %s10188_s6 = sld [smem:[%s12043_s0 + %s9981_s7]]   ;;  %s9985_s7 = smov 38  }
  0x3a   :  { %s10208_s24 = sld [smem:[%s12043_s0 + %s9985_s7]]   ;;  %s9989_s7 = smov 42  }
  0x3b   :  { %12122 = sst [smem:[#allocation38_spill]] %s10173_s20 }
  0x3c   :  { %12123 = sst [smem:[#allocation39_spill]] %s10178_s27 }
  0x3d   :  { %s10193_s20 = sld [smem:[%s12043_s0 + %s9982_s15]]   ;;  %s9986_s15 = smov 39  }
  0x3e   :  { %12124 = sst [smem:[#allocation40_spill]] %s10183_s4 }
  0x3f   :  { %12125 = sst [smem:[#allocation41_spill]] %s10188_s6 }
  0x40   :  { %s10198_s27 = sld [smem:[%s12043_s0 + %s9983_s22]]   ;;  %s9987_s22 = smov 40  }
  0x41   :  { %s10203_s4 = sld [smem:[%s12043_s0 + %s9984_s28]]   ;;  %s9988_s28 = smov 41  }
  0x42   :  { %12129 = sst [smem:[#allocation45_spill]] %s10208_s24 }
  0x43   :  { %12126 = sst [smem:[#allocation42_spill]] %s10193_s20 }
  0x44   :  { %s10213_s20 = sld [smem:[%s12043_s0 + %s9986_s15]]   ;;  %s9990_s15 = smov 43  }
  0x45   :  { %s10228_s24 = sld [smem:[%s12043_s0 + %s9989_s7]]   ;;  %s9993_s7 = smov 46  }
  0x46   :  { %12127 = sst [smem:[#allocation43_spill]] %s10198_s27 }
  0x47   :  { %12128 = sst [smem:[#allocation44_spill]] %s10203_s4 }
  0x48   :  { %s10218_s27 = sld [smem:[%s12043_s0 + %s9987_s22]]   ;;  %s9991_s22 = smov 44  }
  0x49   :  { %s10223_s4 = sld [smem:[%s12043_s0 + %s9988_s28]]   ;;  %s9992_s28 = smov 45  }
  0x4a   :  { %s10233_s30 = sld [smem:[%s12043_s0 + %s9990_s15]]  }
  0x4b   :  { %12132 = sst [smem:[#allocation48_spill]] %s10228_s24 }
  0x4c   :  { %s10248_s24 = sld [smem:[%s12043_s0 + %s9993_s7]]  }
  0x4e   :  { %12130 = sst [smem:[#allocation46_spill]] %s10218_s27 }
  0x4f   :  { %12131 = sst [smem:[#allocation47_spill]] %s10223_s4 }
  0x50   :  { %12133 = sst [smem:[#allocation49_spill]] %s10233_s30 }
  0x51   :  { %s10238_s27 = sld [smem:[%s12043_s0 + %s9991_s22]]  }
  0x52   :  { %s10243_s4 = sld [smem:[%s12043_s0 + %s9992_s28]]  }
  0x58   :  { %12134 = sst [smem:[#allocation50_spill]] %s10243_s4 }
  0x59   :  { %98 = vsyncpa [#allocation3], 0 }
  0x5a   :  { %99 = vsyncpa [#allocation6], 0 }
  0x5b   :  { %100 = vsyncpa [#allocation9], 0 }
  0x5c   :  { %101 = vsyncpa [#allocation4], 0 }
  0x5d   :  { %103 = vsyncpa [#allocation4 + $0x1], 0  ;;  %s10250_s15 = smov 0   ;;  %s10252_s16 = smov 0  }
  0x5e   :  { %s10254_s18 = smov 0   ;;  %s10256_s22 = smov 0  }
  0x5f LB: > { %s12135_s8 = sld [smem:[#allocation18_spill]]  ;;  %s12137_s3 = sld [smem:[#allocation17_spill]]  ;;  %s9934_s15 = sphi %s10250_s15, %s12208_s15   ;;  %s9946_s22 = sphi %s10256_s22, %s12205_s22   ;;  %s9942_s18 = sphi %s10254_s18, %s12207_s18   ;;  %s9938_s16 = sphi %s10252_s16, %s12209_s16  }
  0x60   : > { %s12136_s4 = sld [smem:[#allocation50_spill]]  ;;  %s12138_s30 = sld [smem:[#allocation49_spill]] }
  0x61   : > { %s12139_s6 = sld [smem:[#allocation41_spill]]  ;;  %12140 = sst [smem:[#allocation51_spill]] %s9934_s15 }
  0x62   : > { %12141 = sst [smem:[#allocation52_spill]] %s9942_s18  ;;  %s10271_s0 = sadd.s32 4294967295, %s9946_s22  }
  0x63   : > { %s7868_s23 = sadd.s32 4294967294, %s9946_s22   ;;  %s10275_s26 = sadd.s32 1, %s9946_s22  }
  0x64   : > { %12142 = sst [smem:[#allocation53_spill]] %s10275_s26  ;;  %s1087_s28 = sadd.s32 1, %s9942_s18 }
  0x65   : > { %s1084_s1 = ssub.s32 %s9946_s22, %s10275_s26  ;;  %p1097_p0 = scmp.ne.s32.totalorder %s9942_s18, %s9938_s16 }
  0x66   : > { %p1085_p1 = scmp.eq.s32.totalorder %s1084_s1, 0  ;;  %p1098_p2 = scmp.eq.s32.totalorder %s10271_s0, 1 }
  0x67   : > { %p1103_p3 = scmp.ne.s32.totalorder %s9938_s16, %s9934_s15  ;;  %p1104_p4 = scmp.eq.s32.totalorder %s7868_s23, 1 }
  0x68   : > { %s10286_s2 = scalar_select %p1085_p1, %s9942_s18, %s1087_s28  }
  0x69   : > { %p10288_p5 = por %p1098_p2, %p1097_p0  ;;  %p10292_p6 = por %p1104_p4, %p1103_p3 }
  0x6a   : > { %12143 = sst [smem:[#allocation54_spill]] %s10286_s2  ;;  %p7869_p7 = scmp.ge.s32.totalorder %s9946_s22, 1 }
  0x6b   : > { %s12144_s7 = scalar_select %p10288_p5, 1, 0 }
  0x6c   : > { %s12145_s10 = scalar_select %p10292_p6, 1, 0 }
  0x6d   : > { %p1111_p8 = scmp.lt.s32.totalorder %s9946_s22, 3  ;;  %p12067_p9 = scmp.eq.s32.totalorder %s10271_s0, 0 }
  0x6e   : > { %12146 = sst [smem:[#allocation55_spill]] %s12145_s10  ;;  %s9994_s23 = smov [#allocation5]  }
  0x6f   : > { %p10299_p10 = pnand %p7869_p7, %p1111_p8  ;;  %s1231_s28 = sshll.u32 %s9994_s23, 4  ;;  %s1232_s28 = int_to_ptr.vmem [resolvable:$true] %s1231_s28 }
  0x70   : > { %s9995_s1 = smov [#allocation8]   ;;  %s9996_s26 = smov [#allocation2]  }
  0x71   : > { %s12147_s11 = scalar_select %p10299_p10, 1, 0 }
  0x72   : > { %p9015_p11 = pneg %p10299_p10  ;;  %s1274_s2 = sshll.u32 %s9995_s1, 4  ;;  %s10311_s2 = int_to_ptr.vmem [resolvable:$true] %s1274_s2 }
  0x73   : > { %s1211_s10 = sshll.u32 %s9996_s26, 4  ;;  %s9732_s15 = scalar_lea.hbm %s12139_s6, 16  ;;  %s10313_s10 = int_to_ptr.vmem [resolvable:$true] %s1211_s10 }
  0x74   : > { %p10307_p12 = pnand %p12067_p9, %p9015_p11  ;;  %p9733_p13 = scmp.ne.s32.totalorder %s12139_s6, %s9732_s15 }
  0x75   : > { %p9739_p3 = scmp.lt.u32.totalorder %s9732_s15, %s12139_s6 }
  0x76   : > { %p10319_p0 = pneg %p10307_p12 }
  0x78   : > { %p9735_p1 = pnand %p10319_p0, %p9733_p13 }
  0x7a   : > { %p9736_p2 = pneg %p9735_p1 }
  0x7c   : > { %p9741_p4 = pnand %p9739_p3, %p9736_p2 }
  0x7e   : > { %9744 = shalt.err (!%p9741_p4)
}
  0x7f   : > { %s9745_s1 = scalar_lea.vmem %s1232_s28, 16  ;;  %s9752_s26 = scalar_lea.vmem %s1232_s28, 32 }
  0x80   : > { %p9746_p7 = scmp.ne.s32.totalorder %s1232_s28, %s9745_s1  ;;  %p9753_p9 = scmp.lt.s32.totalorder %s1232_s28, %s1232_s28 }
  0x81   : > { %p9754_p6 = scmp.lt.s32.totalorder %s9752_s26, %s9745_s1 }
  0x82   : > { %p9748_p8 = pnand %p9746_p7, %p10319_p0 }
  0x83   : > { %p9755_p5 = por %p9754_p6, %p9753_p9 }
  0x84   : > { %p9749_p11 = pneg %p9748_p8 }
  0x86   : > { %p9756_p10 = pnand %p9755_p5, %p9749_p11 }
  0x88   : > { %9759 = shalt.err (!%p9756_p10)
}
  0x89   : > { %9021 = dma.hbm_to_vmem [thread:$0]  (!%p10307_p12), %s12139_s6, 16, %s1232_s28, [#allocation6]  }
  0x8a   : > { %s9760_s15 = scalar_lea.hbm %s12138_s30, 16 }
  0x8b   : > { %p9761_p13 = scmp.ne.s32.totalorder %s12138_s30, %s9760_s15  ;;  %p9767_p3 = scmp.lt.u32.totalorder %s9760_s15, %s12138_s30 }
  0x8d   : > { %p9763_p1 = pnand %p9761_p13, %p10319_p0 }
  0x8f   : > { %p9764_p2 = pneg %p9763_p1 }
  0x91   : > { %p9769_p4 = pnand %p9767_p3, %p9764_p2 }
  0x93   : > { %9772 = shalt.err (!%p9769_p4)
}
  0x94   : > { %s9773_s1 = scalar_lea.vmem %s10311_s2, 16  ;;  %s9780_s26 = scalar_lea.vmem %s10311_s2, 32 }
  0x95   : > { %p9774_p5 = scmp.ne.s32.totalorder %s10311_s2, %s9773_s1  ;;  %p9781_p10 = scmp.lt.s32.totalorder %s10311_s2, %s10311_s2 }
  0x96   : > { %p9782_p7 = scmp.lt.s32.totalorder %s9780_s26, %s9773_s1 }
  0x97   : > { %p9776_p6 = pnand %p9774_p5, %p10319_p0 }
  0x98   : > { %p9783_p8 = por %p9782_p7, %p9781_p10 }
  0x99   : > { %p9777_p9 = pneg %p9776_p6 }
  0x9b   : > { %p9784_p11 = pnand %p9783_p8, %p9777_p9 }
  0x9d   : > { %9787 = shalt.err (!%p9784_p11)
}
  0x9e   : > { %9027 = dma.hbm_to_vmem [thread:$0]  (!%p10307_p12), %s12138_s30, 16, %s10311_s2, [#allocation9]  }
  0x9f   : > { %s9788_s28 = scalar_lea.hbm %s10168_s12, 16 }
  0xa0   : > { %p9789_p13 = scmp.ne.s32.totalorder %s10168_s12, %s9788_s28  ;;  %p9795_p3 = scmp.lt.u32.totalorder %s9788_s28, %s10168_s12 }
  0xa2   : > { %p9791_p1 = pnand %p9789_p13, %p10319_p0 }
  0xa4   : > { %p9792_p2 = pneg %p9791_p1 }
  0xa6   : > { %p9797_p4 = pnand %p9795_p3, %p9792_p2 }
  0xa8   : > { %9800 = shalt.err (!%p9797_p4)
}
  0xa9   : > { %s9801_s15 = scalar_lea.vmem %s10313_s10, 16  ;;  %s9808_s1 = scalar_lea.vmem %s10313_s10, 32 }
  0xaa   : > { %p9802_p5 = scmp.ne.s32.totalorder %s10313_s10, %s9801_s15  ;;  %p9809_p10 = scmp.lt.s32.totalorder %s10313_s10, %s10313_s10 }
  0xab   : > { %p9810_p7 = scmp.lt.s32.totalorder %s9808_s1, %s9801_s15 }
  0xac   : > { %p9804_p6 = pnand %p9802_p5, %p10319_p0 }
  0xad   : > { %p9811_p8 = por %p9810_p7, %p9809_p10 }
  0xae   : > { %p9805_p9 = pneg %p9804_p6 }
  0xb0   : > { %p9812_p11 = pnand %p9811_p8, %p9805_p9 }
  0xb2   : > { %9815 = shalt.err (!%p9812_p11)
}
  0xb3   : > { %9018 = dma.hbm_to_vmem [thread:$0]  (!%p10307_p12), %s10168_s12, 16, %s10313_s10, [#allocation3]  }
  0xb4   : > { %s9997_s2 = smov [#allocation7]   ;;  %s9998_s28 = smov [#allocation10]  }
  0xb5   : > { %s1254_s26 = sshll.u32 %s9997_s2, 4  ;;  %s1288_s6 = sshll.u32 %s9998_s28, 4  ;;  %s1255_s26 = int_to_ptr.vmem [resolvable:$true] %s1254_s26  ;;  %s1289_s6 = int_to_ptr.vmem [resolvable:$true] %s1288_s6 }
  0xb6   : > { %s9816_s30 = scalar_lea.hbm %s10213_s20, 16 }
  0xb7   : > { %p9817_p13 = scmp.ne.s32.totalorder %s10213_s20, %s9816_s30  ;;  %p9823_p3 = scmp.lt.u32.totalorder %s9816_s30, %s10213_s20 }
  0xb9   : > { %p9819_p1 = pnand %p9817_p13, %p10319_p0 }
  0xbb   : > { %p9820_p2 = pneg %p9819_p1 }
  0xbd   : > { %p9825_p4 = pnand %p9823_p3, %p9820_p2 }
  0xbf   : > { %9828 = shalt.err (!%p9825_p4)
}
  0xc0   : > { %s9829_s15 = scalar_lea.vmem %s1255_s26, 16  ;;  %s9836_s10 = scalar_lea.vmem %s1255_s26, 32 }
  0xc1   : > { %p9830_p5 = scmp.ne.s32.totalorder %s1255_s26, %s9829_s15  ;;  %p9837_p10 = scmp.lt.s32.totalorder %s1255_s26, %s1255_s26 }
  0xc2   : > { %p9838_p7 = scmp.lt.s32.totalorder %s9836_s10, %s9829_s15 }
  0xc3   : > { %p9832_p6 = pnand %p9830_p5, %p10319_p0 }
  0xc4   : > { %p9839_p8 = por %p9838_p7, %p9837_p10 }
  0xc5   : > { %p9833_p9 = pneg %p9832_p6 }
  0xc7   : > { %p9840_p11 = pnand %p9839_p8, %p9833_p9 }
  0xc9   : > { %9843 = shalt.err (!%p9840_p11)
}
  0xca   : > { %9024 = dma.hbm_to_vmem [thread:$0]  (!%p10307_p12), %s10213_s20, 16, %s1255_s26, [#allocation6]  }
  0xcb   : > { %s9844_s30 = scalar_lea.hbm %s12136_s4, 16 }
  0xcc   : > { %p9845_p13 = scmp.ne.s32.totalorder %s12136_s4, %s9844_s30  ;;  %p9851_p3 = scmp.lt.u32.totalorder %s9844_s30, %s12136_s4 }
  0xce   : > { %p9847_p1 = pnand %p9845_p13, %p10319_p0 }
  0xd0   : > { %p9848_p2 = pneg %p9847_p1 }
  0xd2   : > { %p9853_p4 = pnand %p9851_p3, %p9848_p2 }
  0xd4   : > { %9856 = shalt.err (!%p9853_p4)
}
  0xd5   : > { %s9857_s1 = scalar_lea.vmem %s1289_s6, 16  ;;  %s9864_s2 = scalar_lea.vmem %s1289_s6, 32 }
  0xd6   : > { %p9858_p5 = scmp.ne.s32.totalorder %s1289_s6, %s9857_s1  ;;  %p9865_p10 = scmp.lt.s32.totalorder %s1289_s6, %s1289_s6 }
  0xd7   : > { %p9866_p7 = scmp.lt.s32.totalorder %s9864_s2, %s9857_s1 }
  0xd8   : > { %p9860_p6 = pnand %p9858_p5, %p10319_p0 }
  0xd9   : > { %p9867_p8 = por %p9866_p7, %p9865_p10 }
  0xda   : > { %p9861_p9 = pneg %p9860_p6 }
  0xdc   : > { %p9868_p11 = pnand %p9867_p8, %p9861_p9 }
  0xde   : > { %9871 = shalt.err (!%p9868_p11)
}
  0xdf   : > { %9030 = dma.hbm_to_vmem [thread:$0]  (!%p10307_p12), %s12136_s4, 16, %s1289_s6, [#allocation9]  }
  0xe0   : > { %p12150_p13 = scmp.ne.s32.totalorder %s12147_s11, 0 }
  0xe1   : > { %p12151_p1 = scmp.eq.s32.totalorder (!%p12150_p13), %s10271_s0, 0 }
  0xe2   : > { %1309 = sbr.rel (%p12150_p13) target bundleno = 13929 (0x3669), region = 204 }
  0xe9   : > { %9917 = dma.done.wait (%p12151_p1), [#allocation3], 16   ;;  %p12152_p2 = pmov %p12151_p1 }
  0xea   : > { %p12153_p0 = pmov %p12151_p1 }
  0xeb   : > { %9919 = vsyncadd (%p12152_p2), [#allocation3], 4294967280 }
  0xec   : > { %9921 = dma.done.wait (%p12153_p0), [#allocation6], 32   ;;  %p12154_p3 = pmov %p12153_p0 }
  0xed   : > { %p12155_p4 = pmov %p12153_p0 }
  0xee   : > { %9923 = vsyncadd (%p12154_p3), [#allocation6], 4294967264 }
  0xef   : > { %9925 = dma.done.wait (%p12155_p4), [#allocation9], 32   ;;  %p12156_p12 = pmov %p12153_p0 }
  0xf0   : > { %s12157_s5 = sld [smem:[#allocation16_spill]]  ;;  %p1434_p5 = scmp.lt.s32.totalorder %s10271_s0, 1  ;;  %v9209_v0 = vld [vmem:[%s10023_s9] sm:$0xff]   ;;  %v9210_v1 = vld [vmem:[%s10023_s9 + $0x8] sm:$0xff]   ;;  %vm1483_vm0 = vcmask 392192   ;;  %v9211_v4 = vld [vmem:[%s10023_s9 + $0x10] sm:$0xff]  }
  0xf1   : > { %9927 = vsyncadd (%p12156_p12), [#allocation9], 4294967264  ;;  %8415 = vmatprep.subr.bf16.mxu0 %v9209_v0  ;;  %v7884_v15 = vld [vmem:[%s10028_s13] ss:$0 sm:$0xff]  ;;  %vm1561_vm1 = vcmask 261120   ;;  %vm1929_vm2 = vcmask 130048  }
  0xf2   : > { %s1435_s6 = scalar_select %p1434_p5, %s10271_s0, 1  ;;  %8416 = vmatpush3.bf16.msra.mxu0 %v9209_v0  ;;  %vm2019_vm3 = vcmask 523264  }
  0xf3   : > { %8417 = vmatprep.subr.bf16.mxu0 %v9210_v1  ;;  %s12083_s23 = smov 96   ;;  %s12089_s26 = smov 64  }
  0xf4   : > { %s8143_s18 = sshll.u32 %s1435_s6, 6  ;;  %s12074_s28 = smov 80  }
  0xf5   : > { %s12076_s15 = smov 112   ;;  %s12078_s10 = smov 48  }
  0xf6   : > { %s1438_s11 = scalar_lea.vmem %s12157_s5, %s8143_s18  ;;  %8418 = vmatpush3.bf16.msra.mxu0 %v9210_v1  ;;  %s12072_s30 = smov 16  }
  0xf7   : > { %v1440_v2 = vld [vmem:[%s1438_s11] sm:$0xff]  ;;  %v1441_v3 = vld [vmem:[%s1438_s11 + $0x8] sm:$0xff]  ;;  %v1442_v6 = vld [vmem:[%s1438_s11 + $0x10] sm:$0xff]  ;;  %8419 = vmatprep.subr.bf16.mxu0 %v9211_v4  ;;  %s12158_s1 = sld [smem:[#allocation20_spill]]  ;;  %s12159_s2 = sld [smem:[#allocation19_spill]] }
  0xf8   : > { %v1448_v5 = vpack.c.bf16 %v1441_v3, %v1440_v2  ;;  %v1443_v7 = vld [vmem:[%s1438_s11 + $0x18] sm:$0xff]  ;;  %v1444_v8 = vld [vmem:[%s1438_s11 + $0x20] sm:$0xff]  ;;  %v1445_v9 = vld [vmem:[%s1438_s11 + $0x28] sm:$0xff]  ;;  %s12160_s6 = sld [smem:[#allocation21_spill]]  ;;  %s12161_s18 = sld [smem:[#allocation22_spill]] }
  0xf9   : > { %v1449_v10 = vpack.c.bf16 %v1443_v7, %v1442_v6  ;;  %v1450_v11 = vpack.c.bf16 %v1445_v9, %v1444_v8  ;;  %v1446_v12 = vld [vmem:[%s1438_s11 + $0x30] sm:$0xff]  ;;  %v1447_v13 = vld [vmem:[%s1438_s11 + $0x38] sm:$0xff]  ;;  %s12187_s4 = smov 16   ;;  %s12189_s5 = sld [smem:[#allocation37_spill]] }
  0xfa   : > { %8421 = vmatprep.mubr.msk.bf16.mxu0 %vm1483_vm0, %v1448_v5  ;;  %8420 = vmatpush3.bf16.msra.mxu0 %v9211_v4  ;;  %v1451_v14 = vpack.c.bf16 %v1447_v13, %v1446_v12  ;;  %p12201_p9 = scmp.ne.s32.totalorder %s12144_s7, 0 }
  0xfd   : > { %8422 = vmatmul.mubr.msk.bf16.vlgmr.msra.gmra.mrb[0].mxu0 %vm1483_vm0, %v1449_v10 }
  0xfe   : > { %8425 = vmatprep.mubr.msk.bf16.mxu0 %vm1483_vm0, %v1450_v11  ;;  %s12162_s11 = smov %s12161_s18 }
 0x105   : > { %8426 = vmatmul.mubr.msk.bf16.gmra.mrb[4].mxu0 %vm1483_vm0, %v1451_v14 }
 0x1d0   : > { %v8423_v16 = vpop.f32.mrb[0].mxu0 }
 0x1d1   : > { %v1539_v17 = vadd.f32 %v8423_v16, %v7884_v15  ;;  %v1530_v18 = vpop.f32.mrb[1].mxu0 }
 0x1d2   : > { %v1531_v19 = vadd.f32 %v7884_v15, %v1530_v18  ;;  %v8424_v20 = vpop.f32.mrb[2].mxu0 }
 0x1d3   : > { %v1542_v21 = vadd.f32 %v8424_v20, %v7884_v15  ;;  %v1533_v22 = vpop.f32.mrb[3].mxu0  ;;  %v1568_v23 = vsel %vm1561_vm1, %v1539_v17, 0.0 }
 0x1d4   : > { %v1534_v24 = vadd.f32 %v7884_v15, %v1533_v22  ;;  %1569 = vadd.xlane.f32.xlu1 %v1568_v23  ;;  %v1562_v25 = vsel %vm1561_vm1, %v1531_v19, 0.0 }
 0x1d5   : > { %1563 = vadd.xlane.f32.xlu0 %v1562_v25  ;;  %v1571_v26 = vsel %vm1561_vm1, %v1542_v21, 0.0 }
 0x1d6   : > { %v1565_v28 = vsel %vm1561_vm1, %v1534_v24, 0.0 }
 0x1d8   : > { %1572 = vadd.xlane.f32.xlu1 %v1571_v26  ;;  %v8427_v27 = vpop.f32.mrb[4].mxu0 }
 0x1d9   : > { %v1546_v29 = vpop.f32.mrb[5].mxu0  ;;  %1566 = vadd.xlane.f32.xlu0 %v1565_v28  ;;  %v1555_v30 = vadd.f32 %v8427_v27, %v7884_v15 }
 0x1da   : > { %v1547_v31 = vadd.f32 %v7884_v15, %v1546_v29  ;;  %v8428_v32 = vpop.f32.mrb[6].mxu0 }
 0x1db   : > { %v1549_v33 = vpop.f32.mrb[7].mxu0  ;;  %v1558_v34 = vadd.f32 %v8428_v32, %v7884_v15  ;;  %v1580_v38 = vsel %vm1561_vm1, %v1555_v30, 0.0 }
 0x1dc   : > { %v1550_v35 = vadd.f32 %v7884_v15, %v1549_v33  ;;  %v1574_v36 = vsel %vm1561_vm1, %v1547_v31, 0.0 }
 0x1dd   : > { %1575 = vadd.xlane.f32.xlu0 %v1574_v36  ;;  %v1583_v39 = vsel %vm1561_vm1, %v1558_v34, 0.0 }
 0x1de   : > { %v1577_v37 = vsel %vm1561_vm1, %v1550_v35, 0.0 }
 0x1df   : > { %1578 = vadd.xlane.f32.xlu1 %v1577_v37 }
 0x1e1   : > { %1581 = vadd.xlane.f32.xlu0 %v1580_v38  ;;  %v7892_v38 = vld [vmem:[%s10033_s17] ss:$0 sm:$0xff] }
 0x1e3   : > { %1584 = vadd.xlane.f32.xlu1 %v1583_v39 }
 0x261   : > { %v1570_v40 = vpop.xlane.xlu1 %1569 }
 0x262   : > { %v1589_v41 = vmul.f32 0.03125, %v1570_v40  ;;  %v1564_v42 = vpop.xlane.xlu0 %1563 }
 0x263   : > { %v1587_v43 = vmul.f32 0.03125, %v1564_v42  ;;  %v7893_v42 = vld [vmem:[%s10038_s21] ss:$0 sm:$0xff] }
 0x264   : > { %v10416_v44 = vsub.f32 %v1539_v17, %v1589_v41 }
 0x265   : > { %v10418_v45 = vsub.f32 %v1531_v19, %v1587_v43  ;;  %v1573_v46 = vpop.xlane.xlu1 %1572 }
 0x266   : > { %v1590_v47 = vmul.f32 0.03125, %v1573_v46  ;;  %v1567_v48 = vpop.xlane.xlu0 %1566  ;;  %v1605_v54 = vmul.f32 %v10416_v44, %v10416_v44 }
 0x267   : > { %v1588_v49 = vmul.f32 0.03125, %v1567_v48  ;;  %v1603_v50 = vmul.f32 %v10418_v45, %v10418_v45 }
 0x268   : > { %v10422_v51 = vsub.f32 %v1542_v21, %v1590_v47  ;;  %v1617_v62 = vsel %vm1561_vm1, %v1605_v54, 0.0 }
 0x269   : > { %v10424_v52 = vsub.f32 %v1534_v24, %v1588_v49  ;;  %v1611_v53 = vsel %vm1561_vm1, %v1603_v50, 0.0 }
 0x26a   : > { %1612 = vadd.xlane.f32.xlu0 %v1611_v53  ;;  %v1576_v55 = vpop.xlane.xlu0 %1575  ;;  %v1606_v59 = vmul.f32 %v10422_v51, %v10422_v51 }
 0x26b   : > { %v1591_v56 = vmul.f32 0.03125, %v1576_v55  ;;  %v1604_v57 = vmul.f32 %v10424_v52, %v10424_v52 }
 0x26c   : > { %v1579_v58 = vpop.xlane.xlu1 %1578  ;;  %v1620_v5 = vsel %vm1561_vm1, %v1606_v59, 0.0 }
 0x26d   : > { %v10433_v60 = vsub.f32 %v1547_v31, %v1591_v56  ;;  %v1592_v61 = vmul.f32 0.03125, %v1579_v58  ;;  %v1614_v63 = vsel %vm1561_vm1, %v1604_v57, 0.0 }
 0x26e   : > { %1618 = vadd.xlane.f32.xlu0 %v1617_v62  ;;  %1615 = vadd.xlane.f32.xlu1 %v1614_v63  ;;  %v1582_v0 = vpop.xlane.xlu0 %1581 }
 0x26f   : > { %v10437_v1 = vsub.f32 %v1550_v35, %v1592_v61  ;;  %v1593_v2 = vmul.f32 0.03125, %v1582_v0  ;;  %v1607_v3 = vmul.f32 %v10433_v60, %v10433_v60 }
 0x270   : > { %v1585_v4 = vpop.xlane.xlu1 %1584 }
 0x271   : > { %v10442_v6 = vsub.f32 %v1555_v30, %v1593_v2  ;;  %v1594_v7 = vmul.f32 0.03125, %v1585_v4  ;;  %v1623_v8 = vsel %vm1561_vm1, %v1607_v3, 0.0  ;;  %v1608_v9 = vmul.f32 %v10437_v1, %v10437_v1 }
 0x272   : > { %1621 = vadd.xlane.f32.xlu1 %v1620_v5  ;;  %1624 = vadd.xlane.f32.xlu0 %v1623_v8 }
 0x273   : > { %v10447_v10 = vsub.f32 %v1558_v34, %v1594_v7  ;;  %v1609_v11 = vmul.f32 %v10442_v6, %v10442_v6  ;;  %v1626_v12 = vsel %vm1561_vm1, %v1608_v9, 0.0 }
 0x275   : > { %v1629_v13 = vsel %vm1561_vm1, %v1609_v11, 0.0  ;;  %v1610_v14 = vmul.f32 %v10447_v10, %v10447_v10 }
 0x276   : > { %1627 = vadd.xlane.f32.xlu1 %v1626_v12  ;;  %1630 = vadd.xlane.f32.xlu0 %v1629_v13 }
 0x277   : > { %v1632_v15 = vsel %vm1561_vm1, %v1610_v14, 0.0 }
 0x27a   : > { %1633 = vadd.xlane.f32.xlu1 %v1632_v15 }
 0x2f7   : > { %v1613_v16 = vpop.xlane.xlu0 %1612 }
 0x2f8   : > { %v1635_v17 = vmul.f32 0.03125, %v1613_v16 }
 0x2fa   : > { %v1643_v18 = vadd.f32 1e-05, %v1635_v17 }
 0x2fb   : > { %v1616_v19 = vpop.xlane.xlu1 %1615  ;;  %v1619_v20 = vpop.xlane.xlu0 %1618 }
 0x2fc   : > { %9340 = vrsqrt.f32 %v1643_v18  ;;  %v1636_v21 = vmul.f32 0.03125, %v1616_v19  ;;  %v1637_v22 = vmul.f32 0.03125, %v1619_v20 }
 0x2fe   : > { %v1644_v23 = vadd.f32 1e-05, %v1636_v21  ;;  %v1645_v24 = vadd.f32 1e-05, %v1637_v22 }
 0x2ff   : > { %v1622_v25 = vpop.xlane.xlu1 %1621  ;;  %v1625_v26 = vpop.xlane.xlu0 %1624 }
 0x300   : > { %9342 = vrsqrt.f32 %v1644_v23  ;;  %v1638_v27 = vmul.f32 0.03125, %v1622_v25  ;;  %v1639_v28 = vmul.f32 0.03125, %v1625_v26 }
 0x301   : > { %9344 = vrsqrt.f32 %v1645_v24 }
 0x302   : > { %v1646_v29 = vadd.f32 1e-05, %v1638_v27  ;;  %v1647_v30 = vadd.f32 1e-05, %v1639_v28 }
 0x303   : > { %v1628_v31 = vpop.xlane.xlu1 %1627  ;;  %v1631_v32 = vpop.xlane.xlu0 %1630 }
 0x304   : > { %9346 = vrsqrt.f32 %v1646_v29  ;;  %v1640_v33 = vmul.f32 0.03125, %v1628_v31  ;;  %v1641_v34 = vmul.f32 0.03125, %v1631_v32 }
 0x305   : > { %9348 = vrsqrt.f32 %v1647_v30 }
 0x306   : > { %v9341_v35 = vpop.eup %9340  ;;  %v1648_v36 = vadd.f32 1e-05, %v1640_v33  ;;  %v1649_v37 = vadd.f32 1e-05, %v1641_v34 }
 0x307   : > { %v1634_v39 = vpop.xlane.xlu1 %1633  ;;  %v1659_v40 = vmul.f32 %v9341_v35, %v10418_v45 }
 0x308   : > { %9350 = vrsqrt.f32 %v1648_v36  ;;  %v1642_v41 = vmul.f32 0.03125, %v1634_v39 }
 0x309   : > { %9352 = vrsqrt.f32 %v1649_v37  ;;  %v1674_v43 = vmul.f32 %v7892_v38, %v1659_v40 }
 0x30a   : > { %v9343_v46 = vpop.eup %9342  ;;  %v1650_v47 = vadd.f32 1e-05, %v1642_v41 }
 0x30b   : > { %v9345_v48 = vpop.eup %9344  ;;  %v10459_v49 = vadd.f32 %v7893_v42, %v1674_v43  ;;  %v1660_v50 = vmul.f32 %v9343_v46, %v10424_v52 }
 0x30c   : > { %9354 = vrsqrt.f32 %v1650_v47  ;;  %v1661_v53 = vmul.f32 %v9345_v48, %v10416_v44 }
 0x30d   : > { %v1697_v54 = vsel %vm1561_vm1, %v10459_v49, 0.0  ;;  %v1675_v55 = vmul.f32 %v7892_v38, %v1660_v50 }
 0x30e   : > { %v9347_v45 = vpop.eup %9346  ;;  %1698 = vadd.xlane.f32.xlu0 %v1697_v54  ;;  %v1676_v56 = vmul.f32 %v7892_v38, %v1661_v53 }
 0x30f   : > { %v9349_v57 = vpop.eup %9348  ;;  %v10465_v58 = vadd.f32 %v7893_v42, %v1675_v55  ;;  %v1662_v59 = vmul.f32 %v9347_v45, %v10422_v51 }
 0x310   : > { %v10468_v61 = vadd.f32 %v7893_v42, %v1676_v56  ;;  %v1663_v62 = vmul.f32 %v9349_v57, %v10433_v60 }
 0x311   : > { %v1700_v52 = vsel %vm1561_vm1, %v10465_v58, 0.0  ;;  %v1677_v44 = vmul.f32 %v7892_v38, %v1662_v59 }
 0x312   : > { %v9351_v63 = vpop.eup %9350  ;;  %1701 = vadd.xlane.f32.xlu1 %v1700_v52  ;;  %v1703_v0 = vsel %vm1561_vm1, %v10468_v61, 0.0  ;;  %v1678_v2 = vmul.f32 %v7892_v38, %v1663_v62 }
 0x313   : > { %v9353_v3 = vpop.eup %9352  ;;  %1704 = vadd.xlane.f32.xlu0 %v1703_v0  ;;  %v10475_v4 = vadd.f32 %v7893_v42, %v1677_v44  ;;  %v1664_v51 = vmul.f32 %v9351_v63, %v10437_v1  ;;  %v9212_v63 = vld [vmem:[%s10043_s25] sm:$0xff]   ;;  %v9213_v0 = vld [vmem:[%s10043_s25 + $0x8] sm:$0xff]  }
 0x314   : > { %v10478_v5 = vadd.f32 %v7893_v42, %v1678_v2  ;;  %v1665_v60 = vmul.f32 %v9353_v3, %v10442_v6  ;;  %8429 = vmatprep.subr.bf16.mxu1 %v9212_v63 }
 0x315   : > { %v1706_v7 = vsel %vm1561_vm1, %v10475_v4, 0.0  ;;  %v1679_v8 = vmul.f32 %v7892_v38, %v1664_v51  ;;  %8430 = vmatpush3.bf16.msra.mxu1 %v9212_v63 }
 0x316   : > { %v9355_v9 = vpop.eup %9354  ;;  %1707 = vadd.xlane.f32.xlu1 %v1706_v7  ;;  %v1709_v11 = vsel %vm1561_vm1, %v10478_v5, 0.0  ;;  %v1680_v12 = vmul.f32 %v7892_v38, %v1665_v60  ;;  %8431 = vmatprep.subr.bf16.mxu1 %v9213_v0 }
 0x317   : > { %1710 = vadd.xlane.f32.xlu0 %v1709_v11  ;;  %v10485_v13 = vadd.f32 %v7893_v42, %v1679_v8  ;;  %v1666_v14 = vmul.f32 %v9355_v9, %v10447_v10 }
 0x318   : > { %v10488_v1 = vadd.f32 %v7893_v42, %v1680_v12 }
 0x319   : > { %v1712_v6 = vsel %vm1561_vm1, %v10485_v13, 0.0  ;;  %v1681_v15 = vmul.f32 %v7892_v38, %v1666_v14  ;;  %8432 = vmatpush3.bf16.msra.mxu1 %v9213_v0 }
 0x31a   : > { %1713 = vadd.xlane.f32.xlu1 %v1712_v6  ;;  %v1715_v16 = vsel %vm1561_vm1, %v10488_v1, 0.0 }
 0x31b   : > { %1716 = vadd.xlane.f32.xlu0 %v1715_v16  ;;  %v10494_v17 = vadd.f32 %v7893_v42, %v1681_v15 }
 0x31d   : > { %v1718_v18 = vsel %vm1561_vm1, %v10494_v17, 0.0 }
 0x31e   : > { %1719 = vadd.xlane.f32.xlu1 %v1718_v18 }
 0x39b   : > { %v1699_v19 = vpop.xlane.xlu0 %1698 }
 0x39c   : > { %v1721_v20 = vmul.f32 0.03125, %v1699_v19 }
 0x39e   : > { %v10499_v10 = vsub.f32 %v10459_v49, %v1721_v20 }
 0x39f   : > { %v1702_v21 = vpop.xlane.xlu1 %1701 }
 0x3a0   : > { %v1722_v22 = vmul.f32 0.03125, %v1702_v21  ;;  %v1705_v23 = vpop.xlane.xlu0 %1704  ;;  %v1737_v24 = vmul.f32 %v10499_v10, %v10499_v10 }
 0x3a1   : > { %v1723_v25 = vmul.f32 0.03125, %v1705_v23 }
 0x3a2   : > { %v10504_v26 = vsub.f32 %v10465_v58, %v1722_v22  ;;  %v1745_v27 = vsel %vm1561_vm1, %v1737_v24, 0.0 }
 0x3a3   : > { %v10508_v28 = vsub.f32 %v10468_v61, %v1723_v25  ;;  %v1708_v29 = vpop.xlane.xlu1 %1707  ;;  %1746 = vadd.xlane.f32.xlu0 %v1745_v27 }
 0x3a4   : > { %v1724_v30 = vmul.f32 0.03125, %v1708_v29  ;;  %v1711_v31 = vpop.xlane.xlu0 %1710  ;;  %v1738_v32 = vmul.f32 %v10504_v26, %v10504_v26 }
 0x3a5   : > { %v1725_v33 = vmul.f32 0.03125, %v1711_v31  ;;  %v1739_v34 = vmul.f32 %v10508_v28, %v10508_v28 }
 0x3a6   : > { %v10515_v35 = vsub.f32 %v10475_v4, %v1724_v30  ;;  %v1748_v36 = vsel %vm1561_vm1, %v1738_v32, 0.0 }
 0x3a7   : > { %v10519_v37 = vsub.f32 %v10478_v5, %v1725_v33  ;;  %1749 = vadd.xlane.f32.xlu1 %v1748_v36  ;;  %v1714_v38 = vpop.xlane.xlu1 %1713  ;;  %v1751_v39 = vsel %vm1561_vm1, %v1739_v34, 0.0 }
 0x3a8   : > { %v1726_v40 = vmul.f32 0.03125, %v1714_v38  ;;  %1752 = vadd.xlane.f32.xlu0 %v1751_v39  ;;  %v1717_v41 = vpop.xlane.xlu0 %1716  ;;  %v1740_v42 = vmul.f32 %v10515_v35, %v10515_v35 }
 0x3a9   : > { %v1727_v43 = vmul.f32 0.03125, %v1717_v41  ;;  %v1741_v46 = vmul.f32 %v10519_v37, %v10519_v37 }
 0x3aa   : > { %v10527_v47 = vsub.f32 %v10485_v13, %v1726_v40  ;;  %v1754_v48 = vsel %vm1561_vm1, %v1740_v42, 0.0 }
 0x3ab   : > { %v10531_v50 = vsub.f32 %v10488_v1, %v1727_v43  ;;  %1755 = vadd.xlane.f32.xlu1 %v1754_v48  ;;  %v1720_v53 = vpop.xlane.xlu1 %1719  ;;  %v1757_v54 = vsel %vm1561_vm1, %v1741_v46, 0.0 }
 0x3ac   : > { %v1728_v55 = vmul.f32 0.03125, %v1720_v53  ;;  %1758 = vadd.xlane.f32.xlu0 %v1757_v54  ;;  %v1742_v45 = vmul.f32 %v10527_v47, %v10527_v47 }
 0x3ad   : > { %v1743_v56 = vmul.f32 %v10531_v50, %v10531_v50 }
 0x3ae   : > { %v10539_v57 = vsub.f32 %v10494_v17, %v1728_v55  ;;  %v1760_v59 = vsel %vm1561_vm1, %v1742_v45, 0.0 }
 0x3af   : > { %1761 = vadd.xlane.f32.xlu1 %v1760_v59  ;;  %v1763_v62 = vsel %vm1561_vm1, %v1743_v56, 0.0  ;;  %v7894_v56 = vld [vmem:[%s10048_s29] ss:$0 sm:$0xff] }
 0x3b0   : > { %1764 = vadd.xlane.f32.xlu0 %v1763_v62  ;;  %v1744_v52 = vmul.f32 %v10539_v57, %v10539_v57 }
 0x3b2   : > { %v1766_v44 = vsel %vm1561_vm1, %v1744_v52, 0.0 }
 0x3b3   : > { %1767 = vadd.xlane.f32.xlu1 %v1766_v44 }
 0x430   : > { %v1747_v2 = vpop.xlane.xlu0 %1746 }
 0x431   : > { %v1769_v3 = vmul.f32 0.03125, %v1747_v2 }
 0x433   : > { %v1777_v51 = vadd.f32 1e-05, %v1769_v3 }
 0x434   : > { %v1750_v60 = vpop.xlane.xlu1 %1749 }
 0x435   : > { %v1770_v7 = vmul.f32 0.03125, %v1750_v60  ;;  %v1753_v8 = vpop.xlane.xlu0 %1752  ;;  %9356 = vrsqrt.f32 %v1777_v51 }
 0x436   : > { %v1771_v9 = vmul.f32 0.03125, %v1753_v8 }
 0x437   : > { %v1778_v11 = vadd.f32 1e-05, %v1770_v7 }
 0x438   : > { %v1779_v12 = vadd.f32 1e-05, %v1771_v9  ;;  %v1756_v14 = vpop.xlane.xlu1 %1755 }
 0x439   : > { %9358 = vrsqrt.f32 %v1778_v11  ;;  %v1772_v6 = vmul.f32 0.03125, %v1756_v14  ;;  %v1759_v15 = vpop.xlane.xlu0 %1758 }
 0x43a   : > { %v1773_v16 = vmul.f32 0.03125, %v1759_v15  ;;  %9360 = vrsqrt.f32 %v1779_v12 }
 0x43b   : > { %v1780_v18 = vadd.f32 1e-05, %v1772_v6 }
 0x43c   : > { %v1781_v19 = vadd.f32 1e-05, %v1773_v16  ;;  %v1762_v20 = vpop.xlane.xlu1 %1761 }
 0x43d   : > { %9362 = vrsqrt.f32 %v1780_v18  ;;  %v1774_v21 = vmul.f32 0.03125, %v1762_v20  ;;  %v1765_v22 = vpop.xlane.xlu0 %1764 }
 0x43e   : > { %v1775_v23 = vmul.f32 0.03125, %v1765_v22  ;;  %9364 = vrsqrt.f32 %v1781_v19  ;;  %v1911_v22 = vld [vmem:[%s12137_s3 + $0x10] sm:$0xff] }
 0x43f   : > { %v1782_v24 = vadd.f32 1e-05, %v1774_v21  ;;  %v9357_v29 = vpop.eup %9356 }
 0x440   : > { %v1783_v25 = vadd.f32 1e-05, %v1775_v23  ;;  %v1768_v27 = vpop.xlane.xlu1 %1767  ;;  %v1793_v33 = vmul.f32 %v9357_v29, %v10499_v10  ;;  %v1910_v29 = vld [vmem:[%s12137_s3 + $0x8] sm:$0xff] }
 0x441   : > { %9366 = vrsqrt.f32 %v1782_v24  ;;  %v1776_v30 = vmul.f32 0.03125, %v1768_v27  ;;  %v1909_v24 = vld [vmem:[%s12137_s3] sm:$0xff] }
 0x442   : > { %9368 = vrsqrt.f32 %v1783_v25 }
 0x443   : > { %v9359_v31 = vpop.eup %9358  ;;  %v1784_v32 = vadd.f32 1e-05, %v1776_v30 }
 0x444   : > { %v1794_v34 = vmul.f32 %v9359_v31, %v10504_v26  ;;  %v9361_v36 = vpop.eup %9360 }
 0x445   : > { %9370 = vrsqrt.f32 %v1784_v32  ;;  %v1795_v40 = vmul.f32 %v9361_v36, %v10508_v28 }
 0x446   : > { %v1801_v38 = vpack.c.bf16 %v1794_v34, %v1793_v33  ;;  %v1912_v34 = vld [vmem:[%s12137_s3 + $0x18] sm:$0xff] }
 0x447   : > { %v9363_v39 = vpop.eup %9362 }
 0x448   : > { %8433 = vmatprep.mubr.msk.bf16.mxu1 %vm1561_vm1, %v1801_v38  ;;  %v1796_v41 = vmul.f32 %v9363_v39, %v10515_v35  ;;  %v9365_v42 = vpop.eup %9364 }
 0x449   : > { %v1797_v10 = vmul.f32 %v9365_v42, %v10519_v37 }
 0x44a   : > { %v1802_v43 = vpack.c.bf16 %v1796_v41, %v1795_v40  ;;  %v1915_v41 = vld [vmem:[%s12137_s3 + $0x30] sm:$0xff] }
 0x44b   : > { %v9367_v46 = vpop.eup %9366 }
 0x44c   : > { %8434 = vmatmul.mubr.msk.bf16.vlgmr.msra.gmra.mrb[0].mxu1 %vm1561_vm1, %v1802_v43  ;;  %v1798_v26 = vmul.f32 %v9367_v46, %v10527_v47  ;;  %v9369_v48 = vpop.eup %9368 }
 0x44d   : > { %v1799_v55 = vmul.f32 %v9369_v48, %v10531_v50 }
 0x44e   : > { %v1803_v53 = vpack.c.bf16 %v1798_v26, %v1797_v10 }
 0x44f   : > { %v9371_v54 = vpop.eup %9370 }
 0x450   : > { %8437 = vmatprep.mubr.msk.bf16.mxu1 %vm1561_vm1, %v1803_v53  ;;  %v1800_v28 = vmul.f32 %v9371_v54, %v10539_v57  ;;  %v1913_v53 = vld [vmem:[%s12137_s3 + $0x20] sm:$0xff] }
 0x452   : > { %v1804_v35 = vpack.c.bf16 %v1800_v28, %v1799_v55 }
 0x454   : > { %8438 = vmatmul.mubr.msk.bf16.gmra.mrb[4].mxu1 %vm1561_vm1, %v1804_v35  ;;  %v1916_v35 = vld [vmem:[%s12137_s3 + $0x38] sm:$0xff] }
 0x51f   : > { %v8435_v45 = vpop.f32.mrb[0].mxu1 }
 0x520   : > { %v1874_v59 = vpop.f32.mrb[1].mxu1  ;;  %v1883_v52 = vadd.f32 %v8435_v45, %v7894_v56 }
 0x521   : > { %v8436_v62 = vpop.f32.mrb[2].mxu1  ;;  %v1875_v47 = vadd.f32 %v7894_v56, %v1874_v59 }
 0x522   : > { %v1886_v37 = vadd.f32 %v8436_v62, %v7894_v56  ;;  %v1877_v44 = vpop.f32.mrb[3].mxu1 }
 0x523   : > { %v1878_v63 = vadd.f32 %v7894_v56, %v1877_v44 }
 0x524   : > { %v10561_v0 = vpack.c.bf16 %v1886_v37, %v1883_v52 }
 0x525   : > { %v10563_v2 = vpack.c.bf16 %v1878_v63, %v1875_v47 }
 0x526   : > { %1923 = vrot.lane.b32.xlu1 %v10561_v0, %s12083_s23 }
 0x527   : > { %1921 = vrot.lane.b32.xlu0 %v10563_v2, %s12083_s23  ;;  %v8439_v50 = vpop.f32.mrb[4].mxu1  ;;  %8449 = vmatprep.mubr.msk.bf16.mxu1 %vm1929_vm2, %v10563_v2 }
 0x528   : > { %v1890_v57 = vpop.f32.mrb[5].mxu1  ;;  %v1899_v51 = vadd.f32 %v8439_v50, %v7894_v56 }
 0x529   : > { %v8440_v3 = vpop.f32.mrb[6].mxu1  ;;  %v1891_v8 = vadd.f32 %v7894_v56, %v1890_v57 }
 0x52a   : > { %v1902_v60 = vadd.f32 %v8440_v3, %v7894_v56  ;;  %v1893_v7 = vpop.f32.mrb[7].mxu1 }
 0x52b   : > { %v1894_v9 = vadd.f32 %v7894_v56, %v1893_v7  ;;  %v1914_v56 = vld [vmem:[%s12137_s3 + $0x28] sm:$0xff] }
 0x52c   : > { %v10571_v11 = vpack.c.bf16 %v1902_v60, %v1899_v51 }
 0x52d   : > { %v10573_v12 = vpack.c.bf16 %v1894_v9, %v1891_v8 }
 0x52f   : > { %1925 = vrot.lane.b32.xlu1 %v10573_v12, %s12083_s23 }
 0x533   : > { %1927 = vrot.lane.b32.xlu1 %v10571_v11, %s12083_s23 }
 0x598   : > { %v1924_v15 = vpop.permute.xlu1 %1923 }
 0x599   : > { %v1922_v14 = vpop.permute.xlu0 %1921  ;;  %v1946_v16 = vsel %vm1929_vm2, %v1924_v15, 0 }
 0x59a   : > { %8977 = vmatprep.subr.msk.bf16.mxu1 %vm1929_vm2, %v1922_v14  ;;  %v1943_v6 = vsel %vm1929_vm2, %v1922_v14, 0 }
 0x59b   : > { %8442 = vmatpush3.bf16.xpose.msra.mxu1 %v1943_v6 }
 0x59c   : > { %8978 = vmatprep.subr.msk.bf16.mxu1 %vm1929_vm2, %v1924_v15 }
 0x5a1   : > { %v1926_v18 = vpop.permute.xlu1 %1925 }
 0x5a2   : > { %v1949_v19 = vsel %vm1929_vm2, %v1926_v18, 0 }
 0x5a3   : > { %8444 = vmatpush3.bf16.xpose.msra.mxu1 %v1946_v16 }
 0x5a4   : > { %8979 = vmatprep.subr.msk.bf16.mxu1 %vm1929_vm2, %v1926_v18 }
 0x5a5   : > { %v1928_v20 = vpop.permute.xlu1 %1927 }
 0x5a6   : > { %v1952_v21 = vsel %vm1929_vm2, %v1928_v20, 0 }
 0x5ab   : > { %8446 = vmatpush3.bf16.xpose.msra.mxu1 %v1949_v19 }
 0x5ac   : > { %8980 = vmatprep.subr.msk.bf16.mxu1 %vm1929_vm2, %v1928_v20 }
 0x5b3   : > { %8448 = vmatpush3.bf16.xpose.msra.mxu1 %v1952_v21 }
 0x5ba   : > { %8450 = vmatmul.mubr.msk.bf16.vlgmr.msra.gmra.mrb[8].mxu1 %vm1929_vm2, %v10561_v0 }
 0x5bb   : > { %8453 = vmatprep.mubr.msk.bf16.mxu1 %vm1929_vm2, %v10573_v12 }
 0x5c2   : > { %8454 = vmatmul.mubr.msk.bf16.gmra.mrb[12].mxu1 %vm1929_vm2, %v10571_v11 }
 0x68d   : > { %v8451_v23 = vpop.f32.mrb[8].mxu1 }
 0x68e   : > { %v1997_v25 = vadd.f32 %v8451_v23, %v1911_v22  ;;  %v1988_v27 = vpop.f32.mrb[9].mxu1 }
 0x68f   : > { %v8452_v30 = vpop.f32.mrb[10].mxu1  ;;  %v1989_v31 = vadd.f32 %v1988_v27, %v1909_v24 }
 0x690   : > { %v1991_v32 = vpop.f32.mrb[11].mxu1  ;;  %v2026_v33 = vsel %vm2019_vm3, %v1997_v25, -inf  ;;  %v2000_v39 = vadd.f32 %v8452_v30, %v1912_v34 }
 0x691   : > { %v1992_v36 = vadd.f32 %v1991_v32, %v1910_v29  ;;  %2027 = vmax.xlane.f32.xlu0 %v2026_v33  ;;  %v2020_v40 = vsel %vm2019_vm3, %v1989_v31, -inf }
 0x692   : > { %v2029_v48 = vsel %vm2019_vm3, %v2000_v39, -inf }
 0x693   : > { %v2023_v38 = vsel %vm2019_vm3, %v1992_v36, -inf }
 0x694   : > { %2024 = vmax.xlane.f32.xlu1 %v2023_v38 }
 0x695   : > { %v8455_v42 = vpop.f32.mrb[12].mxu1  ;;  %2021 = vmax.xlane.f32.xlu0 %v2020_v40 }
 0x696   : > { %v2004_v43 = vpop.f32.mrb[13].mxu1  ;;  %v2013_v10 = vadd.f32 %v8455_v42, %v1915_v41 }
 0x697   : > { %v8456_v46 = vpop.f32.mrb[14].mxu1  ;;  %v2005_v54 = vadd.f32 %v2004_v43, %v1913_v53 }
 0x698   : > { %v2007_v26 = vpop.f32.mrb[15].mxu1  ;;  %v2038_v55 = vsel %vm2019_vm3, %v2013_v10, -inf  ;;  %v10612_v45 = vadd.f32 %v8456_v46, %v1916_v35 }
 0x699   : > { %2030 = vmax.xlane.f32.xlu0 %v2029_v48  ;;  %v2032_v28 = vsel %vm2019_vm3, %v2005_v54, -inf  ;;  %v10615_v59 = vadd.f32 %v2007_v26, %v1914_v56 }
 0x69a   : > { %v2041_v62 = vsel %vm2019_vm3, %v10612_v45, -inf }
 0x69b   : > { %v2035_v52 = vsel %vm2019_vm3, %v10615_v59, -inf }
 0x69d   : > { %2039 = vmax.xlane.f32.xlu0 %v2038_v55 }
 0x6a1   : > { %2033 = vmax.xlane.f32.xlu0 %v2032_v28 }
 0x6a5   : > { %2114 = vrot.lane.b32.xlu1 %v10561_v0, %s12089_s26 }
 0x6a9   : > { %2116 = vrot.lane.b32.xlu1 %v10573_v12, %s12089_s26 }
 0x6b7   : > { %2112 = vrot.lane.b32.xlu0 %v10563_v2, %s12089_s26 }
 0x6cd   : > { %2042 = vmax.xlane.f32.xlu1 %v2041_v62 }
 0x6d1   : > { %2036 = vmax.xlane.f32.xlu1 %v2035_v52 }
 0x6e2   : > { %2118 = vrot.lane.b32.xlu1 %v10571_v11, %s12089_s26 }
 0x71e   : > { %v2028_v37 = vpop.xlane.xlu0 %2027 }
 0x71f   : > { %v2046_v44 = vsub.f32 %v1997_v25, %v2028_v37 }
 0x721   : > { %v2056_v47 = vmul.f32 1.442695, %v2046_v44  ;;  %v2025_v63 = vpop.xlane.xlu1 %2024 }
 0x722   : > { %v2022_v50 = vpop.xlane.xlu0 %2021  ;;  %v2045_v3 = vsub.f32 %v1992_v36, %v2025_v63 }
 0x723   : > { %9372 = vpow2.f32 %v2056_v47  ;;  %v2044_v57 = vsub.f32 %v1989_v31, %v2022_v50 }
 0x724   : > { %v2054_v8 = vmul.f32 1.442695, %v2045_v3 }
 0x725   : > { %v2052_v51 = vmul.f32 1.442695, %v2044_v57  ;;  %v2115_v23 = vpop.permute.xlu1 %2114 }
 0x726   : > { %v2031_v60 = vpop.xlane.xlu0 %2030 }
 0x727   : > { %9374 = vpow2.f32 %v2052_v51  ;;  %v2047_v7 = vsub.f32 %v2000_v39, %v2031_v60 }
 0x729   : > { %v2058_v9 = vmul.f32 1.442695, %v2047_v7  ;;  %v2117_v31 = vpop.permute.xlu1 %2116 }
 0x72a   : > { %v2040_v14 = vpop.xlane.xlu0 %2039 }
 0x72b   : > { %9376 = vpow2.f32 %v2058_v9  ;;  %v2050_v6 = vsub.f32 %v2013_v10, %v2040_v14 }
 0x72c   : > { %9378 = vpow2.f32 %v2054_v8 }
 0x72d   : > { %v10623_v15 = vpop.eup %9372  ;;  %v2064_v16 = vmul.f32 1.442695, %v2050_v6 }
 0x72e   : > { %v2034_v18 = vpop.xlane.xlu0 %2033  ;;  %v2074_v19 = vsel %vm2019_vm3, %v10623_v15, 0.0 }
 0x72f   : > { %9380 = vpow2.f32 %v2064_v16  ;;  %v2048_v20 = vsub.f32 %v2005_v54, %v2034_v18  ;;  %2075 = vadd.xlane.f32.xlu0 %v2074_v19 }
 0x731   : > { %v10627_v21 = vpop.eup %9374  ;;  %v2060_v22 = vmul.f32 1.442695, %v2048_v20 }
 0x732   : > { %v2113_v24 = vpop.permute.xlu0 %2112  ;;  %v2068_v25 = vsel %vm2019_vm3, %v10627_v21, 0.0 }
 0x733   : > { %9382 = vpow2.f32 %v2060_v22  ;;  %2069 = vadd.xlane.f32.xlu0 %v2068_v25  ;;  %8457 = vmatprep.subr.bf16.mxu0 %v2113_v24 }
 0x734   : > { %8458 = vmatpush3.bf16.msra.mxu0 %v2113_v24 }
 0x735   : > { %v9377_v27 = vpop.eup %9376  ;;  %8459 = vmatprep.subr.bf16.mxu0 %v2115_v23 }
 0x736   : > { %v2077_v29 = vsel %vm2019_vm3, %v9377_v27, 0.0  ;;  %v9379_v30 = vpop.eup %9378 }
 0x737   : > { %2078 = vadd.xlane.f32.xlu1 %v2077_v29  ;;  %v2071_v33 = vsel %vm2019_vm3, %v9379_v30, 0.0 }
 0x738   : > { %8460 = vmatpush3.bf16.msra.mxu0 %v2115_v23 }
 0x739   : > { %v10632_v32 = vpop.eup %9380  ;;  %8461 = vmatprep.subr.bf16.mxu0 %v2117_v31 }
 0x73a   : > { %v2086_v34 = vsel %vm2019_vm3, %v10632_v32, 0.0 }
 0x73b   : > { %2072 = vadd.xlane.f32.xlu1 %v2071_v33  ;;  %2087 = vadd.xlane.f32.xlu0 %v2086_v34 }
 0x73c   : > { %8462 = vmatpush3.bf16.msra.mxu0 %v2117_v31 }
 0x73d   : > { %v10637_v36 = vpop.eup %9382 }
 0x73e   : > { %v2080_v38 = vsel %vm2019_vm3, %v10637_v36, 0.0 }
 0x73f   : > { %2081 = vadd.xlane.f32.xlu0 %v2080_v38 }
 0x74c   : > { %2220 = vrot.lane.b32.xlu1 %v10561_v0, %s12074_s28 }
 0x750   : > { %2222 = vrot.lane.b32.xlu1 %v10573_v12, %s12074_s28 }
 0x75a   : > { %v2043_v39 = vpop.xlane.xlu1 %2042 }
 0x75b   : > { %v2051_v40 = vsub.f32 %v10612_v45, %v2043_v39 }
 0x75d   : > { %v2066_v41 = vmul.f32 1.442695, %v2051_v40 }
 0x75e   : > { %v2037_v42 = vpop.xlane.xlu1 %2036 }
 0x75f   : > { %9384 = vpow2.f32 %v2066_v41  ;;  %v2049_v43 = vsub.f32 %v10615_v59, %v2037_v42 }
 0x761   : > { %v2062_v46 = vmul.f32 1.442695, %v2049_v43 }
 0x762   : > { %v2119_v10 = vpop.permute.xlu1 %2118 }
 0x763   : > { %8463 = vmatprep.subr.bf16.mxu0 %v2119_v10  ;;  %9386 = vpow2.f32 %v2062_v46 }
 0x764   : > { %8464 = vmatpush3.bf16.msra.mxu0 %v2119_v10 }
 0x769   : > { %v9385_v26 = vpop.eup %9384 }
 0x76a   : > { %v2089_v48 = vsel %vm2019_vm3, %v9385_v26, 0.0 }
 0x76b   : > { %2090 = vadd.xlane.f32.xlu0 %v2089_v48 }
 0x76d   : > { %v9387_v53 = vpop.eup %9386 }
 0x76e   : > { %v2083_v54 = vsel %vm2019_vm3, %v9387_v53, 0.0 }
 0x774   : > { %2084 = vadd.xlane.f32.xlu1 %v2083_v54 }
 0x781   : > { %2218 = vrot.lane.b32.xlu0 %v10563_v2, %s12074_s28 }
 0x785   : > { %2224 = vrot.lane.b32.xlu1 %v10571_v11, %s12074_s28  ;;  %2210 = vrot.lane.b32.xlu0 %v10563_v2, %s12076_s15 }
 0x789   : > { %2212 = vrot.lane.b32.xlu1 %v10561_v0, %s12076_s15  ;;  %2214 = vrot.lane.b32.xlu0 %v10573_v12, %s12076_s15 }
 0x78d   : > { %2216 = vrot.lane.b32.xlu1 %v10571_v11, %s12076_s15 }
 0x7bc   : > { %v2076_v55 = vpop.xlane.xlu0 %2075 }
 0x7c0   : > { %v2070_v28 = vpop.xlane.xlu0 %2069 }
 0x7c4   : > { %v2079_v35 = vpop.xlane.xlu1 %2078 }
 0x7c5   : > { %9388 = vrcp.f32 %v2079_v35 }
 0x7c6   : > { %9390 = vrcp.f32 %v2070_v28 }
 0x7c7   : > { %9392 = vrcp.f32 %v2076_v55  ;;  %v7910_v55 = vld [vmem:[%s12137_s3 + $0x48] sm:$0xff] }
 0x7c8   : > { %v2073_v45 = vpop.xlane.xlu1 %2072  ;;  %v2088_v3 = vpop.xlane.xlu0 %2087 }
 0x7c9   : > { %9394 = vrcp.f32 %v2073_v45 }
 0x7cc   : > { %v2082_v51 = vpop.xlane.xlu0 %2081  ;;  %v2221_v60 = vpop.permute.xlu1 %2220 }
 0x7cf   : > { %v9389_v56 = vpop.eup %9388 }
 0x7d0   : > { %v9391_v59 = vpop.eup %9390  ;;  %v2103_v37 = vmul.f32 %v9389_v56, %v9377_v27  ;;  %v2223_v9 = vpop.permute.xlu1 %2222 }
 0x7d1   : > { %v9393_v62 = vpop.eup %9392  ;;  %v2100_v44 = vmul.f32 %v9391_v59, %v10627_v21  ;;  %v2245_v22 = vsel %vm1929_vm2, %v2223_v9, 0 }
 0x7d2   : > { %v2102_v63 = vmul.f32 %v9393_v62, %v10623_v15  ;;  %v2242_v15 = vsel %vm1929_vm2, %v2221_v60, 0 }
 0x7d3   : > { %v9395_v52 = vpop.eup %9394 }
 0x7d4   : > { %v2101_v47 = vmul.f32 %v9395_v52, %v9379_v30  ;;  %v2109_v57 = vpack.c.bf16 %v2103_v37, %v2102_v63  ;;  %v7912_v52 = vld [vmem:[%s12137_s3 + $0x58] sm:$0xff] }
 0x7d6   : > { %v2108_v50 = vpack.c.bf16 %v2101_v47, %v2100_v44 }
 0x7d8   : > { %8465 = vmatprep.mubr.msk.bf16.mxu0 %vm2019_vm3, %v2108_v50 }
 0x7d9   : > { %8466 = vmatmul.mubr.msk.bf16.vlgmr.msra.gmra.mrb[8].mxu0 %vm2019_vm3, %v2109_v57  ;;  %v7913_v57 = vld [vmem:[%s12137_s3 + $0x60] sm:$0xff] }
 0x7f8   : > { %v2091_v7 = vpop.xlane.xlu0 %2090 }
 0x7f9   : > { %9396 = vrcp.f32 %v2091_v7 }
 0x7fa   : > { %9398 = vrcp.f32 %v2082_v51 }
 0x7fb   : > { %9400 = vrcp.f32 %v2088_v3  ;;  %v7914_v3 = vld [vmem:[%s12137_s3 + $0x68] sm:$0xff] }
 0x7fc   : > { %v2219_v8 = vpop.permute.xlu0 %2218 }
 0x7fd   : > { %8981 = vmatprep.subr.msk.bf16.mxu0 %vm1929_vm2, %v2219_v8  ;;  %v2239_v14 = vsel %vm1929_vm2, %v2219_v8, 0 }
 0x7fe   : > { %8474 = vmatpush3.bf16.xpose.msra.mxu0 %v2239_v14 }
 0x7ff   : > { %8982 = vmatprep.subr.msk.bf16.mxu0 %vm1929_vm2, %v2221_v60  ;;  %v7916_v60 = vld [vmem:[%s12137_s3 + $0x78] sm:$0xff] }
 0x800   : > { %v2211_v31 = vpop.permute.xlu0 %2210 }
 0x801   : > { %v2085_v6 = vpop.xlane.xlu1 %2084 }
 0x802   : > { %9402 = vrcp.f32 %v2085_v6  ;;  %v7915_v6 = vld [vmem:[%s12137_s3 + $0x70] sm:$0xff] }
 0x803   : > { %v9397_v16 = vpop.eup %9396 }
 0x804   : > { %v9399_v18 = vpop.eup %9398  ;;  %v2107_v21 = vmul.f32 %v9397_v16, %v9385_v26  ;;  %v7909_v26 = vld [vmem:[%s12137_s3 + $0x40] sm:$0xff] }
 0x805   : > { %v9401_v19 = vpop.eup %9400  ;;  %v2104_v23 = vmul.f32 %v9399_v18, %v10637_v36  ;;  %v2225_v25 = vpop.permute.xlu1 %2224 }
 0x806   : > { %8476 = vmatpush3.bf16.xpose.msra.mxu0 %v2242_v15  ;;  %v2106_v27 = vmul.f32 %v9401_v19, %v10632_v32  ;;  %v2248_v33 = vsel %vm1929_vm2, %v2225_v25, 0  ;;  %v2215_v36 = vpop.permute.xlu0 %2214 }
 0x807   : > { %8983 = vmatprep.subr.msk.bf16.mxu0 %vm1929_vm2, %v2223_v9 }
 0x808   : > { %v2111_v30 = vpack.c.bf16 %v2107_v21, %v2106_v27 }
 0x809   : > { %v2213_v34 = vpop.permute.xlu1 %2212 }
 0x80c   : > { %v9403_v20 = vpop.eup %9402 }
 0x80d   : > { %v2105_v24 = vmul.f32 %v9403_v20, %v9387_v53  ;;  %v2217_v32 = vpop.permute.xlu1 %2216  ;;  %v7911_v53 = vld [vmem:[%s12137_s3 + $0x50] sm:$0xff]  ;;  %s12186_s3 = smov 80  }
 0x80e   : > { %8478 = vmatpush3.bf16.xpose.msra.mxu0 %v2245_v22 }
 0x80f   : > { %8984 = vmatprep.subr.msk.bf16.mxu0 %vm1929_vm2, %v2225_v25  ;;  %v2110_v29 = vpack.c.bf16 %v2105_v24, %v2104_v23 }
 0x811   : > { %8469 = vmatprep.mubr.msk.bf16.mxu0 %vm2019_vm3, %v2110_v29 }
 0x812   : > { %8470 = vmatmul.mubr.msk.bf16.gmra.mrb[12].mxu0 %vm2019_vm3, %v2111_v30 }
 0x813   : > { %8481 = vmatprep.mubr.msk.bf16.mxu0 %vm1929_vm2, %v2211_v31 }
 0x816   : > { %8480 = vmatpush3.bf16.xpose.msra.mxu0 %v2248_v33 }
 0x81d   : > { %8482 = vmatmul.mubr.msk.bf16.vlgmr.msra.gmra.mrb[16].mxu0 %vm1929_vm2, %v2213_v34 }
 0x81e   : > { %8485 = vmatprep.mubr.msk.bf16.mxu0 %vm1929_vm2, %v2215_v36 }
 0x825   : > { %8486 = vmatmul.mubr.msk.bf16.gmra.mrb[20].mxu0 %vm1929_vm2, %v2217_v32 }
 0x8ac   : > { %v10681_v38 = vpop.f32.mrb[8].mxu0 }
 0x8ad   : > { %v10683_v39 = vpop.f32.mrb[9].mxu0 }
 0x8ae   : > { %v10685_v40 = vpop.f32.mrb[10].mxu0 }
 0x8af   : > { %v10687_v41 = vpop.f32.mrb[11].mxu0 }
 0x8e5   : > { %v10689_v42 = vpop.f32.mrb[12].mxu0 }
 0x8e6   : > { %v10691_v43 = vpop.f32.mrb[13].mxu0 }
 0x8e7   : > { %v10693_v46 = vpop.f32.mrb[14].mxu0 }
 0x8e8   : > { %v10695_v10 = vpop.f32.mrb[15].mxu0 }
 0x8f0   : > { %v8483_v48 = vpop.f32.mrb[16].mxu0 }
 0x8f1   : > { %v2284_v54 = vpop.f32.mrb[17].mxu0  ;;  %v2293_v56 = vadd.f32 %v8483_v48, %v7911_v53 }
 0x8f2   : > { %v2285_v28 = vadd.f32 %v7909_v26, %v2284_v54  ;;  %v8484_v35 = vpop.f32.mrb[18].mxu0 }
 0x8f3   : > { %v2287_v45 = vpop.f32.mrb[19].mxu0  ;;  %v2296_v44 = vadd.f32 %v8484_v35, %v7912_v52  ;;  %v2321_v63 = vsel %vm2019_vm3, %v2293_v56, -inf }
 0x8f4   : > { %v2288_v59 = vadd.f32 %v7910_v55, %v2287_v45  ;;  %v2315_v62 = vsel %vm2019_vm3, %v2285_v28, -inf }
 0x8f5   : > { %2316 = vmax.xlane.f32.xlu0 %v2315_v62  ;;  %v2324_v14 = vsel %vm2019_vm3, %v2296_v44, -inf }
 0x8f6   : > { %v2318_v37 = vsel %vm2019_vm3, %v2288_v59, -inf }
 0x8f7   : > { %2319 = vmax.xlane.f32.xlu1 %v2318_v37 }
 0x8f8   : > { %v8487_v47 = vpop.f32.mrb[20].mxu0 }
 0x8f9   : > { %2322 = vmax.xlane.f32.xlu0 %v2321_v63  ;;  %v2300_v50 = vpop.f32.mrb[21].mxu0  ;;  %v2309_v18 = vadd.f32 %v8487_v47, %v7915_v6 }
 0x8fa   : > { %v8488_v51 = vpop.f32.mrb[22].mxu0  ;;  %v2301_v8 = vadd.f32 %v7913_v57, %v2300_v50 }
 0x8fb   : > { %v2303_v7 = vpop.f32.mrb[23].mxu0  ;;  %v2312_v15 = vadd.f32 %v8488_v51, %v7916_v60  ;;  %v2333_v21 = vsel %vm2019_vm3, %v2309_v18, -inf }
 0x8fc   : > { %v2304_v9 = vadd.f32 %v7914_v3, %v2303_v7  ;;  %v2327_v19 = vsel %vm2019_vm3, %v2301_v8, -inf }
 0x8fd   : > { %2325 = vmax.xlane.f32.xlu0 %v2324_v14  ;;  %v2336_v20 = vsel %vm2019_vm3, %v2312_v15, -inf }
 0x8fe   : > { %v2330_v16 = vsel %vm2019_vm3, %v2304_v9, -inf }
 0x8ff   : > { %2331 = vmax.xlane.f32.xlu1 %v2330_v16 }
 0x901   : > { %2328 = vmax.xlane.f32.xlu0 %v2327_v19 }
 0x903   : > { %2337 = vmax.xlane.f32.xlu1 %v2336_v20 }
 0x905   : > { %2334 = vmax.xlane.f32.xlu0 %v2333_v21 }
 0x91b   : > { %2407 = vrot.lane.b32.xlu0 %v10563_v2, %s12078_s10 }
 0x982   : > { %v2317_v22 = vpop.xlane.xlu0 %2316 }
 0x983   : > { %v2339_v23 = vsub.f32 %v2285_v28, %v2317_v22 }
 0x984   : > { %v2320_v24 = vpop.xlane.xlu1 %2319 }
 0x985   : > { %v2347_v29 = vmul.f32 1.442695, %v2339_v23  ;;  %v2340_v30 = vsub.f32 %v2288_v59, %v2320_v24 }
 0x986   : > { %v2323_v25 = vpop.xlane.xlu0 %2322 }
 0x987   : > { %v2341_v27 = vsub.f32 %v2293_v56, %v2323_v25  ;;  %v2349_v32 = vmul.f32 1.442695, %v2340_v30 }
 0x989   : > { %v2351_v31 = vmul.f32 1.442695, %v2341_v27 }
 0x98a   : > { %v2326_v33 = vpop.xlane.xlu0 %2325 }
 0x98b   : > { %9404 = vpow2.f32 %v2351_v31  ;;  %v2342_v34 = vsub.f32 %v2296_v44, %v2326_v33 }
 0x98c   : > { %v2332_v36 = vpop.xlane.xlu1 %2331  ;;  %9406 = vpow2.f32 %v2347_v29 }
 0x98d   : > { %v2353_v26 = vmul.f32 1.442695, %v2342_v34  ;;  %v2344_v44 = vsub.f32 %v2304_v9, %v2332_v36 }
 0x98e   : > { %v2329_v48 = vpop.xlane.xlu0 %2328 }
 0x98f   : > { %9408 = vpow2.f32 %v2353_v26  ;;  %v2343_v53 = vsub.f32 %v2301_v8, %v2329_v48  ;;  %v2357_v3 = vmul.f32 1.442695, %v2344_v44  ;;  %v9215_v44 = vld [vmem:[%s12135_s8 + $0x8] sm:$0xff]  }
 0x990   : > { %9410 = vpow2.f32 %v2349_v32  ;;  %v2338_v2 = vpop.xlane.xlu1 %2337 }
 0x991   : > { %v2355_v35 = vmul.f32 1.442695, %v2343_v53  ;;  %v2346_v45 = vsub.f32 %v2312_v15, %v2338_v2 }
 0x992   : > { %v2335_v54 = vpop.xlane.xlu0 %2334 }
 0x993   : > { %v2345_v55 = vsub.f32 %v2309_v18, %v2335_v54  ;;  %v2361_v47 = vmul.f32 1.442695, %v2346_v45 }
 0x995   : > { %v10715_v28 = vpop.eup %9404  ;;  %v2359_v56 = vmul.f32 1.442695, %v2345_v55 }
 0x996   : > { %v2408_v59 = vpop.permute.xlu0 %2407  ;;  %v2369_v62 = vsel %vm2019_vm3, %v10715_v28, 0.0  ;;  %v9407_v52 = vpop.eup %9406 }
 0x997   : > { %9412 = vpow2.f32 %v2359_v56  ;;  %2370 = vadd.xlane.f32.xlu0 %v2369_v62  ;;  %8489 = vmatprep.subr.bf16.mxu0 %v2408_v59  ;;  %v2363_v63 = vsel %vm2019_vm3, %v9407_v52, 0.0 }
 0x998   : > { %8969 = vmatprep.subr.bf16.mxu1 %v2408_v59  ;;  %8490 = vmatpush3.bf16.msra.mxu0 %v2408_v59  ;;  %9414 = vpow2.f32 %v2355_v35 }
 0x999   : > { %v10719_v37 = vpop.eup %9408  ;;  %8973 = vmatpush3.bf16.msra.mxu1 %v2408_v59  ;;  %9416 = vpow2.f32 %v2361_v47 }
 0x99a   : > { %v2372_v50 = vsel %vm2019_vm3, %v10719_v37, 0.0  ;;  %v9411_v57 = vpop.eup %9410  ;;  %9418 = vpow2.f32 %v2357_v3 }
 0x99b   : > { %2364 = vadd.xlane.f32.xlu0 %v2363_v63  ;;  %2373 = vadd.xlane.f32.xlu1 %v2372_v50  ;;  %v2366_v51 = vsel %vm2019_vm3, %v9411_v57, 0.0 }
 0x99f   : > { %2367 = vadd.xlane.f32.xlu1 %v2366_v51 }
 0x9a1   : > { %v9413_v60 = vpop.eup %9412 }
 0x9a2   : > { %v2381_v7 = vsel %vm2019_vm3, %v9413_v60, 0.0  ;;  %v9415_v8 = vpop.eup %9414 }
 0x9a3   : > { %2382 = vadd.xlane.f32.xlu1 %v2381_v7  ;;  %v2375_v9 = vsel %vm2019_vm3, %v9415_v8, 0.0  ;;  %v9417_v14 = vpop.eup %9416 }
 0x9a4   : > { %v2384_v6 = vsel %vm2019_vm3, %v9417_v14, 0.0  ;;  %v9419_v15 = vpop.eup %9418 }
 0x9a5   : > { %v2378_v16 = vsel %vm2019_vm3, %v9419_v15, 0.0 }
 0x9a7   : > { %2376 = vadd.xlane.f32.xlu1 %v2375_v9 }
 0x9ab   : > { %2385 = vadd.xlane.f32.xlu1 %v2384_v6 }
 0x9af   : > { %2379 = vadd.xlane.f32.xlu1 %v2378_v16 }
 0x9b1   : > { %2411 = vrot.lane.b32.xlu0 %v10573_v12, %s12078_s10 }
 0x9b5   : > { %2413 = vrot.lane.b32.xlu0 %v10571_v11, %s12078_s10 }
 0x9c0   : > { %2409 = vrot.lane.b32.xlu1 %v10561_v0, %s12078_s10 }
 0xa24   : > { %v2371_v18 = vpop.xlane.xlu0 %2370 }
 0xa28   : > { %v2374_v19 = vpop.xlane.xlu1 %2373  ;;  %v2365_v20 = vpop.xlane.xlu0 %2364 }
 0xa29   : > { %9420 = vrcp.f32 %v2365_v20 }
 0xa2c   : > { %v2368_v21 = vpop.xlane.xlu1 %2367  ;;  %v2412_v30 = vpop.permute.xlu0 %2411 }
 0xa2d   : > { %9422 = vrcp.f32 %v2368_v21 }
 0xa2e   : > { %9424 = vrcp.f32 %v2371_v18 }
 0xa2f   : > { %9426 = vrcp.f32 %v2374_v19 }
 0xa30   : > { %v2383_v22 = vpop.xlane.xlu1 %2382  ;;  %v2414_v48 = vpop.permute.xlu0 %2413 }
 0xa33   : > { %v9421_v24 = vpop.eup %9420 }
 0xa34   : > { %v2377_v23 = vpop.xlane.xlu1 %2376  ;;  %v2395_v29 = vmul.f32 %v9421_v24, %v9407_v52 }
 0xa37   : > { %v9423_v25 = vpop.eup %9422 }
 0xa38   : > { %v2386_v27 = vpop.xlane.xlu1 %2385  ;;  %v2396_v12 = vmul.f32 %v9423_v25, %v9411_v57  ;;  %v9425_v33 = vpop.eup %9424 }
 0xa39   : > { %9428 = vrcp.f32 %v2386_v27  ;;  %v9427_v34 = vpop.eup %9426  ;;  %v2397_v45 = vmul.f32 %v9425_v33, %v10715_v28 }
 0xa3a   : > { %v2403_v11 = vpack.c.bf16 %v2396_v12, %v2395_v29  ;;  %9430 = vrcp.f32 %v2377_v23  ;;  %v2398_v2 = vmul.f32 %v9427_v34, %v10719_v37  ;;  %v9214_v37 = vld [vmem:[%s12135_s8] sm:$0xff]  }
 0xa3b   : > { %9432 = vrcp.f32 %v2383_v22 }
 0xa3c   : > { %v2380_v0 = vpop.xlane.xlu1 %2379  ;;  %8497 = vmatprep.mubr.msk.bf16.mxu0 %vm2019_vm3, %v2403_v11  ;;  %v2404_v62 = vpack.c.bf16 %v2398_v2, %v2397_v45 }
 0xa3d   : > { %9434 = vrcp.f32 %v2380_v0 }
 0xa40   : > { %v2410_v31 = vpop.permute.xlu1 %2409 }
 0xa41   : > { %8491 = vmatprep.subr.bf16.mxu0 %v2410_v31  ;;  %8970 = vmatprep.subr.bf16.mxu1 %v2410_v31 }
 0xa42   : > { %8492 = vmatpush3.bf16.msra.mxu0 %v2410_v31  ;;  %8974 = vmatpush3.bf16.msra.mxu1 %v2410_v31 }
 0xa43   : > { %8493 = vmatprep.subr.bf16.mxu0 %v2412_v30  ;;  %8971 = vmatprep.subr.bf16.mxu1 %v2412_v30  ;;  %v9429_v36 = vpop.eup %9428 }
 0xa44   : > { %v9431_v32 = vpop.eup %9430  ;;  %v2402_v54 = vmul.f32 %v9429_v36, %v9417_v14  ;;  %v7931_v36 = vld [vmem:[%s10063_s14] ss:$0 sm:$0xff] }
 0xa45   : > { %v9433_v26 = vpop.eup %9432  ;;  %v2399_v55 = vmul.f32 %v9431_v32, %v9415_v8 }
 0xa46   : > { %8494 = vmatpush3.bf16.msra.mxu0 %v2412_v30  ;;  %8975 = vmatpush3.bf16.msra.mxu1 %v2412_v30  ;;  %v2401_v56 = vmul.f32 %v9433_v26, %v9413_v60 }
 0xa47   : > { %v9435_v53 = vpop.eup %9434  ;;  %8495 = vmatprep.subr.bf16.mxu0 %v2414_v48  ;;  %8972 = vmatprep.subr.bf16.mxu1 %v2414_v48 }
 0xa48   : > { %v2400_v35 = vmul.f32 %v9435_v53, %v9419_v15  ;;  %v2406_v52 = vpack.c.bf16 %v2402_v54, %v2401_v56 }
 0xa4a   : > { %8496 = vmatpush3.bf16.msra.mxu0 %v2414_v48  ;;  %8976 = vmatpush3.bf16.msra.mxu1 %v2414_v48  ;;  %v2405_v59 = vpack.c.bf16 %v2400_v35, %v2399_v55 }
 0xa4b   : > { %8505 = vmatprep.subr.bf16.mxu1 %v9214_v37 }
 0xa4c   : > { %8501 = vmatprep.mubr.msk.bf16.mxu1 %vm2019_vm3, %v2405_v59 }
 0xa4d   : > { %8498 = vmatmul.mubr.msk.bf16.vlgmr.msra.gmra.mrb[24].mxu0 %vm2019_vm3, %v2404_v62  ;;  %8502 = vmatmul.mubr.msk.bf16.vlgmr.msra.gmra.mrb[16].mxu1 %vm2019_vm3, %v2406_v52 }
 0xa4e   : > { %8506 = vmatpush3.bf16.msra.mxu1 %v9214_v37 }
 0xa4f   : > { %8507 = vmatprep.subr.bf16.mxu1 %v9215_v44 }
 0xa52   : > { %8508 = vmatpush3.bf16.msra.mxu1 %v9215_v44 }
 0xb20   : > { %v8499_v47 = vpop.f32.mrb[24].mxu0  ;;  %v8503_v28 = vpop.f32.mrb[16].mxu1 }
 0xb21   : > { %v2465_v63 = vpop.f32.mrb[25].mxu0  ;;  %v2481_v50 = vpop.f32.mrb[17].mxu1 }
 0xb22   : > { %v8500_v57 = vpop.f32.mrb[26].mxu0  ;;  %v8504_v3 = vpop.f32.mrb[18].mxu1 }
 0xb23   : > { %v9144_v51 = vpack.i.bf16 %v8500_v57, %v8499_v47  ;;  %v9154_v60 = vpack.i.bf16 %v8504_v3, %v8503_v28  ;;  %v2468_v7 = vpop.f32.mrb[27].mxu0  ;;  %v2484_v8 = vpop.f32.mrb[19].mxu1 }
 0xb24   : > { %v9139_v9 = vpack.i.bf16 %v2468_v7, %v2465_v63  ;;  %v9149_v14 = vpack.i.bf16 %v2484_v8, %v2481_v50 }
 0xb25   : > { %9145 = vrot.lane.b32.xlu1 %v9144_v51, %s12072_s30 }
 0xb26   : > { %9140 = vrot.lane.b32.xlu0 %v9139_v9, %s12072_s30 }
 0xb29   : > { %9155 = vrot.lane.b32.xlu1 %v9154_v60, %s12072_s30 }
 0xb2a   : > { %9150 = vrot.lane.b32.xlu0 %v9149_v14, %s12072_s30 }
 0xb97   : > { %v9146_v6 = vpop.permute.xlu1 %9145 }
 0xb98   : > { %v9148_v15 = vunpack.i.h.bf16 %v9146_v6  ;;  %v9147_v16 = vunpack.i.l.bf16 %v9146_v6  ;;  %v9141_v18 = vpop.permute.xlu0 %9140 }
 0xb99   : > { %v9143_v19 = vunpack.i.h.bf16 %v9141_v18  ;;  %v9142_v20 = vunpack.i.l.bf16 %v9141_v18 }
 0xb9a   : > { %v2531_v21 = vsel %vm1929_vm2, %v10685_v40, %v9148_v15  ;;  %v2530_v22 = vsel %vm1929_vm2, %v10681_v38, %v9147_v16 }
 0xb9b   : > { %v2537_v23 = vpack.c.bf16 %v2531_v21, %v2530_v22  ;;  %v2529_v24 = vsel %vm1929_vm2, %v10687_v41, %v9143_v19  ;;  %v2528_v25 = vsel %vm1929_vm2, %v10683_v39, %v9142_v20  ;;  %v9156_v27 = vpop.permute.xlu1 %9155 }
 0xb9c   : > { %v9158_v29 = vunpack.i.h.bf16 %v9156_v27  ;;  %v9157_v12 = vunpack.i.l.bf16 %v9156_v27  ;;  %v9151_v11 = vpop.permute.xlu0 %9150  ;;  %v2536_v0 = vpack.c.bf16 %v2529_v24, %v2528_v25 }
 0xb9d   : > { %v9153_v30 = vunpack.i.h.bf16 %v9151_v11  ;;  %v9152_v31 = vunpack.i.l.bf16 %v9151_v11 }
 0xb9e   : > { %v2535_v40 = vsel %vm1929_vm2, %v10693_v46, %v9158_v29  ;;  %v2534_v38 = vsel %vm1929_vm2, %v10689_v42, %v9157_v12  ;;  %8509 = vmatprep.mubr.msk.bf16.mxu1 %vm1561_vm1, %v2536_v0 }
 0xb9f   : > { %v2533_v41 = vsel %vm1929_vm2, %v10695_v10, %v9153_v30  ;;  %v2532_v39 = vsel %vm1929_vm2, %v10691_v43, %v9152_v31  ;;  %8510 = vmatmul.mubr.msk.bf16.vlgmr.msra.gmra.mrb[20].mxu1 %vm1561_vm1, %v2537_v23  ;;  %v2539_v33 = vpack.c.bf16 %v2535_v40, %v2534_v38 }
 0xba0   : > { %v2538_v34 = vpack.c.bf16 %v2533_v41, %v2532_v39 }
 0xba2   : > { %8513 = vmatprep.mubr.msk.bf16.mxu1 %vm1561_vm1, %v2538_v34 }
 0xba7   : > { %8514 = vmatmul.mubr.msk.bf16.gmra.mrb[24].mxu1 %vm1561_vm1, %v2539_v33 }
 0xc72   : > { %v8511_v46 = vpop.f32.mrb[20].mxu1 }
 0xc73   : > { %v2602_v32 = vpop.f32.mrb[21].mxu1  ;;  %v2635_v42 = vadd.f32 %v8511_v46, %v10468_v61 }
 0xc74   : > { %v2633_v26 = vadd.f32 %v2602_v32, %v10459_v49  ;;  %v8512_v48 = vpop.f32.mrb[22].mxu1 }
 0xc75   : > { %v2605_v10 = vpop.f32.mrb[23].mxu1  ;;  %v10773_v2 = vadd.f32 %v7931_v36, %v2635_v42  ;;  %v2636_v54 = vadd.f32 %v8512_v48, %v10475_v4 }
 0xc76   : > { %v10770_v53 = vadd.f32 %v7931_v36, %v2633_v26  ;;  %v2634_v43 = vadd.f32 %v2605_v10, %v10465_v58 }
 0xc77   : > { %v10782_v56 = vadd.f32 %v7931_v36, %v2636_v54  ;;  %v2662_v4 = vsel %vm1561_vm1, %v10773_v2, 0.0 }
 0xc78   : > { %v10776_v55 = vadd.f32 %v7931_v36, %v2634_v43  ;;  %v2656_v35 = vsel %vm1561_vm1, %v10770_v53, 0.0 }
 0xc79   : > { %2657 = vadd.xlane.f32.xlu0 %v2656_v35  ;;  %v2665_v63 = vsel %vm1561_vm1, %v10782_v56, 0.0  ;;  %v9216_v35 = vld [vmem:[%s10068_s19] sm:$0xff]  }
 0xc7a   : > { %v8515_v45 = vpop.f32.mrb[24].mxu1  ;;  %v2659_v49 = vsel %vm1561_vm1, %v10776_v55, 0.0  ;;  %8517 = vmatprep.subr.bf16.mxu0 %v9216_v35 }
 0xc7b   : > { %2660 = vadd.xlane.f32.xlu1 %v2659_v49  ;;  %v2618_v61 = vpop.f32.mrb[25].mxu1  ;;  %v2639_v44 = vadd.f32 %v8515_v45, %v10488_v1  ;;  %8518 = vmatpush3.bf16.msra.mxu0 %v9216_v35  ;;  %v9217_v45 = vld [vmem:[%s10068_s19 + $0x8] sm:$0xff]  }
 0xc7c   : > { %v2637_v58 = vadd.f32 %v2618_v61, %v10478_v5  ;;  %v8516_v59 = vpop.f32.mrb[26].mxu1  ;;  %8519 = vmatprep.subr.bf16.mxu0 %v9217_v45 }
 0xc7d   : > { %2663 = vadd.xlane.f32.xlu0 %v2662_v4  ;;  %v2621_v62 = vpop.f32.mrb[27].mxu1  ;;  %v2640_v52 = vadd.f32 %v8516_v59, %v10494_v17  ;;  %v10800_v57 = vadd.f32 %v7931_v36, %v2639_v44 }
 0xc7e   : > { %v2638_v37 = vadd.f32 %v2621_v62, %v10485_v13  ;;  %v10790_v47 = vadd.f32 %v7931_v36, %v2637_v58 }
 0xc7f   : > { %v10796_v5 = vadd.f32 %v7931_v36, %v2640_v52  ;;  %v2674_v17 = vsel %vm1561_vm1, %v10800_v57, 0.0  ;;  %8520 = vmatpush3.bf16.msra.mxu0 %v9217_v45 }
 0xc80   : > { %v10792_v28 = vadd.f32 %v7931_v36, %v2638_v37  ;;  %v2668_v13 = vsel %vm1561_vm1, %v10790_v47, 0.0 }
 0xc81   : > { %2666 = vadd.xlane.f32.xlu0 %v2665_v63  ;;  %v2677_v1 = vsel %vm1561_vm1, %v10796_v5, 0.0 }
 0xc82   : > { %v2671_v50 = vsel %vm1561_vm1, %v10792_v28, 0.0 }
 0xc83   : > { %2672 = vadd.xlane.f32.xlu1 %v2671_v50 }
 0xc85   : > { %2669 = vadd.xlane.f32.xlu0 %v2668_v13 }
 0xc87   : > { %2678 = vadd.xlane.f32.xlu1 %v2677_v1 }
 0xc89   : > { %2675 = vadd.xlane.f32.xlu0 %v2674_v17 }
 0xd06   : > { %v2658_v3 = vpop.xlane.xlu0 %2657 }
 0xd07   : > { %v2680_v51 = vmul.f32 0.03125, %v2658_v3 }
 0xd08   : > { %v2661_v60 = vpop.xlane.xlu1 %2660 }
 0xd09   : > { %v10809_v7 = vsub.f32 %v10770_v53, %v2680_v51  ;;  %v2681_v8 = vmul.f32 0.03125, %v2661_v60 }
 0xd0a   : > { %v2664_v9 = vpop.xlane.xlu0 %2663 }
 0xd0b   : > { %v10812_v14 = vsub.f32 %v10776_v55, %v2681_v8  ;;  %v2682_v6 = vmul.f32 0.03125, %v2664_v9  ;;  %v2696_v15 = vmul.f32 %v10809_v7, %v10809_v7 }
 0xd0d   : > { %v10817_v16 = vsub.f32 %v10773_v2, %v2682_v6  ;;  %v2704_v18 = vsel %vm1561_vm1, %v2696_v15, 0.0  ;;  %v2697_v19 = vmul.f32 %v10812_v14, %v10812_v14 }
 0xd0e   : > { %v2667_v20 = vpop.xlane.xlu0 %2666  ;;  %2705 = vadd.xlane.f32.xlu0 %v2704_v18 }
 0xd0f   : > { %v2683_v21 = vmul.f32 0.03125, %v2667_v20  ;;  %v2707_v22 = vsel %vm1561_vm1, %v2697_v19, 0.0  ;;  %v2698_v23 = vmul.f32 %v10817_v16, %v10817_v16 }
 0xd10   : > { %2708 = vadd.xlane.f32.xlu1 %v2707_v22  ;;  %v2673_v24 = vpop.xlane.xlu1 %2672 }
 0xd11   : > { %v10826_v25 = vsub.f32 %v10782_v56, %v2683_v21  ;;  %v2685_v27 = vmul.f32 0.03125, %v2673_v24  ;;  %v2710_v29 = vsel %vm1561_vm1, %v2698_v23, 0.0 }
 0xd12   : > { %2711 = vadd.xlane.f32.xlu0 %v2710_v29  ;;  %v2670_v12 = vpop.xlane.xlu0 %2669 }
 0xd13   : > { %v10830_v11 = vsub.f32 %v10792_v28, %v2685_v27  ;;  %v2684_v0 = vmul.f32 0.03125, %v2670_v12  ;;  %v2699_v30 = vmul.f32 %v10826_v25, %v10826_v25 }
 0xd14   : > { %v2679_v31 = vpop.xlane.xlu1 %2678 }
 0xd15   : > { %v10835_v40 = vsub.f32 %v10790_v47, %v2684_v0  ;;  %v2687_v38 = vmul.f32 0.03125, %v2679_v31  ;;  %v2713_v41 = vsel %vm1561_vm1, %v2699_v30, 0.0  ;;  %v2701_v39 = vmul.f32 %v10830_v11, %v10830_v11 }
 0xd16   : > { %v2676_v33 = vpop.xlane.xlu0 %2675  ;;  %2714 = vadd.xlane.f32.xlu1 %v2713_v41 }
 0xd17   : > { %v10841_v34 = vsub.f32 %v10796_v5, %v2687_v38  ;;  %v2686_v46 = vmul.f32 0.03125, %v2676_v33  ;;  %v2700_v36 = vmul.f32 %v10835_v40, %v10835_v40  ;;  %v2719_v26 = vsel %vm1561_vm1, %v2701_v39, 0.0 }
 0xd19   : > { %v10846_v32 = vsub.f32 %v10800_v57, %v2686_v46  ;;  %v2716_v42 = vsel %vm1561_vm1, %v2700_v36, 0.0  ;;  %v2703_v48 = vmul.f32 %v10841_v34, %v10841_v34 }
 0xd1a   : > { %2717 = vadd.xlane.f32.xlu0 %v2716_v42  ;;  %2720 = vadd.xlane.f32.xlu1 %v2719_v26  ;;  %v9218_v42 = vld [vmem:[%s12158_s1] sm:$0xff]   ;;  %v9223_v26 = vld [vmem:[%s12158_s1 + $0x28] sm:$0xff]  }
 0xd1b   : > { %v2702_v10 = vmul.f32 %v10846_v32, %v10846_v32  ;;  %v2725_v54 = vsel %vm1561_vm1, %v2703_v48, 0.0  ;;  %8529 = vmatprep.subr.bf16.mxu1 %v9218_v42  ;;  %v9224_v48 = vld [vmem:[%s12158_s1 + $0x30] sm:$0xff]  }
 0xd1c   : > { %8530 = vmatpush3.bf16.msra.mxu1 %v9218_v42 }
 0xd1d   : > { %v2722_v43 = vsel %vm1561_vm1, %v2702_v10, 0.0  ;;  %v9225_v10 = vld [vmem:[%s12158_s1 + $0x38] sm:$0xff]  }
 0xd1e   : > { %2723 = vadd.xlane.f32.xlu0 %v2722_v43  ;;  %2726 = vadd.xlane.f32.xlu1 %v2725_v54  ;;  %v7932_v43 = vld [vmem:[%s12159_s2] ss:$0 sm:$0xff]  ;;  %s12163_s2 = sld [smem:[#allocation23_spill]] }
 0xd9b   : > { %v2706_v49 = vpop.xlane.xlu0 %2705 }
 0xd9c   : > { %v2728_v61 = vmul.f32 0.03125, %v2706_v49 }
 0xd9d   : > { %v2709_v58 = vpop.xlane.xlu1 %2708 }
 0xd9e   : > { %v2736_v59 = vadd.f32 1e-05, %v2728_v61  ;;  %v2729_v4 = vmul.f32 0.03125, %v2709_v58 }
 0xd9f   : > { %v2712_v62 = vpop.xlane.xlu0 %2711 }
 0xda0   : > { %9436 = vrsqrt.f32 %v2736_v59  ;;  %v2737_v52 = vadd.f32 1e-05, %v2729_v4  ;;  %v2730_v37 = vmul.f32 0.03125, %v2712_v62 }
 0xda2   : > { %9438 = vrsqrt.f32 %v2737_v52  ;;  %v2738_v44 = vadd.f32 1e-05, %v2730_v37 }
 0xda3   : > { %v2715_v63 = vpop.xlane.xlu1 %2714 }
 0xda4   : > { %v2731_v50 = vmul.f32 0.03125, %v2715_v63  ;;  %9440 = vrsqrt.f32 %v2738_v44 }
 0xda6   : > { %v2739_v13 = vadd.f32 1e-05, %v2731_v50 }
 0xda7   : > { %v2718_v1 = vpop.xlane.xlu0 %2717  ;;  %v2721_v17 = vpop.xlane.xlu1 %2720 }
 0xda8   : > { %9442 = vrsqrt.f32 %v2739_v13  ;;  %v2732_v3 = vmul.f32 0.03125, %v2718_v1  ;;  %v2733_v51 = vmul.f32 0.03125, %v2721_v17 }
 0xdaa   : > { %v9437_v60 = vpop.eup %9436  ;;  %v2740_v8 = vadd.f32 1e-05, %v2732_v3  ;;  %v2741_v9 = vadd.f32 1e-05, %v2733_v51 }
 0xdab   : > { %v2724_v6 = vpop.xlane.xlu0 %2723  ;;  %v2727_v15 = vpop.xlane.xlu1 %2726  ;;  %v2752_v21 = vmul.f32 %v9437_v60, %v10809_v7 }
 0xdac   : > { %v9439_v18 = vpop.eup %9438  ;;  %9444 = vrsqrt.f32 %v2740_v8  ;;  %v2734_v19 = vmul.f32 0.03125, %v2724_v6  ;;  %v2735_v20 = vmul.f32 0.03125, %v2727_v15 }
 0xdad   : > { %9446 = vrsqrt.f32 %v2741_v9  ;;  %v2753_v22 = vmul.f32 %v9439_v18, %v10812_v14 }
 0xdae   : > { %v2742_v23 = vadd.f32 1e-05, %v2734_v19  ;;  %v2743_v24 = vadd.f32 1e-05, %v2735_v20  ;;  %v9441_v29 = vpop.eup %9440 }
 0xdaf   : > { %v2760_v27 = vpack.c.bf16 %v2753_v22, %v2752_v21  ;;  %v2754_v0 = vmul.f32 %v9441_v29, %v10817_v16 }
 0xdb0   : > { %9448 = vrsqrt.f32 %v2742_v23 }
 0xdb1   : > { %9450 = vrsqrt.f32 %v2743_v24  ;;  %8521 = vmatprep.mubr.msk.bf16.mxu0 %vm1561_vm1, %v2760_v27 }
 0xdb2   : > { %v9443_v12 = vpop.eup %9442 }
 0xdb3   : > { %v2755_v30 = vmul.f32 %v9443_v12, %v10826_v25 }
 0xdb5   : > { %v2761_v31 = vpack.c.bf16 %v2755_v30, %v2754_v0 }
 0xdb6   : > { %v9445_v38 = vpop.eup %9444 }
 0xdb7   : > { %v9447_v7 = vpop.eup %9446  ;;  %8522 = vmatmul.mubr.msk.bf16.vlgmr.msra.gmra.mrb[28].mxu0 %vm1561_vm1, %v2761_v31  ;;  %v2756_v14 = vmul.f32 %v9445_v38, %v10835_v40  ;;  %v9220_v40 = vld [vmem:[%s12158_s1 + $0x10] sm:$0xff]  }
 0xdb8   : > { %v2757_v41 = vmul.f32 %v9447_v7, %v10830_v11  ;;  %v9219_v11 = vld [vmem:[%s12158_s1 + $0x8] sm:$0xff]  }
 0xdb9   : > { %8531 = vmatprep.subr.bf16.mxu1 %v9219_v11 }
 0xdba   : > { %v9449_v39 = vpop.eup %9448  ;;  %v2762_v33 = vpack.c.bf16 %v2757_v41, %v2756_v14  ;;  %8532 = vmatpush3.bf16.msra.mxu1 %v9219_v11 }
 0xdbb   : > { %v9451_v46 = vpop.eup %9450  ;;  %v2758_v16 = vmul.f32 %v9449_v39, %v10846_v32  ;;  %8533 = vmatprep.subr.bf16.mxu1 %v9220_v40  ;;  %v9221_v32 = vld [vmem:[%s12158_s1 + $0x18] sm:$0xff]  }
 0xdbc   : > { %8525 = vmatprep.mubr.msk.bf16.mxu0 %vm1561_vm1, %v2762_v33  ;;  %v2759_v25 = vmul.f32 %v9451_v46, %v10841_v34  ;;  %v9222_v34 = vld [vmem:[%s12158_s1 + $0x20] sm:$0xff]  }
 0xdbe   : > { %v2763_v36 = vpack.c.bf16 %v2759_v25, %v2758_v16  ;;  %8534 = vmatpush3.bf16.msra.mxu1 %v9220_v40 }
 0xdbf   : > { %8535 = vmatprep.subr.bf16.mxu1 %v9221_v32 }
 0xdc0   : > { %8526 = vmatmul.mubr.msk.bf16.gmra.mrb[32].mxu0 %vm1561_vm1, %v2763_v36 }
 0xdc2   : > { %8536 = vmatpush3.bf16.msra.mxu1 %v9221_v32 }
 0xdc3   : > { %8537 = vmatprep.subr.bf16.mxu1 %v9222_v34 }
 0xdc6   : > { %8538 = vmatpush3.bf16.msra.mxu1 %v9222_v34 }
 0xdc7   : > { %8539 = vmatprep.subr.bf16.mxu1 %v9223_v26 }
 0xdca   : > { %8540 = vmatpush3.bf16.msra.mxu1 %v9223_v26 }
 0xdcb   : > { %8541 = vmatprep.subr.bf16.mxu1 %v9224_v48 }
 0xdce   : > { %8542 = vmatpush3.bf16.msra.mxu1 %v9224_v48 }
 0xdcf   : > { %8543 = vmatprep.subr.bf16.mxu1 %v9225_v10 }
 0xdd2   : > { %8544 = vmatpush3.bf16.msra.mxu1 %v9225_v10 }
 0xe8a   : > { %v8523_v54 = vpop.f32.mrb[28].mxu0 }
 0xe8b   : > { %v10879_v35 = vadd.f32 %v8523_v54, %v7932_v43  ;;  %v2833_v45 = vpop.f32.mrb[29].mxu0 }
 0xe8c   : > { %v10881_v49 = vadd.f32 %v7932_v43, %v2833_v45  ;;  %v8524_v61 = vpop.f32.mrb[30].mxu0 }
 0xe8d   : > { %v2866_v58 = vand.u32 2147483647, %v10879_v35  ;;  %v10884_v59 = vadd.f32 %v8524_v61, %v7932_v43  ;;  %v2836_v4 = vpop.f32.mrb[31].mxu0  ;;  %vm3026_vm4 = vcmp.lt.f32.partialorder %v10879_v35, 0.0 }
 0xe8e   : > { %v2864_v62 = vand.u32 2147483647, %v10881_v49  ;;  %v10887_v52 = vadd.f32 %v7932_v43, %v2836_v4  ;;  %vm3024_vm5 = vcmp.lt.f32.partialorder %v10881_v49, 0.0 }
 0xe8f   : > { %v2874_v37 = vmul.f32 0.70710677, %v2866_v58  ;;  %v2867_v44 = vand.u32 2147483647, %v10884_v59  ;;  %vm3027_vm6 = vcmp.lt.f32.partialorder %v10884_v59, 0.0 }
 0xe90   : > { %v2872_v63 = vmul.f32 0.70710677, %v2864_v62  ;;  %v2865_v50 = vand.u32 2147483647, %v10887_v52  ;;  %vm3025_vm7 = vcmp.lt.f32.partialorder %v10887_v52, 0.0 }
 0xe91   : > { %v2882_v13 = vmul.f32 0.3275911, %v2874_v37  ;;  %v2875_v1 = vmul.f32 0.70710677, %v2867_v44  ;;  %v2978_v12 = vmul.f32 %v2874_v37, %v2874_v37  ;;  %v10910_v44 = vmul.f32 0.5, %v10879_v35 }
 0xe92   : > { %v2880_v17 = vmul.f32 0.3275911, %v2872_v63  ;;  %v2873_v3 = vmul.f32 0.70710677, %v2865_v50  ;;  %v2976_v0 = vmul.f32 %v2872_v63, %v2872_v63 }
 0xe93   : > { %v2890_v51 = vadd.f32 1.0, %v2882_v13  ;;  %v2883_v60 = vmul.f32 0.3275911, %v2875_v1  ;;  %v8527_v8 = vpop.f32.mrb[32].mxu0  ;;  %v2979_v31 = vmul.f32 %v2875_v1, %v2875_v1  ;;  %v2986_v16 = vsub.f32 0.0, %v2978_v12 }
 0xe94   : > { %v2888_v9 = vadd.f32 1.0, %v2880_v17  ;;  %v2881_v6 = vmul.f32 0.3275911, %v2873_v3  ;;  %v2849_v15 = vpop.f32.mrb[33].mxu0  ;;  %v10891_v22 = vadd.f32 %v8527_v8, %v7932_v43  ;;  %v2977_v14 = vmul.f32 %v2873_v3, %v2873_v3 }
 0xe95   : > { %9452 = vrcp.f32 %v2890_v51  ;;  %v2891_v18 = vadd.f32 1.0, %v2883_v60  ;;  %v8528_v19 = vpop.f32.mrb[34].mxu0  ;;  %v10893_v23 = vadd.f32 %v7932_v43, %v2849_v15  ;;  %v2984_v25 = vsub.f32 0.0, %v2976_v0 }
 0xe96   : > { %9454 = vrcp.f32 %v2888_v9  ;;  %v2852_v20 = vpop.f32.mrb[35].mxu0  ;;  %v2889_v21 = vadd.f32 1.0, %v2881_v6  ;;  %v10895_v24 = vadd.f32 %v8528_v19, %v7932_v43  ;;  %v2870_v29 = vand.u32 2147483647, %v10891_v22 }
 0xe97   : > { %v10897_v27 = vadd.f32 %v7932_v43, %v2852_v20  ;;  %9456 = vrcp.f32 %v2891_v18  ;;  %v2868_v30 = vand.u32 2147483647, %v10893_v23  ;;  %v2987_v40 = vsub.f32 0.0, %v2979_v31 }
 0xe98   : > { %9458 = vrcp.f32 %v2889_v21  ;;  %v2878_v38 = vmul.f32 0.70710677, %v2870_v29  ;;  %v2871_v7 = vand.u32 2147483647, %v10895_v24  ;;  %v2985_v43 = vsub.f32 0.0, %v2977_v14 }
 0xe99   : > { %v2876_v41 = vmul.f32 0.70710677, %v2868_v30  ;;  %v2869_v39 = vand.u32 2147483647, %v10897_v27  ;;  %v2996_v37 = vmul.f32 1.442695, %v2986_v16 }
 0xe9a   : > { %v2886_v33 = vmul.f32 0.3275911, %v2878_v38  ;;  %v2879_v46 = vmul.f32 0.70710677, %v2871_v7  ;;  %v2982_v34 = vmul.f32 %v2878_v38, %v2878_v38  ;;  %v2992_v51 = vmul.f32 1.442695, %v2984_v25 }
 0xe9b   : > { %v2884_v36 = vmul.f32 0.3275911, %v2876_v41  ;;  %v2877_v42 = vmul.f32 0.70710677, %v2869_v39  ;;  %v2980_v58 = vmul.f32 %v2876_v41, %v2876_v41  ;;  %v2998_v8 = vmul.f32 1.442695, %v2987_v40 }
 0xe9c   : > { %v2894_v32 = vadd.f32 1.0, %v2886_v33  ;;  %v2887_v26 = vmul.f32 0.3275911, %v2879_v46  ;;  %v2990_v13 = vsub.f32 0.0, %v2982_v34  ;;  %v2983_v1 = vmul.f32 %v2879_v46, %v2879_v46 }
 0xe9d   : > { %v2892_v54 = vadd.f32 1.0, %v2884_v36  ;;  %v2885_v45 = vmul.f32 0.3275911, %v2877_v42  ;;  %v2994_v15 = vmul.f32 1.442695, %v2985_v43  ;;  %v2988_v18 = vsub.f32 0.0, %v2980_v58 }
 0xe9e   : > { %9460 = vrcp.f32 %v2894_v32  ;;  %v2895_v4 = vadd.f32 1.0, %v2887_v26  ;;  %v3004_v12 = vmul.f32 1.442695, %v2990_v13  ;;  %v2991_v0 = vsub.f32 0.0, %v2983_v1 }
 0xe9f   : > { %v10903_v11 = vpop.eup %9452  ;;  %9462 = vrcp.f32 %v2892_v54  ;;  %v2893_v17 = vadd.f32 1.0, %v2885_v45  ;;  %v3000_v14 = vmul.f32 1.442695, %v2988_v18  ;;  %v2981_v41 = vmul.f32 %v2877_v42, %v2877_v42 }
 0xea0   : > { %v10905_v48 = vpop.eup %9454  ;;  %v2906_v10 = vmul.f32 1.0614054, %v10903_v11  ;;  %9464 = vrcp.f32 %v2895_v4  ;;  %v10927_v36 = vmul.f32 0.5, %v10881_v49  ;;  %v3006_v40 = vmul.f32 1.442695, %v2991_v0 }
 0xea1   : > { %v2904_v61 = vmul.f32 1.0614054, %v10905_v48  ;;  %v10912_v63 = vpop.eup %9456  ;;  %9466 = vpow2.f32 %v2996_v37  ;;  %v2989_v45 = vsub.f32 0.0, %v2981_v41  ;;  %v10941_v13 = vmul.f32 0.5, %v10884_v59 }
 0xea2   : > { %v2914_v62 = vadd.f32 -1.4531521, %v2906_v10  ;;  %v2907_v60 = vmul.f32 1.0614054, %v10912_v63  ;;  %v10916_v9 = vpop.eup %9458  ;;  %9468 = vrcp.f32 %v2893_v17  ;;  %vm3030_vm8 = vcmp.lt.f32.partialorder %v10891_v22, 0.0 }
 0xea3   : > { %v2912_v50 = vadd.f32 -1.4531521, %v2904_v61  ;;  %v2905_v21 = vmul.f32 1.0614054, %v10916_v9  ;;  %9470 = vpow2.f32 %v2992_v51  ;;  %vm3031_vm9 = vcmp.lt.f32.partialorder %v10895_v24, 0.0 }
 0xea4   : > { %v2922_v3 = vmul.f32 %v10903_v11, %v2914_v62  ;;  %v2915_v20 = vadd.f32 -1.4531521, %v2907_v60  ;;  %9472 = vpow2.f32 %v2998_v8  ;;  %vm3028_vm10 = vcmp.lt.f32.partialorder %v10893_v23, 0.0 }
 0xea5   : > { %v2920_v6 = vmul.f32 %v10905_v48, %v2912_v50  ;;  %v2913_v38 = vadd.f32 -1.4531521, %v2905_v21  ;;  %9474 = vpow2.f32 %v2994_v15  ;;  %vm3029_vm11 = vcmp.lt.f32.partialorder %v10897_v27, 0.0 }
 0xea6   : > { %v2930_v19 = vadd.f32 1.4214138, %v2922_v3  ;;  %v2923_v31 = vmul.f32 %v10912_v63, %v2915_v20  ;;  %9476 = vpow2.f32 %v3004_v12  ;;  %v3002_v20 = vmul.f32 1.442695, %v2989_v45 }
 0xea7   : > { %v2928_v29 = vadd.f32 1.4214138, %v2920_v6  ;;  %v2921_v46 = vmul.f32 %v10916_v9, %v2913_v38  ;;  %9478 = vpow2.f32 %v3000_v14 }
 0xea8   : > { %v2938_v30 = vmul.f32 %v10903_v11, %v2930_v19  ;;  %v2931_v33 = vadd.f32 1.4214138, %v2923_v31  ;;  %v10924_v16 = vpop.eup %9460  ;;  %9480 = vpow2.f32 %v3006_v40 }
 0xea9   : > { %v2936_v7 = vmul.f32 %v10905_v48, %v2928_v29  ;;  %v10929_v32 = vpop.eup %9462  ;;  %v2929_v42 = vadd.f32 1.4214138, %v2921_v46  ;;  %v2910_v10 = vmul.f32 1.0614054, %v10924_v16  ;;  %9482 = vpow2.f32 %v3002_v20 }
 0xeaa   : > { %v2946_v39 = vadd.f32 -0.28449672, %v2938_v30  ;;  %v2939_v26 = vmul.f32 %v10912_v63, %v2931_v33  ;;  %v2908_v54 = vmul.f32 1.0614054, %v10929_v32  ;;  %v10937_v37 = vpop.eup %9464  ;;  %v3049_v20 = vmul.f32 0.5, %v10887_v52 }
 0xeab   : > { %v2944_v25 = vadd.f32 -0.28449672, %v2936_v7  ;;  %v2937_v4 = vmul.f32 %v10916_v9, %v2929_v42  ;;  %v2918_v62 = vadd.f32 -1.4531521, %v2910_v10  ;;  %v9467_v17 = vpop.eup %9466  ;;  %v2911_v19 = vmul.f32 1.0614054, %v10937_v37 }
 0xeac   : > { %v2954_v34 = vmul.f32 %v10903_v11, %v2946_v39  ;;  %v2947_v58 = vadd.f32 -0.28449672, %v2939_v26  ;;  %v2916_v1 = vadd.f32 -1.4531521, %v2908_v54  ;;  %v10947_v6 = vpop.eup %9468 }
 0xead   : > { %v2952_v43 = vmul.f32 %v10905_v48, %v2944_v25  ;;  %v2945_v60 = vadd.f32 -0.28449672, %v2937_v4  ;;  %v2926_v8 = vmul.f32 %v10924_v16, %v2918_v62  ;;  %v9471_v21 = vpop.eup %9470  ;;  %v2919_v7 = vadd.f32 -1.4531521, %v2911_v19 }
 0xeae   : > { %v2962_v61 = vadd.f32 0.2548296, %v2954_v34  ;;  %v2955_v51 = vmul.f32 %v10912_v63, %v2947_v58  ;;  %v2924_v18 = vmul.f32 %v10929_v32, %v2916_v1  ;;  %v9473_v30 = vpop.eup %9472  ;;  %v2909_v14 = vmul.f32 1.0614054, %v10947_v6 }
 0xeaf   : > { %v2960_v50 = vadd.f32 0.2548296, %v2952_v43  ;;  %v2934_v0 = vadd.f32 1.4214138, %v2926_v8  ;;  %v2927_v26 = vmul.f32 %v10937_v37, %v2919_v7 }
 0xeb0   : > { %v2970_v3 = vmul.f32 %v10903_v11, %v2962_v61  ;;  %v2963_v12 = vadd.f32 0.2548296, %v2955_v51  ;;  %v2953_v11 = vmul.f32 %v10916_v9, %v2945_v60  ;;  %v2932_v38 = vadd.f32 1.4214138, %v2924_v18 }
 0xeb1   : > { %v2968_v15 = vmul.f32 %v10905_v48, %v2960_v50  ;;  %v9475_v48 = vpop.eup %9474  ;;  %v2942_v46 = vmul.f32 %v10924_v16, %v2934_v0  ;;  %v2917_v42 = vadd.f32 -1.4531521, %v2909_v14  ;;  %v2935_v62 = vadd.f32 1.4214138, %v2927_v26 }
 0xeb2   : > { %v3010_v29 = vmul.f32 %v9467_v17, %v2970_v3  ;;  %v2971_v39 = vmul.f32 %v10912_v63, %v2963_v12  ;;  %v2961_v33 = vadd.f32 0.2548296, %v2953_v11  ;;  %v9477_v25 = vpop.eup %9476  ;;  %v2940_v34 = vmul.f32 %v10929_v32, %v2932_v38 }
 0xeb3   : > { %v3008_v31 = vmul.f32 %v9471_v21, %v2968_v15  ;;  %v2950_v45 = vadd.f32 -0.28449672, %v2942_v46  ;;  %v9479_v61 = vpop.eup %9478  ;;  %v2925_v63 = vmul.f32 %v10947_v6, %v2917_v42  ;;  %v2943_v8 = vmul.f32 %v10937_v37, %v2935_v62 }
 0xeb4   : > { %v3018_v41 = vsub.f32 1.0, %v3010_v29  ;;  %v3011_v43 = vmul.f32 %v9473_v30, %v2971_v39  ;;  %v2969_v54 = vmul.f32 %v10916_v9, %v2961_v33  ;;  %v2948_v4 = vadd.f32 -0.28449672, %v2940_v34  ;;  %v9481_v51 = vpop.eup %9480 }
 0xeb5   : > { %v3016_v40 = vsub.f32 1.0, %v3008_v31  ;;  %v2958_v3 = vmul.f32 %v10924_v16, %v2950_v45  ;;  %v2951_v29 = vadd.f32 -0.28449672, %v2943_v8  ;;  %v2933_v12 = vadd.f32 1.4214138, %v2925_v63 }
 0xeb6   : > { %v3034_v10 = vsub.f32 0.0, %v3018_v41  ;;  %v3019_v1 = vsub.f32 1.0, %v3011_v43  ;;  %v3009_v17 = vmul.f32 %v9475_v48, %v2969_v54  ;;  %v2956_v9 = vmul.f32 %v10929_v32, %v2948_v4 }
 0xeb7   : > { %v3032_v58 = vsub.f32 0.0, %v3016_v40  ;;  %v2966_v21 = vadd.f32 0.2548296, %v2958_v3  ;;  %v2959_v7 = vmul.f32 %v10937_v37, %v2951_v29  ;;  %v2941_v14 = vmul.f32 %v10947_v6, %v2933_v12 }
 0xeb8   : > { %v3042_v50 = vsel %vm3026_vm4, %v3034_v10, %v3018_v41  ;;  %v3035_v18 = vsub.f32 0.0, %v3019_v1  ;;  %v3017_v19 = vsub.f32 1.0, %v3009_v17  ;;  %v2964_v35 = vadd.f32 0.2548296, %v2956_v9 }
 0xeb9   : > { %v3040_v60 = vsel %vm3024_vm5, %v3032_v58, %v3016_v40  ;;  %v3058_v15 = vadd.f32 1.0, %v3042_v50  ;;  %v2974_v30 = vmul.f32 %v10924_v16, %v2966_v21  ;;  %v2967_v16 = vadd.f32 0.2548296, %v2959_v7 }
 0xeba   : > { %v3056_v11 = vadd.f32 1.0, %v3040_v60  ;;  %v3043_v0 = vsel %vm3027_vm6, %v3035_v18, %v3019_v1  ;;  %v3033_v49 = vsub.f32 0.0, %v3017_v19  ;;  %v2972_v38 = vmul.f32 %v10929_v32, %v2964_v35 }
 0xebb   : > { %v3059_v31 = vadd.f32 1.0, %v3043_v0  ;;  %v3066_v48 = vmul.f32 %v3058_v15, %v10910_v44  ;;  %v3014_v39 = vmul.f32 %v9477_v25, %v2974_v30  ;;  %v2949_v34 = vadd.f32 -0.28449672, %v2941_v14  ;;  %v9483_v25 = vpop.eup %9482  ;;  %v7947_v0 = vld [vmem:[%s12160_s6] ss:$0 sm:$0xff]  ;;  %s12164_s6 = sld [smem:[#allocation24_spill]] }
 0xebc   : > { %v3041_v41 = vsel %vm3025_vm7, %v3033_v49, %v3017_v19  ;;  %v3012_v46 = vmul.f32 %v9479_v61, %v2972_v38  ;;  %v2975_v26 = vmul.f32 %v10937_v37, %v2967_v16  ;;  %v3064_v42 = vmul.f32 %v3056_v11, %v10927_v36 }
 0xebd   : > { %v3067_v59 = vmul.f32 %v3059_v31, %v10941_v13  ;;  %v3057_v33 = vadd.f32 1.0, %v3041_v41  ;;  %v3022_v40 = vsub.f32 1.0, %v3014_v39  ;;  %v2957_v54 = vmul.f32 %v10947_v6, %v2949_v34 }
 0xebe   : > { %v3020_v43 = vsub.f32 1.0, %v3012_v46  ;;  %v3015_v45 = vmul.f32 %v9481_v51, %v2975_v26  ;;  %v3054_v50 = vmul.f32 0.5, %v10891_v22  ;;  %v3055_v3 = vmul.f32 0.5, %v10895_v24 }
 0xebf   : > { %v3073_v32 = vpack.c.bf16 %v3067_v59, %v3066_v48  ;;  %v3065_v10 = vmul.f32 %v3057_v33, %v3049_v20  ;;  %v3038_v44 = vsub.f32 0.0, %v3022_v40  ;;  %v2965_v13 = vadd.f32 0.2548296, %v2957_v54 }
 0xec0   : > { %v3023_v58 = vsub.f32 1.0, %v3015_v45  ;;  %v3036_v4 = vsub.f32 0.0, %v3020_v43  ;;  %v3052_v21 = vmul.f32 0.5, %v10893_v23  ;;  %v3053_v22 = vmul.f32 0.5, %v10897_v27 }
 0xec1   : > { %v3072_v52 = vpack.c.bf16 %v3065_v10, %v3064_v42  ;;  %v3046_v61 = vsel %vm3030_vm8, %v3038_v44, %v3022_v40  ;;  %v2973_v62 = vmul.f32 %v10947_v6, %v2965_v13  ;;  %vm5120_vm8 = vcmask 785408  }
 0xec2   : > { %v3039_v37 = vsub.f32 0.0, %v3023_v58  ;;  %v3062_v36 = vadd.f32 1.0, %v3046_v61  ;;  %v3044_v17 = vsel %vm3028_vm10, %v3036_v4, %v3020_v43 }
 0xec3   : > { %8545 = vmatprep.mubr.bf16.mxu1 %v3072_v52  ;;  %v3013_v63 = vmul.f32 %v9483_v25, %v2973_v62  ;;  %v3060_v15 = vadd.f32 1.0, %v3044_v17 }
 0xec4   : > { %8546 = vmatmul.mubr.bf16.vlgmr.msra.gmra.mrb[28].mxu1 %v3073_v32  ;;  %v3047_v1 = vsel %vm3031_vm9, %v3039_v37, %v3023_v58  ;;  %v3070_v8 = vmul.f32 %v3062_v36, %v3054_v50  ;;  %vm10007_vm9 = vmmov 0  }
 0xec5   : > { %v3063_v51 = vadd.f32 1.0, %v3047_v1  ;;  %v3021_v60 = vsub.f32 1.0, %v3013_v63  ;;  %v3068_v29 = vmul.f32 %v3060_v15, %v3052_v21 }
 0xec7   : > { %v3037_v9 = vsub.f32 0.0, %v3021_v60  ;;  %v3071_v6 = vmul.f32 %v3063_v51, %v3055_v3 }
 0xec9   : > { %v3045_v18 = vsel %vm3029_vm11, %v3037_v9, %v3021_v60  ;;  %v3075_v19 = vpack.c.bf16 %v3071_v6, %v3070_v8 }
 0xeca   : > { %v3061_v35 = vadd.f32 1.0, %v3045_v18 }
 0xecc   : > { %v3069_v12 = vmul.f32 %v3061_v35, %v3053_v22 }
 0xece   : > { %v3074_v11 = vpack.c.bf16 %v3069_v12, %v3068_v29 }
 0xed0   : > { %8549 = vmatprep.mubr.bf16.mxu1 %v3074_v11 }
 0xed1   : > { %8550 = vmatmul.mubr.bf16.gmra.mrb[32].mxu1 %v3075_v19 }
 0xf97   : > { %v8547_v24 = vpop.f32.mrb[28].mxu1 }
 0xf98   : > { %v3174_v49 = vpop.f32.mrb[29].mxu1  ;;  %v3207_v30 = vadd.f32 %v8547_v24, %v10773_v2 }
 0xf99   : > { %v3205_v31 = vadd.f32 %v3174_v49, %v10770_v53  ;;  %v8548_v38 = vpop.f32.mrb[30].mxu1 }
 0xf9a   : > { %v3177_v7 = vpop.f32.mrb[31].mxu1  ;;  %v3208_v23 = vadd.f32 %v8548_v38, %v10782_v56  ;;  %v10999_v48 = vadd.f32 %v7947_v0, %v3207_v30 }
 0xf9b   : > { %v10995_v14 = vadd.f32 %v7947_v0, %v3205_v31  ;;  %v3206_v27 = vadd.f32 %v3177_v7, %v10776_v55 }
 0xf9c   : > { %v11005_v39 = vadd.f32 %v7947_v0, %v3208_v23  ;;  %v3234_v2 = vsel %vm1561_vm1, %v10999_v48, 0.0 }
 0xf9d   : > { %v11001_v41 = vadd.f32 %v7947_v0, %v3206_v27  ;;  %v3228_v20 = vsel %vm1561_vm1, %v10995_v14, 0.0 }
 0xf9e   : > { %3229 = vadd.xlane.f32.xlu0 %v3228_v20  ;;  %v3237_v55 = vsel %vm1561_vm1, %v11005_v39, 0.0  ;;  %v9226_v20 = vld [vmem:[%s12161_s18] sm:$0xff]   ;;  %s12165_s18 = sld [smem:[#allocation25_spill]] }
 0xf9f   : > { %v3231_v53 = vsel %vm1561_vm1, %v11001_v41, 0.0  ;;  %8553 = vmatprep.subr.bf16.mxu0 %v9226_v20 }
 0xfa0   : > { %3232 = vadd.xlane.f32.xlu1 %v3231_v53  ;;  %8554 = vmatpush3.bf16.msra.mxu0 %v9226_v20  ;;  %v9227_v53 = vld [vmem:[%s12162_s11 + $0x8] sm:$0xff]  }
 0xfa1   : > { %8555 = vmatprep.subr.bf16.mxu0 %v9227_v53 }
 0xfa2   : > { %3235 = vadd.xlane.f32.xlu0 %v3234_v2 }
 0xfa4   : > { %3238 = vadd.xlane.f32.xlu1 %v3237_v55  ;;  %v8551_v56 = vpop.f32.mrb[32].mxu1  ;;  %8556 = vmatpush3.bf16.msra.mxu0 %v9227_v53 }
 0xfa5   : > { %v3190_v59 = vpop.f32.mrb[33].mxu1  ;;  %v3211_v33 = vadd.f32 %v8551_v56, %v10800_v57 }
 0xfa6   : > { %v3209_v46 = vadd.f32 %v3190_v59, %v10790_v47  ;;  %v8552_v16 = vpop.f32.mrb[34].mxu1 }
 0xfa7   : > { %v3193_v40 = vpop.f32.mrb[35].mxu1  ;;  %v3212_v32 = vadd.f32 %v8552_v16, %v10796_v5  ;;  %v11019_v42 = vadd.f32 %v7947_v0, %v3211_v33 }
 0xfa8   : > { %v11015_v34 = vadd.f32 %v7947_v0, %v3209_v46  ;;  %v3210_v26 = vadd.f32 %v3193_v40, %v10792_v28 }
 0xfa9   : > { %v11025_v43 = vadd.f32 %v7947_v0, %v3212_v32  ;;  %v3246_v57 = vsel %vm1561_vm1, %v11019_v42, 0.0 }
 0xfaa   : > { %v11021_v10 = vadd.f32 %v7947_v0, %v3210_v26  ;;  %v3240_v44 = vsel %vm1561_vm1, %v11015_v34, 0.0 }
 0xfab   : > { %3241 = vadd.xlane.f32.xlu0 %v3240_v44  ;;  %v3249_v28 = vsel %vm1561_vm1, %v11025_v43, 0.0 }
 0xfac   : > { %v3243_v47 = vsel %vm1561_vm1, %v11021_v10, 0.0 }
 0xfad   : > { %3244 = vadd.xlane.f32.xlu1 %v3243_v47 }
 0xfaf   : > { %3247 = vadd.xlane.f32.xlu0 %v3246_v57 }
 0xfb1   : > { %3250 = vadd.xlane.f32.xlu1 %v3249_v28 }
0x102b   : > { %v3230_v5 = vpop.xlane.xlu0 %3229 }
0x102c   : > { %v3252_v54 = vmul.f32 0.03125, %v3230_v5 }
0x102d   : > { %v3233_v45 = vpop.xlane.xlu1 %3232 }
0x102e   : > { %v11034_v52 = vsub.f32 %v10995_v14, %v3252_v54  ;;  %v3253_v13 = vmul.f32 0.03125, %v3233_v45 }
0x102f   : > { %v3236_v25 = vpop.xlane.xlu0 %3235 }
0x1030   : > { %v11037_v61 = vsub.f32 %v11001_v41, %v3253_v13  ;;  %v3254_v58 = vmul.f32 0.03125, %v3236_v25  ;;  %v3268_v4 = vmul.f32 %v11034_v52, %v11034_v52 }
0x1031   : > { %v3239_v62 = vpop.xlane.xlu1 %3238 }
0x1032   : > { %v11042_v37 = vsub.f32 %v10999_v48, %v3254_v58  ;;  %v3255_v36 = vmul.f32 0.03125, %v3239_v62  ;;  %v3276_v63 = vsel %vm1561_vm1, %v3268_v4, 0.0  ;;  %v3269_v50 = vmul.f32 %v11037_v61, %v11037_v61 }
0x1033   : > { %3277 = vadd.xlane.f32.xlu0 %v3276_v63 }
0x1034   : > { %v11048_v1 = vsub.f32 %v11005_v39, %v3255_v36  ;;  %v3279_v17 = vsel %vm1561_vm1, %v3269_v50, 0.0  ;;  %v3270_v3 = vmul.f32 %v11042_v37, %v11042_v37 }
0x1035   : > { %3280 = vadd.xlane.f32.xlu1 %v3279_v17 }
0x1036   : > { %v3282_v51 = vsel %vm1561_vm1, %v3270_v3, 0.0  ;;  %v3271_v60 = vmul.f32 %v11048_v1, %v11048_v1 }
0x1037   : > { %3283 = vadd.xlane.f32.xlu0 %v3282_v51 }
0x1038   : > { %v3285_v9 = vsel %vm1561_vm1, %v3271_v60, 0.0  ;;  %v3242_v8 = vpop.xlane.xlu0 %3241 }
0x1039   : > { %3286 = vadd.xlane.f32.xlu1 %v3285_v9  ;;  %v3256_v6 = vmul.f32 0.03125, %v3242_v8 }
0x103a   : > { %v3245_v15 = vpop.xlane.xlu1 %3244 }
0x103b   : > { %v11058_v18 = vsub.f32 %v11015_v34, %v3256_v6  ;;  %v3257_v19 = vmul.f32 0.03125, %v3245_v15 }
0x103c   : > { %v3248_v21 = vpop.xlane.xlu0 %3247 }
0x103d   : > { %v11061_v22 = vsub.f32 %v11021_v10, %v3257_v19  ;;  %v3258_v35 = vmul.f32 0.03125, %v3248_v21  ;;  %v3272_v29 = vmul.f32 %v11058_v18, %v11058_v18 }
0x103e   : > { %v3251_v12 = vpop.xlane.xlu1 %3250 }
0x103f   : > { %v11066_v11 = vsub.f32 %v11019_v42, %v3258_v35  ;;  %v3259_v24 = vmul.f32 0.03125, %v3251_v12  ;;  %v3288_v0 = vsel %vm1561_vm1, %v3272_v29, 0.0  ;;  %v3273_v49 = vmul.f32 %v11061_v22, %v11061_v22 }
0x1040   : > { %3289 = vadd.xlane.f32.xlu0 %v3288_v0 }
0x1041   : > { %v11072_v30 = vsub.f32 %v11025_v43, %v3259_v24  ;;  %v3291_v31 = vsel %vm1561_vm1, %v3273_v49, 0.0  ;;  %v3274_v38 = vmul.f32 %v11066_v11, %v11066_v11 }
0x1042   : > { %3292 = vadd.xlane.f32.xlu1 %v3291_v31  ;;  %v7948_v31 = vld [vmem:[%s12163_s2] ss:$0 sm:$0xff]  ;;  %s12166_s2 = smov %s12165_s18 }
0x1043   : > { %v3294_v7 = vsel %vm1561_vm1, %v3274_v38, 0.0  ;;  %v3275_v23 = vmul.f32 %v11072_v30, %v11072_v30 }
0x1044   : > { %3295 = vadd.xlane.f32.xlu0 %v3294_v7 }
0x1045   : > { %v3297_v27 = vsel %vm1561_vm1, %v3275_v23, 0.0 }
0x1046   : > { %3298 = vadd.xlane.f32.xlu1 %v3297_v27 }
0x10c0   : > { %v3278_v2 = vpop.xlane.xlu0 %3277 }
0x10c1   : > { %v3300_v55 = vmul.f32 0.03125, %v3278_v2 }
0x10c2   : > { %v3281_v56 = vpop.xlane.xlu1 %3280 }
0x10c3   : > { %v3308_v59 = vadd.f32 1e-05, %v3300_v55  ;;  %v3301_v33 = vmul.f32 0.03125, %v3281_v56 }
0x10c4   : > { %v3284_v46 = vpop.xlane.xlu0 %3283 }
0x10c5   : > { %9484 = vrsqrt.f32 %v3308_v59  ;;  %v3309_v16 = vadd.f32 1e-05, %v3301_v33  ;;  %v3302_v40 = vmul.f32 0.03125, %v3284_v46 }
0x10c6   : > { %v3287_v32 = vpop.xlane.xlu1 %3286 }
0x10c7   : > { %9486 = vrsqrt.f32 %v3309_v16  ;;  %v3310_v26 = vadd.f32 1e-05, %v3302_v40  ;;  %v3303_v44 = vmul.f32 0.03125, %v3287_v32 }
0x10c9   : > { %9488 = vrsqrt.f32 %v3310_v26  ;;  %v3311_v47 = vadd.f32 1e-05, %v3303_v44 }
0x10cb   : > { %9490 = vrsqrt.f32 %v3311_v47 }
0x10cd   : > { %v3290_v28 = vpop.xlane.xlu0 %3289 }
0x10ce   : > { %v3304_v54 = vmul.f32 0.03125, %v3290_v28 }
0x10cf   : > { %v9485_v57 = vpop.eup %9484  ;;  %v3293_v45 = vpop.xlane.xlu1 %3292 }
0x10d0   : > { %v3324_v13 = vmul.f32 %v9485_v57, %v11034_v52  ;;  %v3312_v4 = vadd.f32 1e-05, %v3304_v54  ;;  %v3305_v62 = vmul.f32 0.03125, %v3293_v45 }
0x10d1   : > { %v9487_v5 = vpop.eup %9486  ;;  %v3296_v36 = vpop.xlane.xlu0 %3295 }
0x10d2   : > { %v3325_v25 = vmul.f32 %v9487_v5, %v11037_v61  ;;  %9492 = vrsqrt.f32 %v3312_v4  ;;  %v3313_v17 = vadd.f32 1e-05, %v3305_v62  ;;  %v3306_v3 = vmul.f32 0.03125, %v3296_v36  ;;  %v3441_v36 = vld [vmem:[%s12164_s6 + $0x8] sm:$0xff] }
0x10d3   : > { %v9489_v58 = vpop.eup %9488  ;;  %v3299_v9 = vpop.xlane.xlu1 %3298 }
0x10d4   : > { %v3332_v63 = vpack.c.bf16 %v3325_v25, %v3324_v13  ;;  %v3326_v51 = vmul.f32 %v9489_v58, %v11042_v37  ;;  %9494 = vrsqrt.f32 %v3313_v17  ;;  %v3314_v52 = vadd.f32 1e-05, %v3306_v3  ;;  %v3442_v13 = vld [vmem:[%s12164_s6 + $0x10] sm:$0xff]  ;;  %v3440_v58 = vld [vmem:[%s12164_s6] sm:$0xff] }
0x10d5   : > { %v9491_v50 = vpop.eup %9490  ;;  %v3307_v8 = vmul.f32 0.03125, %v3299_v9 }
0x10d6   : > { %v3327_v60 = vmul.f32 %v9491_v50, %v11048_v1  ;;  %8557 = vmatprep.mubr.msk.bf16.mxu0 %vm1561_vm1, %v3332_v63  ;;  %9496 = vrsqrt.f32 %v3314_v52 }
0x10d7   : > { %v3315_v6 = vadd.f32 1e-05, %v3307_v8 }
0x10d8   : > { %v3333_v61 = vpack.c.bf16 %v3327_v60, %v3326_v51  ;;  %v3443_v51 = vld [vmem:[%s12164_s6 + $0x18] sm:$0xff] }
0x10d9   : > { %9498 = vrsqrt.f32 %v3315_v6 }
0x10da   : > { %8558 = vmatmul.mubr.msk.bf16.vlgmr.msra.gmra.mrb[36].mxu0 %vm1561_vm1, %v3333_v61  ;;  %v3446_v61 = vld [vmem:[%s12164_s6 + $0x30] sm:$0xff] }
0x10dc   : > { %v9493_v15 = vpop.eup %9492 }
0x10dd   : > { %v3328_v21 = vmul.f32 %v9493_v15, %v11058_v18 }
0x10de   : > { %v9495_v19 = vpop.eup %9494 }
0x10df   : > { %v3329_v37 = vmul.f32 %v9495_v19, %v11061_v22 }
0x10e0   : > { %v9497_v1 = vpop.eup %9496 }
0x10e1   : > { %v3334_v35 = vpack.c.bf16 %v3329_v37, %v3328_v21  ;;  %v3330_v12 = vmul.f32 %v9497_v1, %v11066_v11 }
0x10e3   : > { %v9499_v29 = vpop.eup %9498  ;;  %8561 = vmatprep.mubr.msk.bf16.mxu0 %vm1561_vm1, %v3334_v35  ;;  %v3444_v35 = vld [vmem:[%s12164_s6 + $0x20] sm:$0xff] }
0x10e4   : > { %v3331_v24 = vmul.f32 %v9499_v29, %v11072_v30 }
0x10e6   : > { %v3335_v0 = vpack.c.bf16 %v3331_v24, %v3330_v12 }
0x10e8   : > { %8562 = vmatmul.mubr.msk.bf16.gmra.mrb[40].mxu0 %vm1561_vm1, %v3335_v0  ;;  %v3447_v0 = vld [vmem:[%s12164_s6 + $0x38] sm:$0xff] }
0x11ad   : > { %v8559_v49 = vpop.f32.mrb[36].mxu0 }
0x11ae   : > { %v3405_v38 = vpop.f32.mrb[37].mxu0  ;;  %v3414_v23 = vadd.f32 %v8559_v49, %v7948_v31 }
0x11af   : > { %v8560_v7 = vpop.f32.mrb[38].mxu0  ;;  %v3406_v22 = vadd.f32 %v7948_v31, %v3405_v38 }
0x11b0   : > { %v3417_v18 = vadd.f32 %v8560_v7, %v7948_v31  ;;  %v3408_v27 = vpop.f32.mrb[39].mxu0 }
0x11b1   : > { %v3409_v20 = vadd.f32 %v7948_v31, %v3408_v27 }
0x11b2   : > { %v11096_v53 = vpack.c.bf16 %v3417_v18, %v3414_v23 }
0x11b3   : > { %v11098_v2 = vpack.c.bf16 %v3409_v20, %v3406_v22 }
0x11b4   : > { %3454 = vrot.lane.b32.xlu1 %v11096_v53, %s12083_s23 }
0x11b5   : > { %3452 = vrot.lane.b32.xlu0 %v11098_v2, %s12083_s23  ;;  %8573 = vmatprep.mubr.msk.bf16.mxu0 %vm1929_vm2, %v11098_v2 }
0x11bb   : > { %v8563_v11 = vpop.f32.mrb[40].mxu0 }
0x11bc   : > { %v3421_v30 = vpop.f32.mrb[41].mxu0  ;;  %v3430_v56 = vadd.f32 %v8563_v11, %v7948_v31 }
0x11bd   : > { %v8564_v55 = vpop.f32.mrb[42].mxu0  ;;  %v3422_v46 = vadd.f32 %v7948_v31, %v3421_v30 }
0x11be   : > { %v3433_v59 = vadd.f32 %v8564_v55, %v7948_v31  ;;  %v3424_v33 = vpop.f32.mrb[43].mxu0 }
0x11bf   : > { %v3425_v16 = vadd.f32 %v7948_v31, %v3424_v33  ;;  %v3445_v31 = vld [vmem:[%s12164_s6 + $0x28] sm:$0xff] }
0x11c0   : > { %v11106_v40 = vpack.c.bf16 %v3433_v59, %v3430_v56 }
0x11c1   : > { %v11108_v32 = vpack.c.bf16 %v3425_v16, %v3422_v46 }
0x11c3   : > { %3456 = vrot.lane.b32.xlu1 %v11108_v32, %s12083_s23 }
0x11c7   : > { %3458 = vrot.lane.b32.xlu1 %v11106_v40, %s12083_s23 }
0x1226   : > { %v3455_v47 = vpop.permute.xlu1 %3454 }
0x1227   : > { %v3453_v26 = vpop.permute.xlu0 %3452  ;;  %v3476_v57 = vsel %vm1929_vm2, %v3455_v47, 0 }
0x1228   : > { %8985 = vmatprep.subr.msk.bf16.mxu0 %vm1929_vm2, %v3453_v26  ;;  %v3473_v44 = vsel %vm1929_vm2, %v3453_v26, 0 }
0x1229   : > { %8566 = vmatpush3.bf16.xpose.msra.mxu0 %v3473_v44 }
0x122a   : > { %8986 = vmatprep.subr.msk.bf16.mxu0 %vm1929_vm2, %v3455_v47 }
0x1231   : > { %8568 = vmatpush3.bf16.xpose.msra.mxu0 %v3476_v57 }
0x1235   : > { %v3457_v28 = vpop.permute.xlu1 %3456 }
0x1236   : > { %8987 = vmatprep.subr.msk.bf16.mxu0 %vm1929_vm2, %v3457_v28  ;;  %v3479_v5 = vsel %vm1929_vm2, %v3457_v28, 0 }
0x1239   : > { %8570 = vmatpush3.bf16.xpose.msra.mxu0 %v3479_v5  ;;  %v3459_v54 = vpop.permute.xlu1 %3458 }
0x123a   : > { %8988 = vmatprep.subr.msk.bf16.mxu0 %vm1929_vm2, %v3459_v54  ;;  %v3482_v45 = vsel %vm1929_vm2, %v3459_v54, 0 }
0x1241   : > { %8572 = vmatpush3.bf16.xpose.msra.mxu0 %v3482_v45 }
0x1248   : > { %8574 = vmatmul.mubr.msk.bf16.vlgmr.msra.gmra.mrb[44].mxu0 %vm1929_vm2, %v11096_v53 }
0x1249   : > { %8577 = vmatprep.mubr.msk.bf16.mxu0 %vm1929_vm2, %v11108_v32 }
0x1250   : > { %8578 = vmatmul.mubr.msk.bf16.gmra.mrb[48].mxu0 %vm1929_vm2, %v11106_v40 }
0x131b   : > { %v8575_v25 = vpop.f32.mrb[44].mxu0 }
0x131c   : > { %v3527_v4 = vadd.f32 %v8575_v25, %v3442_v13  ;;  %v3518_v62 = vpop.f32.mrb[45].mxu0 }
0x131d   : > { %v8576_v63 = vpop.f32.mrb[46].mxu0  ;;  %v3519_v50 = vadd.f32 %v3518_v62, %v3440_v58 }
0x131e   : > { %v3521_v17 = vpop.f32.mrb[47].mxu0  ;;  %v3555_v3 = vsel %vm2019_vm3, %v3527_v4, -inf  ;;  %v3530_v52 = vadd.f32 %v8576_v63, %v3443_v51 }
0x131f   : > { %v3522_v60 = vadd.f32 %v3521_v17, %v3441_v36  ;;  %3556 = vmax.xlane.f32.xlu0 %v3555_v3  ;;  %v3549_v8 = vsel %vm2019_vm3, %v3519_v50, -inf }
0x1320   : > { %v3558_v1 = vsel %vm2019_vm3, %v3530_v52, -inf }
0x1321   : > { %v3552_v9 = vsel %vm2019_vm3, %v3522_v60, -inf }
0x1322   : > { %3553 = vmax.xlane.f32.xlu1 %v3552_v9 }
0x1323   : > { %v8579_v6 = vpop.f32.mrb[48].mxu0  ;;  %3550 = vmax.xlane.f32.xlu0 %v3549_v8 }
0x1324   : > { %v3534_v15 = vpop.f32.mrb[49].mxu0  ;;  %v3543_v21 = vadd.f32 %v8579_v6, %v3446_v61 }
0x1325   : > { %v8580_v19 = vpop.f32.mrb[50].mxu0  ;;  %v3535_v29 = vadd.f32 %v3534_v15, %v3444_v35 }
0x1326   : > { %v3537_v37 = vpop.f32.mrb[51].mxu0  ;;  %v3567_v12 = vsel %vm2019_vm3, %v3543_v21, -inf  ;;  %v11147_v49 = vadd.f32 %v8580_v19, %v3447_v0 }
0x1327   : > { %3559 = vmax.xlane.f32.xlu0 %v3558_v1  ;;  %v3561_v24 = vsel %vm2019_vm3, %v3535_v29, -inf  ;;  %v11150_v38 = vadd.f32 %v3537_v37, %v3445_v31 }
0x1328   : > { %v3570_v7 = vsel %vm2019_vm3, %v11147_v49, -inf }
0x1329   : > { %v3564_v23 = vsel %vm2019_vm3, %v11150_v38, -inf }
0x132b   : > { %3568 = vmax.xlane.f32.xlu0 %v3567_v12 }
0x132f   : > { %3562 = vmax.xlane.f32.xlu0 %v3561_v24 }
0x1333   : > { %3643 = vrot.lane.b32.xlu1 %v11096_v53, %s12089_s26 }
0x1337   : > { %3645 = vrot.lane.b32.xlu1 %v11108_v32, %s12089_s26 }
0x1345   : > { %3641 = vrot.lane.b32.xlu0 %v11098_v2, %s12089_s26 }
0x135b   : > { %3571 = vmax.xlane.f32.xlu1 %v3570_v7 }
0x135f   : > { %3565 = vmax.xlane.f32.xlu1 %v3564_v23 }
0x1370   : > { %3647 = vrot.lane.b32.xlu1 %v11106_v40, %s12089_s26 }
0x13ac   : > { %v3557_v18 = vpop.xlane.xlu0 %3556 }
0x13ad   : > { %v3575_v27 = vsub.f32 %v3527_v4, %v3557_v18 }
0x13af   : > { %v3585_v22 = vmul.f32 1.442695, %v3575_v27  ;;  %v3554_v20 = vpop.xlane.xlu1 %3553 }
0x13b0   : > { %v3551_v11 = vpop.xlane.xlu0 %3550  ;;  %v3574_v55 = vsub.f32 %v3522_v60, %v3554_v20 }
0x13b1   : > { %9500 = vpow2.f32 %v3585_v22  ;;  %v3573_v30 = vsub.f32 %v3519_v50, %v3551_v11 }
0x13b2   : > { %v3583_v46 = vmul.f32 1.442695, %v3574_v55 }
0x13b3   : > { %v3581_v56 = vmul.f32 1.442695, %v3573_v30  ;;  %v3644_v25 = vpop.permute.xlu1 %3643 }
0x13b4   : > { %v3560_v59 = vpop.xlane.xlu0 %3559 }
0x13b5   : > { %9502 = vpow2.f32 %v3581_v56  ;;  %v3576_v33 = vsub.f32 %v3530_v52, %v3560_v59 }
0x13b7   : > { %v3587_v16 = vmul.f32 1.442695, %v3576_v33  ;;  %v3646_v50 = vpop.permute.xlu1 %3645 }
0x13b8   : > { %v3569_v26 = vpop.xlane.xlu0 %3568 }
0x13b9   : > { %9504 = vpow2.f32 %v3587_v16  ;;  %v3579_v44 = vsub.f32 %v3543_v21, %v3569_v26 }
0x13ba   : > { %9506 = vpow2.f32 %v3583_v46 }
0x13bb   : > { %v11158_v47 = vpop.eup %9500  ;;  %v3593_v57 = vmul.f32 1.442695, %v3579_v44 }
0x13bc   : > { %v3563_v28 = vpop.xlane.xlu0 %3562  ;;  %v3603_v5 = vsel %vm2019_vm3, %v11158_v47, 0.0 }
0x13bd   : > { %9508 = vpow2.f32 %v3593_v57  ;;  %v3577_v54 = vsub.f32 %v3535_v29, %v3563_v28  ;;  %3604 = vadd.xlane.f32.xlu0 %v3603_v5 }
0x13bf   : > { %v11162_v45 = vpop.eup %9502  ;;  %v3589_v13 = vmul.f32 1.442695, %v3577_v54 }
0x13c0   : > { %v3642_v58 = vpop.permute.xlu0 %3641  ;;  %v3597_v4 = vsel %vm2019_vm3, %v11162_v45, 0.0 }
0x13c1   : > { %9510 = vpow2.f32 %v3589_v13  ;;  %3598 = vadd.xlane.f32.xlu0 %v3597_v4  ;;  %8581 = vmatprep.subr.bf16.mxu1 %v3642_v58 }
0x13c2   : > { %8582 = vmatpush3.bf16.msra.mxu1 %v3642_v58 }
0x13c3   : > { %v9505_v62 = vpop.eup %9504  ;;  %8583 = vmatprep.subr.bf16.mxu1 %v3644_v25 }
0x13c4   : > { %v3606_v36 = vsel %vm2019_vm3, %v9505_v62, 0.0  ;;  %v9507_v63 = vpop.eup %9506 }
0x13c5   : > { %3607 = vadd.xlane.f32.xlu1 %v3606_v36  ;;  %v3600_v3 = vsel %vm2019_vm3, %v9507_v63, 0.0 }
0x13c6   : > { %8584 = vmatpush3.bf16.msra.mxu1 %v3644_v25 }
0x13c7   : > { %v11167_v17 = vpop.eup %9508  ;;  %8585 = vmatprep.subr.bf16.mxu1 %v3646_v50 }
0x13c8   : > { %v3615_v51 = vsel %vm2019_vm3, %v11167_v17, 0.0 }
0x13c9   : > { %3601 = vadd.xlane.f32.xlu1 %v3600_v3  ;;  %3616 = vadd.xlane.f32.xlu0 %v3615_v51 }
0x13ca   : > { %8586 = vmatpush3.bf16.msra.mxu1 %v3646_v50 }
0x13cb   : > { %v11172_v60 = vpop.eup %9510 }
0x13cc   : > { %v3609_v9 = vsel %vm2019_vm3, %v11172_v60, 0.0 }
0x13cd   : > { %3610 = vadd.xlane.f32.xlu0 %v3609_v9 }
0x13da   : > { %3749 = vrot.lane.b32.xlu1 %v11096_v53, %s12074_s28 }
0x13de   : > { %3751 = vrot.lane.b32.xlu1 %v11108_v32, %s12074_s28 }
0x13e8   : > { %v3572_v52 = vpop.xlane.xlu1 %3571 }
0x13e9   : > { %v3580_v8 = vsub.f32 %v11147_v49, %v3572_v52 }
0x13eb   : > { %v3595_v61 = vmul.f32 1.442695, %v3580_v8 }
0x13ec   : > { %v3566_v6 = vpop.xlane.xlu1 %3565 }
0x13ed   : > { %9512 = vpow2.f32 %v3595_v61  ;;  %v3578_v15 = vsub.f32 %v11150_v38, %v3566_v6 }
0x13ef   : > { %v3591_v19 = vmul.f32 1.442695, %v3578_v15 }
0x13f0   : > { %v3648_v21 = vpop.permute.xlu1 %3647 }
0x13f1   : > { %8587 = vmatprep.subr.bf16.mxu1 %v3648_v21  ;;  %9514 = vpow2.f32 %v3591_v19 }
0x13f2   : > { %8588 = vmatpush3.bf16.msra.mxu1 %v3648_v21 }
0x13f7   : > { %v9513_v37 = vpop.eup %9512 }
0x13f8   : > { %v3618_v1 = vsel %vm2019_vm3, %v9513_v37, 0.0 }
0x13f9   : > { %3619 = vadd.xlane.f32.xlu0 %v3618_v1 }
0x13fb   : > { %v9515_v35 = vpop.eup %9514 }
0x13fc   : > { %v3612_v29 = vsel %vm2019_vm3, %v9515_v35, 0.0 }
0x1402   : > { %3613 = vadd.xlane.f32.xlu1 %v3612_v29 }
0x140f   : > { %3747 = vrot.lane.b32.xlu0 %v11098_v2, %s12074_s28 }
0x1413   : > { %3753 = vrot.lane.b32.xlu1 %v11106_v40, %s12074_s28  ;;  %3739 = vrot.lane.b32.xlu0 %v11098_v2, %s12076_s15 }
0x1417   : > { %3741 = vrot.lane.b32.xlu1 %v11096_v53, %s12076_s15  ;;  %3743 = vrot.lane.b32.xlu0 %v11108_v32, %s12076_s15 }
0x141b   : > { %3745 = vrot.lane.b32.xlu1 %v11106_v40, %s12076_s15  ;;  %s12172_s15 = sld [smem:[#allocation28_spill]] }
0x144a   : > { %v3605_v12 = vpop.xlane.xlu0 %3604 }
0x144e   : > { %v3599_v24 = vpop.xlane.xlu0 %3598 }
0x1452   : > { %v3608_v0 = vpop.xlane.xlu1 %3607 }
0x1453   : > { %9516 = vrcp.f32 %v3608_v0 }
0x1454   : > { %9518 = vrcp.f32 %v3599_v24 }
0x1455   : > { %9520 = vrcp.f32 %v3605_v12  ;;  %v7964_v12 = vld [vmem:[%s12164_s6 + $0x48] sm:$0xff] }
0x1456   : > { %v3602_v49 = vpop.xlane.xlu1 %3601  ;;  %v3617_v55 = vpop.xlane.xlu0 %3616 }
0x1457   : > { %9522 = vrcp.f32 %v3602_v49 }
0x145a   : > { %v3611_v56 = vpop.xlane.xlu0 %3610  ;;  %v3750_v59 = vpop.permute.xlu1 %3749 }
0x145d   : > { %v9517_v31 = vpop.eup %9516 }
0x145e   : > { %v9519_v38 = vpop.eup %9518  ;;  %v3632_v18 = vmul.f32 %v9517_v31, %v9505_v62  ;;  %v3752_v16 = vpop.permute.xlu1 %3751 }
0x145f   : > { %v9521_v7 = vpop.eup %9520  ;;  %v3629_v27 = vmul.f32 %v9519_v38, %v11162_v45  ;;  %v3774_v13 = vsel %vm1929_vm2, %v3752_v16, 0 }
0x1460   : > { %v3631_v20 = vmul.f32 %v9521_v7, %v11158_v47  ;;  %v3771_v47 = vsel %vm1929_vm2, %v3750_v59, 0 }
0x1461   : > { %v9523_v23 = vpop.eup %9522 }
0x1462   : > { %v3630_v22 = vmul.f32 %v9523_v23, %v9507_v63  ;;  %v3638_v30 = vpack.c.bf16 %v3632_v18, %v3631_v20  ;;  %v7966_v23 = vld [vmem:[%s12164_s6 + $0x58] sm:$0xff] }
0x1464   : > { %v3637_v11 = vpack.c.bf16 %v3630_v22, %v3629_v27 }
0x1466   : > { %8589 = vmatprep.mubr.msk.bf16.mxu1 %vm2019_vm3, %v3637_v11 }
0x1467   : > { %8590 = vmatmul.mubr.msk.bf16.vlgmr.msra.gmra.mrb[36].mxu1 %vm2019_vm3, %v3638_v30  ;;  %v7967_v30 = vld [vmem:[%s12164_s6 + $0x60] sm:$0xff] }
0x1486   : > { %v3620_v33 = vpop.xlane.xlu0 %3619 }
0x1487   : > { %9524 = vrcp.f32 %v3620_v33 }
0x1488   : > { %9526 = vrcp.f32 %v3611_v56 }
0x1489   : > { %9528 = vrcp.f32 %v3617_v55  ;;  %v7968_v55 = vld [vmem:[%s12164_s6 + $0x68] sm:$0xff] }
0x148a   : > { %v3748_v46 = vpop.permute.xlu0 %3747 }
0x148b   : > { %8989 = vmatprep.subr.msk.bf16.mxu1 %vm1929_vm2, %v3748_v46  ;;  %v3768_v26 = vsel %vm1929_vm2, %v3748_v46, 0 }
0x148c   : > { %8598 = vmatpush3.bf16.xpose.msra.mxu1 %v3768_v26 }
0x148d   : > { %8990 = vmatprep.subr.msk.bf16.mxu1 %vm1929_vm2, %v3750_v59  ;;  %v7970_v59 = vld [vmem:[%s12164_s6 + $0x78] sm:$0xff] }
0x148e   : > { %v3740_v50 = vpop.permute.xlu0 %3739 }
0x148f   : > { %v3614_v44 = vpop.xlane.xlu1 %3613 }
0x1490   : > { %9530 = vrcp.f32 %v3614_v44  ;;  %v7969_v44 = vld [vmem:[%s12164_s6 + $0x70] sm:$0xff] }
0x1491   : > { %v9525_v57 = vpop.eup %9524 }
0x1492   : > { %v9527_v28 = vpop.eup %9526  ;;  %v3636_v45 = vmul.f32 %v9525_v57, %v9513_v37  ;;  %v7963_v37 = vld [vmem:[%s12164_s6 + $0x40] sm:$0xff] }
0x1493   : > { %v9529_v5 = vpop.eup %9528  ;;  %v3633_v25 = vmul.f32 %v9527_v28, %v11172_v60  ;;  %v3754_v4 = vpop.permute.xlu1 %3753 }
0x1494   : > { %8600 = vmatpush3.bf16.xpose.msra.mxu1 %v3771_v47  ;;  %v3635_v62 = vmul.f32 %v9529_v5, %v11167_v17  ;;  %v3777_v3 = vsel %vm1929_vm2, %v3754_v4, 0  ;;  %v3744_v60 = vpop.permute.xlu0 %3743 }
0x1495   : > { %8991 = vmatprep.subr.msk.bf16.mxu1 %vm1929_vm2, %v3752_v16 }
0x1496   : > { %v3640_v63 = vpack.c.bf16 %v3636_v45, %v3635_v62 }
0x1497   : > { %v3742_v51 = vpop.permute.xlu1 %3741 }
0x149a   : > { %v9531_v54 = vpop.eup %9530 }
0x149b   : > { %v3634_v58 = vmul.f32 %v9531_v54, %v9515_v35  ;;  %v3746_v17 = vpop.permute.xlu1 %3745  ;;  %v7965_v35 = vld [vmem:[%s12164_s6 + $0x50] sm:$0xff]  ;;  %s12191_s6 = sld [smem:[#allocation40_spill]] }
0x149c   : > { %8602 = vmatpush3.bf16.xpose.msra.mxu1 %v3774_v13 }
0x149d   : > { %8992 = vmatprep.subr.msk.bf16.mxu1 %vm1929_vm2, %v3754_v4  ;;  %v3639_v36 = vpack.c.bf16 %v3634_v58, %v3633_v25 }
0x149f   : > { %8593 = vmatprep.mubr.msk.bf16.mxu1 %vm2019_vm3, %v3639_v36 }
0x14a0   : > { %8594 = vmatmul.mubr.msk.bf16.gmra.mrb[40].mxu1 %vm2019_vm3, %v3640_v63 }
0x14a1   : > { %8605 = vmatprep.mubr.msk.bf16.mxu1 %vm1929_vm2, %v3740_v50 }
0x14a4   : > { %8604 = vmatpush3.bf16.xpose.msra.mxu1 %v3777_v3 }
0x14ab   : > { %8606 = vmatmul.mubr.msk.bf16.vlgmr.msra.gmra.mrb[44].mxu1 %vm1929_vm2, %v3742_v51 }
0x14ac   : > { %8609 = vmatprep.mubr.msk.bf16.mxu1 %vm1929_vm2, %v3744_v60 }
0x14b3   : > { %8610 = vmatmul.mubr.msk.bf16.gmra.mrb[48].mxu1 %vm1929_vm2, %v3746_v17 }
0x153a   : > { %v11216_v9 = vpop.f32.mrb[36].mxu1 }
0x153b   : > { %v11218_v52 = vpop.f32.mrb[37].mxu1 }
0x153c   : > { %v11220_v8 = vpop.f32.mrb[38].mxu1 }
0x153d   : > { %v11222_v61 = vpop.f32.mrb[39].mxu1 }
0x1573   : > { %v11224_v6 = vpop.f32.mrb[40].mxu1 }
0x1574   : > { %v11226_v15 = vpop.f32.mrb[41].mxu1 }
0x1575   : > { %v11228_v19 = vpop.f32.mrb[42].mxu1 }
0x1576   : > { %v11230_v21 = vpop.f32.mrb[43].mxu1 }
0x157e   : > { %v8607_v1 = vpop.f32.mrb[44].mxu1 }
0x157f   : > { %v3813_v29 = vpop.f32.mrb[45].mxu1  ;;  %v3822_v31 = vadd.f32 %v8607_v1, %v7965_v35 }
0x1580   : > { %v3814_v24 = vadd.f32 %v7963_v37, %v3813_v29  ;;  %v8608_v0 = vpop.f32.mrb[46].mxu1 }
0x1581   : > { %v3816_v49 = vpop.f32.mrb[47].mxu1  ;;  %v3825_v27 = vadd.f32 %v8608_v0, %v7966_v23  ;;  %v3850_v20 = vsel %vm2019_vm3, %v3822_v31, -inf }
0x1582   : > { %v3817_v38 = vadd.f32 %v7964_v12, %v3816_v49  ;;  %v3844_v7 = vsel %vm2019_vm3, %v3814_v24, -inf }
0x1583   : > { %3845 = vmax.xlane.f32.xlu0 %v3844_v7  ;;  %v3853_v26 = vsel %vm2019_vm3, %v3825_v27, -inf }
0x1584   : > { %v3847_v18 = vsel %vm2019_vm3, %v3817_v38, -inf }
0x1585   : > { %3848 = vmax.xlane.f32.xlu1 %v3847_v18 }
0x1586   : > { %v8611_v22 = vpop.f32.mrb[48].mxu1 }
0x1587   : > { %3851 = vmax.xlane.f32.xlu0 %v3850_v20  ;;  %v3829_v11 = vpop.f32.mrb[49].mxu1  ;;  %v3838_v28 = vadd.f32 %v8611_v22, %v7969_v44 }
0x1588   : > { %v8612_v56 = vpop.f32.mrb[50].mxu1  ;;  %v3830_v46 = vadd.f32 %v7967_v30, %v3829_v11 }
0x1589   : > { %v3832_v33 = vpop.f32.mrb[51].mxu1  ;;  %v3841_v47 = vadd.f32 %v8612_v56, %v7970_v59  ;;  %v3862_v45 = vsel %vm2019_vm3, %v3838_v28, -inf }
0x158a   : > { %v11242_v16 = vadd.f32 %v7968_v55, %v3832_v33  ;;  %v3856_v5 = vsel %vm2019_vm3, %v3830_v46, -inf }
0x158b   : > { %3854 = vmax.xlane.f32.xlu0 %v3853_v26  ;;  %v3865_v54 = vsel %vm2019_vm3, %v3841_v47, -inf }
0x158c   : > { %v3859_v57 = vsel %vm2019_vm3, %v11242_v16, -inf }
0x158d   : > { %3860 = vmax.xlane.f32.xlu1 %v3859_v57 }
0x158f   : > { %3857 = vmax.xlane.f32.xlu0 %v3856_v5 }
0x1591   : > { %3866 = vmax.xlane.f32.xlu1 %v3865_v54 }
0x1593   : > { %3863 = vmax.xlane.f32.xlu0 %v3862_v45 }
0x1610   : > { %v3846_v13 = vpop.xlane.xlu0 %3845 }
0x1611   : > { %v3868_v25 = vsub.f32 %v3814_v24, %v3846_v13 }
0x1612   : > { %v3849_v58 = vpop.xlane.xlu1 %3848 }
0x1613   : > { %v3876_v36 = vmul.f32 1.442695, %v3868_v25  ;;  %v3869_v63 = vsub.f32 %v3817_v38, %v3849_v58 }
0x1614   : > { %v3852_v4 = vpop.xlane.xlu0 %3851 }
0x1615   : > { %v3870_v62 = vsub.f32 %v3822_v31, %v3852_v4  ;;  %v3878_v60 = vmul.f32 1.442695, %v3869_v63 }
0x1617   : > { %v3880_v50 = vmul.f32 1.442695, %v3870_v62 }
0x1618   : > { %v3855_v3 = vpop.xlane.xlu0 %3854 }
0x1619   : > { %9532 = vpow2.f32 %v3880_v50  ;;  %v3871_v51 = vsub.f32 %v3825_v27, %v3855_v3 }
0x161a   : > { %9534 = vpow2.f32 %v3876_v36  ;;  %v3861_v55 = vpop.xlane.xlu1 %3860 }
0x161b   : > { %v3882_v17 = vmul.f32 1.442695, %v3871_v51  ;;  %v3873_v33 = vsub.f32 %v11242_v16, %v3861_v55 }
0x161c   : > { %v3858_v37 = vpop.xlane.xlu0 %3857 }
0x161d   : > { %9536 = vpow2.f32 %v3882_v17  ;;  %v3872_v1 = vsub.f32 %v3830_v46, %v3858_v37  ;;  %v3886_v26 = vmul.f32 1.442695, %v3873_v33 }
0x161e   : > { %9538 = vpow2.f32 %v3878_v60  ;;  %v3867_v56 = vpop.xlane.xlu1 %3866 }
0x161f   : > { %v3884_v24 = vmul.f32 1.442695, %v3872_v1  ;;  %v3875_v59 = vsub.f32 %v3841_v47, %v3867_v56 }
0x1620   : > { %v3864_v35 = vpop.xlane.xlu0 %3863 }
0x1621   : > { %v3874_v29 = vsub.f32 %v3838_v28, %v3864_v35  ;;  %v3890_v46 = vmul.f32 1.442695, %v3875_v59 }
0x1623   : > { %v11251_v12 = vpop.eup %9532  ;;  %v3888_v0 = vmul.f32 1.442695, %v3874_v29 }
0x1624   : > { %v3898_v49 = vsel %vm2019_vm3, %v11251_v12, 0.0  ;;  %v9535_v31 = vpop.eup %9534 }
0x1625   : > { %9540 = vpow2.f32 %v3888_v0  ;;  %3899 = vadd.xlane.f32.xlu0 %v3898_v49  ;;  %v3892_v7 = vsel %vm2019_vm3, %v9535_v31, 0.0 }
0x1626   : > { %9542 = vpow2.f32 %v3884_v24 }
0x1627   : > { %v11255_v38 = vpop.eup %9536  ;;  %9544 = vpow2.f32 %v3890_v46 }
0x1628   : > { %v3901_v23 = vsel %vm2019_vm3, %v11255_v38, 0.0  ;;  %v9539_v18 = vpop.eup %9538  ;;  %9546 = vpow2.f32 %v3886_v26 }
0x1629   : > { %3893 = vadd.xlane.f32.xlu0 %v3892_v7  ;;  %3902 = vadd.xlane.f32.xlu1 %v3901_v23  ;;  %v3895_v27 = vsel %vm2019_vm3, %v9539_v18, 0.0 }
0x162d   : > { %3896 = vadd.xlane.f32.xlu1 %v3895_v27  ;;  %v9229_v27 = vld [vmem:[%s12166_s2 + $0x8] sm:$0xff]   ;;  %s12185_s2 = smov 32  }
0x162f   : > { %v11261_v22 = vpop.eup %9540 }
0x1630   : > { %v3910_v20 = vsel %vm2019_vm3, %v11261_v22, 0.0  ;;  %v11265_v11 = vpop.eup %9542 }
0x1631   : > { %3911 = vadd.xlane.f32.xlu0 %v3910_v20  ;;  %v3904_v30 = vsel %vm2019_vm3, %v11265_v11, 0.0  ;;  %v9545_v44 = vpop.eup %9544 }
0x1632   : > { %v3913_v57 = vsel %vm2019_vm3, %v9545_v44, 0.0  ;;  %v9547_v28 = vpop.eup %9546 }
0x1635   : > { %3905 = vadd.xlane.f32.xlu0 %v3904_v30 }
0x163e   : > { %3938 = vrot.lane.b32.xlu1 %v11096_v53, %s12078_s10  ;;  %v3907_v53 = vsel %vm2019_vm3, %v9547_v28, 0.0 }
0x1642   : > { %3940 = vrot.lane.b32.xlu1 %v11108_v32, %s12078_s10 }
0x164b   : > { %3936 = vrot.lane.b32.xlu0 %v11098_v2, %s12078_s10 }
0x1666   : > { %3914 = vadd.xlane.f32.xlu1 %v3913_v57 }
0x166a   : > { %3908 = vadd.xlane.f32.xlu1 %v3907_v53 }
0x167b   : > { %3942 = vrot.lane.b32.xlu1 %v11106_v40, %s12078_s10 }
0x16b2   : > { %v3900_v2 = vpop.xlane.xlu0 %3899 }
0x16b6   : > { %v3903_v32 = vpop.xlane.xlu1 %3902  ;;  %v3894_v47 = vpop.xlane.xlu0 %3893 }
0x16b7   : > { %9548 = vrcp.f32 %v3894_v47 }
0x16ba   : > { %v3897_v16 = vpop.xlane.xlu1 %3896 }
0x16bb   : > { %9550 = vrcp.f32 %v3897_v16 }
0x16bc   : > { %9552 = vrcp.f32 %v3903_v32 }
0x16bd   : > { %9554 = vrcp.f32 %v3900_v2 }
0x16be   : > { %v3912_v5 = vpop.xlane.xlu0 %3911  ;;  %v3939_v25 = vpop.permute.xlu1 %3938 }
0x16c1   : > { %v9549_v45 = vpop.eup %9548 }
0x16c2   : > { %v3906_v54 = vpop.xlane.xlu0 %3905  ;;  %v3924_v4 = vmul.f32 %v9549_v45, %v9535_v31  ;;  %v3941_v40 = vpop.permute.xlu1 %3940 }
0x16c5   : > { %v9551_v13 = vpop.eup %9550 }
0x16c6   : > { %v3937_v58 = vpop.permute.xlu0 %3936  ;;  %v3925_v62 = vmul.f32 %v9551_v13, %v9539_v18  ;;  %v9553_v50 = vpop.eup %9552 }
0x16c7   : > { %8613 = vmatprep.subr.bf16.mxu0 %v3937_v58  ;;  %v9555_v51 = vpop.eup %9554  ;;  %v3927_v60 = vmul.f32 %v9553_v50, %v11255_v38 }
0x16c8   : > { %8614 = vmatpush3.bf16.msra.mxu0 %v3937_v58  ;;  %v3932_v36 = vpack.c.bf16 %v3925_v62, %v3924_v4  ;;  %v3926_v37 = vmul.f32 %v9555_v51, %v11251_v12  ;;  %v9228_v12 = vld [vmem:[%s12165_s18] sm:$0xff]   ;;  %s12167_s18 = sld [smem:[#allocation26_spill]] }
0x16c9   : > { %8615 = vmatprep.subr.bf16.mxu0 %v3939_v25 }
0x16ca   : > { %8621 = vmatprep.mubr.msk.bf16.mxu0 %vm2019_vm3, %v3932_v36  ;;  %v3933_v1 = vpack.c.bf16 %v3927_v60, %v3926_v37 }
0x16cc   : > { %8616 = vmatpush3.bf16.msra.mxu0 %v3939_v25 }
0x16cd   : > { %8617 = vmatprep.subr.bf16.mxu0 %v3941_v40 }
0x16d0   : > { %8618 = vmatpush3.bf16.msra.mxu0 %v3941_v40 }
0x16f3   : > { %v3915_v63 = vpop.xlane.xlu1 %3914 }
0x16f4   : > { %9556 = vrcp.f32 %v3915_v63 }
0x16f5   : > { %9558 = vrcp.f32 %v3906_v54 }
0x16f6   : > { %9560 = vrcp.f32 %v3912_v5 }
0x16f7   : > { %v3909_v3 = vpop.xlane.xlu1 %3908 }
0x16f8   : > { %9562 = vrcp.f32 %v3909_v3 }
0x16fb   : > { %v3943_v17 = vpop.permute.xlu1 %3942 }
0x16fc   : > { %8619 = vmatprep.subr.bf16.mxu0 %v3943_v17 }
0x16fd   : > { %8620 = vmatpush3.bf16.msra.mxu0 %v3943_v17  ;;  %v7985_v17 = vld [vmem:[%s12167_s18] ss:$0 sm:$0xff]  ;;  %s12168_s18 = sld [smem:[#allocation27_spill]] }
0x16fe   : > { %v9557_v35 = vpop.eup %9556  ;;  %8629 = vmatprep.subr.bf16.mxu0 %v9228_v12 }
0x16ff   : > { %v9559_v29 = vpop.eup %9558  ;;  %v3931_v49 = vmul.f32 %v9557_v35, %v9545_v44 }
0x1700   : > { %8622 = vmatmul.mubr.msk.bf16.vlgmr.msra.gmra.mrb[52].mxu0 %vm2019_vm3, %v3933_v1  ;;  %v9561_v24 = vpop.eup %9560  ;;  %v3928_v31 = vmul.f32 %v9559_v29, %v11265_v11 }
0x1701   : > { %v3930_v38 = vmul.f32 %v9561_v24, %v11261_v22  ;;  %8630 = vmatpush3.bf16.msra.mxu0 %v9228_v12 }
0x1702   : > { %v9563_v0 = vpop.eup %9562  ;;  %8631 = vmatprep.subr.bf16.mxu0 %v9229_v27 }
0x1703   : > { %v3929_v7 = vmul.f32 %v9563_v0, %v9547_v28  ;;  %v3935_v18 = vpack.c.bf16 %v3931_v49, %v3930_v38 }
0x1705   : > { %v3934_v23 = vpack.c.bf16 %v3929_v7, %v3928_v31  ;;  %8632 = vmatpush3.bf16.msra.mxu0 %v9229_v27 }
0x1707   : > { %8625 = vmatprep.mubr.msk.bf16.mxu0 %vm2019_vm3, %v3934_v23 }
0x1708   : > { %8626 = vmatmul.mubr.msk.bf16.gmra.mrb[56].mxu0 %vm2019_vm3, %v3935_v18 }
0x17d3   : > { %v8623_v20 = vpop.f32.mrb[52].mxu0 }
0x17d4   : > { %v3994_v30 = vpop.f32.mrb[53].mxu0 }
0x17d5   : > { %v8624_v55 = vpop.f32.mrb[54].mxu0 }
0x17d6   : > { %v9164_v56 = vpack.i.bf16 %v8624_v55, %v8623_v20  ;;  %v3997_v11 = vpop.f32.mrb[55].mxu0 }
0x17d7   : > { %v9159_v59 = vpack.i.bf16 %v3997_v11, %v3994_v30 }
0x17d8   : > { %9165 = vrot.lane.b32.xlu1 %v9164_v56, %s12072_s30 }
0x17d9   : > { %9160 = vrot.lane.b32.xlu0 %v9159_v59, %s12072_s30 }
0x17db   : > { %v8627_v22 = vpop.f32.mrb[56].mxu0 }
0x17dc   : > { %v4010_v33 = vpop.f32.mrb[57].mxu0 }
0x17dd   : > { %v8628_v46 = vpop.f32.mrb[58].mxu0 }
0x17de   : > { %v9174_v26 = vpack.i.bf16 %v8628_v46, %v8627_v22  ;;  %v4013_v44 = vpop.f32.mrb[59].mxu0 }
0x17df   : > { %v9169_v57 = vpack.i.bf16 %v4013_v44, %v4010_v33 }
0x17e0   : > { %9175 = vrot.lane.b32.xlu1 %v9174_v26, %s12072_s30 }
0x17e1   : > { %9170 = vrot.lane.b32.xlu0 %v9169_v57, %s12072_s30  ;;  %s12169_s30 = smov %s12168_s18 }
0x184a   : > { %v9166_v28 = vpop.permute.xlu1 %9165 }
0x184b   : > { %v9168_v53 = vunpack.i.h.bf16 %v9166_v28  ;;  %v9167_v2 = vunpack.i.l.bf16 %v9166_v28  ;;  %v9161_v32 = vpop.permute.xlu0 %9160 }
0x184c   : > { %v9163_v47 = vunpack.i.h.bf16 %v9161_v32  ;;  %v9162_v16 = vunpack.i.l.bf16 %v9161_v32 }
0x184d   : > { %v4060_v5 = vsel %vm1929_vm2, %v11220_v8, %v9168_v53  ;;  %v4059_v54 = vsel %vm1929_vm2, %v11216_v9, %v9167_v2 }
0x184e   : > { %v4066_v45 = vpack.c.bf16 %v4060_v5, %v4059_v54  ;;  %v4058_v13 = vsel %vm1929_vm2, %v11222_v61, %v9163_v47  ;;  %v4057_v25 = vsel %vm1929_vm2, %v11218_v52, %v9162_v16 }
0x184f   : > { %v4065_v58 = vpack.c.bf16 %v4058_v13, %v4057_v25 }
0x1851   : > { %8633 = vmatprep.mubr.msk.bf16.mxu0 %vm1561_vm1, %v4065_v58 }
0x1852   : > { %8634 = vmatmul.mubr.msk.bf16.vlgmr.msra.gmra.mrb[60].mxu0 %vm1561_vm1, %v4066_v45  ;;  %v9176_v4 = vpop.permute.xlu1 %9175 }
0x1853   : > { %v9178_v62 = vunpack.i.h.bf16 %v9176_v4  ;;  %v9177_v36 = vunpack.i.l.bf16 %v9176_v4  ;;  %v9171_v8 = vpop.permute.xlu0 %9170 }
0x1854   : > { %v9173_v40 = vunpack.i.h.bf16 %v9171_v8  ;;  %v9172_v63 = vunpack.i.l.bf16 %v9171_v8 }
0x1855   : > { %v4064_v9 = vsel %vm1929_vm2, %v11228_v19, %v9178_v62  ;;  %v4063_v61 = vsel %vm1929_vm2, %v11224_v6, %v9177_v36 }
0x1856   : > { %v4062_v52 = vsel %vm1929_vm2, %v11230_v21, %v9173_v40  ;;  %v4061_v50 = vsel %vm1929_vm2, %v11226_v15, %v9172_v63  ;;  %v4068_v3 = vpack.c.bf16 %v4064_v9, %v4063_v61 }
0x1857   : > { %v4067_v51 = vpack.c.bf16 %v4062_v52, %v4061_v50 }
0x1859   : > { %8637 = vmatprep.mubr.msk.bf16.mxu0 %vm1561_vm1, %v4067_v51 }
0x185a   : > { %8638 = vmatmul.mubr.msk.bf16.gmra.mrb[64].mxu0 %vm1561_vm1, %v4068_v3 }
0x1925   : > { %v8635_v60 = vpop.f32.mrb[60].mxu0 }
0x1926   : > { %v4131_v37 = vpop.f32.mrb[61].mxu0  ;;  %v4164_v19 = vadd.f32 %v8635_v60, %v10999_v48 }
0x1927   : > { %v4162_v1 = vadd.f32 %v4131_v37, %v10995_v14  ;;  %v8636_v6 = vpop.f32.mrb[62].mxu0 }
0x1928   : > { %v4134_v35 = vpop.f32.mrb[63].mxu0  ;;  %v11320_v15 = vadd.f32 %v7985_v17, %v4164_v19  ;;  %v4165_v24 = vadd.f32 %v8636_v6, %v11005_v39 }
0x1929   : > { %v11317_v29 = vadd.f32 %v7985_v17, %v4162_v1  ;;  %v4163_v21 = vadd.f32 %v4134_v35, %v11001_v41 }
0x192a   : > { %v11329_v7 = vadd.f32 %v7985_v17, %v4165_v24  ;;  %v4191_v39 = vsel %vm1561_vm1, %v11320_v15, 0.0 }
0x192b   : > { %v11323_v0 = vadd.f32 %v7985_v17, %v4163_v21  ;;  %v4185_v49 = vsel %vm1561_vm1, %v11317_v29, 0.0 }
0x192c   : > { %4186 = vadd.xlane.f32.xlu0 %v4185_v49  ;;  %v4194_v55 = vsel %vm1561_vm1, %v11329_v7, 0.0  ;;  %v9230_v49 = vld [vmem:[%s12168_s18] sm:$0xff]   ;;  %s12170_s18 = sld [smem:[#allocation29_spill]] }
0x192d   : > { %v8639_v31 = vpop.f32.mrb[64].mxu0  ;;  %v4188_v14 = vsel %vm1561_vm1, %v11323_v0, 0.0  ;;  %8641 = vmatprep.subr.bf16.mxu1 %v9230_v49 }
0x192e   : > { %4189 = vadd.xlane.f32.xlu1 %v4188_v14  ;;  %v4147_v48 = vpop.f32.mrb[65].mxu0  ;;  %v4168_v27 = vadd.f32 %v8639_v31, %v11019_v42  ;;  %v9231_v31 = vld [vmem:[%s12169_s30 + $0x8] sm:$0xff]   ;;  %8642 = vmatpush3.bf16.msra.mxu1 %v9230_v49 }
0x192f   : > { %v4166_v41 = vadd.f32 %v4147_v48, %v11015_v34  ;;  %v8640_v38 = vpop.f32.mrb[66].mxu0  ;;  %8643 = vmatprep.subr.bf16.mxu1 %v9231_v31 }
0x1930   : > { %4192 = vadd.xlane.f32.xlu0 %v4191_v39  ;;  %v4150_v23 = vpop.f32.mrb[67].mxu0  ;;  %v4169_v18 = vadd.f32 %v8640_v38, %v11025_v43  ;;  %v11347_v11 = vadd.f32 %v7985_v17, %v4168_v27 }
0x1931   : > { %v4167_v12 = vadd.f32 %v4150_v23, %v11021_v10  ;;  %v11337_v20 = vadd.f32 %v7985_v17, %v4166_v41 }
0x1932   : > { %v11343_v34 = vadd.f32 %v7985_v17, %v4169_v18  ;;  %v4203_v43 = vsel %vm1561_vm1, %v11347_v11, 0.0  ;;  %8644 = vmatpush3.bf16.msra.mxu1 %v9231_v31  ;;  %s12171_s28 = smov %s12170_s18 }
0x1933   : > { %v11339_v30 = vadd.f32 %v7985_v17, %v4167_v12  ;;  %v4197_v10 = vsel %vm1561_vm1, %v11337_v20, 0.0 }
0x1934   : > { %4195 = vadd.xlane.f32.xlu0 %v4194_v55  ;;  %v4206_v42 = vsel %vm1561_vm1, %v11343_v34, 0.0 }
0x1935   : > { %v4200_v56 = vsel %vm1561_vm1, %v11339_v30, 0.0 }
0x1936   : > { %4201 = vadd.xlane.f32.xlu1 %v4200_v56 }
0x1938   : > { %4198 = vadd.xlane.f32.xlu0 %v4197_v10 }
0x193a   : > { %4207 = vadd.xlane.f32.xlu1 %v4206_v42 }
0x193c   : > { %4204 = vadd.xlane.f32.xlu0 %v4203_v43 }
0x19b9   : > { %v4187_v59 = vpop.xlane.xlu0 %4186 }
0x19ba   : > { %v4209_v22 = vmul.f32 0.03125, %v4187_v59 }
0x19bb   : > { %v4190_v33 = vpop.xlane.xlu1 %4189 }
0x19bc   : > { %v11356_v46 = vsub.f32 %v11317_v29, %v4209_v22  ;;  %v4210_v26 = vmul.f32 0.03125, %v4190_v33 }
0x19bd   : > { %v4193_v44 = vpop.xlane.xlu0 %4192 }
0x19be   : > { %v11359_v57 = vsub.f32 %v11323_v0, %v4210_v26  ;;  %v4211_v28 = vmul.f32 0.03125, %v4193_v44  ;;  %v4225_v53 = vmul.f32 %v11356_v46, %v11356_v46 }
0x19c0   : > { %v11364_v2 = vsub.f32 %v11320_v15, %v4211_v28  ;;  %v4233_v32 = vsel %vm1561_vm1, %v4225_v53, 0.0  ;;  %v4226_v47 = vmul.f32 %v11359_v57, %v11359_v57 }
0x19c1   : > { %v4196_v16 = vpop.xlane.xlu0 %4195  ;;  %4234 = vadd.xlane.f32.xlu0 %v4233_v32 }
0x19c2   : > { %v4212_v5 = vmul.f32 0.03125, %v4196_v16  ;;  %v4236_v54 = vsel %vm1561_vm1, %v4226_v47, 0.0  ;;  %v4227_v45 = vmul.f32 %v11364_v2, %v11364_v2 }
0x19c3   : > { %4237 = vadd.xlane.f32.xlu1 %v4236_v54  ;;  %v4202_v13 = vpop.xlane.xlu1 %4201 }
0x19c4   : > { %v11373_v25 = vsub.f32 %v11329_v7, %v4212_v5  ;;  %v4214_v58 = vmul.f32 0.03125, %v4202_v13  ;;  %v4239_v4 = vsel %vm1561_vm1, %v4227_v45, 0.0 }
0x19c5   : > { %4240 = vadd.xlane.f32.xlu0 %v4239_v4  ;;  %v4199_v62 = vpop.xlane.xlu0 %4198 }
0x19c6   : > { %v11377_v36 = vsub.f32 %v11339_v30, %v4214_v58  ;;  %v4213_v8 = vmul.f32 0.03125, %v4199_v62  ;;  %v4228_v40 = vmul.f32 %v11373_v25, %v11373_v25 }
0x19c7   : > { %v4208_v63 = vpop.xlane.xlu1 %4207 }
0x19c8   : > { %v11382_v9 = vsub.f32 %v11337_v20, %v4213_v8  ;;  %v4216_v61 = vmul.f32 0.03125, %v4208_v63  ;;  %v4242_v52 = vsel %vm1561_vm1, %v4228_v40, 0.0  ;;  %v4230_v50 = vmul.f32 %v11377_v36, %v11377_v36 }
0x19c9   : > { %v4205_v3 = vpop.xlane.xlu0 %4204  ;;  %4243 = vadd.xlane.f32.xlu1 %v4242_v52 }
0x19ca   : > { %v11388_v51 = vsub.f32 %v11343_v34, %v4216_v61  ;;  %v4215_v60 = vmul.f32 0.03125, %v4205_v3  ;;  %v4229_v17 = vmul.f32 %v11382_v9, %v11382_v9  ;;  %v4248_v1 = vsel %vm1561_vm1, %v4230_v50, 0.0 }
0x19cc   : > { %v11393_v37 = vsub.f32 %v11347_v11, %v4215_v60  ;;  %v4245_v19 = vsel %vm1561_vm1, %v4229_v17, 0.0  ;;  %v4232_v6 = vmul.f32 %v11388_v51, %v11388_v51 }
0x19cd   : > { %4246 = vadd.xlane.f32.xlu0 %v4245_v19  ;;  %4249 = vadd.xlane.f32.xlu1 %v4248_v1  ;;  %v9232_v19 = vld [vmem:[%s12170_s18] sm:$0xff]   ;;  %v9237_v1 = vld [vmem:[%s12171_s28 + $0x28] sm:$0xff]   ;;  %s12175_s18 = sld [smem:[#allocation30_spill]] }
0x19ce   : > { %v4231_v35 = vmul.f32 %v11393_v37, %v11393_v37  ;;  %v4254_v24 = vsel %vm1561_vm1, %v4232_v6, 0.0  ;;  %8653 = vmatprep.subr.bf16.mxu0 %v9232_v19  ;;  %v9238_v6 = vld [vmem:[%s12171_s28 + $0x30] sm:$0xff]  }
0x19cf   : > { %8654 = vmatpush3.bf16.msra.mxu0 %v9232_v19 }
0x19d0   : > { %v4251_v21 = vsel %vm1561_vm1, %v4231_v35, 0.0  ;;  %v9239_v35 = vld [vmem:[%s12171_s28 + $0x38] sm:$0xff]  }
0x19d1   : > { %4252 = vadd.xlane.f32.xlu0 %v4251_v21  ;;  %4255 = vadd.xlane.f32.xlu1 %v4254_v24  ;;  %v7986_v21 = vld [vmem:[%s12172_s15] ss:$0 sm:$0xff]  ;;  %s12173_s15 = sld [smem:[#allocation31_spill]] }
0x19d7   : > { %s12174_s10 = smov %s12173_s15 }
0x1a4e   : > { %v4235_v14 = vpop.xlane.xlu0 %4234 }
0x1a4f   : > { %v4257_v48 = vmul.f32 0.03125, %v4235_v14 }
0x1a50   : > { %v4238_v41 = vpop.xlane.xlu1 %4237 }
0x1a51   : > { %v4265_v38 = vadd.f32 1e-05, %v4257_v48  ;;  %v4258_v39 = vmul.f32 0.03125, %v4238_v41 }
0x1a52   : > { %v4241_v23 = vpop.xlane.xlu0 %4240 }
0x1a53   : > { %9564 = vrsqrt.f32 %v4265_v38  ;;  %v4266_v18 = vadd.f32 1e-05, %v4258_v39  ;;  %v4259_v12 = vmul.f32 0.03125, %v4241_v23 }
0x1a55   : > { %9566 = vrsqrt.f32 %v4266_v18  ;;  %v4267_v27 = vadd.f32 1e-05, %v4259_v12 }
0x1a56   : > { %v4244_v55 = vpop.xlane.xlu1 %4243 }
0x1a57   : > { %v4260_v56 = vmul.f32 0.03125, %v4244_v55  ;;  %9568 = vrsqrt.f32 %v4267_v27 }
0x1a59   : > { %v4268_v10 = vadd.f32 1e-05, %v4260_v56 }
0x1a5a   : > { %v4247_v42 = vpop.xlane.xlu0 %4246  ;;  %v4250_v43 = vpop.xlane.xlu1 %4249 }
0x1a5b   : > { %9570 = vrsqrt.f32 %v4268_v10  ;;  %v4261_v59 = vmul.f32 0.03125, %v4247_v42  ;;  %v4262_v22 = vmul.f32 0.03125, %v4250_v43 }
0x1a5d   : > { %v9565_v33 = vpop.eup %9564  ;;  %v4269_v26 = vadd.f32 1e-05, %v4261_v59  ;;  %v4270_v44 = vadd.f32 1e-05, %v4262_v22 }
0x1a5e   : > { %v4253_v28 = vpop.xlane.xlu0 %4252  ;;  %v4256_v53 = vpop.xlane.xlu1 %4255  ;;  %v4281_v5 = vmul.f32 %v9565_v33, %v11356_v46 }
0x1a5f   : > { %v9567_v32 = vpop.eup %9566  ;;  %9572 = vrsqrt.f32 %v4269_v26  ;;  %v4263_v47 = vmul.f32 0.03125, %v4253_v28  ;;  %v4264_v16 = vmul.f32 0.03125, %v4256_v53 }
0x1a60   : > { %9574 = vrsqrt.f32 %v4270_v44  ;;  %v4282_v54 = vmul.f32 %v9567_v32, %v11359_v57 }
0x1a61   : > { %v4271_v45 = vadd.f32 1e-05, %v4263_v47  ;;  %v4272_v13 = vadd.f32 1e-05, %v4264_v16  ;;  %v9569_v4 = vpop.eup %9568 }
0x1a62   : > { %v4289_v58 = vpack.c.bf16 %v4282_v54, %v4281_v5  ;;  %v4283_v8 = vmul.f32 %v9569_v4, %v11364_v2 }
0x1a63   : > { %9576 = vrsqrt.f32 %v4271_v45 }
0x1a64   : > { %9578 = vrsqrt.f32 %v4272_v13  ;;  %8645 = vmatprep.mubr.msk.bf16.mxu1 %vm1561_vm1, %v4289_v58 }
0x1a65   : > { %v9571_v62 = vpop.eup %9570 }
0x1a66   : > { %v4284_v40 = vmul.f32 %v9571_v62, %v11373_v25 }
0x1a68   : > { %v4290_v63 = vpack.c.bf16 %v4284_v40, %v4283_v8 }
0x1a69   : > { %v9573_v61 = vpop.eup %9572 }
0x1a6a   : > { %v9575_v46 = vpop.eup %9574  ;;  %8646 = vmatmul.mubr.msk.bf16.vlgmr.msra.gmra.mrb[52].mxu1 %vm1561_vm1, %v4290_v63  ;;  %v4285_v57 = vmul.f32 %v9573_v61, %v11382_v9  ;;  %v9234_v9 = vld [vmem:[%s12171_s28 + $0x10] sm:$0xff]  }
0x1a6b   : > { %v4286_v52 = vmul.f32 %v9575_v46, %v11377_v36  ;;  %v9233_v36 = vld [vmem:[%s12171_s28 + $0x8] sm:$0xff]  }
0x1a6c   : > { %8655 = vmatprep.subr.bf16.mxu0 %v9233_v36 }
0x1a6d   : > { %v9577_v50 = vpop.eup %9576  ;;  %v4291_v3 = vpack.c.bf16 %v4286_v52, %v4285_v57  ;;  %8656 = vmatpush3.bf16.msra.mxu0 %v9233_v36 }
0x1a6e   : > { %v9579_v60 = vpop.eup %9578  ;;  %v4287_v2 = vmul.f32 %v9577_v50, %v11393_v37  ;;  %8657 = vmatprep.subr.bf16.mxu0 %v9234_v9  ;;  %v9235_v37 = vld [vmem:[%s12171_s28 + $0x18] sm:$0xff]  }
0x1a6f   : > { %8649 = vmatprep.mubr.msk.bf16.mxu1 %vm1561_vm1, %v4291_v3  ;;  %v4288_v25 = vmul.f32 %v9579_v60, %v11388_v51  ;;  %v9236_v51 = vld [vmem:[%s12171_s28 + $0x20] sm:$0xff]  }
0x1a71   : > { %v4292_v17 = vpack.c.bf16 %v4288_v25, %v4287_v2  ;;  %8658 = vmatpush3.bf16.msra.mxu0 %v9234_v9 }
0x1a72   : > { %8659 = vmatprep.subr.bf16.mxu0 %v9235_v37 }
0x1a73   : > { %8650 = vmatmul.mubr.msk.bf16.gmra.mrb[56].mxu1 %vm1561_vm1, %v4292_v17 }
0x1a75   : > { %8660 = vmatpush3.bf16.msra.mxu0 %v9235_v37 }
0x1a76   : > { %8661 = vmatprep.subr.bf16.mxu0 %v9236_v51 }
0x1a79   : > { %8662 = vmatpush3.bf16.msra.mxu0 %v9236_v51 }
0x1a7a   : > { %8663 = vmatprep.subr.bf16.mxu0 %v9237_v1 }
0x1a7d   : > { %8664 = vmatpush3.bf16.msra.mxu0 %v9237_v1 }
0x1a7e   : > { %8665 = vmatprep.subr.bf16.mxu0 %v9238_v6 }
0x1a81   : > { %8666 = vmatpush3.bf16.msra.mxu0 %v9238_v6 }
0x1a82   : > { %8667 = vmatprep.subr.bf16.mxu0 %v9239_v35 }
0x1a85   : > { %8668 = vmatpush3.bf16.msra.mxu0 %v9239_v35 }
0x1b3d   : > { %v8647_v24 = vpop.f32.mrb[52].mxu1 }
0x1b3e   : > { %v11426_v49 = vadd.f32 %v8647_v24, %v7986_v21  ;;  %v4362_v31 = vpop.f32.mrb[53].mxu1 }
0x1b3f   : > { %v11428_v14 = vadd.f32 %v7986_v21, %v4362_v31  ;;  %v8648_v48 = vpop.f32.mrb[54].mxu1 }
0x1b40   : > { %v4395_v41 = vand.u32 2147483647, %v11426_v49  ;;  %v11431_v38 = vadd.f32 %v8648_v48, %v7986_v21  ;;  %v4365_v39 = vpop.f32.mrb[55].mxu1  ;;  %vm4555_vm12 = vcmp.lt.f32.partialorder %v11426_v49, 0.0 }
0x1b41   : > { %v4393_v23 = vand.u32 2147483647, %v11428_v14  ;;  %v11434_v18 = vadd.f32 %v7986_v21, %v4365_v39  ;;  %vm4553_vm13 = vcmp.lt.f32.partialorder %v11428_v14, 0.0 }
0x1b42   : > { %v4403_v12 = vmul.f32 0.70710677, %v4395_v41  ;;  %v4396_v27 = vand.u32 2147483647, %v11431_v38  ;;  %vm4556_vm14 = vcmp.lt.f32.partialorder %v11431_v38, 0.0 }
0x1b43   : > { %v4401_v55 = vmul.f32 0.70710677, %v4393_v23  ;;  %v4394_v56 = vand.u32 2147483647, %v11434_v18  ;;  %vm4554_vm15 = vcmp.lt.f32.partialorder %v11434_v18, 0.0 }
0x1b44   : > { %v4411_v10 = vmul.f32 0.3275911, %v4403_v12  ;;  %v4404_v42 = vmul.f32 0.70710677, %v4396_v27  ;;  %v4507_v62 = vmul.f32 %v4403_v12, %v4403_v12  ;;  %v11457_v27 = vmul.f32 0.5, %v11426_v49 }
0x1b45   : > { %v4409_v43 = vmul.f32 0.3275911, %v4401_v55  ;;  %v4402_v59 = vmul.f32 0.70710677, %v4394_v56  ;;  %v4505_v8 = vmul.f32 %v4401_v55, %v4401_v55 }
0x1b46   : > { %v4419_v22 = vadd.f32 1.0, %v4411_v10  ;;  %v4412_v33 = vmul.f32 0.3275911, %v4404_v42  ;;  %v8651_v26 = vpop.f32.mrb[56].mxu1  ;;  %v4508_v63 = vmul.f32 %v4404_v42, %v4404_v42  ;;  %v4515_v2 = vsub.f32 0.0, %v4507_v62 }
0x1b47   : > { %v4417_v44 = vadd.f32 1.0, %v4409_v43  ;;  %v4410_v28 = vmul.f32 0.3275911, %v4402_v59  ;;  %v4378_v53 = vpop.f32.mrb[57].mxu1  ;;  %v11438_v54 = vadd.f32 %v8651_v26, %v7986_v21  ;;  %v4506_v57 = vmul.f32 %v4402_v59, %v4402_v59 }
0x1b48   : > { %9580 = vrcp.f32 %v4419_v22  ;;  %v4420_v32 = vadd.f32 1.0, %v4412_v33  ;;  %v8652_v47 = vpop.f32.mrb[58].mxu1  ;;  %v11440_v45 = vadd.f32 %v7986_v21, %v4378_v53  ;;  %v4513_v25 = vsub.f32 0.0, %v4505_v8 }
0x1b49   : > { %9582 = vrcp.f32 %v4417_v44  ;;  %v4381_v16 = vpop.f32.mrb[59].mxu1  ;;  %v4418_v5 = vadd.f32 1.0, %v4410_v28  ;;  %v11442_v13 = vadd.f32 %v8652_v47, %v7986_v21  ;;  %v4399_v4 = vand.u32 2147483647, %v11438_v54 }
0x1b4a   : > { %v11444_v58 = vadd.f32 %v7986_v21, %v4381_v16  ;;  %9584 = vrcp.f32 %v4420_v32  ;;  %v4397_v40 = vand.u32 2147483647, %v11440_v45  ;;  %v4516_v9 = vsub.f32 0.0, %v4508_v63 }
0x1b4b   : > { %9586 = vrcp.f32 %v4418_v5  ;;  %v4407_v61 = vmul.f32 0.70710677, %v4399_v4  ;;  %v4400_v46 = vand.u32 2147483647, %v11442_v13  ;;  %v4514_v21 = vsub.f32 0.0, %v4506_v57 }
0x1b4c   : > { %v4405_v52 = vmul.f32 0.70710677, %v4397_v40  ;;  %v4398_v50 = vand.u32 2147483647, %v11444_v58  ;;  %v4525_v12 = vmul.f32 1.442695, %v4515_v2 }
0x1b4d   : > { %v4415_v3 = vmul.f32 0.3275911, %v4407_v61  ;;  %v4408_v60 = vmul.f32 0.70710677, %v4400_v46  ;;  %v4511_v51 = vmul.f32 %v4407_v61, %v4407_v61  ;;  %v4521_v22 = vmul.f32 1.442695, %v4513_v25 }
0x1b4e   : > { %v4413_v17 = vmul.f32 0.3275911, %v4405_v52  ;;  %v4406_v19 = vmul.f32 0.70710677, %v4398_v50  ;;  %v4509_v41 = vmul.f32 %v4405_v52, %v4405_v52  ;;  %v4527_v26 = vmul.f32 1.442695, %v4516_v9 }
0x1b4f   : > { %v4423_v37 = vadd.f32 1.0, %v4415_v3  ;;  %v4416_v1 = vmul.f32 0.3275911, %v4408_v60  ;;  %v4519_v10 = vsub.f32 0.0, %v4511_v51  ;;  %v4512_v42 = vmul.f32 %v4408_v60, %v4408_v60 }
0x1b50   : > { %v4421_v24 = vadd.f32 1.0, %v4413_v17  ;;  %v4414_v31 = vmul.f32 0.3275911, %v4406_v19  ;;  %v4523_v53 = vmul.f32 1.442695, %v4514_v21  ;;  %v4517_v32 = vsub.f32 0.0, %v4509_v41 }
0x1b51   : > { %9588 = vrcp.f32 %v4423_v37  ;;  %v4424_v39 = vadd.f32 1.0, %v4416_v1  ;;  %v4533_v62 = vmul.f32 1.442695, %v4519_v10  ;;  %v4520_v8 = vsub.f32 0.0, %v4512_v42 }
0x1b52   : > { %v11450_v36 = vpop.eup %9580  ;;  %9590 = vrcp.f32 %v4421_v24  ;;  %v4422_v43 = vadd.f32 1.0, %v4414_v31  ;;  %v4529_v57 = vmul.f32 1.442695, %v4517_v32  ;;  %v4510_v52 = vmul.f32 %v4406_v19, %v4406_v19 }
0x1b53   : > { %v11452_v6 = vpop.eup %9582  ;;  %v4435_v35 = vmul.f32 1.0614054, %v11450_v36  ;;  %9592 = vrcp.f32 %v4424_v39  ;;  %v11474_v17 = vmul.f32 0.5, %v11428_v14  ;;  %v4535_v9 = vmul.f32 1.442695, %v4520_v8 }
0x1b54   : > { %v4433_v48 = vmul.f32 1.0614054, %v11452_v6  ;;  %v11459_v55 = vpop.eup %9584  ;;  %9594 = vpow2.f32 %v4525_v12  ;;  %v4518_v31 = vsub.f32 0.0, %v4510_v52  ;;  %v11488_v10 = vmul.f32 0.5, %v11431_v38 }
0x1b55   : > { %v4443_v23 = vadd.f32 -1.4531521, %v4435_v35  ;;  %v4436_v33 = vmul.f32 1.0614054, %v11459_v55  ;;  %v11463_v44 = vpop.eup %9586  ;;  %9596 = vrcp.f32 %v4422_v43  ;;  %vm4559_vm4 = vcmp.lt.f32.partialorder %v11438_v54, 0.0 }
0x1b56   : > { %v4441_v56 = vadd.f32 -1.4531521, %v4433_v48  ;;  %v4434_v5 = vmul.f32 1.0614054, %v11463_v44  ;;  %9598 = vpow2.f32 %v4521_v22  ;;  %vm4560_vm5 = vcmp.lt.f32.partialorder %v11442_v13, 0.0 }
0x1b57   : > { %v4451_v59 = vmul.f32 %v11450_v36, %v4443_v23  ;;  %v4444_v16 = vadd.f32 -1.4531521, %v4436_v33  ;;  %9600 = vpow2.f32 %v4527_v26  ;;  %vm4557_vm6 = vcmp.lt.f32.partialorder %v11440_v45, 0.0 }
0x1b58   : > { %v4449_v28 = vmul.f32 %v11452_v6, %v4441_v56  ;;  %v4442_v61 = vadd.f32 -1.4531521, %v4434_v5  ;;  %9602 = vpow2.f32 %v4523_v53  ;;  %vm4558_vm7 = vcmp.lt.f32.partialorder %v11444_v58, 0.0 }
0x1b59   : > { %v4459_v47 = vadd.f32 1.4214138, %v4451_v59  ;;  %v4452_v63 = vmul.f32 %v11459_v55, %v4444_v16  ;;  %9604 = vpow2.f32 %v4533_v62  ;;  %v4531_v16 = vmul.f32 1.442695, %v4518_v31 }
0x1b5a   : > { %v4457_v4 = vadd.f32 1.4214138, %v4449_v28  ;;  %v4450_v60 = vmul.f32 %v11463_v44, %v4442_v61  ;;  %9606 = vpow2.f32 %v4529_v57 }
0x1b5b   : > { %v4467_v40 = vmul.f32 %v11450_v36, %v4459_v47  ;;  %v4460_v3 = vadd.f32 1.4214138, %v4452_v63  ;;  %v11471_v2 = vpop.eup %9588  ;;  %9608 = vpow2.f32 %v4535_v9 }
0x1b5c   : > { %v4465_v46 = vmul.f32 %v11452_v6, %v4457_v4  ;;  %v11476_v37 = vpop.eup %9590  ;;  %v4458_v19 = vadd.f32 1.4214138, %v4450_v60  ;;  %v4439_v35 = vmul.f32 1.0614054, %v11471_v2  ;;  %9610 = vpow2.f32 %v4531_v16 }
0x1b5d   : > { %v4475_v50 = vadd.f32 -0.28449672, %v4467_v40  ;;  %v4468_v1 = vmul.f32 %v11459_v55, %v4460_v3  ;;  %v4437_v24 = vmul.f32 1.0614054, %v11476_v37  ;;  %v11484_v12 = vpop.eup %9592  ;;  %v4578_v16 = vmul.f32 0.5, %v11434_v18 }
0x1b5e   : > { %v4473_v25 = vadd.f32 -0.28449672, %v4465_v46  ;;  %v4466_v39 = vmul.f32 %v11463_v44, %v4458_v19  ;;  %v4447_v23 = vadd.f32 -1.4531521, %v4439_v35  ;;  %v9595_v43 = vpop.eup %9594  ;;  %v4440_v47 = vmul.f32 1.0614054, %v11484_v12 }
0x1b5f   : > { %v4483_v51 = vmul.f32 %v11450_v36, %v4475_v50  ;;  %v4476_v41 = vadd.f32 -0.28449672, %v4468_v1  ;;  %v4445_v42 = vadd.f32 -1.4531521, %v4437_v24  ;;  %v11494_v28 = vpop.eup %9596 }
0x1b60   : > { %v4481_v21 = vmul.f32 %v11452_v6, %v4473_v25  ;;  %v4474_v33 = vadd.f32 -0.28449672, %v4466_v39  ;;  %v4455_v26 = vmul.f32 %v11471_v2, %v4447_v23  ;;  %v9599_v5 = vpop.eup %9598  ;;  %v4448_v46 = vadd.f32 -1.4531521, %v4440_v47 }
0x1b61   : > { %v4491_v48 = vadd.f32 0.2548296, %v4483_v51  ;;  %v4484_v22 = vmul.f32 %v11459_v55, %v4476_v41  ;;  %v4453_v32 = vmul.f32 %v11476_v37, %v4445_v42  ;;  %v9601_v40 = vpop.eup %9600  ;;  %v4438_v57 = vmul.f32 1.0614054, %v11494_v28 }
0x1b62   : > { %v4489_v56 = vadd.f32 0.2548296, %v4481_v21  ;;  %v4463_v8 = vadd.f32 1.4214138, %v4455_v26  ;;  %v4456_v1 = vmul.f32 %v11484_v12, %v4448_v46 }
0x1b63   : > { %v4499_v59 = vmul.f32 %v11450_v36, %v4491_v48  ;;  %v4492_v62 = vadd.f32 0.2548296, %v4484_v22  ;;  %v4482_v36 = vmul.f32 %v11463_v44, %v4474_v33  ;;  %v4461_v61 = vadd.f32 1.4214138, %v4453_v32 }
0x1b64   : > { %v4497_v53 = vmul.f32 %v11452_v6, %v4489_v56  ;;  %v9603_v6 = vpop.eup %9602  ;;  %v4471_v60 = vmul.f32 %v11471_v2, %v4463_v8  ;;  %v4446_v19 = vadd.f32 -1.4531521, %v4438_v57  ;;  %v4464_v23 = vadd.f32 1.4214138, %v4456_v1 }
0x1b65   : > { %v4539_v4 = vmul.f32 %v9595_v43, %v4499_v59  ;;  %v4500_v50 = vmul.f32 %v11459_v55, %v4492_v62  ;;  %v4490_v3 = vadd.f32 0.2548296, %v4482_v36  ;;  %v9605_v25 = vpop.eup %9604  ;;  %v4469_v51 = vmul.f32 %v11476_v37, %v4461_v61 }
0x1b66   : > { %v4537_v63 = vmul.f32 %v9599_v5, %v4497_v53  ;;  %v4479_v31 = vadd.f32 -0.28449672, %v4471_v60  ;;  %v9607_v48 = vpop.eup %9606  ;;  %v4454_v55 = vmul.f32 %v11494_v28, %v4446_v19  ;;  %v4472_v26 = vmul.f32 %v11484_v12, %v4464_v23 }
0x1b67   : > { %v4547_v52 = vsub.f32 1.0, %v4539_v4  ;;  %v4540_v21 = vmul.f32 %v9601_v40, %v4500_v50  ;;  %v4498_v24 = vmul.f32 %v11463_v44, %v4490_v3  ;;  %v4477_v39 = vadd.f32 -0.28449672, %v4469_v51  ;;  %v9609_v22 = vpop.eup %9608 }
0x1b68   : > { %v4545_v9 = vsub.f32 1.0, %v4537_v63  ;;  %v4487_v59 = vmul.f32 %v11471_v2, %v4479_v31  ;;  %v4480_v4 = vadd.f32 -0.28449672, %v4472_v26  ;;  %v4462_v62 = vadd.f32 1.4214138, %v4454_v55 }
0x1b69   : > { %v4563_v35 = vsub.f32 0.0, %v4547_v52  ;;  %v4548_v42 = vsub.f32 1.0, %v4540_v21  ;;  %v4538_v43 = vmul.f32 %v9603_v6, %v4498_v24  ;;  %v4485_v44 = vmul.f32 %v11476_v37, %v4477_v39 }
0x1b6a   : > { %v4561_v41 = vsub.f32 0.0, %v4545_v9  ;;  %v4495_v5 = vadd.f32 0.2548296, %v4487_v59  ;;  %v4488_v46 = vmul.f32 %v11484_v12, %v4480_v4  ;;  %v4470_v57 = vmul.f32 %v11494_v28, %v4462_v62 }
0x1b6b   : > { %v4571_v56 = vsel %vm4555_vm12, %v4563_v35, %v4547_v52  ;;  %v4564_v32 = vsub.f32 0.0, %v4548_v42  ;;  %v4546_v47 = vsub.f32 1.0, %v4538_v43  ;;  %v4493_v49 = vadd.f32 0.2548296, %v4485_v44 }
0x1b6c   : > { %v4569_v33 = vsel %vm4553_vm13, %v4561_v41, %v4545_v9  ;;  %v4587_v53 = vadd.f32 1.0, %v4571_v56  ;;  %v4503_v40 = vmul.f32 %v11471_v2, %v4495_v5  ;;  %v4496_v2 = vadd.f32 0.2548296, %v4488_v46 }
0x1b6d   : > { %v4585_v36 = vadd.f32 1.0, %v4569_v33  ;;  %v4572_v8 = vsel %vm4556_vm14, %v4564_v32, %v4548_v42  ;;  %v4562_v14 = vsub.f32 0.0, %v4546_v47  ;;  %v4501_v61 = vmul.f32 %v11476_v37, %v4493_v49 }
0x1b6e   : > { %v4588_v63 = vadd.f32 1.0, %v4572_v8  ;;  %v4595_v6 = vmul.f32 %v4587_v53, %v11457_v27  ;;  %v4543_v50 = vmul.f32 %v9605_v25, %v4503_v40  ;;  %v4478_v51 = vadd.f32 -0.28449672, %v4470_v57  ;;  %v9611_v25 = vpop.eup %9610  ;;  %v8008_v8 = vld [vmem:[%s12174_s10 + $0x20] sm:$0xff] }
0x1b6f   : > { %v4570_v52 = vsel %vm4554_vm15, %v4562_v14, %v4546_v47  ;;  %v4541_v60 = vmul.f32 %v9607_v48, %v4501_v61  ;;  %v4504_v1 = vmul.f32 %v11484_v12, %v4496_v2  ;;  %v4593_v19 = vmul.f32 %v4585_v36, %v11474_v17  ;;  %v4757_v36 = vld [vmem:[%s12173_s15] sm:$0xff]  ;;  %s12081_s15 = smov 32  }
0x1b70   : > { %v4596_v38 = vmul.f32 %v4588_v63, %v11488_v10  ;;  %v4586_v3 = vadd.f32 1.0, %v4570_v52  ;;  %v4551_v9 = vsub.f32 1.0, %v4543_v50  ;;  %v4486_v24 = vmul.f32 %v11494_v28, %v4478_v51  ;;  %8693 = vmatprep.mubr.msk.f32.mxu1 %vm2019_vm3, %v4757_v36  ;;  %v8001_v61 = vld [vmem:[%s12175_s18] ss:$0 sm:$0xff]  ;;  %s12176_s18 = sld [smem:[#allocation32_spill]] }
0x1b71   : > { %v4549_v21 = vsub.f32 1.0, %v4541_v60  ;;  %v4544_v31 = vmul.f32 %v9609_v22, %v4504_v1  ;;  %v4583_v56 = vmul.f32 0.5, %v11438_v54  ;;  %v4584_v59 = vmul.f32 0.5, %v11442_v13 }
0x1b72   : > { %v4602_v37 = vpack.c.bf16 %v4596_v38, %v4595_v6  ;;  %v4594_v35 = vmul.f32 %v4586_v3, %v4578_v16  ;;  %v4567_v27 = vsub.f32 0.0, %v4551_v9  ;;  %v4494_v10 = vadd.f32 0.2548296, %v4486_v24 }
0x1b73   : > { %v4552_v41 = vsub.f32 1.0, %v4544_v31  ;;  %v4565_v39 = vsub.f32 0.0, %v4549_v21  ;;  %v4581_v54 = vmul.f32 0.5, %v11440_v45  ;;  %v4582_v5 = vmul.f32 0.5, %v11444_v58  ;;  %v8012_v31 = vld [vmem:[%s12174_s10 + $0x30] sm:$0xff] }
0x1b74   : > { %v4601_v18 = vpack.c.bf16 %v4594_v35, %v4593_v19  ;;  %v4575_v48 = vsel %vm4559_vm4, %v4567_v27, %v4551_v9  ;;  %v4502_v23 = vmul.f32 %v11494_v28, %v4494_v10  ;;  %vm7702_vm15 = vcmask 8192  }
0x1b75   : > { %v4568_v12 = vsub.f32 0.0, %v4552_v41  ;;  %v4591_v17 = vadd.f32 1.0, %v4575_v48  ;;  %v4573_v43 = vsel %vm4557_vm6, %v4565_v39, %v4549_v21 }
0x1b76   : > { %8669 = vmatprep.mubr.bf16.mxu0 %v4601_v18  ;;  %v4542_v55 = vmul.f32 %v9611_v25, %v4502_v23  ;;  %v4589_v53 = vadd.f32 1.0, %v4573_v43  ;;  %v8013_v18 = vld [vmem:[%s12174_s10 + $0x38] sm:$0xff]  ;;  %s12177_s1 = smov %s12176_s18 }
0x1b77   : > { %8670 = vmatmul.mubr.bf16.vlgmr.msra.gmra.mrb[68].mxu0 %v4602_v37  ;;  %v4576_v42 = vsel %vm4560_vm5, %v4568_v12, %v4552_v41  ;;  %v4599_v26 = vmul.f32 %v4591_v17, %v4583_v56 }
0x1b78   : > { %v4592_v22 = vadd.f32 1.0, %v4576_v42  ;;  %v4550_v33 = vsub.f32 1.0, %v4542_v55  ;;  %v4597_v4 = vmul.f32 %v4589_v53, %v4581_v54  ;;  %v10006_v54 = vmov 0.0  }
0x1b7a   : > { %v4566_v44 = vsub.f32 0.0, %v4550_v33  ;;  %v4600_v28 = vmul.f32 %v4592_v22, %v4584_v59 }
0x1b7c   : > { %v4574_v32 = vsel %vm4558_vm7, %v4566_v44, %v4550_v33  ;;  %v4604_v47 = vpack.c.bf16 %v4600_v28, %v4599_v26 }
0x1b7d   : > { %v4590_v49 = vadd.f32 1.0, %v4574_v32 }
0x1b7f   : > { %v4598_v13 = vmul.f32 %v4590_v49, %v4582_v5  ;;  %v9241_v5 = vld [vmem:[%s12177_s1 + $0x8] sm:$0xff]  }
0x1b81   : > { %v4603_v62 = vpack.c.bf16 %v4598_v13, %v4597_v4 }
0x1b83   : > { %8673 = vmatprep.mubr.bf16.mxu0 %v4603_v62 }
0x1b84   : > { %8674 = vmatmul.mubr.bf16.gmra.mrb[72].mxu0 %v4604_v47  ;;  %v9240_v47 = vld [vmem:[%s12176_s18] sm:$0xff]   ;;  %s12178_s18 = sld [smem:[#allocation33_spill]] }
0x1b85   : > { %8731 = vmatprep.mubr.msk.f32.mxu0 %vm2019_vm3, %v8008_v8 }
0x1c4a   : > { %v8671_v14 = vpop.f32.mrb[68].mxu0 }
0x1c4b   : > { %v4736_v40 = vadd.f32 %v8671_v14, %v11320_v15  ;;  %v4703_v63 = vpop.f32.mrb[69].mxu0 }
0x1c4c   : > { %v4734_v45 = vadd.f32 %v4703_v63, %v11317_v29  ;;  %v8672_v58 = vpop.f32.mrb[70].mxu0  ;;  %v9242_v63 = vld [vmem:[%s12177_s1 + $0x10] sm:$0xff]  }
0x1c4d   : > { %v4737_v46 = vadd.f32 %v8672_v58, %v11329_v7  ;;  %v4706_v57 = vpop.f32.mrb[71].mxu0  ;;  %v4751_v52 = vadd.f32 %v8001_v61, %v4736_v40  ;;  %v9245_v58 = vld [vmem:[%s12177_s1 + $0x28] sm:$0xff]  }
0x1c4e   : > { %v4735_v6 = vadd.f32 %v4706_v57, %v11323_v0  ;;  %v4749_v50 = vadd.f32 %v8001_v61, %v4734_v45  ;;  %v9244_v45 = vld [vmem:[%s12177_s1 + $0x20] sm:$0xff]   ;;  %v9247_v57 = vld [vmem:[%s12177_s1 + $0x38] sm:$0xff]  }
0x1c4f   : > { %v4752_v16 = vadd.f32 %v8001_v61, %v4737_v46  ;;  %v9246_v46 = vld [vmem:[%s12177_s1 + $0x30] sm:$0xff]  }
0x1c50   : > { %v4750_v38 = vadd.f32 %v8001_v61, %v4735_v6 }
0x1c51   : > { %v8909_v3 = vpack.c.bf16 %v4752_v16, %v4751_v52 }
0x1c52   : > { %v8905_v60 = vpack.c.bf16 %v4750_v38, %v4749_v50 }
0x1c54   : > { %8906 = vmatprep.subr.bf16.mxu1 %v8905_v60  ;;  %8938 = vmatprep.subr.bf16.mxu0 %v8905_v60 }
0x1c55   : > { %8908 = vmatpush3.bf16.msra.mxu1 %v8905_v60  ;;  %8940 = vmatpush3.bf16.msra.mxu0 %v8905_v60 }
0x1c56   : > { %8910 = vmatprep.subr.bf16.mxu1 %v8909_v3  ;;  %8942 = vmatprep.subr.bf16.mxu0 %v8909_v3 }
0x1c57   : > { %v8675_v29 = vpop.f32.mrb[72].mxu0 }
0x1c58   : > { %v4740_v15 = vadd.f32 %v8675_v29, %v11347_v11  ;;  %v4719_v7 = vpop.f32.mrb[73].mxu0  ;;  %v8005_v11 = vld [vmem:[%s12174_s10 + $0x18] sm:$0xff] }
0x1c59   : > { %8912 = vmatpush3.bf16.msra.mxu1 %v8909_v3  ;;  %8944 = vmatpush3.bf16.msra.mxu0 %v8909_v3  ;;  %v4738_v0 = vadd.f32 %v4719_v7, %v11337_v20  ;;  %v8676_v2 = vpop.f32.mrb[74].mxu0  ;;  %v4758_v20 = vld [vmem:[%s12174_s10 + $0x8] sm:$0xff] }
0x1c5a   : > { %v4741_v9 = vadd.f32 %v8676_v2, %v11343_v34  ;;  %v4722_v51 = vpop.f32.mrb[75].mxu0  ;;  %v4755_v1 = vadd.f32 %v8001_v61, %v4740_v15  ;;  %v8004_v34 = vld [vmem:[%s12174_s10 + $0x10] sm:$0xff]  ;;  %v8016_v2 = vld [vmem:[%s12178_s18] ss:$0 sm:$0xff]  ;;  %s12182_s18 = smov 48  }
0x1c5b   : > { %v4739_v37 = vadd.f32 %v4722_v51, %v11339_v30  ;;  %v4753_v35 = vadd.f32 %v8001_v61, %v4738_v0  ;;  %v8009_v30 = vld [vmem:[%s12174_s10 + $0x28] sm:$0xff] }
0x1c5c   : > { %v4756_v19 = vadd.f32 %v8001_v61, %v4741_v9 }
0x1c5d   : > { %v4754_v27 = vadd.f32 %v8001_v61, %v4739_v37  ;;  %v9243_v61 = vld [vmem:[%s12177_s1 + $0x18] sm:$0xff]   ;;  %s12184_s1 = smov 96  }
0x1c5e   : > { %v8917_v21 = vpack.c.bf16 %v4756_v19, %v4755_v1 }
0x1c5f   : > { %v8913_v24 = vpack.c.bf16 %v4754_v27, %v4753_v35 }
0x1c61   : > { %8914 = vmatprep.subr.bf16.mxu1 %v8913_v24  ;;  %8946 = vmatprep.subr.bf16.mxu0 %v8913_v24 }
0x1c62   : > { %8916 = vmatpush3.bf16.msra.mxu1 %v8913_v24  ;;  %8948 = vmatpush3.bf16.msra.mxu0 %v8913_v24 }
0x1c63   : > { %8918 = vmatprep.subr.bf16.mxu1 %v8917_v21  ;;  %8950 = vmatprep.subr.bf16.mxu0 %v8917_v21 }
0x1c66   : > { %8920 = vmatpush3.bf16.msra.mxu1 %v8917_v21  ;;  %8952 = vmatpush3.bf16.msra.mxu0 %v8917_v21 }
0x1c67   : > { %8922 = vmatprep.subr.bf16.mxu1 %v8905_v60  ;;  %8753 = vmatprep.subr.bf16.mxu0 %v10006_v54 }
0x1c69   : > { %8694 = vmatmul.mubr.msk.f32.vlgmr.msra.gmra.mrb[60].mxu1 %vm2019_vm3, %v4758_v20  ;;  %8732 = vmatmul.mubr.msk.f32.vlgmr.msra.gmra.mrb[76].mxu0 %vm2019_vm3, %v8009_v30 }
0x1c6a   : > { %8924 = vmatpush3.bf16.msra.mxu1 %v8905_v60  ;;  %8712 = vmatprep.mubr.msk.f32.mxu1 %vm2019_vm3, %v8004_v34 }
0x1c6b   : > { %8926 = vmatprep.subr.bf16.mxu1 %v8909_v3  ;;  %8754 = vmatpush3.bf16.msra.mxu0 %v9240_v47 }
0x1c6c   : > { %8755 = vmatprep.subr.bf16.mxu0 %v10006_v54  ;;  %8769 = vmatprep.mubr.msk.bf16.mxu0 %vm10007_vm9, %v10006_v54 }
0x1c6e   : > { %8928 = vmatpush3.bf16.msra.mxu1 %v8909_v3 }
0x1c6f   : > { %8930 = vmatprep.subr.bf16.mxu1 %v8913_v24  ;;  %8756 = vmatpush3.bf16.msra.mxu0 %v9241_v5 }
0x1c70   : > { %8757 = vmatprep.subr.bf16.mxu0 %v10006_v54 }
0x1c72   : > { %8932 = vmatpush3.bf16.msra.mxu1 %v8913_v24 }
0x1c73   : > { %8934 = vmatprep.subr.bf16.mxu1 %v8917_v21  ;;  %8758 = vmatpush3.bf16.msra.mxu0 %v9242_v63 }
0x1c74   : > { %8759 = vmatprep.subr.bf16.mxu0 %v10006_v54 }
0x1c76   : > { %8936 = vmatpush3.bf16.msra.mxu1 %v8917_v21 }
0x1c77   : > { %8954 = vmatprep.subr.bf16.mxu1 %v8905_v60  ;;  %8760 = vmatpush3.bf16.msra.mxu0 %v9243_v61 }
0x1c78   : > { %8761 = vmatprep.subr.bf16.mxu0 %v10006_v54 }
0x1c79   : > { %8713 = vmatmul.mubr.msk.f32.vlgmr.msra.gmra.mrb[62].mxu1 %vm2019_vm3, %v8005_v11 }
0x1c7a   : > { %8956 = vmatpush3.bf16.msra.mxu1 %v8905_v60  ;;  %8750 = vmatprep.mubr.msk.f32.mxu1 %vm2019_vm3, %v8012_v31 }
0x1c7b   : > { %8958 = vmatprep.subr.bf16.mxu1 %v8909_v3  ;;  %8762 = vmatpush3.bf16.msra.mxu0 %v9244_v45 }
0x1c7c   : > { %8763 = vmatprep.subr.bf16.mxu0 %v10006_v54 }
0x1c7e   : > { %8960 = vmatpush3.bf16.msra.mxu1 %v8909_v3 }
0x1c7f   : > { %8962 = vmatprep.subr.bf16.mxu1 %v8913_v24  ;;  %8764 = vmatpush3.bf16.msra.mxu0 %v9245_v58 }
0x1c80   : > { %8765 = vmatprep.subr.bf16.mxu0 %v10006_v54 }
0x1c82   : > { %8964 = vmatpush3.bf16.msra.mxu1 %v8913_v24 }
0x1c83   : > { %8966 = vmatprep.subr.bf16.mxu1 %v8917_v21  ;;  %8766 = vmatpush3.bf16.msra.mxu0 %v9246_v46 }
0x1c84   : > { %8767 = vmatprep.subr.bf16.mxu0 %v10006_v54 }
0x1c86   : > { %8968 = vmatpush3.bf16.msra.mxu1 %v8917_v21 }
0x1c87   : > { %8768 = vmatpush3.bf16.msra.mxu0 %v9247_v57 }
0x1c88   : > { %8779 = vmatprep.subr.bf16.mxu0 %v10006_v54 }
0x1c89   : > { %8751 = vmatmul.mubr.msk.f32.vlgmr.msra.gmra.mrb[64].mxu1 %vm2019_vm3, %v8013_v18 }
0x1d3c   : > { %v8695_v10 = vpop.f32.mrb[60].mxu1  ;;  %v8733_v25 = vpop.f32.mrb[76].mxu0 }
0x1d3d   : > { %v4831_v48 = vpop.f32.mrb[61].mxu1  ;;  %5104 = vrot.lane.b32.xlu1 %v8733_v25, %s12089_s26  ;;  %v4999_v41 = vpop.f32.mrb[77].mxu0 }
0x1d41   : > { %5102 = vrot.lane.b32.xlu1 %v4999_v41, %s12089_s26 }
0x1d4c   : > { %v8714_v39 = vpop.f32.mrb[62].mxu1 }
0x1d4d   : > { %5096 = vrot.lane.b32.xlu1 %v8714_v39, %s12081_s15  ;;  %v4915_v23 = vpop.f32.mrb[63].mxu1 }
0x1d4e   : > { %5094 = vrot.lane.b32.xlu0 %v4915_v23, %s12081_s15  ;;  %s12179_s15 = sld [smem:[#allocation34_spill]] }
0x1d54   : > { %v9250_v41 = vld [vmem:[%s12179_s15 + $0x4] ss:$8 sps:$4 sm:$0xff]  }
0x1d55   : > { %5350 = vmatprep.subr.bf16.mxu1 %v9250_v41 }
0x1d5c   : > { %v8752_v12 = vpop.f32.mrb[64].mxu1 }
0x1d5d   : > { %5112 = vrot.lane.b32.xlu1 %v8752_v12, %s12083_s23  ;;  %v5083_v17 = vpop.f32.mrb[65].mxu1 }
0x1d5e   : > { %5110 = vrot.lane.b32.xlu0 %v5083_v17, %s12083_s23  ;;  %s12180_s23 = smov %s12179_s15  ;;  %s12181_s15 = sld [smem:[#allocation35_spill]] }
0x1d5f   : > { %v9248_v39 = vld [vmem:[%s12180_s23] ss:$8 sps:$4 sm:$0xff]   ;;  %v9253_v23 = vld [vmem:[%s12180_s23 + $0x14] ss:$8 sps:$4 sm:$0xff]   ;;  %v9251_v12 = vld [vmem:[%s12180_s23 + $0x10] ss:$8 sps:$4 sm:$0xff]  }
0x1d60   : > { %5351 = vmatpush1.bf16.msra.mxu1 %v9248_v39  ;;  %v9256_v17 = vld [vmem:[%s12180_s23 + $0x24] ss:$8 sps:$4 sm:$0xff]  }
0x1d61   : > { %5352 = vmatprep.subr.bf16.mxu1 %v9253_v23 }
0x1d64   : > { %5353 = vmatpush1.bf16.msra.mxu1 %v9251_v12 }
0x1d65   : > { %5354 = vmatprep.subr.bf16.mxu1 %v9256_v17 }
0x1daf   : > { %v5105_v55 = vpop.permute.xlu1 %5104 }
0x1db3   : > { %v5103_v56 = vpop.permute.xlu1 %5102 }
0x1dbf   : > { %v5097_v42 = vpop.permute.xlu1 %5096 }
0x1dc0   : > { %v5095_v43 = vpop.permute.xlu0 %5094  ;;  %v5117_v59 = vsel %vm1561_vm1, %v8695_v10, %v5097_v42  ;;  %v9257_v42 = vld [vmem:[%s12180_s23 + $0x30] ss:$8 sps:$4 sm:$0xff]  }
0x1dc1   : > { %v5116_v22 = vsel %vm1561_vm1, %v4831_v48, %v5095_v43  ;;  %v5119_v44 = vsel %vm2019_vm3, %v5117_v59, %v5105_v55  ;;  %v9254_v55 = vld [vmem:[%s12180_s23 + $0x20] ss:$8 sps:$4 sm:$0xff]   ;;  %v10008_v43 = vmov 0  }
0x1dc2   : > { %v5118_v53 = vsel %vm2019_vm3, %v5116_v22, %v5103_v56  ;;  %5355 = vmatpush1.bf16.msra.mxu1 %v9254_v55  ;;  %v9259_v56 = vld [vmem:[%s12180_s23 + $0x34] ss:$8 sps:$4 sm:$0xff]   ;;  %5382 = vmatprep.mubr.bf16.mxu1 %v10008_v43 }
0x1dc3   : > { %5356 = vmatprep.subr.bf16.mxu1 %v9259_v56 }
0x1dc6   : > { %5357 = vmatpush1.bf16.msra.mxu1 %v9257_v42 }
0x1dc7   : > { %8773 = vmatprep.subr.bf16.mxu1 %v10006_v54 }
0x1dcf   : > { %v5113_v33 = vpop.permute.xlu1 %5112 }
0x1dd0   : > { %v5111_v26 = vpop.permute.xlu0 %5110  ;;  %v5122_v28 = vsel %vm5120_vm8, %v5119_v44, %v5113_v33 }
0x1dd1   : > { %5125 = vadd.xlane.f32.xlu1 %v5122_v28  ;;  %v5121_v32 = vsel %vm5120_vm8, %v5118_v53, %v5111_v26 }
0x1dd2   : > { %5123 = vadd.xlane.f32.xlu0 %v5121_v32 }
0x1e5e   : > { %v5126_v49 = vpop.xlane.xlu1 %5125 }
0x1e5f   : > { %v5124_v4 = vpop.xlane.xlu0 %5123  ;;  %v5129_v13 = vmul.f32 0.0078125, %v5126_v49 }
0x1e60   : > { %v5128_v62 = vmul.f32 0.0078125, %v5124_v4  ;;  %v5297_v4 = vlaneseq }
0x1e61   : > { %v5131_v8 = vsub.f32 %v5122_v28, %v5129_v13 }
0x1e62   : > { %v5130_v36 = vsub.f32 %v5121_v32, %v5128_v62  ;;  %v5298_v13 = vshrl.u32 %v5297_v4, 7 }
0x1e63   : > { %v5133_v40 = vmul.f32 %v5131_v8, %v5131_v8 }
0x1e64   : > { %v5132_v14 = vmul.f32 %v5130_v36, %v5130_v36  ;;  %v11621_v62 = vsub.s32 0, %v5298_v13 }
0x1e66   : > { %5134 = vadd.xlane.f32.xlu0 %v5132_v14 }
0x1e6a   : > { %5136 = vadd.xlane.f32.xlu0 %v5133_v40 }
0x1ef3   : > { %v5135_v6 = vpop.xlane.xlu0 %5134 }
0x1ef4   : > { %v5138_v52 = vmul.f32 0.0078125, %v5135_v6 }
0x1ef6   : > { %v5140_v16 = vadd.f32 1e-05, %v5138_v52 }
0x1ef7   : > { %v5137_v50 = vpop.xlane.xlu0 %5136 }
0x1ef8   : > { %v5139_v38 = vmul.f32 0.0078125, %v5137_v50  ;;  %9612 = vrsqrt.f32 %v5140_v16 }
0x1efa   : > { %v5141_v3 = vadd.f32 1e-05, %v5139_v38 }
0x1efc   : > { %9614 = vrsqrt.f32 %v5141_v3 }
0x1f02   : > { %v9613_v60 = vpop.eup %9612 }
0x1f03   : > { %v5144_v15 = vmul.f32 %v9613_v60, %v5130_v36  ;;  %v5295_v36 = vld [vmem:[%s12181_s15] sm:$0x3]  ;;  %s12183_s15 = smov 112  }
0x1f04   : > { %v5300_v14 = vrot.slane %v5295_v36, %v11621_v62 }
0x1f06   : > { %v9615_v29 = vpop.eup %9614 }
0x1f07   : > { %v5145_v7 = vmul.f32 %v9615_v29, %v5131_v8  ;;  %v11624_v8 = vsub.s32 1, %v5298_v13 }
0x1f09   : > { %v5146_v0 = vpack.c.bf16 %v5145_v7, %v5144_v15  ;;  %v5304_v63 = vrot.slane %v5295_v36, %v11624_v8 }
0x1f0b   : > { %8770 = vmatmul.mubr.bf16.vlgmr.msra.gmra.mrb[80].mxu0 %v5146_v0 }
0x1f0c   : > { %8781 = vmatprep.mubr.msk.bf16.mxu0 %vm10007_vm9, %v10006_v54 }
0x1fde   : > { %v5252_v9 = vpop.f32.mrb[80].mxu0 }
0x1fdf   : > { %v11596_v51 = vadd.f32 %v8016_v2, %v5252_v9  ;;  %v8771_v37 = vpop.f32.mrb[81].mxu0 }
0x1fe0   : > { %v5255_v1 = vpop.f32.mrb[82].mxu0 }
0x1fe1   : > { %v11598_v19 = vadd.f32 %v8016_v2, %v5255_v1  ;;  %v8772_v35 = vpop.f32.mrb[83].mxu0  ;;  %v5259_v27 = vsel %vm2019_vm3, %v11596_v51, 0.0 }
0x1fe2   : > { %5260 = vadd.xlane.f32.xlu0 %v5259_v27 }
0x1fe3   : > { %v5262_v21 = vsel %vm2019_vm3, %v11598_v19, 0.0 }
0x1fe4   : > { %5263 = vadd.xlane.f32.xlu1 %v5262_v21 }
0x206f   : > { %v5261_v24 = vpop.xlane.xlu0 %5260 }
0x2070   : > { %v5266_v20 = vmul.f32 0.015625, %v5261_v24 }
0x2071   : > { %v5264_v30 = vpop.xlane.xlu1 %5263 }
0x2072   : > { %v5268_v34 = vsub.f32 %v11596_v51, %v5266_v20  ;;  %v5267_v11 = vmul.f32 0.015625, %v5264_v30 }
0x2074   : > { %v5269_v31 = vsub.f32 %v11598_v19, %v5267_v11  ;;  %v5270_v18 = vmul.f32 %v5268_v34, %v5268_v34 }
0x2076   : > { %v5272_v10 = vsel %vm2019_vm3, %v5270_v18, 0.0  ;;  %v5271_v25 = vmul.f32 %v5269_v31, %v5269_v31 }
0x2077   : > { %5273 = vadd.xlane.f32.xlu0 %v5272_v10 }
0x2078   : > { %v5275_v48 = vsel %vm2019_vm3, %v5271_v25, 0.0 }
0x2079   : > { %5276 = vadd.xlane.f32.xlu1 %v5275_v48 }
0x2104   : > { %v5274_v59 = vpop.xlane.xlu0 %5273 }
0x2105   : > { %v5278_v22 = vmul.f32 0.015625, %v5274_v59 }
0x2106   : > { %v5277_v33 = vpop.xlane.xlu1 %5276 }
0x2107   : > { %v5280_v44 = vadd.f32 1e-05, %v5278_v22  ;;  %v5279_v26 = vmul.f32 0.015625, %v5277_v33 }
0x2109   : > { %9616 = vrsqrt.f32 %v5280_v44  ;;  %v5281_v28 = vadd.f32 1e-05, %v5279_v26 }
0x210b   : > { %9618 = vrsqrt.f32 %v5281_v28 }
0x2113   : > { %v9617_v53 = vpop.eup %9616 }
0x2114   : > { %v5284_v47 = vmul.f32 %v9617_v53, %v5268_v34 }
0x2115   : > { %v9619_v32 = vpop.eup %9618 }
0x2116   : > { %v5285_v5 = vmul.f32 %v9619_v32, %v5269_v31 }
0x2118   : > { %v5286_v49 = vpack.c.bf16 %v5285_v5, %v5284_v47 }
0x211a   : > { %8033 = vmatmul.mubr.msk.bf16.vlgmr.msra.gmra.mrb[68].mxu1 %vm2019_vm3, %v5286_v49 }
0x211b   : > { %8775 = vmatprep.mubr.msk.bf16.mxu1 %vm10007_vm9, %v10006_v54 }
0x21ed   : > { %v5384_v40 = vpop.f32.mrb[68].mxu1 }
0x21ee   : > { %v5386_v61 = vpop.f32.mrb[69].mxu1  ;;  %v5385_v58 = vadd.f32 %v5384_v40, %v5300_v14 }
0x21ef   : > { %v5388_v45 = vpop.f32.mrb[70].mxu1  ;;  %v5387_v6 = vadd.f32 %v5386_v61, %v5304_v63 }
0x21f0   : > { %v5389_v46 = vadd.f32 %v5388_v45, %v5300_v14  ;;  %v5390_v57 = vpop.f32.mrb[71].mxu1 }
0x21f1   : > { %v5391_v52 = vadd.f32 %v5390_v57, %v5304_v63 }
0x21f2   : > { %v5393_v16 = vpack.c.bf16 %v5389_v46, %v5385_v58 }
0x21f3   : > { %v11628_v50 = vpack.c.bf16 %v5391_v52, %v5387_v6 }
0x21f4   : > { %5519 = vrot.lane.b32.xlu1 %v5393_v16, %s12182_s18  ;;  %5397 = vrot.lane.b32.xlu0 %v5393_v16, %s12089_s26  ;;  %s12188_s26 = sld [smem:[#allocation36_spill]] }
0x21f5   : > { %8780 = vmatpush3.bf16.msra.mxu0 %v11628_v50 }
0x21f6   : > { %8791 = vmatprep.subr.bf16.mxu0 %v10006_v54 }
0x21f8   : > { %5517 = vrot.lane.b32.xlu1 %v5393_v16, %s12183_s15  ;;  %5642 = vrot.lane.b32.xlu0 %v5393_v16, %s12184_s1 }
0x21fa   : > { %v5394_v35 = vld [vmem:[%s12188_s26] sm:$0xff]  ;;  %v5395_v21 = vld [vmem:[%s12188_s26 + $0x8] sm:$0xff]  ;;  %v8036_v10 = vld [vmem:[%s12188_s26 + $0x10] sm:$0xff] }
0x21fb   : > { %v8037_v48 = vld [vmem:[%s12188_s26 + $0x18] sm:$0xff]  ;;  %v8040_v56 = vld [vmem:[%s12188_s26 + $0x20] sm:$0xff]  ;;  %v8041_v22 = vld [vmem:[%s12188_s26 + $0x28] sm:$0xff] }
0x21fc   : > { %5644 = vrot.lane.b32.xlu1 %v5393_v16, %s12185_s2  ;;  %5766 = vrot.lane.b32.xlu0 %v5393_v16, %s12186_s3  ;;  %v8044_v5 = vld [vmem:[%s12188_s26 + $0x30] sm:$0xff]  ;;  %v8045_v4 = vld [vmem:[%s12188_s26 + $0x38] sm:$0xff] }
0x2200   : > { %5768 = vrot.lane.b32.xlu1 %v5393_v16, %s12187_s4 }
0x2266   : > { %v5398_v38 = vpop.permute.xlu0 %5397  ;;  %v5520_v60 = vpop.permute.xlu1 %5519 }
0x2267   : > { %v5403_v3 = vsel %vm1929_vm2, %v5398_v38, 0  ;;  %v5525_v15 = vsel %vm1929_vm2, %v5520_v60, 0 }
0x2268   : > { %8774 = vmatpush3.bf16.xpose.msra.mxu1 %v5403_v3 }
0x2269   : > { %8785 = vmatprep.subr.bf16.mxu1 %v10006_v54 }
0x226a   : > { %v5518_v29 = vpop.permute.xlu1 %5517  ;;  %v5643_v9 = vpop.permute.xlu0 %5642 }
0x226e   : > { %v5645_v7 = vpop.permute.xlu1 %5644  ;;  %v5767_v1 = vpop.permute.xlu0 %5766 }
0x226f   : > { %8776 = vmatmul.mubr.msk.bf16.vlgmr.msra.gmra.mrb[72].mxu1 %vm1929_vm2, %v5393_v16  ;;  %v5650_v0 = vsel %vm1929_vm2, %v5645_v7, 0 }
0x2270   : > { %8786 = vmatpush3.bf16.xpose.msra.mxu1 %v5525_v15  ;;  %8787 = vmatprep.mubr.msk.bf16.mxu1 %vm10007_vm9, %v10006_v54 }
0x2271   : > { %8797 = vmatprep.subr.bf16.mxu1 %v10006_v54 }
0x2272   : > { %v5769_v2 = vpop.permute.xlu1 %5768 }
0x2273   : > { %v5774_v37 = vsel %vm1929_vm2, %v5769_v2, 0 }
0x2277   : > { %8788 = vmatmul.mubr.msk.bf16.vlgmr.msra.gmra.mrb[76].mxu1 %vm1929_vm2, %v5518_v29 }
0x2278   : > { %8798 = vmatpush3.bf16.xpose.msra.mxu1 %v5650_v0  ;;  %8799 = vmatprep.mubr.msk.bf16.mxu1 %vm10007_vm9, %v10006_v54 }
0x2279   : > { %8809 = vmatprep.subr.bf16.mxu1 %v10006_v54 }
0x227f   : > { %8800 = vmatmul.mubr.msk.bf16.vlgmr.msra.gmra.mrb[80].mxu1 %vm1929_vm2, %v5643_v9 }
0x2280   : > { %8810 = vmatpush3.bf16.xpose.msra.mxu1 %v5774_v37  ;;  %8811 = vmatprep.mubr.msk.bf16.mxu1 %vm10007_vm9, %v10006_v54 }
0x2281   : > { %8821 = vmatprep.subr.bf16.mxu1 %v10006_v54 }
0x2287   : > { %8812 = vmatmul.mubr.msk.bf16.vlgmr.msra.gmra.mrb[84].mxu1 %vm1929_vm2, %v5767_v1 }
0x2288   : > { %8829 = vmatprep.mubr.msk.bf16.mxu1 %vm10007_vm9, %v10006_v54 }
0x2342   : > { %v5439_v27 = vpop.f32.mrb[72].mxu1 }
0x2343   : > { %v5440_v24 = vadd.f32 %v5439_v27, %v5394_v35  ;;  %v8777_v20 = vpop.f32.mrb[73].mxu1 }
0x2344   : > { %v5442_v30 = vpop.f32.mrb[74].mxu1 }
0x2345   : > { %v5443_v34 = vadd.f32 %v5442_v30, %v5395_v21  ;;  %v8778_v11 = vpop.f32.mrb[75].mxu1  ;;  %v5446_v31 = vsel %vm1929_vm2, %v5440_v24, -inf }
0x2346   : > { %5447 = vmax.xlane.f32.xlu1 %v5446_v31 }
0x2347   : > { %v5449_v18 = vsel %vm1929_vm2, %v5443_v34, -inf }
0x2348   : > { %5450 = vmax.xlane.f32.xlu0 %v5449_v18 }
0x234a   : > { %v5561_v25 = vpop.f32.mrb[76].mxu1 }
0x234b   : > { %v11665_v41 = vadd.f32 %v8036_v10, %v5561_v25  ;;  %v8789_v39 = vpop.f32.mrb[77].mxu1 }
0x234c   : > { %v5564_v23 = vpop.f32.mrb[78].mxu1 }
0x234d   : > { %v5565_v12 = vadd.f32 %v8037_v48, %v5564_v23  ;;  %v8790_v17 = vpop.f32.mrb[79].mxu1  ;;  %v5568_v55 = vsel %vm1929_vm2, %v11665_v41, -inf }
0x234e   : > { %5569 = vmax.xlane.f32.xlu0 %v5568_v55 }
0x234f   : > { %v5571_v42 = vsel %vm1929_vm2, %v5565_v12, -inf }
0x2352   : > { %5572 = vmax.xlane.f32.xlu0 %v5571_v42  ;;  %v5686_v59 = vpop.f32.mrb[80].mxu1 }
0x2353   : > { %v11672_v33 = vadd.f32 %v8040_v56, %v5686_v59  ;;  %v8801_v44 = vpop.f32.mrb[81].mxu1 }
0x2354   : > { %v5689_v26 = vpop.f32.mrb[82].mxu1 }
0x2355   : > { %v5690_v28 = vadd.f32 %v8041_v22, %v5689_v26  ;;  %v8802_v53 = vpop.f32.mrb[83].mxu1  ;;  %v5693_v32 = vsel %vm1929_vm2, %v11672_v33, -inf }
0x2356   : > { %5694 = vmax.xlane.f32.xlu1 %v5693_v32 }
0x2357   : > { %v5696_v47 = vsel %vm1929_vm2, %v5690_v28, -inf }
0x2358   : > { %5697 = vmax.xlane.f32.xlu0 %v5696_v47 }
0x235a   : > { %v5810_v49 = vpop.f32.mrb[84].mxu1 }
0x235b   : > { %v5811_v13 = vadd.f32 %v8044_v5, %v5810_v49  ;;  %v8813_v36 = vpop.f32.mrb[85].mxu1 }
0x235c   : > { %v5813_v14 = vpop.f32.mrb[86].mxu1 }
0x235d   : > { %v5814_v40 = vadd.f32 %v8045_v4, %v5813_v14  ;;  %v8814_v63 = vpop.f32.mrb[87].mxu1  ;;  %v5817_v61 = vsel %vm1929_vm2, %v5811_v13, -inf }
0x235e   : > { %5818 = vmax.xlane.f32.xlu1 %v5817_v61 }
0x235f   : > { %v5820_v45 = vsel %vm1929_vm2, %v5814_v40, -inf }
0x2360   : > { %5821 = vmax.xlane.f32.xlu0 %v5820_v45 }
0x23d3   : > { %v5448_v58 = vpop.xlane.xlu1 %5447 }
0x23d4   : > { %v5452_v46 = vsub.f32 %v5440_v24, %v5448_v58 }
0x23d5   : > { %v5451_v57 = vpop.xlane.xlu0 %5450 }
0x23d6   : > { %v5454_v6 = vmul.f32 1.442695, %v5452_v46  ;;  %v5453_v52 = vsub.f32 %v5443_v34, %v5451_v57 }
0x23d8   : > { %9620 = vpow2.f32 %v5454_v6  ;;  %v5456_v16 = vmul.f32 1.442695, %v5453_v52 }
0x23da   : > { %9622 = vpow2.f32 %v5456_v16 }
0x23db   : > { %v5570_v38 = vpop.xlane.xlu0 %5569 }
0x23dc   : > { %v5574_v18 = vsub.f32 %v11665_v41, %v5570_v38 }
0x23de   : > { %v5576_v25 = vmul.f32 1.442695, %v5574_v18 }
0x23df   : > { %v5573_v3 = vpop.xlane.xlu0 %5572 }
0x23e0   : > { %v5575_v60 = vsub.f32 %v5565_v12, %v5573_v3 }
0x23e2   : > { %v9621_v29 = vpop.eup %9620  ;;  %v5578_v15 = vmul.f32 1.442695, %v5575_v60 }
0x23e3   : > { %v5458_v7 = vsel %vm1929_vm2, %v9621_v29, 0.0  ;;  %v5695_v10 = vpop.xlane.xlu1 %5694 }
0x23e4   : > { %v9623_v0 = vpop.eup %9622  ;;  %9624 = vpow2.f32 %v5578_v15  ;;  %5459 = vadd.xlane.f32.xlu1 %v5458_v7  ;;  %v5699_v48 = vsub.f32 %v11672_v33, %v5695_v10  ;;  %v9263_v10 = vld [vmem:[%s12189_s5 + $0x18] sm:$0xff]  }
0x23e5   : > { %v5698_v2 = vpop.xlane.xlu0 %5697  ;;  %v5461_v9 = vsel %vm1929_vm2, %v9623_v0, 0.0 }
0x23e6   : > { %v5700_v37 = vsub.f32 %v5690_v28, %v5698_v2  ;;  %5462 = vadd.xlane.f32.xlu0 %v5461_v9  ;;  %v5701_v23 = vmul.f32 1.442695, %v5699_v48 }
0x23e8   : > { %v5703_v1 = vmul.f32 1.442695, %v5700_v37 }
0x23ea   : > { %9626 = vpow2.f32 %v5703_v1 }
0x23eb   : > { %v5819_v39 = vpop.xlane.xlu1 %5818 }
0x23ec   : > { %v5823_v12 = vsub.f32 %v5811_v13, %v5819_v39 }
0x23ed   : > { %v5822_v35 = vpop.xlane.xlu0 %5821 }
0x23ee   : > { %v9625_v27 = vpop.eup %9624  ;;  %v5824_v21 = vsub.f32 %v5814_v40, %v5822_v35  ;;  %v5825_v17 = vmul.f32 1.442695, %v5823_v12  ;;  %v9260_v35 = vld [vmem:[%s12189_s5] sm:$0xff]  }
0x23ef   : > { %v5583_v24 = vsel %vm1929_vm2, %v9625_v27, 0.0  ;;  %8822 = vmatpush3.bf16.msra.mxu1 %v9260_v35 }
0x23f0   : > { %v5827_v20 = vmul.f32 1.442695, %v5824_v21  ;;  %5584 = vadd.xlane.f32.xlu0 %v5583_v24  ;;  %8823 = vmatprep.subr.bf16.mxu1 %v10006_v54  ;;  %v9261_v24 = vld [vmem:[%s12189_s5 + $0x8] sm:$0xff]  }
0x23f2   : > { %9628 = vpow2.f32 %v5827_v20 }
0x23f3   : > { %9630 = vpow2.f32 %v5576_v25  ;;  %8824 = vmatpush3.bf16.msra.mxu1 %v9261_v24 }
0x23f4   : > { %v11684_v30 = vpop.eup %9626  ;;  %9632 = vpow2.f32 %v5701_v23  ;;  %8825 = vmatprep.subr.bf16.mxu1 %v10006_v54 }
0x23f5   : > { %5592 = vrot.lane.b32.xlu1 %v11628_v50, %s12183_s15  ;;  %v5708_v34 = vsel %vm1929_vm2, %v11684_v30, 0.0  ;;  %9634 = vpow2.f32 %v5825_v17 }
0x23f6   : > { %5709 = vadd.xlane.f32.xlu0 %v5708_v34 }
0x23fc   : > { %v11690_v11 = vpop.eup %9628 }
0x23fd   : > { %v5832_v31 = vsel %vm1929_vm2, %v11690_v11, 0.0  ;;  %v9631_v55 = vpop.eup %9630 }
0x23fe   : > { %5833 = vadd.xlane.f32.xlu0 %v5832_v31  ;;  %v5580_v56 = vsel %vm1929_vm2, %v9631_v55, 0.0  ;;  %v9633_v42 = vpop.eup %9632 }
0x23ff   : > { %v5705_v41 = vsel %vm1929_vm2, %v9633_v42, 0.0  ;;  %v9635_v59 = vpop.eup %9634 }
0x2400   : > { %v5829_v22 = vsel %vm1929_vm2, %v9635_v59, 0.0 }
0x2414   : > { %5716 = vrot.lane.b32.xlu0 %v11628_v50, %s12184_s1 }
0x2419   : > { %5581 = vadd.xlane.f32.xlu1 %v5580_v56 }
0x241d   : > { %5706 = vadd.xlane.f32.xlu1 %v5705_v41 }
0x2421   : > { %5830 = vadd.xlane.f32.xlu1 %v5829_v22 }
0x2432   : > { %5840 = vrot.lane.b32.xlu1 %v11628_v50, %s12186_s3 }
0x2471   : > { %v5460_v33 = vpop.xlane.xlu1 %5459 }
0x2472   : > { %9636 = vrcp.f32 %v5460_v33 }
0x2473   : > { %v5463_v44 = vpop.xlane.xlu0 %5462 }
0x2474   : > { %9638 = vrcp.f32 %v5463_v44 }
0x2475   : > { %v5593_v5 = vpop.permute.xlu1 %5592 }
0x247c   : > { %v9637_v26 = vpop.eup %9636 }
0x247d   : > { %v5466_v53 = vmul.f32 %v9637_v26, %v9621_v29  ;;  %v5585_v49 = vpop.xlane.xlu0 %5584 }
0x247e   : > { %v9639_v28 = vpop.eup %9638  ;;  %9640 = vrcp.f32 %v5585_v49 }
0x247f   : > { %v5467_v32 = vmul.f32 %v9639_v28, %v9623_v0 }
0x2481   : > { %v5468_v47 = vpack.c.bf16 %v5467_v32, %v5466_v53 }
0x2483   : > { %8782 = vmatmul.mubr.msk.bf16.vlgmr.msra.gmra.mrb[84].mxu0 %vm1929_vm2, %v5468_v47  ;;  %v5710_v4 = vpop.xlane.xlu0 %5709 }
0x2484   : > { %8792 = vmatpush3.bf16.msra.mxu0 %v5593_v5  ;;  %8793 = vmatprep.mubr.msk.bf16.mxu0 %vm10007_vm9, %v10006_v54 }
0x2485   : > { %8803 = vmatprep.subr.bf16.mxu0 %v10006_v54 }
0x2488   : > { %v9641_v36 = vpop.eup %9640 }
0x2489   : > { %v5589_v61 = vmul.f32 %v9641_v36, %v9625_v27 }
0x248b   : > { %v5834_v14 = vpop.xlane.xlu0 %5833 }
0x248f   : > { %v5717_v57 = vpop.permute.xlu0 %5716 }
0x24a6   : > { %v5582_v50 = vpop.xlane.xlu1 %5581 }
0x24a7   : > { %9642 = vrcp.f32 %v5582_v50 }
0x24aa   : > { %v5707_v13 = vpop.xlane.xlu1 %5706 }
0x24ab   : > { %9644 = vrcp.f32 %v5707_v13 }
0x24ac   : > { %9646 = vrcp.f32 %v5710_v4 }
0x24ae   : > { %v5831_v40 = vpop.xlane.xlu1 %5830 }
0x24af   : > { %9648 = vrcp.f32 %v5831_v40 }
0x24b0   : > { %9650 = vrcp.f32 %v5834_v14  ;;  %v8053_v14 = vld [vmem:[#allocation2] ss:$0 sm:$0xff] }
0x24b1   : > { %v9643_v63 = vpop.eup %9642 }
0x24b2   : > { %v5588_v45 = vmul.f32 %v9643_v63, %v9631_v55  ;;  %v5841_v60 = vpop.permute.xlu1 %5840 }
0x24b4   : > { %v5590_v58 = vpack.c.bf16 %v5589_v61, %v5588_v45 }
0x24b5   : > { %v9645_v46 = vpop.eup %9644 }
0x24b6   : > { %8794 = vmatmul.mubr.msk.bf16.vlgmr.msra.gmra.mrb[88].mxu0 %vm1929_vm2, %v5590_v58  ;;  %v9647_v6 = vpop.eup %9646  ;;  %v5713_v52 = vmul.f32 %v9645_v46, %v9633_v42 }
0x24b7   : > { %8804 = vmatpush3.bf16.msra.mxu0 %v5717_v57  ;;  %8805 = vmatprep.mubr.msk.bf16.mxu0 %vm10007_vm9, %v10006_v54  ;;  %v5714_v16 = vmul.f32 %v9647_v6, %v11684_v30 }
0x24b8   : > { %8815 = vmatprep.subr.bf16.mxu0 %v10006_v54 }
0x24b9   : > { %v5715_v38 = vpack.c.bf16 %v5714_v16, %v5713_v52  ;;  %v9649_v3 = vpop.eup %9648 }
0x24ba   : > { %v9651_v29 = vpop.eup %9650  ;;  %v5837_v15 = vmul.f32 %v9649_v3, %v9635_v59 }
0x24bb   : > { %v5838_v7 = vmul.f32 %v9651_v29, %v11690_v11  ;;  %v9262_v11 = vld [vmem:[%s12189_s5 + $0x10] sm:$0xff]   ;;  %s12190_s5 = sld [smem:[#allocation38_spill]] }
0x24bc   : > { %8826 = vmatpush3.bf16.msra.mxu1 %v9262_v11 }
0x24bd   : > { %v5839_v0 = vpack.c.bf16 %v5838_v7, %v5837_v15  ;;  %8827 = vmatprep.subr.bf16.mxu1 %v10006_v54 }
0x24be   : > { %8806 = vmatmul.mubr.msk.bf16.vlgmr.msra.gmra.mrb[92].mxu0 %vm1929_vm2, %v5715_v38 }
0x24bf   : > { %8816 = vmatpush3.bf16.msra.mxu0 %v5841_v60  ;;  %8817 = vmatprep.mubr.msk.bf16.mxu0 %vm10007_vm9, %v10006_v54 }
0x24c0   : > { %8828 = vmatpush3.bf16.msra.mxu1 %v9263_v10 }
0x24c1   : > { %v9272_v35 = vld [vmem:[%s12190_s5 + $0x24] ss:$8 sps:$4 sm:$0xff]   ;;  %v9273_v24 = vld [vmem:[%s12190_s5 + $0x30] ss:$8 sps:$4 sm:$0xff]  }
0x24c6   : > { %8818 = vmatmul.mubr.msk.bf16.vlgmr.msra.gmra.mrb[96].mxu0 %vm1929_vm2, %v5839_v0 }
0x24c7   : > { %6127 = vmatprep.mubr.bf16.mxu0 %v10008_v43 }
0x2556   : > { %v5507_v2 = vpop.f32.mrb[84].mxu0 }
0x2557   : > { %v8783_v9 = vpop.f32.mrb[85].mxu0 }
0x2558   : > { %v5510_v37 = vpop.f32.mrb[86].mxu0  ;;  %v9264_v9 = vld [vmem:[%s12190_s5] ss:$8 sps:$4 sm:$0xff]  }
0x2559   : > { %v8784_v1 = vpop.f32.mrb[87].mxu0 }
0x255a   : > { %v9267_v1 = vld [vmem:[%s12190_s5 + $0x10] ss:$8 sps:$4 sm:$0xff]  }
0x2589   : > { %v5632_v27 = vpop.f32.mrb[88].mxu0 }
0x258a   : > { %v8795_v21 = vpop.f32.mrb[89].mxu0 }
0x258b   : > { %v5635_v20 = vpop.f32.mrb[90].mxu0  ;;  %v9275_v21 = vld [vmem:[%s12190_s5 + $0x34] ss:$8 sps:$4 sm:$0xff]  }
0x258c   : > { %v9179_v30 = vpack.i.bf16 %v5635_v20, %v5632_v27  ;;  %v8796_v34 = vpop.f32.mrb[91].mxu0  ;;  %v9270_v27 = vld [vmem:[%s12190_s5 + $0x20] ss:$8 sps:$4 sm:$0xff]  }
0x258e   : > { %9180 = vrot.lane.b32.xlu1 %v9179_v30, %s12187_s4 }
0x2591   : > { %v5756_v31 = vpop.f32.mrb[92].mxu0 }
0x2592   : > { %v8807_v18 = vpop.f32.mrb[93].mxu0 }
0x2593   : > { %v5759_v25 = vpop.f32.mrb[94].mxu0 }
0x2594   : > { %v9184_v48 = vpack.i.bf16 %v5759_v25, %v5756_v31  ;;  %v8808_v39 = vpop.f32.mrb[95].mxu0 }
0x2596   : > { %9185 = vrot.lane.b32.xlu1 %v9184_v48, %s12185_s2 }
0x2599   : > { %v5880_v23 = vpop.f32.mrb[96].mxu0 }
0x259a   : > { %v8819_v12 = vpop.f32.mrb[97].mxu0 }
0x259b   : > { %v5883_v17 = vpop.f32.mrb[98].mxu0  ;;  %v9276_v12 = vld [vmem:[%s12191_s6 + $0x40] sm:$0xff]  }
0x259c   : > { %v9189_v55 = vpack.i.bf16 %v5883_v17, %v5880_v23  ;;  %v8820_v56 = vpop.f32.mrb[99].mxu0  ;;  %v9277_v17 = vld [vmem:[%s12191_s6] sm:$0xff]   ;;  %8345 = vmatprep.subr.bf16.mxu1 %v9276_v12 }
0x259d   : > { %v9279_v56 = vld [vmem:[%s12191_s6 + $0x8] sm:$0xff]  }
0x259e   : > { %9190 = vrot.lane.b32.xlu0 %v9189_v55, %s12182_s18  ;;  %v9278_v55 = vld [vmem:[%s12191_s6 + $0x48] sm:$0xff]  }
0x2600   : > { %v9181_v42 = vpop.permute.xlu1 %9180 }
0x2601   : > { %v9183_v59 = vunpack.i.h.bf16 %v9181_v42  ;;  %v9182_v22 = vunpack.i.l.bf16 %v9181_v42  ;;  %v9280_v42 = vld [vmem:[%s12191_s6 + $0x50] sm:$0xff]  }
0x2603   : > { %v5912_v28 = vsel %vm1929_vm2, %v5510_v37, %v9183_v59  ;;  %v5911_v53 = vsel %vm1929_vm2, %v5507_v2, %v9182_v22  ;;  %v9266_v2 = vld [vmem:[%s12190_s5 + $0x4] ss:$8 sps:$4 sm:$0xff]   ;;  %v9269_v37 = vld [vmem:[%s12190_s5 + $0x14] ss:$8 sps:$4 sm:$0xff]   ;;  %s12192_s5 = sld [smem:[#allocation39_spill]] }
0x2604   : > { %6095 = vmatprep.subr.bf16.mxu0 %v9266_v2  ;;  %v9282_v59 = vld [vmem:[%s12191_s6 + $0x58] sm:$0xff]  }
0x2605   : > { %6096 = vmatpush1.bf16.msra.mxu0 %v9264_v9  ;;  %v9283_v22 = vld [vmem:[%s12191_s6 + $0x18] sm:$0xff]  }
0x2606   : > { %6097 = vmatprep.subr.bf16.mxu0 %v9269_v37 }
0x2608   : > { %v9186_v41 = vpop.permute.xlu1 %9185 }
0x2609   : > { %v9188_v33 = vunpack.i.h.bf16 %v9186_v41  ;;  %v9187_v44 = vunpack.i.l.bf16 %v9186_v41  ;;  %6098 = vmatpush1.bf16.msra.mxu0 %v9267_v1  ;;  %v9281_v41 = vld [vmem:[%s12191_s6 + $0x10] sm:$0xff]  }
0x260a   : > { %6099 = vmatprep.subr.bf16.mxu0 %v9272_v35 }
0x260b   : > { %v5914_v5 = vsel %vm1561_vm1, %v5912_v28, %v9188_v33  ;;  %v5913_v49 = vsel %vm1561_vm1, %v5911_v53, %v9187_v44  ;;  %v9284_v33 = vld [vmem:[%s12191_s6 + $0x60] sm:$0xff]   ;;  %v9287_v28 = vld [vmem:[%s12191_s6 + $0x28] sm:$0xff]   ;;  %v9288_v53 = vld [vmem:[%s12191_s6 + $0x70] sm:$0xff]  }
0x260c   : > { %v9285_v44 = vld [vmem:[%s12191_s6 + $0x20] sm:$0xff]  }
0x260d   : > { %6100 = vmatpush1.bf16.msra.mxu0 %v9270_v27 }
0x260e   : > { %6101 = vmatprep.subr.bf16.mxu0 %v9275_v21 }
0x2610   : > { %v9191_v26 = vpop.permute.xlu0 %9190 }
0x2611   : > { %v9193_v32 = vunpack.i.h.bf16 %v9191_v26  ;;  %v9192_v47 = vunpack.i.l.bf16 %v9191_v26  ;;  %6102 = vmatpush1.bf16.msra.mxu0 %v9273_v24  ;;  %v9286_v26 = vld [vmem:[%s12191_s6 + $0x68] sm:$0xff]  }
0x2613   : > { %v5916_v50 = vsel %vm1483_vm0, %v5914_v5, %v9193_v32  ;;  %v5915_v4 = vsel %vm1483_vm0, %v5913_v49, %v9192_v47  ;;  %v9289_v32 = vld [vmem:[%s12191_s6 + $0x30] sm:$0xff]   ;;  %v9290_v47 = vld [vmem:[%s12191_s6 + $0x78] sm:$0xff]   ;;  %v6040_v49 = vld [vmem:[%s12192_s5] sm:$0x3]  ;;  %s12193_s5 = sld [smem:[#allocation42_spill]] }
0x2614   : > { %v5917_v13 = vpack.c.bf16 %v5916_v50, %v5915_v4  ;;  %v9291_v5 = vld [vmem:[%s12191_s6 + $0x38] sm:$0xff]   ;;  %v6045_v50 = vrot.slane %v6040_v49, %v11621_v62  ;;  %v6049_v4 = vrot.slane %v6040_v49, %v11624_v8  ;;  %s12194_s6 = sld [smem:[#allocation43_spill]] }
0x2616   : > { %8830 = vmatmul.mubr.msk.bf16.vlgmr.msra.gmra.mrb[88].mxu1 %vm2019_vm3, %v5917_v13 }
0x2617   : > { %8346 = vmatpush3.bf16.msra.mxu1 %v9277_v17 }
0x2618   : > { %8347 = vmatprep.subr.bf16.mxu1 %v9278_v55 }
0x261b   : > { %8348 = vmatpush3.bf16.msra.mxu1 %v9279_v56 }
0x261c   : > { %8349 = vmatprep.subr.bf16.mxu1 %v9280_v42 }
0x261f   : > { %8350 = vmatpush3.bf16.msra.mxu1 %v9281_v41 }
0x2620   : > { %8351 = vmatprep.subr.bf16.mxu1 %v9282_v59 }
0x2623   : > { %8352 = vmatpush3.bf16.msra.mxu1 %v9283_v22 }
0x2624   : > { %8353 = vmatprep.subr.bf16.mxu1 %v9284_v33 }
0x2627   : > { %8354 = vmatpush3.bf16.msra.mxu1 %v9285_v44 }
0x2628   : > { %8355 = vmatprep.subr.bf16.mxu1 %v9286_v26 }
0x262b   : > { %8356 = vmatpush3.bf16.msra.mxu1 %v9287_v28 }
0x262c   : > { %8357 = vmatprep.subr.bf16.mxu1 %v9288_v53 }
0x262f   : > { %8358 = vmatpush3.bf16.msra.mxu1 %v9289_v32 }
0x2630   : > { %8359 = vmatprep.subr.bf16.mxu1 %v9290_v47 }
0x2633   : > { %8360 = vmatpush3.bf16.msra.mxu1 %v9291_v5 }
0x2634   : > { %8845 = vmatprep.subr.bf16.mxu1 %v10006_v54 }
0x26e9   : > { %v5987_v36 = vpop.f32.mrb[88].mxu1 }
0x26ea   : > { %v5994_v40 = vadd.f32 %v5987_v36, %v11596_v51  ;;  %v8831_v63 = vpop.f32.mrb[89].mxu1 }
0x26eb   : > { %v5990_v61 = vpop.f32.mrb[90].mxu1 }
0x26ec   : > { %v11736_v45 = vadd.f32 %v8053_v14, %v5994_v40  ;;  %v5995_v58 = vadd.f32 %v5990_v61, %v11598_v19  ;;  %v8832_v46 = vpop.f32.mrb[91].mxu1 }
0x26ee   : > { %v11739_v57 = vadd.f32 %v8053_v14, %v5995_v58  ;;  %v6005_v6 = vsel %vm2019_vm3, %v11736_v45, 0.0 }
0x26ef   : > { %6006 = vadd.xlane.f32.xlu1 %v6005_v6 }
0x26f0   : > { %v6008_v52 = vsel %vm2019_vm3, %v11739_v57, 0.0 }
0x26f1   : > { %6009 = vadd.xlane.f32.xlu0 %v6008_v52 }
0x277c   : > { %v6007_v51 = vpop.xlane.xlu1 %6006 }
0x277d   : > { %v6011_v16 = vmul.f32 0.015625, %v6007_v51 }
0x277e   : > { %v6010_v38 = vpop.xlane.xlu0 %6009 }
0x277f   : > { %v6013_v19 = vsub.f32 %v11736_v45, %v6011_v16  ;;  %v6012_v3 = vmul.f32 0.015625, %v6010_v38 }
0x2781   : > { %v6014_v60 = vsub.f32 %v11739_v57, %v6012_v3  ;;  %v6015_v29 = vmul.f32 %v6013_v19, %v6013_v19 }
0x2783   : > { %v6017_v15 = vsel %vm2019_vm3, %v6015_v29, 0.0  ;;  %v6016_v7 = vmul.f32 %v6014_v60, %v6014_v60 }
0x2784   : > { %6018 = vadd.xlane.f32.xlu0 %v6017_v15 }
0x2785   : > { %v6020_v0 = vsel %vm2019_vm3, %v6016_v7, 0.0 }
0x2788   : > { %6021 = vadd.xlane.f32.xlu0 %v6020_v0 }
0x2811   : > { %v6019_v20 = vpop.xlane.xlu0 %6018 }
0x2812   : > { %v6023_v30 = vmul.f32 0.015625, %v6019_v20 }
0x2814   : > { %v6025_v34 = vadd.f32 1e-05, %v6023_v30 }
0x2815   : > { %v6022_v11 = vpop.xlane.xlu0 %6021 }
0x2816   : > { %v6024_v31 = vmul.f32 0.015625, %v6022_v11  ;;  %9652 = vrsqrt.f32 %v6025_v34 }
0x2818   : > { %v6026_v18 = vadd.f32 1e-05, %v6024_v31 }
0x281a   : > { %9654 = vrsqrt.f32 %v6026_v18 }
0x2820   : > { %v9653_v10 = vpop.eup %9652 }
0x2821   : > { %v6029_v48 = vmul.f32 %v9653_v10, %v6013_v19 }
0x2824   : > { %v9655_v25 = vpop.eup %9654 }
0x2825   : > { %v6030_v39 = vmul.f32 %v9655_v25, %v6014_v60 }
0x2827   : > { %v6031_v23 = vpack.c.bf16 %v6030_v39, %v6029_v48 }
0x2829   : > { %8062 = vmatmul.mubr.msk.bf16.vlgmr.msra.gmra.mrb[100].mxu0 %vm2019_vm3, %v6031_v23 }
0x282a   : > { %6546 = vmatprep.mubr.bf16.mxu0 %v10008_v43 }
0x28fc   : > { %v6129_v13 = vpop.f32.mrb[100].mxu0 }
0x28fd   : > { %v11779_v36 = vadd.f32 %v6129_v13, %v6045_v50  ;;  %v6131_v14 = vpop.f32.mrb[101].mxu0 }
0x28fe   : > { %v11781_v40 = vadd.f32 %v6131_v14, %v6049_v4  ;;  %v6133_v63 = vpop.f32.mrb[102].mxu0 }
0x28ff   : > { %v6138_v61 = vand.u32 2147483647, %v11779_v36  ;;  %v11784_v58 = vadd.f32 %v6133_v63, %v6045_v50  ;;  %v6135_v46 = vpop.f32.mrb[103].mxu0  ;;  %vm6218_vm10 = vcmp.lt.f32.partialorder %v11779_v36, 0.0 }
0x2900   : > { %v6139_v6 = vand.u32 2147483647, %v11781_v40  ;;  %v11787_v52 = vadd.f32 %v6135_v46, %v6049_v4  ;;  %vm6219_vm11 = vcmp.lt.f32.partialorder %v11781_v40, 0.0 }
0x2901   : > { %v6142_v51 = vmul.f32 0.70710677, %v6138_v61  ;;  %v6140_v16 = vand.u32 2147483647, %v11784_v58  ;;  %vm6220_vm12 = vcmp.lt.f32.partialorder %v11784_v58, 0.0 }
0x2902   : > { %v6143_v38 = vmul.f32 0.70710677, %v6139_v6  ;;  %v6141_v19 = vand.u32 2147483647, %v11787_v52  ;;  %vm6221_vm13 = vcmp.lt.f32.partialorder %v11787_v52, 0.0 }
0x2903   : > { %v6146_v3 = vmul.f32 0.3275911, %v6142_v51  ;;  %v6144_v60 = vmul.f32 0.70710677, %v6140_v16  ;;  %v6194_v35 = vmul.f32 %v6142_v51, %v6142_v51 }
0x2904   : > { %v6147_v29 = vmul.f32 0.3275911, %v6143_v38  ;;  %v6145_v15 = vmul.f32 0.70710677, %v6141_v19  ;;  %v6195_v27 = vmul.f32 %v6143_v38, %v6143_v38 }
0x2905   : > { %v6150_v7 = vadd.f32 1.0, %v6146_v3  ;;  %v6148_v0 = vmul.f32 0.3275911, %v6144_v60  ;;  %v6198_v24 = vsub.f32 0.0, %v6194_v35  ;;  %v6196_v20 = vmul.f32 %v6144_v60, %v6144_v60 }
0x2906   : > { %v6151_v2 = vadd.f32 1.0, %v6147_v29  ;;  %v6149_v9 = vmul.f32 0.3275911, %v6145_v15  ;;  %v6199_v11 = vsub.f32 0.0, %v6195_v27  ;;  %v6197_v18 = vmul.f32 %v6145_v15, %v6145_v15 }
0x2907   : > { %9656 = vrcp.f32 %v6150_v7  ;;  %v6152_v37 = vadd.f32 1.0, %v6148_v0  ;;  %v6202_v48 = vmul.f32 1.442695, %v6198_v24  ;;  %v6200_v23 = vsub.f32 0.0, %v6196_v20 }
0x2908   : > { %9658 = vrcp.f32 %v6151_v2  ;;  %v6153_v1 = vadd.f32 1.0, %v6149_v9  ;;  %v6204_v17 = vmul.f32 1.442695, %v6199_v11  ;;  %v6201_v41 = vsub.f32 0.0, %v6197_v18 }
0x2909   : > { %9660 = vrcp.f32 %v6152_v37  ;;  %v6206_v26 = vmul.f32 1.442695, %v6200_v23 }
0x290a   : > { %9662 = vrcp.f32 %v6153_v1  ;;  %v6208_v5 = vmul.f32 1.442695, %v6201_v41  ;;  %v6232_v41 = vmul.f32 0.5, %v11784_v58 }
0x290b   : > { %9664 = vpow2.f32 %v6202_v48 }
0x290c   : > { %9666 = vpow2.f32 %v6204_v17 }
0x290d   : > { %9668 = vpow2.f32 %v6206_v26 }
0x290e   : > { %9670 = vpow2.f32 %v6208_v5 }
0x2911   : > { %v9657_v21 = vpop.eup %9656 }
0x2912   : > { %v9659_v30 = vpop.eup %9658  ;;  %v6158_v34 = vmul.f32 1.0614054, %v9657_v21 }
0x2913   : > { %v6159_v31 = vmul.f32 1.0614054, %v9659_v30  ;;  %v9661_v25 = vpop.eup %9660 }
0x2914   : > { %v6162_v10 = vadd.f32 -1.4531521, %v6158_v34  ;;  %v6160_v55 = vmul.f32 1.0614054, %v9661_v25  ;;  %v9663_v56 = vpop.eup %9662 }
0x2915   : > { %v6163_v39 = vadd.f32 -1.4531521, %v6159_v31  ;;  %v6161_v33 = vmul.f32 1.0614054, %v9663_v56  ;;  %v9665_v29 = vpop.eup %9664 }
0x2916   : > { %v6166_v12 = vmul.f32 %v9657_v21, %v6162_v10  ;;  %v6164_v22 = vadd.f32 -1.4531521, %v6160_v55  ;;  %v9667_v7 = vpop.eup %9666 }
0x2917   : > { %v6167_v42 = vmul.f32 %v9659_v30, %v6163_v39  ;;  %v6165_v32 = vadd.f32 -1.4531521, %v6161_v33  ;;  %v9669_v24 = vpop.eup %9668 }
0x2918   : > { %v6170_v59 = vadd.f32 1.4214138, %v6166_v12  ;;  %v6168_v53 = vmul.f32 %v9661_v25, %v6164_v22  ;;  %v9671_v18 = vpop.eup %9670  ;;  %v6231_v22 = vmul.f32 0.5, %v11781_v40  ;;  %v8079_v40 = vld [vmem:[#allocation5] ss:$0 sm:$0xff] }
0x2919   : > { %v6171_v44 = vadd.f32 1.4214138, %v6167_v42  ;;  %v6169_v4 = vmul.f32 %v9663_v56, %v6165_v32 }
0x291a   : > { %v6174_v28 = vmul.f32 %v9657_v21, %v6170_v59  ;;  %v6172_v50 = vadd.f32 1.4214138, %v6168_v53 }
0x291b   : > { %v6175_v47 = vmul.f32 %v9659_v30, %v6171_v44  ;;  %v6173_v61 = vadd.f32 1.4214138, %v6169_v4 }
0x291c   : > { %v6178_v49 = vadd.f32 -0.28449672, %v6174_v28  ;;  %v6176_v63 = vmul.f32 %v9661_v25, %v6172_v50  ;;  %v6233_v28 = vmul.f32 0.5, %v11787_v52 }
0x291d   : > { %v6179_v13 = vadd.f32 -0.28449672, %v6175_v47  ;;  %v6177_v16 = vmul.f32 %v9663_v56, %v6173_v61 }
0x291e   : > { %v6182_v14 = vmul.f32 %v9657_v21, %v6178_v49  ;;  %v6180_v51 = vadd.f32 -0.28449672, %v6176_v63 }
0x291f   : > { %v6183_v46 = vmul.f32 %v9659_v30, %v6179_v13  ;;  %v6181_v60 = vadd.f32 -0.28449672, %v6177_v16 }
0x2920   : > { %v6186_v6 = vadd.f32 0.2548296, %v6182_v14  ;;  %v6184_v3 = vmul.f32 %v9661_v25, %v6180_v51 }
0x2921   : > { %v6187_v38 = vadd.f32 0.2548296, %v6183_v46  ;;  %v6185_v9 = vmul.f32 %v9663_v56, %v6181_v60 }
0x2922   : > { %v6190_v19 = vmul.f32 %v9657_v21, %v6186_v6  ;;  %v6188_v2 = vadd.f32 0.2548296, %v6184_v3 }
0x2923   : > { %v6191_v15 = vmul.f32 %v9659_v30, %v6187_v38  ;;  %v6189_v27 = vadd.f32 0.2548296, %v6185_v9  ;;  %v9297_v9 = vld [vmem:[%s12193_s5 + $0x14] ss:$8 sps:$4 sm:$0xff]  }
0x2924   : > { %v6210_v0 = vmul.f32 %v9665_v29, %v6190_v19  ;;  %v6192_v35 = vmul.f32 %v9661_v25, %v6188_v2  ;;  %v6230_v25 = vmul.f32 0.5, %v11779_v36  ;;  %v9292_v2 = vld [vmem:[%s12193_s5] ss:$8 sps:$4 sm:$0xff]  }
0x2925   : > { %v6211_v37 = vmul.f32 %v9667_v7, %v6191_v15  ;;  %v6193_v31 = vmul.f32 %v9663_v56, %v6189_v27  ;;  %v9303_v27 = vld [vmem:[%s12193_s5 + $0x34] ss:$8 sps:$4 sm:$0xff]  }
0x2926   : > { %v6214_v1 = vsub.f32 1.0, %v6210_v0  ;;  %v6212_v11 = vmul.f32 %v9669_v24, %v6192_v35  ;;  %v9294_v0 = vld [vmem:[%s12193_s5 + $0x4] ss:$8 sps:$4 sm:$0xff]   ;;  %v9298_v35 = vld [vmem:[%s12193_s5 + $0x20] ss:$8 sps:$4 sm:$0xff]  }
0x2927   : > { %v6215_v20 = vsub.f32 1.0, %v6211_v37  ;;  %v6213_v30 = vmul.f32 %v9671_v18, %v6193_v31  ;;  %6514 = vmatprep.subr.bf16.mxu0 %v9294_v0  ;;  %v9295_v37 = vld [vmem:[%s12193_s5 + $0x10] ss:$8 sps:$4 sm:$0xff]  }
0x2928   : > { %v6222_v34 = vsub.f32 0.0, %v6214_v1  ;;  %v6216_v48 = vsub.f32 1.0, %v6212_v11  ;;  %6515 = vmatpush1.bf16.msra.mxu0 %v9292_v2  ;;  %v9301_v24 = vld [vmem:[%s12193_s5 + $0x30] ss:$8 sps:$4 sm:$0xff]  }
0x2929   : > { %v6223_v21 = vsub.f32 0.0, %v6215_v20  ;;  %v6217_v12 = vsub.f32 1.0, %v6213_v30  ;;  %6516 = vmatprep.subr.bf16.mxu0 %v9297_v9 }
0x292a   : > { %v6226_v10 = vsel %vm6218_vm10, %v6222_v34, %v6214_v1  ;;  %v6224_v23 = vsub.f32 0.0, %v6216_v48  ;;  %v9300_v1 = vld [vmem:[%s12193_s5 + $0x24] ss:$8 sps:$4 sm:$0xff]   ;;  %s12195_s5 = smov 64  }
0x292b   : > { %v6227_v39 = vsel %vm6219_vm11, %v6223_v21, %v6215_v20  ;;  %v6234_v17 = vadd.f32 1.0, %v6226_v10  ;;  %v6225_v42 = vsub.f32 0.0, %v6217_v12 }
0x292c   : > { %v6228_v55 = vsel %vm6220_vm12, %v6224_v23, %v6216_v48  ;;  %v6235_v56 = vadd.f32 1.0, %v6227_v39  ;;  %6517 = vmatpush1.bf16.msra.mxu0 %v9295_v37 }
0x292d   : > { %v6236_v59 = vadd.f32 1.0, %v6228_v55  ;;  %v6229_v33 = vsel %vm6221_vm13, %v6225_v42, %v6217_v12  ;;  %v6238_v44 = vmul.f32 %v6234_v17, %v6230_v25  ;;  %6518 = vmatprep.subr.bf16.mxu0 %v9300_v1  ;;  %v6459_v12 = vld [vmem:[%s12194_s6] sm:$0x3]  ;;  %s12196_s6 = sld [smem:[#allocation44_spill]] }
0x292e   : > { %v6237_v53 = vadd.f32 1.0, %v6229_v33  ;;  %v6239_v32 = vmul.f32 %v6235_v56, %v6231_v22  ;;  %v6464_v17 = vrot.slane %v6459_v12, %v11621_v62  ;;  %v6468_v55 = vrot.slane %v6459_v12, %v11624_v8 }
0x292f   : > { %v6240_v26 = vmul.f32 %v6236_v59, %v6232_v41 }
0x2930   : > { %v6241_v47 = vmul.f32 %v6237_v53, %v6233_v28  ;;  %6519 = vmatpush1.bf16.msra.mxu0 %v9298_v35 }
0x2931   : > { %v6242_v5 = vpack.c.bf16 %v6240_v26, %v6238_v44  ;;  %6520 = vmatprep.subr.bf16.mxu0 %v9303_v27 }
0x2932   : > { %v6243_v36 = vpack.c.bf16 %v6241_v47, %v6239_v32 }
0x2933   : > { %v8092_v0 = vld [vmem:[%s12196_s6 + $0x18] sm:$0xff]  ;;  %v8095_v1 = vld [vmem:[%s12196_s6 + $0x20] sm:$0xff]  ;;  %v8096_v27 = vld [vmem:[%s12196_s6 + $0x28] sm:$0xff] }
0x2934   : > { %6404 = vmatprep.mubr.bf16.mxu1 %v6243_v36  ;;  %6521 = vmatpush1.bf16.msra.mxu0 %v9301_v24 }
0x2935   : > { %6405 = vmatmul.mubr.bf16.vlgmr.msra.gmra.mrb[92].mxu1 %v6242_v5  ;;  %8833 = vmatprep.subr.bf16.mxu0 %v10006_v54 }
0x2936   : > { %8847 = vmatprep.mubr.msk.bf16.mxu1 %vm10007_vm9, %v10006_v54 }
0x2a08   : > { %v8361_v58 = vpop.f32.mrb[92].mxu1 }
0x2a09   : > { %v8362_v49 = vpop.f32.mrb[93].mxu1 }
0x2a0a   : > { %v8363_v50 = vadd.f32 %v8362_v49, %v8361_v58  ;;  %v8364_v4 = vpop.f32.mrb[94].mxu1 }
0x2a0b   : > { %v8365_v13 = vpop.f32.mrb[95].mxu1 }
0x2a0c   : > { %v6413_v14 = vadd.f32 %v8363_v50, %v11736_v45  ;;  %v8366_v63 = vadd.f32 %v8365_v13, %v8364_v4 }
0x2a0e   : > { %v11802_v52 = vadd.f32 %v8079_v40, %v6413_v14  ;;  %v6414_v61 = vadd.f32 %v8366_v63, %v11739_v57  ;;  %v6558_v14 = vld [vmem:[%s12196_s6] sm:$0xff] }
0x2a10   : > { %v11805_v46 = vadd.f32 %v8079_v40, %v6414_v61  ;;  %v6424_v6 = vsel %vm2019_vm3, %v11802_v52, 0.0  ;;  %v8091_v61 = vld [vmem:[%s12196_s6 + $0x10] sm:$0xff] }
0x2a11   : > { %6425 = vadd.xlane.f32.xlu1 %v6424_v6 }
0x2a12   : > { %v6427_v51 = vsel %vm2019_vm3, %v11805_v46, 0.0 }
0x2a13   : > { %6428 = vadd.xlane.f32.xlu0 %v6427_v51  ;;  %v6559_v51 = vld [vmem:[%s12196_s6 + $0x8] sm:$0xff] }
0x2a9e   : > { %v6426_v16 = vpop.xlane.xlu1 %6425 }
0x2a9f   : > { %v6430_v45 = vmul.f32 0.015625, %v6426_v16 }
0x2aa0   : > { %v6429_v38 = vpop.xlane.xlu0 %6428 }
0x2aa1   : > { %v6432_v19 = vsub.f32 %v11802_v52, %v6430_v45  ;;  %v6431_v57 = vmul.f32 0.015625, %v6429_v38 }
0x2aa3   : > { %v6433_v3 = vsub.f32 %v11805_v46, %v6431_v57  ;;  %v6434_v60 = vmul.f32 %v6432_v19, %v6432_v19 }
0x2aa5   : > { %v6436_v29 = vsel %vm2019_vm3, %v6434_v60, 0.0  ;;  %v6435_v15 = vmul.f32 %v6433_v3, %v6433_v3 }
0x2aa6   : > { %6437 = vadd.xlane.f32.xlu1 %v6436_v29 }
0x2aa7   : > { %v6439_v7 = vsel %vm2019_vm3, %v6435_v15, 0.0 }
0x2aa8   : > { %6440 = vadd.xlane.f32.xlu0 %v6439_v7 }
0x2b33   : > { %v6438_v20 = vpop.xlane.xlu1 %6437 }
0x2b34   : > { %v6442_v34 = vmul.f32 0.015625, %v6438_v20 }
0x2b35   : > { %v6441_v11 = vpop.xlane.xlu0 %6440 }
0x2b36   : > { %v6444_v31 = vadd.f32 1e-05, %v6442_v34  ;;  %v6443_v18 = vmul.f32 0.015625, %v6441_v11 }
0x2b38   : > { %9672 = vrsqrt.f32 %v6444_v31  ;;  %v6445_v21 = vadd.f32 1e-05, %v6443_v18 }
0x2b3a   : > { %9674 = vrsqrt.f32 %v6445_v21 }
0x2b42   : > { %v9673_v10 = vpop.eup %9672 }
0x2b43   : > { %v6448_v30 = vmul.f32 %v9673_v10, %v6432_v19  ;;  %v8099_v10 = vld [vmem:[%s12196_s6 + $0x30] sm:$0xff] }
0x2b44   : > { %v9675_v48 = vpop.eup %9674 }
0x2b45   : > { %v6449_v39 = vmul.f32 %v9675_v48, %v6433_v3 }
0x2b47   : > { %v6450_v23 = vpack.c.bf16 %v6449_v39, %v6448_v30  ;;  %v8100_v39 = vld [vmem:[%s12196_s6 + $0x38] sm:$0xff] }
0x2b49   : > { %8088 = vmatmul.mubr.msk.bf16.vlgmr.msra.gmra.mrb[104].mxu0 %vm2019_vm3, %v6450_v23 }
0x2b4a   : > { %8835 = vmatprep.mubr.msk.bf16.mxu0 %vm10007_vm9, %v10006_v54 }
0x2c1c   : > { %v6548_v25 = vpop.f32.mrb[104].mxu0 }
0x2c1d   : > { %v6550_v42 = vpop.f32.mrb[105].mxu0  ;;  %v6549_v41 = vadd.f32 %v6548_v25, %v6464_v17 }
0x2c1e   : > { %v6552_v56 = vpop.f32.mrb[106].mxu0  ;;  %v6551_v33 = vadd.f32 %v6550_v42, %v6468_v55 }
0x2c1f   : > { %v6553_v59 = vadd.f32 %v6552_v56, %v6464_v17  ;;  %v6554_v22 = vpop.f32.mrb[107].mxu0 }
0x2c20   : > { %v6555_v44 = vadd.f32 %v6554_v22, %v6468_v55 }
0x2c21   : > { %v6557_v26 = vpack.c.bf16 %v6553_v59, %v6549_v41 }
0x2c22   : > { %v11830_v28 = vpack.c.bf16 %v6555_v44, %v6551_v33 }
0x2c23   : > { %6683 = vrot.lane.b32.xlu0 %v6557_v26, %s12182_s18  ;;  %6561 = vrot.lane.b32.xlu1 %v6557_v26, %s12195_s5 }
0x2c27   : > { %6932 = vrot.lane.b32.xlu0 %v6557_v26, %s12187_s4  ;;  %6681 = vrot.lane.b32.xlu1 %v6557_v26, %s12183_s15 }
0x2c2b   : > { %6808 = vrot.lane.b32.xlu1 %v6557_v26, %s12185_s2 }
0x2c2f   : > { %6806 = vrot.lane.b32.xlu1 %v6557_v26, %s12184_s1 }
0x2c33   : > { %6930 = vrot.lane.b32.xlu1 %v6557_v26, %s12186_s3 }
0x2c95   : > { %v6684_v53 = vpop.permute.xlu0 %6683  ;;  %v6562_v32 = vpop.permute.xlu1 %6561 }
0x2c96   : > { %v6689_v47 = vsel %vm1929_vm2, %v6684_v53, 0  ;;  %v6567_v5 = vsel %vm1929_vm2, %v6562_v32, 0 }
0x2c97   : > { %8834 = vmatpush3.bf16.xpose.msra.mxu0 %v6567_v5  ;;  %8846 = vmatpush3.bf16.xpose.msra.mxu1 %v6689_v47 }
0x2c98   : > { %8839 = vmatprep.subr.bf16.mxu0 %v10006_v54  ;;  %8857 = vmatprep.subr.bf16.mxu1 %v10006_v54 }
0x2c99   : > { %v6682_v36 = vpop.permute.xlu1 %6681  ;;  %v6933_v50 = vpop.permute.xlu0 %6932 }
0x2c9a   : > { %v6938_v40 = vsel %vm1929_vm2, %v6933_v50, 0 }
0x2c9d   : > { %v6809_v58 = vpop.permute.xlu1 %6808 }
0x2c9e   : > { %v6814_v49 = vsel %vm1929_vm2, %v6809_v58, 0  ;;  %8836 = vmatmul.mubr.msk.bf16.vlgmr.msra.gmra.mrb[108].mxu0 %vm1929_vm2, %v6557_v26  ;;  %8848 = vmatmul.mubr.msk.bf16.vlgmr.msra.gmra.mrb[96].mxu1 %vm1929_vm2, %v6682_v36 }
0x2c9f   : > { %8840 = vmatpush3.bf16.msra.mxu0 %v11830_v28  ;;  %8858 = vmatpush3.bf16.xpose.msra.mxu1 %v6814_v49 }
0x2ca0   : > { %8859 = vmatprep.mubr.msk.bf16.mxu1 %vm10007_vm9, %v10006_v54  ;;  %8869 = vmatprep.subr.bf16.mxu1 %v10006_v54 }
0x2ca1   : > { %8841 = vmatprep.mubr.msk.bf16.mxu0 %vm10007_vm9, %v10006_v54  ;;  %8851 = vmatprep.subr.bf16.mxu0 %v10006_v54  ;;  %v6807_v4 = vpop.permute.xlu1 %6806 }
0x2ca5   : > { %v6931_v13 = vpop.permute.xlu1 %6930 }
0x2ca6   : > { %8860 = vmatmul.mubr.msk.bf16.vlgmr.msra.gmra.mrb[100].mxu1 %vm1929_vm2, %v6807_v4 }
0x2ca7   : > { %8870 = vmatpush3.bf16.xpose.msra.mxu1 %v6938_v40  ;;  %8871 = vmatprep.mubr.msk.bf16.mxu1 %vm10007_vm9, %v10006_v54 }
0x2ca8   : > { %8881 = vmatprep.subr.bf16.mxu1 %v10006_v54 }
0x2cae   : > { %8872 = vmatmul.mubr.msk.bf16.vlgmr.msra.gmra.mrb[104].mxu1 %vm1929_vm2, %v6931_v13 }
0x2caf   : > { %8889 = vmatprep.mubr.msk.bf16.mxu1 %vm10007_vm9, %v10006_v54 }
0x2d71   : > { %v6603_v63 = vpop.f32.mrb[108].mxu0  ;;  %v6725_v6 = vpop.f32.mrb[96].mxu1 }
0x2d72   : > { %v6604_v16 = vadd.f32 %v6603_v63, %v6558_v14  ;;  %v8837_v45 = vpop.f32.mrb[109].mxu0  ;;  %v8849_v38 = vpop.f32.mrb[97].mxu1  ;;  %v6726_v3 = vadd.f32 %v8091_v61, %v6725_v6 }
0x2d73   : > { %v6606_v19 = vpop.f32.mrb[110].mxu0  ;;  %v6728_v57 = vpop.f32.mrb[98].mxu1 }
0x2d74   : > { %v6607_v60 = vadd.f32 %v6606_v19, %v6559_v51  ;;  %v8838_v29 = vpop.f32.mrb[111].mxu0  ;;  %v8850_v15 = vpop.f32.mrb[99].mxu1  ;;  %v6610_v7 = vsel %vm1929_vm2, %v6604_v16, -inf  ;;  %v6729_v9 = vadd.f32 %v8092_v0, %v6728_v57  ;;  %v6732_v37 = vsel %vm1929_vm2, %v6726_v3, -inf }
0x2d75   : > { %6611 = vmax.xlane.f32.xlu0 %v6610_v7 }
0x2d76   : > { %v6613_v2 = vsel %vm1929_vm2, %v6607_v60, -inf  ;;  %v6735_v18 = vsel %vm1929_vm2, %v6729_v9, -inf }
0x2d77   : > { %6614 = vmax.xlane.f32.xlu1 %v6613_v2 }
0x2d79   : > { %6733 = vmax.xlane.f32.xlu0 %v6732_v37  ;;  %v6850_v35 = vpop.f32.mrb[100].mxu1 }
0x2d7a   : > { %v8861_v24 = vpop.f32.mrb[101].mxu1  ;;  %v6851_v34 = vadd.f32 %v8095_v1, %v6850_v35 }
0x2d7b   : > { %v6853_v20 = vpop.f32.mrb[102].mxu1 }
0x2d7c   : > { %v6854_v11 = vadd.f32 %v8096_v27, %v6853_v20  ;;  %v8862_v31 = vpop.f32.mrb[103].mxu1  ;;  %v6857_v48 = vsel %vm1929_vm2, %v6851_v34, -inf }
0x2d7d   : > { %6736 = vmax.xlane.f32.xlu0 %v6735_v18 }
0x2d7e   : > { %v6860_v21 = vsel %vm1929_vm2, %v6854_v11, -inf }
0x2d7f   : > { %6861 = vmax.xlane.f32.xlu1 %v6860_v21 }
0x2d81   : > { %6858 = vmax.xlane.f32.xlu0 %v6857_v48  ;;  %v6974_v30 = vpop.f32.mrb[104].mxu1 }
0x2d82   : > { %v6975_v23 = vadd.f32 %v8099_v10, %v6974_v30  ;;  %v8873_v12 = vpop.f32.mrb[105].mxu1 }
0x2d83   : > { %v6977_v17 = vpop.f32.mrb[106].mxu1 }
0x2d84   : > { %v6978_v25 = vadd.f32 %v8100_v39, %v6977_v17  ;;  %v8874_v55 = vpop.f32.mrb[107].mxu1  ;;  %v6981_v42 = vsel %vm1929_vm2, %v6975_v23, -inf }
0x2d85   : > { %6982 = vmax.xlane.f32.xlu0 %v6981_v42 }
0x2d86   : > { %v6984_v56 = vsel %vm1929_vm2, %v6978_v25, -inf }
0x2d87   : > { %6985 = vmax.xlane.f32.xlu1 %v6984_v56 }
0x2e02   : > { %v6612_v41 = vpop.xlane.xlu0 %6611 }
0x2e03   : > { %v6616_v59 = vsub.f32 %v6604_v16, %v6612_v41 }
0x2e04   : > { %v6615_v22 = vpop.xlane.xlu1 %6614 }
0x2e05   : > { %v6618_v33 = vmul.f32 1.442695, %v6616_v59  ;;  %v6617_v44 = vsub.f32 %v6607_v60, %v6615_v22 }
0x2e06   : > { %v6734_v26 = vpop.xlane.xlu0 %6733 }
0x2e07   : > { %9676 = vpow2.f32 %v6618_v33  ;;  %v6620_v53 = vmul.f32 1.442695, %v6617_v44  ;;  %v6738_v32 = vsub.f32 %v6726_v3, %v6734_v26 }
0x2e09   : > { %9678 = vpow2.f32 %v6620_v53  ;;  %v6740_v47 = vmul.f32 1.442695, %v6738_v32 }
0x2e0a   : > { %v6737_v5 = vpop.xlane.xlu0 %6736 }
0x2e0b   : > { %9680 = vpow2.f32 %v6740_v47  ;;  %v6739_v36 = vsub.f32 %v6729_v9, %v6737_v5 }
0x2e0c   : > { %v6862_v58 = vpop.xlane.xlu1 %6861 }
0x2e0d   : > { %v6742_v49 = vmul.f32 1.442695, %v6739_v36  ;;  %v6864_v50 = vsub.f32 %v6854_v11, %v6862_v58 }
0x2e0e   : > { %v6859_v4 = vpop.xlane.xlu0 %6858 }
0x2e0f   : > { %9682 = vpow2.f32 %v6742_v49  ;;  %v6867_v40 = vmul.f32 1.442695, %v6864_v50  ;;  %v6863_v13 = vsub.f32 %v6851_v34, %v6859_v4 }
0x2e11   : > { %v9677_v14 = vpop.eup %9676  ;;  %9684 = vpow2.f32 %v6867_v40  ;;  %v6865_v63 = vmul.f32 1.442695, %v6863_v13 }
0x2e12   : > { %v6983_v61 = vpop.xlane.xlu0 %6982  ;;  %v6622_v6 = vsel %vm1929_vm2, %v9677_v14, 0.0 }
0x2e13   : > { %v9679_v51 = vpop.eup %9678  ;;  %9686 = vpow2.f32 %v6865_v63  ;;  %v6987_v16 = vsub.f32 %v6975_v23, %v6983_v61  ;;  %6623 = vadd.xlane.f32.xlu0 %v6622_v6 }
0x2e14   : > { %v6625_v45 = vsel %vm1929_vm2, %v9679_v51, 0.0  ;;  %v6986_v37 = vpop.xlane.xlu1 %6985 }
0x2e15   : > { %v9681_v38 = vpop.eup %9680  ;;  %v6989_v19 = vmul.f32 1.442695, %v6987_v16  ;;  %6626 = vadd.xlane.f32.xlu1 %v6625_v45  ;;  %v6988_v1 = vsub.f32 %v6978_v25, %v6986_v37 }
0x2e16   : > { %v6744_v57 = vsel %vm1929_vm2, %v9681_v38, 0.0 }
0x2e17   : > { %9688 = vpow2.f32 %v6989_v19  ;;  %6745 = vadd.xlane.f32.xlu0 %v6744_v57  ;;  %v6991_v35 = vmul.f32 1.442695, %v6988_v1 }
0x2e19   : > { %v9683_v3 = vpop.eup %9682  ;;  %9690 = vpow2.f32 %v6991_v35 }
0x2e1a   : > { %v6747_v60 = vsel %vm1929_vm2, %v9683_v3, 0.0 }
0x2e1b   : > { %v9685_v29 = vpop.eup %9684  ;;  %6748 = vadd.xlane.f32.xlu1 %v6747_v60 }
0x2e1c   : > { %v6872_v0 = vsel %vm1929_vm2, %v9685_v29, 0.0 }
0x2e1d   : > { %v9687_v15 = vpop.eup %9686 }
0x2e1e   : > { %v6869_v7 = vsel %vm1929_vm2, %v9687_v15, 0.0 }
0x2e1f   : > { %6870 = vadd.xlane.f32.xlu0 %v6869_v7  ;;  %6873 = vadd.xlane.f32.xlu1 %v6872_v0 }
0x2e21   : > { %v9689_v2 = vpop.eup %9688 }
0x2e22   : > { %v6993_v9 = vsel %vm1929_vm2, %v9689_v2, 0.0 }
0x2e23   : > { %6994 = vadd.xlane.f32.xlu0 %v6993_v9  ;;  %v9691_v27 = vpop.eup %9690 }
0x2e24   : > { %v6996_v24 = vsel %vm1929_vm2, %v9691_v27, 0.0 }
0x2e30   : > { %6880 = vrot.lane.b32.xlu1 %v11830_v28, %s12184_s1  ;;  %s12199_s1 = sld [smem:[#allocation48_spill]] }
0x2e39   : > { %6756 = vrot.lane.b32.xlu0 %v11830_v28, %s12183_s15  ;;  %s8140_s15 = sshll.u32 %s10271_s0, 4  ;;  %s10009_s0 = smov [#allocation11]  }
0x2e3a   : > { %s9876_s6 = sshll.u32 %s10009_s0, 4  ;;  %s9877_s6 = int_to_ptr.vmem [resolvable:$false] %s9876_s6 }
0x2e3b   : > { %s9878_s8 = scalar_lea.vmem %s9877_s6, 32 }
0x2e54   : > { %6997 = vadd.xlane.f32.xlu1 %v6996_v24 }
0x2e65   : > { %7004 = vrot.lane.b32.xlu1 %v11830_v28, %s12186_s3  ;;  %s12197_s3 = sld [smem:[#allocation45_spill]] }
0x2e6b   : > { %v9304_v6 = vld [vmem:[%s12197_s3] sm:$0xff]   ;;  %v9305_v45 = vld [vmem:[%s12197_s3 + $0x8] sm:$0xff]  }
0x2e6c   : > { %8882 = vmatpush3.bf16.msra.mxu1 %v9304_v6 }
0x2e6d   : > { %8883 = vmatprep.subr.bf16.mxu1 %v10006_v54 }
0x2e70   : > { %8884 = vmatpush3.bf16.msra.mxu1 %v9305_v45 }
0x2e71   : > { %8885 = vmatprep.subr.bf16.mxu1 %v10006_v54 }
0x2ea0   : > { %v6624_v20 = vpop.xlane.xlu0 %6623 }
0x2ea1   : > { %9692 = vrcp.f32 %v6624_v20 }
0x2ea2   : > { %v6627_v34 = vpop.xlane.xlu1 %6626 }
0x2ea3   : > { %9694 = vrcp.f32 %v6627_v34 }
0x2ea4   : > { %v6746_v11 = vpop.xlane.xlu0 %6745 }
0x2ea5   : > { %9696 = vrcp.f32 %v6746_v11 }
0x2ea8   : > { %v6749_v31 = vpop.xlane.xlu1 %6748 }
0x2ea9   : > { %9698 = vrcp.f32 %v6749_v31 }
0x2eab   : > { %v9693_v18 = vpop.eup %9692 }
0x2eac   : > { %v6871_v21 = vpop.xlane.xlu0 %6870  ;;  %v6874_v10 = vpop.xlane.xlu1 %6873  ;;  %v6630_v30 = vmul.f32 %v9693_v18, %v9677_v14 }
0x2ead   : > { %v9695_v48 = vpop.eup %9694  ;;  %9700 = vrcp.f32 %v6871_v21 }
0x2eae   : > { %v6631_v39 = vmul.f32 %v9695_v48, %v9679_v51  ;;  %9702 = vrcp.f32 %v6874_v10 }
0x2eaf   : > { %v9697_v17 = vpop.eup %9696 }
0x2eb0   : > { %v6995_v23 = vpop.xlane.xlu0 %6994  ;;  %v6632_v12 = vpack.c.bf16 %v6631_v39, %v6630_v30  ;;  %v6752_v42 = vmul.f32 %v9697_v17, %v9681_v38  ;;  %v6881_v22 = vpop.permute.xlu1 %6880  ;;  %v8108_v17 = vld [vmem:[#allocation7] ss:$0 sm:$0xff] }
0x2eb1   : > { %9704 = vrcp.f32 %v6995_v23 }
0x2eb2   : > { %8842 = vmatmul.mubr.msk.bf16.vlgmr.msra.gmra.mrb[112].mxu0 %vm1929_vm2, %v6632_v12 }
0x2eb3   : > { %v9699_v28 = vpop.eup %9698  ;;  %8853 = vmatprep.mubr.msk.bf16.mxu0 %vm10007_vm9, %v10006_v54 }
0x2eb4   : > { %v6753_v25 = vmul.f32 %v9699_v28, %v9683_v3  ;;  %v6757_v55 = vpop.permute.xlu0 %6756 }
0x2eb5   : > { %8852 = vmatpush3.bf16.msra.mxu0 %v6757_v55 }
0x2eb6   : > { %8863 = vmatprep.subr.bf16.mxu0 %v10006_v54  ;;  %v6754_v41 = vpack.c.bf16 %v6753_v25, %v6752_v42 }
0x2eb7   : > { %v9701_v56 = vpop.eup %9700 }
0x2eb8   : > { %v9703_v59 = vpop.eup %9702  ;;  %v6877_v33 = vmul.f32 %v9701_v56, %v9687_v15 }
0x2eb9   : > { %v6878_v44 = vmul.f32 %v9703_v59, %v9685_v29  ;;  %v9307_v29 = vld [vmem:[%s12197_s3 + $0x18] sm:$0xff]  }
0x2eba   : > { %8854 = vmatmul.mubr.msk.bf16.vlgmr.msra.gmra.mrb[116].mxu0 %vm1929_vm2, %v6754_v41 }
0x2ebb   : > { %8864 = vmatpush3.bf16.msra.mxu0 %v6881_v22  ;;  %8865 = vmatprep.mubr.msk.bf16.mxu0 %vm10007_vm9, %v10006_v54  ;;  %v6879_v26 = vpack.c.bf16 %v6878_v44, %v6877_v33  ;;  %v9705_v47 = vpop.eup %9704 }
0x2ebc   : > { %8875 = vmatprep.subr.bf16.mxu0 %v10006_v54  ;;  %v7001_v36 = vmul.f32 %v9705_v47, %v9689_v2 }
0x2ec2   : > { %8866 = vmatmul.mubr.msk.bf16.vlgmr.msra.gmra.mrb[120].mxu0 %vm1929_vm2, %v6879_v26 }
0x2ec3   : > { %8877 = vmatprep.mubr.msk.bf16.mxu0 %vm10007_vm9, %v10006_v54 }
0x2ee1   : > { %v6998_v53 = vpop.xlane.xlu1 %6997 }
0x2ee2   : > { %9706 = vrcp.f32 %v6998_v53 }
0x2ee5   : > { %v7005_v32 = vpop.permute.xlu1 %7004 }
0x2ee6   : > { %8876 = vmatpush3.bf16.msra.mxu0 %v7005_v32 }
0x2eec   : > { %v9707_v5 = vpop.eup %9706 }
0x2eed   : > { %v7002_v58 = vmul.f32 %v9707_v5, %v9691_v27 }
0x2eef   : > { %v7003_v49 = vpack.c.bf16 %v7002_v58, %v7001_v36 }
0x2ef1   : > { %8878 = vmatmul.mubr.msk.bf16.vlgmr.msra.gmra.mrb[124].mxu0 %vm1929_vm2, %v7003_v49 }
0x2ef2   : > { %7291 = vmatprep.mubr.bf16.mxu0 %v10008_v43  ;;  %v9306_v43 = vld [vmem:[%s12197_s3 + $0x10] sm:$0xff]  }
0x2ef3   : > { %8886 = vmatpush3.bf16.msra.mxu1 %v9306_v43 }
0x2ef4   : > { %8887 = vmatprep.subr.bf16.mxu1 %v10006_v54 }
0x2ef7   : > { %8888 = vmatpush3.bf16.msra.mxu1 %v9307_v29 }
0x2f85   : > { %v6671_v50 = vpop.f32.mrb[112].mxu0 }
0x2f86   : > { %v8843_v4 = vpop.f32.mrb[113].mxu0 }
0x2f87   : > { %v6674_v40 = vpop.f32.mrb[114].mxu0 }
0x2f88   : > { %v8844_v13 = vpop.f32.mrb[115].mxu0 }
0x2f8d   : > { %v6796_v14 = vpop.f32.mrb[116].mxu0 }
0x2f8e   : > { %v8855_v63 = vpop.f32.mrb[117].mxu0 }
0x2f8f   : > { %v6799_v61 = vpop.f32.mrb[118].mxu0 }
0x2f90   : > { %v9194_v51 = vpack.i.bf16 %v6799_v61, %v6796_v14  ;;  %v8856_v16 = vpop.f32.mrb[119].mxu0 }
0x2f92   : > { %9195 = vrot.lane.b32.xlu1 %v9194_v51, %s12187_s4  ;;  %s12198_s4 = sld [smem:[#allocation46_spill]] }
0x2f95   : > { %v6920_v38 = vpop.f32.mrb[120].mxu0 }
0x2f96   : > { %v8867_v19 = vpop.f32.mrb[121].mxu0 }
0x2f97   : > { %v6923_v57 = vpop.f32.mrb[122].mxu0 }
0x2f98   : > { %v9199_v3 = vpack.i.bf16 %v6923_v57, %v6920_v38  ;;  %v8868_v60 = vpop.f32.mrb[123].mxu0  ;;  %v9310_v49 = vld [vmem:[%s12198_s4 + $0x4] ss:$8 sps:$4 sm:$0xff]   ;;  %v9313_v4 = vld [vmem:[%s12198_s4 + $0x14] ss:$8 sps:$4 sm:$0xff]  }
0x2f99   : > { %7259 = vmatprep.subr.bf16.mxu0 %v9310_v49  ;;  %v9316_v13 = vld [vmem:[%s12198_s4 + $0x24] ss:$8 sps:$4 sm:$0xff]   ;;  %v9314_v14 = vld [vmem:[%s12198_s4 + $0x20] ss:$8 sps:$4 sm:$0xff]   ;;  %v9319_v63 = vld [vmem:[%s12198_s4 + $0x34] ss:$8 sps:$4 sm:$0xff]  }
0x2f9a   : > { %9200 = vrot.lane.b32.xlu0 %v9199_v3, %s12185_s2  ;;  %v9317_v61 = vld [vmem:[%s12198_s4 + $0x30] ss:$8 sps:$4 sm:$0xff]   ;;  %s12200_s2 = sld [smem:[#allocation47_spill]] }
0x2fc4   : > { %v7044_v15 = vpop.f32.mrb[124].mxu0 }
0x2fc5   : > { %v8879_v7 = vpop.f32.mrb[125].mxu0 }
0x2fc6   : > { %v7047_v0 = vpop.f32.mrb[126].mxu0  ;;  %v9321_v7 = vld [vmem:[%s12199_s1] sm:$0xff]  }
0x2fc7   : > { %v9204_v2 = vpack.i.bf16 %v7047_v0, %v7044_v15  ;;  %v8880_v9 = vpop.f32.mrb[127].mxu0  ;;  %v9320_v15 = vld [vmem:[%s12199_s1 + $0x40] sm:$0xff]   ;;  %v9322_v0 = vld [vmem:[%s12199_s1 + $0x48] sm:$0xff]  }
0x2fc8   : > { %8388 = vmatprep.subr.bf16.mxu1 %v9320_v15  ;;  %v9324_v9 = vld [vmem:[%s12199_s1 + $0x50] sm:$0xff]  }
0x2fc9   : > { %9205 = vrot.lane.b32.xlu1 %v9204_v2, %s12182_s18  ;;  %v9323_v2 = vld [vmem:[%s12199_s1 + $0x8] sm:$0xff]   ;;  %s1432_s18 = sand.u32 1, %s9938_s16  }
0x2fca   : > { %s1433_s5 = scalar_lea.vmem [#allocation11], %s1432_s18  ;;  %s7705_s3 = scalar_lea.sflag [#allocation4], %s1432_s18 }
0x3004   : > { %v9196_v37 = vpop.permute.xlu1 %9195 }
0x3005   : > { %v9198_v35 = vunpack.i.h.bf16 %v9196_v37  ;;  %v9197_v27 = vunpack.i.l.bf16 %v9196_v37  ;;  %v9325_v37 = vld [vmem:[%s12199_s1 + $0x10] sm:$0xff]  }
0x3007   : > { %v7076_v11 = vsel %vm1929_vm2, %v6674_v40, %v9198_v35  ;;  %v7075_v31 = vsel %vm1929_vm2, %v6671_v50, %v9197_v27  ;;  %v9308_v50 = vld [vmem:[%s12198_s4] ss:$8 sps:$4 sm:$0xff]   ;;  %v9311_v40 = vld [vmem:[%s12198_s4 + $0x10] ss:$8 sps:$4 sm:$0xff]  }
0x3008   : > { %7260 = vmatpush1.bf16.msra.mxu0 %v9308_v50  ;;  %v9327_v35 = vld [vmem:[%s12199_s1 + $0x18] sm:$0xff]   ;;  %v9328_v27 = vld [vmem:[%s12199_s1 + $0x60] sm:$0xff]  }
0x3009   : > { %7261 = vmatprep.subr.bf16.mxu0 %v9313_v4 }
0x300c   : > { %v9201_v1 = vpop.permute.xlu0 %9200  ;;  %7262 = vmatpush1.bf16.msra.mxu0 %v9311_v40 }
0x300d   : > { %v9203_v24 = vunpack.i.h.bf16 %v9201_v1  ;;  %v9202_v20 = vunpack.i.l.bf16 %v9201_v1  ;;  %7263 = vmatprep.subr.bf16.mxu0 %v9316_v13  ;;  %v9326_v1 = vld [vmem:[%s12199_s1 + $0x58] sm:$0xff]  }
0x300f   : > { %v7077_v10 = vsel %vm1561_vm1, %v7075_v31, %v9202_v20  ;;  %v7078_v48 = vsel %vm1561_vm1, %v7076_v11, %v9203_v24  ;;  %v9329_v24 = vld [vmem:[%s12199_s1 + $0x20] sm:$0xff]   ;;  %v9330_v20 = vld [vmem:[%s12199_s1 + $0x68] sm:$0xff]   ;;  %v9332_v11 = vld [vmem:[%s12199_s1 + $0x70] sm:$0xff]  }
0x3010   : > { %7264 = vmatpush1.bf16.msra.mxu0 %v9314_v14  ;;  %v9333_v31 = vld [vmem:[%s12199_s1 + $0x30] sm:$0xff]  }
0x3011   : > { %7265 = vmatprep.subr.bf16.mxu0 %v9319_v63 }
0x3014   : > { %7266 = vmatpush1.bf16.msra.mxu0 %v9317_v61 }
0x3015   : > { %8893 = vmatprep.subr.bf16.mxu0 %v10006_v54 }
0x303b   : > { %v9206_v34 = vpop.permute.xlu1 %9205 }
0x303c   : > { %v9208_v18 = vunpack.i.h.bf16 %v9206_v34  ;;  %v9207_v21 = vunpack.i.l.bf16 %v9206_v34  ;;  %v9331_v34 = vld [vmem:[%s12199_s1 + $0x28] sm:$0xff]  }
0x303e   : > { %v7079_v30 = vsel %vm1483_vm0, %v7077_v10, %v9207_v21  ;;  %v7080_v39 = vsel %vm1483_vm0, %v7078_v48, %v9208_v18  ;;  %v9334_v18 = vld [vmem:[%s12199_s1 + $0x78] sm:$0xff]   ;;  %v7204_v10 = vld [vmem:[%s12200_s2] sm:$0x3]  ;;  %s7717_s2 = sshll.u32 %s1433_s5, 4  ;;  %s12007_s2 = int_to_ptr.vmem [resolvable:$true] %s7717_s2 }
0x303f   : > { %v7081_v23 = vpack.c.bf16 %v7080_v39, %v7079_v30  ;;  %v9335_v21 = vld [vmem:[%s12199_s1 + $0x38] sm:$0xff]   ;;  %v7209_v48 = vrot.slane %v7204_v10, %v11621_v62  ;;  %v7213_v30 = vrot.slane %v7204_v10, %v11624_v8  ;;  %s12005_s1 = scalar_lea.hbm %s10248_s24, %s8140_s15  ;;  %s9872_s4 = scalar_lea.vmem %s12007_s2, 16 }
0x3040   : > { %p9873_p6 = scmp.ne.s32.totalorder %s12007_s2, %s9872_s4  ;;  %p9879_p8 = scmp.lt.s32.totalorder %s12007_s2, %s9877_s6 }
0x3041   : > { %8890 = vmatmul.mubr.msk.bf16.vlgmr.msra.gmra.mrb[108].mxu1 %vm2019_vm3, %v7081_v23  ;;  %p9880_p11 = scmp.lt.s32.totalorder %s9878_s8, %s9872_s4 }
0x3042   : > { %8389 = vmatpush3.bf16.msra.mxu1 %v9321_v7  ;;  %p9874_p10 = pnand %p9873_p6, %p12201_p9 }
0x3043   : > { %8390 = vmatprep.subr.bf16.mxu1 %v9322_v0  ;;  %p9881_p13 = por %p9880_p11, %p9879_p8 }
0x3044   : > { %p9875_p7 = pneg %p9874_p10 }
0x3046   : > { %8391 = vmatpush3.bf16.msra.mxu1 %v9323_v2  ;;  %p9882_p1 = pnand %p9881_p13, %p9875_p7 }
0x3047   : > { %8392 = vmatprep.subr.bf16.mxu1 %v9324_v9 }
0x304a   : > { %8393 = vmatpush3.bf16.msra.mxu1 %v9325_v37 }
0x304b   : > { %8394 = vmatprep.subr.bf16.mxu1 %v9326_v1 }
0x304e   : > { %8395 = vmatpush3.bf16.msra.mxu1 %v9327_v35 }
0x304f   : > { %8396 = vmatprep.subr.bf16.mxu1 %v9328_v27 }
0x3052   : > { %8397 = vmatpush3.bf16.msra.mxu1 %v9329_v24 }
0x3053   : > { %8398 = vmatprep.subr.bf16.mxu1 %v9330_v20 }
0x3056   : > { %8399 = vmatpush3.bf16.msra.mxu1 %v9331_v34 }
0x3057   : > { %8400 = vmatprep.subr.bf16.mxu1 %v9332_v11 }
0x305a   : > { %8401 = vmatpush3.bf16.msra.mxu1 %v9333_v31 }
0x305b   : > { %8402 = vmatprep.subr.bf16.mxu1 %v9334_v18 }
0x305e   : > { %8403 = vmatpush3.bf16.msra.mxu1 %v9335_v21 }
0x3114   : > { %v7151_v12 = vpop.f32.mrb[108].mxu1 }
0x3115   : > { %v7158_v28 = vadd.f32 %v7151_v12, %v11802_v52  ;;  %v8891_v25 = vpop.f32.mrb[109].mxu1 }
0x3116   : > { %v7154_v55 = vpop.f32.mrb[110].mxu1 }
0x3117   : > { %v11922_v42 = vadd.f32 %v8108_v17, %v7158_v28  ;;  %v7159_v56 = vadd.f32 %v7154_v55, %v11805_v46  ;;  %v8892_v41 = vpop.f32.mrb[111].mxu1 }
0x3119   : > { %v11925_v59 = vadd.f32 %v8108_v17, %v7159_v56  ;;  %v7169_v22 = vsel %vm2019_vm3, %v11922_v42, 0.0 }
0x311a   : > { %7170 = vadd.xlane.f32.xlu0 %v7169_v22 }
0x311b   : > { %v7172_v33 = vsel %vm2019_vm3, %v11925_v59, 0.0 }
0x311c   : > { %7173 = vadd.xlane.f32.xlu1 %v7172_v33 }
0x31a7   : > { %v7171_v52 = vpop.xlane.xlu0 %7170 }
0x31a8   : > { %v7175_v44 = vmul.f32 0.015625, %v7171_v52 }
0x31a9   : > { %v7174_v26 = vpop.xlane.xlu1 %7173 }
0x31aa   : > { %v7177_v46 = vsub.f32 %v11922_v42, %v7175_v44  ;;  %v7176_v53 = vmul.f32 0.015625, %v7174_v26 }
0x31ac   : > { %v7178_v32 = vsub.f32 %v11925_v59, %v7176_v53  ;;  %v7179_v47 = vmul.f32 %v7177_v46, %v7177_v46 }
0x31ae   : > { %v7181_v5 = vsel %vm2019_vm3, %v7179_v47, 0.0  ;;  %v7180_v36 = vmul.f32 %v7178_v32, %v7178_v32 }
0x31af   : > { %7182 = vadd.xlane.f32.xlu0 %v7181_v5 }
0x31b0   : > { %v7184_v58 = vsel %vm2019_vm3, %v7180_v36, 0.0 }
0x31b3   : > { %7185 = vadd.xlane.f32.xlu0 %v7184_v58 }
0x323c   : > { %v7183_v6 = vpop.xlane.xlu0 %7182 }
0x323d   : > { %v7187_v51 = vmul.f32 0.015625, %v7183_v6 }
0x323f   : > { %v7189_v16 = vadd.f32 1e-05, %v7187_v51 }
0x3240   : > { %v7186_v45 = vpop.xlane.xlu0 %7185 }
0x3241   : > { %v7188_v38 = vmul.f32 0.015625, %v7186_v45  ;;  %9708 = vrsqrt.f32 %v7189_v16 }
0x3243   : > { %v7190_v43 = vadd.f32 1e-05, %v7188_v38 }
0x3245   : > { %9710 = vrsqrt.f32 %v7190_v43 }
0x324b   : > { %v9709_v19 = vpop.eup %9708 }
0x324c   : > { %v7193_v3 = vmul.f32 %v9709_v19, %v7177_v46 }
0x324f   : > { %v9711_v57 = vpop.eup %9710 }
0x3250   : > { %v7194_v60 = vmul.f32 %v9711_v57, %v7178_v32 }
0x3252   : > { %v7195_v29 = vpack.c.bf16 %v7194_v60, %v7193_v3 }
0x3254   : > { %8117 = vmatmul.mubr.msk.bf16.vlgmr.msra.gmra.mrb[128].mxu0 %vm2019_vm3, %v7195_v29 }
0x3255   : > { %8901 = vmatprep.mubr.msk.bf16.mxu0 %vm10007_vm9, %v10006_v54 }
0x3327   : > { %v7293_v39 = vpop.f32.mrb[128].mxu0 }
0x3328   : > { %v11966_v23 = vadd.f32 %v7293_v39, %v7209_v48  ;;  %v7295_v12 = vpop.f32.mrb[129].mxu0 }
0x3329   : > { %v11968_v17 = vadd.f32 %v7295_v12, %v7213_v30  ;;  %v7297_v28 = vpop.f32.mrb[130].mxu0 }
0x332a   : > { %v7302_v25 = vand.u32 2147483647, %v11966_v23  ;;  %v11971_v55 = vadd.f32 %v7297_v28, %v7209_v48  ;;  %v7299_v56 = vpop.f32.mrb[131].mxu0  ;;  %vm7382_vm0 = vcmp.lt.f32.partialorder %v11966_v23, 0.0 }
0x332b   : > { %v7303_v41 = vand.u32 2147483647, %v11968_v17  ;;  %v11974_v22 = vadd.f32 %v7299_v56, %v7213_v30  ;;  %vm7383_vm1 = vcmp.lt.f32.partialorder %v11968_v17, 0.0 }
0x332c   : > { %v7306_v33 = vmul.f32 0.70710677, %v7302_v25  ;;  %v7304_v62 = vand.u32 2147483647, %v11971_v55  ;;  %vm7384_vm2 = vcmp.lt.f32.partialorder %v11971_v55, 0.0 }
0x332d   : > { %v7307_v8 = vmul.f32 0.70710677, %v7303_v41  ;;  %v7305_v52 = vand.u32 2147483647, %v11974_v22  ;;  %vm7385_vm14 = vcmp.lt.f32.partialorder %v11974_v22, 0.0 }
0x332e   : > { %v7310_v44 = vmul.f32 0.3275911, %v7306_v33  ;;  %v7308_v26 = vmul.f32 0.70710677, %v7304_v62  ;;  %v7358_v50 = vmul.f32 %v7306_v33, %v7306_v33 }
0x332f   : > { %v7311_v46 = vmul.f32 0.3275911, %v7307_v8  ;;  %v7309_v53 = vmul.f32 0.70710677, %v7305_v52  ;;  %v7359_v4 = vmul.f32 %v7307_v8, %v7307_v8 }
0x3330   : > { %v7314_v32 = vadd.f32 1.0, %v7310_v44  ;;  %v7312_v47 = vmul.f32 0.3275911, %v7308_v26  ;;  %v7362_v13 = vsub.f32 0.0, %v7358_v50  ;;  %v7360_v14 = vmul.f32 %v7308_v26, %v7308_v26 }
0x3331   : > { %v7315_v5 = vadd.f32 1.0, %v7311_v46  ;;  %v7313_v36 = vmul.f32 0.3275911, %v7309_v53  ;;  %v7363_v6 = vsub.f32 0.0, %v7359_v4  ;;  %v7361_v16 = vmul.f32 %v7309_v53, %v7309_v53 }
0x3332   : > { %9712 = vrcp.f32 %v7314_v32  ;;  %v7316_v58 = vadd.f32 1.0, %v7312_v47  ;;  %v7366_v43 = vmul.f32 1.442695, %v7362_v13  ;;  %v7364_v57 = vsub.f32 0.0, %v7360_v14 }
0x3333   : > { %9714 = vrcp.f32 %v7315_v5  ;;  %v7317_v49 = vadd.f32 1.0, %v7313_v36  ;;  %v7368_v60 = vmul.f32 1.442695, %v7363_v6  ;;  %v7365_v0 = vsub.f32 0.0, %v7361_v16 }
0x3334   : > { %9716 = vrcp.f32 %v7316_v58  ;;  %v7370_v35 = vmul.f32 1.442695, %v7364_v57 }
0x3335   : > { %9718 = vrcp.f32 %v7317_v49  ;;  %v7372_v11 = vmul.f32 1.442695, %v7365_v0 }
0x3336   : > { %9720 = vpow2.f32 %v7366_v43 }
0x3337   : > { %9722 = vpow2.f32 %v7368_v60 }
0x3338   : > { %9724 = vpow2.f32 %v7370_v35 }
0x3339   : > { %9726 = vpow2.f32 %v7372_v11 }
0x333c   : > { %v9713_v40 = vpop.eup %9712 }
0x333d   : > { %v9715_v63 = vpop.eup %9714  ;;  %v7322_v61 = vmul.f32 1.0614054, %v9713_v40 }
0x333e   : > { %v7323_v51 = vmul.f32 1.0614054, %v9715_v63  ;;  %v9717_v38 = vpop.eup %9716 }
0x333f   : > { %v7326_v45 = vadd.f32 -1.4531521, %v7322_v61  ;;  %v7324_v29 = vmul.f32 1.0614054, %v9717_v38  ;;  %v9719_v15 = vpop.eup %9718 }
0x3340   : > { %v7327_v19 = vadd.f32 -1.4531521, %v7323_v51  ;;  %v7325_v37 = vmul.f32 1.0614054, %v9719_v15  ;;  %v9721_v52 = vpop.eup %9720 }
0x3341   : > { %v7330_v3 = vmul.f32 %v9713_v40, %v7326_v45  ;;  %v7328_v9 = vadd.f32 -1.4531521, %v7324_v29  ;;  %v9723_v26 = vpop.eup %9722  ;;  %v7396_v29 = vmul.f32 0.5, %v11971_v55 }
0x3342   : > { %v7331_v7 = vmul.f32 %v9715_v63, %v7327_v19  ;;  %v7329_v20 = vadd.f32 -1.4531521, %v7325_v37  ;;  %v9725_v49 = vpop.eup %9724  ;;  %v7397_v37 = vmul.f32 0.5, %v11974_v22 }
0x3343   : > { %v7334_v2 = vadd.f32 1.4214138, %v7330_v3  ;;  %v7332_v24 = vmul.f32 %v9717_v38, %v7328_v9  ;;  %v9727_v61 = vpop.eup %9726 }
0x3344   : > { %v7335_v1 = vadd.f32 1.4214138, %v7331_v7  ;;  %v7333_v21 = vmul.f32 %v9719_v15, %v7329_v20  ;;  %v7395_v7 = vmul.f32 0.5, %v11968_v17 }
0x3345   : > { %v7338_v27 = vmul.f32 %v9713_v40, %v7334_v2  ;;  %v7336_v18 = vadd.f32 1.4214138, %v7332_v24 }
0x3346   : > { %v7339_v34 = vmul.f32 %v9715_v63, %v7335_v1  ;;  %v7337_v39 = vadd.f32 1.4214138, %v7333_v21 }
0x3347   : > { %v7342_v31 = vadd.f32 -0.28449672, %v7338_v27  ;;  %v7340_v30 = vmul.f32 %v9717_v38, %v7336_v18  ;;  %v8134_v18 = vld [vmem:[#allocation8] ss:$0 sm:$0xff] }
0x3348   : > { %v7343_v10 = vadd.f32 -0.28449672, %v7339_v34  ;;  %v7341_v56 = vmul.f32 %v9719_v15, %v7337_v39 }
0x3349   : > { %v7346_v48 = vmul.f32 %v9713_v40, %v7342_v31  ;;  %v7344_v25 = vadd.f32 -0.28449672, %v7340_v30 }
0x334a   : > { %v7347_v12 = vmul.f32 %v9715_v63, %v7343_v10  ;;  %v7345_v8 = vadd.f32 -0.28449672, %v7341_v56 }
0x334b   : > { %v7350_v28 = vadd.f32 0.2548296, %v7346_v48  ;;  %v7348_v62 = vmul.f32 %v9717_v38, %v7344_v25 }
0x334c   : > { %v7351_v41 = vadd.f32 0.2548296, %v7347_v12  ;;  %v7349_v32 = vmul.f32 %v9719_v15, %v7345_v8 }
0x334d   : > { %v7354_v33 = vmul.f32 %v9713_v40, %v7350_v28  ;;  %v7352_v53 = vadd.f32 0.2548296, %v7348_v62 }
0x334e   : > { %v7355_v44 = vmul.f32 %v9715_v63, %v7351_v41  ;;  %v7353_v58 = vadd.f32 0.2548296, %v7349_v32 }
0x334f   : > { %v7374_v46 = vmul.f32 %v9721_v52, %v7354_v33  ;;  %v7356_v36 = vmul.f32 %v9717_v38, %v7352_v53  ;;  %v7394_v38 = vmul.f32 0.5, %v11966_v23  ;;  %v9336_v52 = vld [vmem:[%s10238_s27] sm:$0xff]  }
0x3350   : > { %v7375_v47 = vmul.f32 %v9723_v26, %v7355_v44  ;;  %v7357_v14 = vmul.f32 %v9719_v15, %v7353_v58  ;;  %8894 = vmatpush3.bf16.msra.mxu0 %v9336_v52  ;;  %v9337_v44 = vld [vmem:[%s10238_s27 + $0x8] sm:$0xff]   ;;  %v9338_v26 = vld [vmem:[%s10238_s27 + $0x10] sm:$0xff]  }
0x3351   : > { %v7378_v5 = vsub.f32 1.0, %v7374_v46  ;;  %v7376_v13 = vmul.f32 %v9725_v49, %v7356_v36  ;;  %8895 = vmatprep.subr.bf16.mxu0 %v10006_v54  ;;  %v9339_v46 = vld [vmem:[%s10238_s27 + $0x18] sm:$0xff]  }
0x3352   : > { %v7379_v50 = vsub.f32 1.0, %v7375_v47  ;;  %v7377_v63 = vmul.f32 %v9727_v61, %v7357_v14 }
0x3353   : > { %v7386_v4 = vsub.f32 0.0, %v7378_v5  ;;  %v7380_v51 = vsub.f32 1.0, %v7376_v13 }
0x3354   : > { %v7387_v40 = vsub.f32 0.0, %v7379_v50  ;;  %v7381_v43 = vsub.f32 1.0, %v7377_v63  ;;  %8896 = vmatpush3.bf16.msra.mxu0 %v9337_v44 }
0x3355   : > { %v7390_v6 = vsel %vm7382_vm0, %v7386_v4, %v7378_v5  ;;  %v7388_v45 = vsub.f32 0.0, %v7380_v51  ;;  %8897 = vmatprep.subr.bf16.mxu0 %v10006_v54 }
0x3356   : > { %v7391_v16 = vsel %vm7383_vm1, %v7387_v40, %v7379_v50  ;;  %v7398_v19 = vadd.f32 1.0, %v7390_v6  ;;  %v7389_v3 = vsub.f32 0.0, %v7381_v43 }
0x3357   : > { %v7392_v57 = vsel %vm7384_vm2, %v7388_v45, %v7380_v51  ;;  %v7399_v60 = vadd.f32 1.0, %v7391_v16 }
0x3358   : > { %v7400_v15 = vadd.f32 1.0, %v7392_v57  ;;  %v7393_v0 = vsel %vm7385_vm14, %v7389_v3, %v7381_v43  ;;  %v7402_v2 = vmul.f32 %v7398_v19, %v7394_v38  ;;  %8898 = vmatpush3.bf16.msra.mxu0 %v9338_v26  ;;  %v7634_v38 = vld [vmem:[#allocation10] sm:$0x1] }
0x3359   : > { %v7401_v1 = vadd.f32 1.0, %v7393_v0  ;;  %v7403_v35 = vmul.f32 %v7399_v60, %v7395_v7  ;;  %8899 = vmatprep.subr.bf16.mxu0 %v10006_v54 }
0x335a   : > { %v7404_v9 = vmul.f32 %v7400_v15, %v7396_v29 }
0x335b   : > { %v7405_v27 = vmul.f32 %v7401_v1, %v7397_v37 }
0x335c   : > { %v7406_v24 = vpack.c.bf16 %v7404_v9, %v7402_v2  ;;  %8900 = vmatpush3.bf16.msra.mxu0 %v9339_v46 }
0x335d   : > { %v7407_v23 = vpack.c.bf16 %v7405_v27, %v7403_v35 }
0x335f   : > { %7568 = vmatprep.mubr.bf16.mxu1 %v7407_v23 }
0x3360   : > { %7569 = vmatmul.mubr.bf16.vlgmr.msra.gmra.mrb[112].mxu1 %v7406_v24 }
0x3433   : > { %v8404_v20 = vpop.f32.mrb[112].mxu1 }
0x3434   : > { %v8405_v34 = vpop.f32.mrb[113].mxu1 }
0x3435   : > { %v8406_v55 = vadd.f32 %v8405_v34, %v8404_v20  ;;  %v8407_v11 = vpop.f32.mrb[114].mxu1 }
0x3436   : > { %v8408_v31 = vpop.f32.mrb[115].mxu1 }
0x3437   : > { %v7577_v17 = vadd.f32 %v8406_v55, %v11922_v42  ;;  %v8409_v21 = vadd.f32 %v8408_v31, %v8407_v11 }
0x3439   : > { %v7578_v10 = vadd.f32 %v8409_v21, %v11925_v59  ;;  %v7586_v48 = vadd.f32 %v8134_v18, %v7577_v17 }
0x343b   : > { %v7588_v22 = vsel %vm2019_vm3, %v7586_v48, 0.0  ;;  %v7587_v30 = vadd.f32 %v8134_v18, %v7578_v10 }
0x343c   : > { %7589 = vadd.xlane.f32.xlu0 %v7588_v22 }
0x343d   : > { %v7591_v39 = vsel %vm2019_vm3, %v7587_v30, 0.0 }
0x343e   : > { %7592 = vadd.xlane.f32.xlu1 %v7591_v39 }
0x34c9   : > { %v7590_v12 = vpop.xlane.xlu0 %7589 }
0x34ca   : > { %v7594_v28 = vmul.f32 0.015625, %v7590_v12 }
0x34cb   : > { %v7593_v25 = vpop.xlane.xlu1 %7592 }
0x34cc   : > { %v7596_v56 = vsub.f32 %v7586_v48, %v7594_v28  ;;  %v7595_v41 = vmul.f32 0.015625, %v7593_v25 }
0x34ce   : > { %v7597_v42 = vsub.f32 %v7587_v30, %v7595_v41  ;;  %v7598_v33 = vmul.f32 %v7596_v56, %v7596_v56 }
0x34d0   : > { %v7600_v59 = vsel %vm2019_vm3, %v7598_v33, 0.0  ;;  %v7599_v62 = vmul.f32 %v7597_v42, %v7597_v42 }
0x34d1   : > { %7601 = vadd.xlane.f32.xlu0 %v7600_v59 }
0x34d2   : > { %v7603_v8 = vsel %vm2019_vm3, %v7599_v62, 0.0 }
0x34d3   : > { %7604 = vadd.xlane.f32.xlu1 %v7603_v8 }
0x355e   : > { %v7602_v53 = vpop.xlane.xlu0 %7601 }
0x355f   : > { %v7606_v32 = vmul.f32 0.015625, %v7602_v53 }
0x3560   : > { %v7605_v47 = vpop.xlane.xlu1 %7604 }
0x3561   : > { %v7608_v5 = vadd.f32 1e-05, %v7606_v32  ;;  %v7607_v36 = vmul.f32 0.015625, %v7605_v47 }
0x3563   : > { %9728 = vrsqrt.f32 %v7608_v5  ;;  %v7609_v58 = vadd.f32 1e-05, %v7607_v36 }
0x3565   : > { %9730 = vrsqrt.f32 %v7609_v58 }
0x356d   : > { %v9729_v49 = vpop.eup %9728 }
0x356e   : > { %v7612_v50 = vmul.f32 %v9729_v49, %v7596_v56 }
0x356f   : > { %v9731_v4 = vpop.eup %9730 }
0x3570   : > { %v7613_v13 = vmul.f32 %v9731_v4, %v7597_v42  ;;  %v7614_v14 = vsel %vm2019_vm3, %v7612_v50, 0.0 }
0x3572   : > { %v7615_v61 = vsel %vm2019_vm3, %v7613_v13, 0.0 }
0x3573   : > { %v7616_v54 = vadd.f32 %v7615_v61, %v7614_v14 }
0x3575   : > { %v7617_v40 = vrot.slane %v7616_v54, 4 }
0x3577   : > { %v7618_v6 = vadd.f32 %v7617_v40, %v7616_v54 }
0x3579   : > { %v7619_v51 = vrot.slane %v7618_v6, 2 }
0x357b   : > { %v7620_v63 = vadd.f32 %v7619_v51, %v7618_v6 }
0x357d   : > { %v7621_v16 = vrot.slane %v7620_v63, 1 }
0x357f   : > { %v7622_v45 = vadd.f32 %v7621_v16, %v7620_v63 }
0x3581   : > { %v7624_v43 = vmul.f32 0.0625, %v7622_v45 }
0x3583   : > { %v7625_v19 = vpack.c.bf16 %v7624_v43, %v7624_v43 }
0x3585   : > { %8902 = vmatmul.mubr.msk.bf16.vlgmr.msra.gmra.mrb[132].mxu0 %vm2019_vm3, %v7625_v19 }
0x3658   : > { %v7696_v57 = vpop.f32.mrb[132].mxu0 }
0x3659   : > { %v7697_v3 = vadd.f32 %v7696_v57, %v7634_v38  ;;  %v8903_v60 = vpop.f32.mrb[133].mxu0 }
0x365a   : > { %v7699_v29 = vpop.f32.mrb[134].mxu0 }
0x365b   : > { %v8904_v15 = vpop.f32.mrb[135].mxu0  ;;  %7703 = vst.msk [vmem:[%s1433_s5] sm:$0x1] %vm7702_vm15, %v7697_v3 }
0x365c   : > { %9885 = shalt.err (!%p9882_p1)
}
0x365d   : > { %s9886_s18 = scalar_lea.hbm %s12005_s1, 16  ;;  %s9890_s15 = scalar_lea.hbm %s10248_s24, 32 }
0x365e   : > { %p9887_p2 = scmp.ne.s32.totalorder %s12005_s1, %s9886_s18  ;;  %p9891_p4 = scmp.lt.u32.totalorder %s12005_s1, %s10248_s24 }
0x365f   : > { %p9892_p12 = scmp.lt.u32.totalorder %s9890_s15, %s9886_s18  ;;  %p9894_p6 = scmp.lt.u32.totalorder %s9886_s18, %s12005_s1 }
0x3660   : > { %p9888_p0 = pnand %p9887_p2, %p12201_p9 }
0x3661   : > { %p9893_p5 = por %p9892_p12, %p9891_p4 }
0x3662   : > { %p9889_p3 = pneg %p9888_p0 }
0x3663   : > { %p9895_p10 = por %p9894_p6, %p9893_p5 }
0x3665   : > { %p9896_p7 = pnand %p9895_p10, %p9889_p3 }
0x3667   : > { %9899 = shalt.err (!%p9896_p7)
}
0x3668   : > { %9013 = dma.vmem_to_hbm [thread:$0]  (%p12201_p9), %s12007_s2, 16, %s12005_s1, %s7705_s3  }
0x3669 PF: > { %s12202_s8 = sld [smem:[#allocation51_spill]]  ;;  %s12203_s6 = sld [smem:[#allocation55_spill]] }
0x366a   : > { %p9045_p8 = scmp.ge.s32.totalorder %s9946_s22, 2 }
0x366f   : > { %s7729_s4 = sand.u32 1, %s12202_s8   ;;  %p12204_p11 = scmp.ne.s32.totalorder %s12203_s6, 0 }
0x3670   : > { %s7730_s5 = scalar_lea.sflag [#allocation4], %s7729_s4 }
0x3671   : > { %p9032_p13 = pnand %p9045_p8, %p12204_p11 }
0x3673   : > { %9929 = dma.done.wait (!%p9032_p13), %s7730_s5, 16  }
0x3674   : > { %9931 = vsyncadd (!%p9032_p13), %s7730_s5, 4294967280  ;;  %s12205_s22 = sld [smem:[#allocation53_spill]]  ;;  %s12206_s0 = sld [smem:[#allocation52_spill]] }
0x3675   : > { %s12207_s18 = sld [smem:[#allocation54_spill]]  ;;  %s12208_s15 = smov %s9938_s16 }
0x367a   : > { %p106_p1 = scmp.ge.s32.totalorder %s12205_s22, 4   ;;  %s12209_s16 = smov %s12206_s0 }
0x367c   :  { %108 = sbr.rel (!%p106_p1) target bundleno = 95 (0x5f), region = 317 }
0x3683   :  { %7734 = vsyncpa [#allocation3], 1 }
0x3684   :  { %7736 = vsyncpa [#allocation3 + $0x1], 1 }
0x3685   :  { %7737 = vsyncpa [#allocation6], 1 }
0x3686   :  { %7738 = vsyncpa [#allocation9], 1 }
0x3687   :  { %7739 = vsyncpa [#allocation4], 1 }
0x3688   :  { %7741 = vsyncpa [#allocation4 + $0x1], 1 }

</bundles_post_ra>
